<compile_context>
chip_gen: v7x
topology: tpu7x:2x2x1
jax: 0.10.0
libtpu: 0.0.40
codegen_flags: <defaults>
</compile_context>

<pallas_src>
import functools

import jax
import jax.numpy as jnp
from jax.experimental import pallas as pl
from jax.experimental.pallas import tpu as pltpu


def _round_up(x, m):
    return (x + m - 1) // m * m


def _default_vmem_limit():
    try:
        info = pltpu.get_tpu_info()
        cap = getattr(info, "vmem_capacity_bytes", None)
        if cap:
            return min(int(cap) * 3 // 4, 100 * 1024 * 1024)
    except Exception:
        pass
    return 48 * 1024 * 1024


_VMEM_LIMIT = _default_vmem_limit()
_FUSED_Y_BUDGET = min(_VMEM_LIMIT // 2, 24 * 1024 * 1024)  # resident-y scratch budget
_TILE_BYTES_BUDGET = 8 * 1024 * 1024                       # per-tile (double-buffered)


def _pick_tile_m(mp, row_bytes):
    # Largest tile dividing Mp (prefer multiples of 16 for bf16 sublane packing)
    # whose double-buffered footprint stays within budget; amortizes the
    # ~0.35us/grid-step overhead on the deep layer-1 grid.
    for cand in (2048, 1024, 512, 256, 128, 64, 32, 16, 8):
        if mp % cand == 0 and cand * row_bytes * 2 <= _TILE_BYTES_BUDGET:
            return cand
    return 8


# ----------------------------------------------------------------------------
# Pallas kernels
# ----------------------------------------------------------------------------
def _matmul_act_kernel(p_ref, w_ref, o_ref, *, activation):
    # p_ref: (tile_m, K) bf16   w_ref: (K, C) bf16   o_ref: (tile_m, C)
    y = jnp.dot(p_ref[...], w_ref[...], preferred_element_type=jnp.float32)
    if activation == "lrelu":
        y = jnp.maximum(y, 0.2 * y)
    elif activation == "sigmoid":
        y = 1.0 / (1.0 + jnp.exp(-y))
    o_ref[...] = y.astype(o_ref.dtype)


def _conv_bn_lrelu_fused_kernel(p_ref, w_ref, g_ref, b_ref, o_ref,
                                y_scr, sum_scr, sq_scr, *, m_total):
    # grid = (2, num_tiles): pass 0 = matmul + stats into VMEM, pass 1 = normalize.
    pass_idx = pl.program_id(0)
    i = pl.program_id(1)

    @pl.when(jnp.logical_and(pass_idx == 0, i == 0))
    def _init():
        sum_scr[...] = jnp.zeros_like(sum_scr)
        sq_scr[...] = jnp.zeros_like(sq_scr)

    @pl.when(pass_idx == 0)
    def _matmul_stats():
        y = jnp.dot(p_ref[...], w_ref[...], preferred_element_type=jnp.float32)
        y_scr[i] = y.astype(y_scr.dtype)                 # stays resident in VMEM
        sum_scr[...] += jnp.sum(y, axis=0, keepdims=True)
        sq_scr[...] += jnp.sum(y * y, axis=0, keepdims=True)

    @pl.when(pass_idx == 1)
    def _normalize():
        inv_m = 1.0 / m_total
        mean = sum_scr[...] * inv_m
        var = jnp.maximum(sq_scr[...] * inv_m - mean * mean, 0.0)
        scale = g_ref[...] * jax.lax.rsqrt(var + 1e-5)
        shift = b_ref[...] - mean * scale
        y = y_scr[i].astype(jnp.float32) * scale + shift
        o_ref[...] = jnp.maximum(y, 0.2 * y).astype(o_ref.dtype)


def _matmul_stats_kernel(p_ref, w_ref, y_ref, sum_ref, sq_ref):
    # Two-pass fallback (large batch): matmul + resident stat accumulators,
    # bf16 intermediate y (stats are taken from the f32 dot result).
    @pl.when(pl.program_id(0) == 0)
    def _init():
        sum_ref[...] = jnp.zeros_like(sum_ref)
        sq_ref[...] = jnp.zeros_like(sq_ref)

    y = jnp.dot(p_ref[...], w_ref[...], preferred_element_type=jnp.float32)
    y_ref[...] = y.astype(y_ref.dtype)
    sum_ref[...] += jnp.sum(y, axis=0, keepdims=True)
    sq_ref[...] += jnp.sum(y * y, axis=0, keepdims=True)


def _bn_lrelu_kernel(y_ref, sum_ref, sq_ref, g_ref, b_ref, o_ref, *, m_total):
    inv_m = 1.0 / m_total
    mean = sum_ref[...] * inv_m
    var = jnp.maximum(sq_ref[...] * inv_m - mean * mean, 0.0)
    scale = g_ref[...] * jax.lax.rsqrt(var + 1e-5)
    shift = b_ref[...] - mean * scale
    y = y_ref[...].astype(jnp.float32) * scale + shift
    o_ref[...] = jnp.maximum(y, 0.2 * y).astype(o_ref.dtype)


# ----------------------------------------------------------------------------
# pallas_call wrappers
# ----------------------------------------------------------------------------
def _matmul_act(patches, w2d, *, activation, tile_m, out_dtype):
    Mp, K = patches.shape
    C = w2d.shape[1]
    kernel = functools.partial(_matmul_act_kernel, activation=activation)
    return pl.pallas_call(
        kernel,
        out_shape=jax.ShapeDtypeStruct((Mp, C), out_dtype),
        grid_spec=pltpu.PrefetchScalarGridSpec(
            num_scalar_prefetch=0,
            grid=(Mp // tile_m,),
            in_specs=[pl.BlockSpec((tile_m, K), lambda i: (i, 0)),
                      pl.BlockSpec((K, C), lambda i: (0, 0))],
            out_specs=pl.BlockSpec((tile_m, C), lambda i: (i, 0))),
        compiler_params=pltpu.CompilerParams(
            dimension_semantics=("parallel",),
            vmem_limit_bytes=_VMEM_LIMIT),
    )(patches, w2d)


def _conv_bn_lrelu_fused(patches, w2d, gamma, beta, *, m_total, tile_m, out_dtype):
    Mp, K = patches.shape
    C = w2d.shape[1]
    n_tiles = Mp // tile_m
    kernel = functools.partial(_conv_bn_lrelu_fused_kernel, m_total=float(m_total))
    vec_spec = pl.BlockSpec((1, C), lambda p, i: (0, 0))
    return pl.pallas_call(
        kernel,
        out_shape=jax.ShapeDtypeStruct((Mp, C), out_dtype),
        grid_spec=pltpu.PrefetchScalarGridSpec(
            num_scalar_prefetch=0,
            grid=(2, n_tiles),
            in_specs=[
                # Pass 1 never reads patches: pin the block index so only one
                # extra tile is fetched instead of re-reading everything.
                pl.BlockSpec((tile_m, K), lambda p, i: (i * (1 - p), 0)),
                pl.BlockSpec((K, C), lambda p, i: (0, 0)),
                vec_spec, vec_spec,
            ],
            # Pass 0 keeps the output block index constant (no garbage
            # write-back); pass 1 walks and writes each block exactly once.
            out_specs=pl.BlockSpec((tile_m, C), lambda p, i: (i * p, 0)),
            scratch_shapes=[
                pltpu.VMEM((n_tiles, tile_m, C), jnp.bfloat16),  # resident y
                pltpu.VMEM((1, C), jnp.float32),                 # sum
                pltpu.VMEM((1, C), jnp.float32),                 # sumsq
            ]),
        compiler_params=pltpu.CompilerParams(
            dimension_semantics=("arbitrary", "arbitrary"),
            vmem_limit_bytes=_VMEM_LIMIT),
    )(patches, w2d, gamma, beta)


def _matmul_stats(patches, w2d, *, tile_m):
    Mp, K = patches.shape
    C = w2d.shape[1]
    return pl.pallas_call(
        _matmul_stats_kernel,
        out_shape=(jax.ShapeDtypeStruct((Mp, C), jnp.bfloat16),
                   jax.ShapeDtypeStruct((1, C), jnp.float32),
                   jax.ShapeDtypeStruct((1, C), jnp.float32)),
        grid_spec=pltpu.PrefetchScalarGridSpec(
            num_scalar_prefetch=0,
            grid=(Mp // tile_m,),
            in_specs=[pl.BlockSpec((tile_m, K), lambda i: (i, 0)),
                      pl.BlockSpec((K, C), lambda i: (0, 0))],
            out_specs=(pl.BlockSpec((tile_m, C), lambda i: (i, 0)),
                       pl.BlockSpec((1, C), lambda i: (0, 0)),
                       pl.BlockSpec((1, C), lambda i: (0, 0)))),
        compiler_params=pltpu.CompilerParams(
            dimension_semantics=("arbitrary",),   # stat accumulators resident
            vmem_limit_bytes=_VMEM_LIMIT),
    )(patches, w2d)


def _bn_lrelu(y, s, ss, gamma, beta, *, m_total, tile_m, out_dtype):
    Mp, C = y.shape
    kernel = functools.partial(_bn_lrelu_kernel, m_total=float(m_total))
    vec_spec = pl.BlockSpec((1, C), lambda i: (0, 0))
    return pl.pallas_call(
        kernel,
        out_shape=jax.ShapeDtypeStruct((Mp, C), out_dtype),
        grid_spec=pltpu.PrefetchScalarGridSpec(
            num_scalar_prefetch=0,
            grid=(Mp // tile_m,),
            in_specs=[pl.BlockSpec((tile_m, C), lambda i: (i, 0)),
                      vec_spec, vec_spec, vec_spec, vec_spec],
            out_specs=pl.BlockSpec((tile_m, C), lambda i: (i, 0))),
        compiler_params=pltpu.CompilerParams(
            dimension_semantics=("parallel",),
            vmem_limit_bytes=_VMEM_LIMIT),
    )(y, s, ss, gamma, beta)


# ----------------------------------------------------------------------------
# Plain-JAX glue: NHWC im2col (bf16 throughout; layout plumbing kept in XLA)
# ----------------------------------------------------------------------------
def _im2col_nhwc(x, k, stride, pad):
    B, H, W, C = x.shape
    if pad:
        x = jnp.pad(x, ((0, 0), (pad, pad), (pad, pad), (0, 0)))
    Ho = (H + 2 * pad - k) // stride + 1
    Wo = (W + 2 * pad - k) // stride + 1
    parts = [x[:, kh:kh + stride * Ho:stride, kw:kw + stride * Wo:stride, :]
             for kh in range(k) for kw in range(k)]
    p = jnp.stack(parts, axis=3)                      # (B, Ho, Wo, k*k, C)
    return p.reshape(B * Ho * Wo, k * k * C), Ho, Wo  # features ordered (kh,kw,cin)


def _conv_layer(x, lp, cfg, *, out_dtype, force_two_pass=False):
    B, H, W, C = x.shape
    k, stride, pad = cfg["ksize"], cfg["stride"], cfg["pad"]
    if k == H and k == W and stride == 1 and pad == 0:
        # Final 4x4 "valid" conv is a flatten ((h,w,c) order matches the weights).
        patches, Ho, Wo = x.reshape(B, k * k * C), 1, 1
    else:
        patches, Ho, Wo = _im2col_nhwc(x, k, stride, pad)

    M, K = patches.shape
    Mp = _round_up(M, 8)
    if Mp != M:
        # Zero rows contribute 0 to BN sum/sumsq; m_total uses the real M.
        patches = jnp.pad(patches, ((0, Mp - M), (0, 0)))

    Cp = lp["w2d"].shape[1]
    tile_m = _pick_tile_m(Mp, 2 * (K + Cp))

    if cfg["use_bn"]:
        y_scratch_bytes = Mp * _round_up(Cp, 128) * 2   # physical (lane-padded) bf16
        if (not force_two_pass) and y_scratch_bytes <= _FUSED_Y_BUDGET:
            out_p = _conv_bn_lrelu_fused(patches, lp["w2d"], lp["gamma"], lp["beta"],
                                         m_total=M, tile_m=tile_m, out_dtype=out_dtype)
        else:
            y_p, s, ss = _matmul_stats(patches, lp["w2d"], tile_m=tile_m)
            out_p = _bn_lrelu(y_p, s, ss, lp["gamma"], lp["beta"],
                              m_total=M, tile_m=tile_m, out_dtype=out_dtype)
    else:
        out_p = _matmul_act(patches, lp["w2d"], activation=cfg["activation"],
                            tile_m=tile_m, out_dtype=out_dtype)

    cout = cfg["cout"]
    out = out_p
    if Mp != M:
        out = out[:M]
    if Cp != cout:
        out = out[:, :cout]
    return out.reshape(B, Ho, Wo, cout)


# ----------------------------------------------------------------------------
# Parameters (matches weights_init: conv ~ N(0,0.02); BN w ~ N(1,0.02), b = 0;
# conv bias=False as in the reference Discriminator).
# ----------------------------------------------------------------------------
def init_params(key, in_dim=3, feature_dim=8):
    fd = feature_dim
    keys = jax.random.split(key, 8)
    p = {}
    p["w1"] = 0.02 * jax.random.normal(keys[0], (fd, in_dim, 4, 4), jnp.float32)
    p["w2"] = 0.02 * jax.random.normal(keys[1], (2 * fd, fd, 4, 4), jnp.float32)
    p["w3"] = 0.02 * jax.random.normal(keys[2], (4 * fd, 2 * fd, 4, 4), jnp.float32)
    p["w4"] = 0.02 * jax.random.normal(keys[3], (8 * fd, 4 * fd, 4, 4), jnp.float32)
    p["w5"] = 0.02 * jax.random.normal(keys[4], (1, 8 * fd, 4, 4), jnp.float32)
    p["g2"] = 1.0 + 0.02 * jax.random.normal(keys[5], (2 * fd,), jnp.float32)
    p["g3"] = 1.0 + 0.02 * jax.random.normal(keys[6], (4 * fd,), jnp.float32)
    p["g4"] = 1.0 + 0.02 * jax.random.normal(keys[7], (8 * fd,), jnp.float32)
    p["b2"] = jnp.zeros((2 * fd,), jnp.float32)
    p["b3"] = jnp.zeros((4 * fd,), jnp.float32)
    p["b4"] = jnp.zeros((8 * fd,), jnp.float32)
    return p


def prepare_params(raw):
    """Pre-transpose/flatten conv weights once ((kh,kw,cin) rows), cast bf16.

    No HBM padding except the final 1-channel conv, whose N dim is padded to
    128 (negligible bytes, keeps a well-conditioned matmul/store shape).
    """
    specs = [("w1", None, None, 2, 1, "lrelu", False),
             ("w2", "g2", "b2", 2, 1, "lrelu", False),
             ("w3", "g3", "b3", 2, 1, "lrelu", False),
             ("w4", "g4", "b4", 2, 1, "lrelu", False),
             ("w5", None, None, 1, 0, "sigmoid", True)]
    arrays, cfgs = [], []
    for wname, gname, bname, stride, pad, act, pad_cout in specs:
        w = raw[wname]
        cout, cin, kh, kw = w.shape
        K = kh * kw * cin
        w2d = jnp.transpose(w, (2, 3, 1, 0)).reshape(K, cout)   # rows (kh,kw,cin)
        Cp = _round_up(cout, 128) if pad_cout else cout
        if Cp != cout:
            w2d = jnp.pad(w2d, ((0, 0), (0, Cp - cout)))
        entry = {"w2d": w2d.astype(jnp.bfloat16)}
        if gname is not None:
            entry["gamma"] = raw[gname].reshape(1, cout).astype(jnp.float32)
            entry["beta"] = raw[bname].reshape(1, cout).astype(jnp.float32)
        arrays.append(entry)
        cfgs.append(dict(cout=cout, ksize=kh, stride=stride, pad=pad,
                         use_bn=gname is not None, activation=act))
    return arrays, tuple(cfgs)


def discriminator_forward(arrays, x_nchw, cfgs, *, force_two_pass=False):
    # NCHW -> NHWC and f32 -> bf16 once, at the model boundary, so all im2col
    # intermediates between pallas_calls are half-width.
    x = jnp.transpose(x_nchw, (0, 2, 3, 1)).astype(jnp.bfloat16)
    n = len(cfgs)
    for i, (lp, cfg) in enumerate(zip(arrays, cfgs)):
        out_dtype = jnp.float32 if i == n - 1 else jnp.bfloat16
        x = _conv_layer(x, lp, cfg, out_dtype=out_dtype,
                        force_two_pass=force_two_pass)
    return x.reshape(-1).astype(jnp.float32)   # (B,1,1,1) -> (B,)


if __name__ == "__main__":
    key = jax.random.PRNGKey(0)
    k_param, k_x = jax.random.split(key)
    # Input must be (B, in_dim, 64, 64) for the final 4x4 valid conv; keep
    # batch and feature_dim small for the test.
    x = jax.random.normal(k_x, (2, 3, 64, 64), jnp.float32)
    raw = init_params(k_param, in_dim=3, feature_dim=8)
    arrays, cfgs = prepare_params(raw)

    fwd = jax.jit(lambda p, xx: discriminator_forward(p, xx, cfgs))
    out = jax.block_until_ready(fwd(arrays, x))
    assert out.shape == (2,), out.shape
    assert bool(jnp.all(jnp.isfinite(out)))
    assert bool(jnp.all((out >= 0.0) & (out <= 1.0)))

    # Cross-check the fused single-call BN path against the two-pass fallback.
    fwd2 = jax.jit(lambda p, xx: discriminator_forward(p, xx, cfgs,
                                                       force_two_pass=True))
    out2 = jax.block_until_ready(fwd2(arrays, x))
    assert bool(jnp.allclose(out, out2, atol=5e-2)), (out, out2)

    print("KERNEL_OK")
</pallas_src>

<mosaic_0001>
module attributes {stable_mosaic.version = 11 : i64} {
  func.func @_matmul_act_kernel(%arg0: i32, %arg1: memref<2048x48xbf16, #tpu.memory_space<vmem>>, %arg2: memref<48x8xbf16, #tpu.memory_space<vmem>>, %arg3: memref<2048x8xbf16, #tpu.memory_space<vmem>>) attributes {dimension_semantics = [#tpu.dimension_semantics<parallel>], iteration_bounds = array<i64: 1>, scalar_prefetch = 0 : i64, scratch_operands = 0 : i64, tpu.core_type = #tpu.core_type<tc>, window_params = [{transform_indices = @transform_0, window_bounds = array<i64: 2048, 48>}, {pipeline_mode = #tpu.pipeline_mode<synchronous>, transform_indices = @transform_1, window_bounds = array<i64: 48, 8>}, {transform_indices = @transform_2, window_bounds = array<i64: 2048, 8>}]} {
    %c0 = arith.constant 0 : index
    %c0_0 = arith.constant 0 : index
    %0 = vector.load %arg1[%c0, %c0_0] : memref<2048x48xbf16, #tpu.memory_space<vmem>>, vector<2048x48xbf16>
    %c0_1 = arith.constant 0 : index
    %c0_2 = arith.constant 0 : index
    %1 = vector.load %arg2[%c0_1, %c0_2] : memref<48x8xbf16, #tpu.memory_space<vmem>>, vector<48x8xbf16>
    %cst = arith.constant dense<0.000000e+00> : vector<2048x8xf32>
    %2 = tpu.matmul %0, %1, %cst {dimension_numbers = #tpu.dot_dimension_numbers<[1], [0], [0], [1], [0, 0, 1, 1], [], []>} : vector<2048x48xbf16>, vector<48x8xbf16>, vector<2048x8xf32> -> vector<2048x8xf32>
    %cst_3 = arith.constant 2.000000e-01 : f32
    %3 = vector.broadcast %cst_3 : f32 to vector<2048x8xf32>
    %4 = arith.mulf %3, %2 : vector<2048x8xf32>
    %5 = arith.maximumf %2, %4 : vector<2048x8xf32>
    %6 = arith.truncf %5 : vector<2048x8xf32> to vector<2048x8xbf16>
    %c0_4 = arith.constant 0 : index
    %c0_5 = arith.constant 0 : index
    %7 = vector.load %arg3[%c0_4, %c0_5] : memref<2048x8xbf16, #tpu.memory_space<vmem>>, vector<2048x8xbf16>
    tpu.vector_store %arg3[%c0_4, %c0_5], %6 {strides = array<i32>} : memref<2048x8xbf16, #tpu.memory_space<vmem>>, vector<2048x8xbf16>,
    return
  }
  func.func @transform_0(%arg0: i32) -> (i32, i32) {
    %c0_i32 = arith.constant 0 : i32
    %c0_i32_0 = arith.constant 0 : i32
    return %arg0, %c0_i32 : i32, i32
  }
  func.func @transform_1(%arg0: i32) -> (i32, i32) {
    %c0_i32 = arith.constant 0 : i32
    %c0_i32_0 = arith.constant 0 : i32
    %c0_i32_1 = arith.constant 0 : i32
    return %c0_i32, %c0_i32_0 : i32, i32
  }
  func.func @transform_2(%arg0: i32) -> (i32, i32) {
    %c0_i32 = arith.constant 0 : i32
    %c0_i32_0 = arith.constant 0 : i32
    return %arg0, %c0_i32 : i32, i32
  }
}

module attributes {stable_mosaic.version = 11 : i64} {
  func.func @_conv_bn_lrelu_fused_kernel(%arg0: i32, %arg1: i32, %arg2: memref<512x128xbf16, #tpu.memory_space<vmem>>, %arg3: memref<128x16xbf16, #tpu.memory_space<vmem>>, %arg4: memref<1x16xf32, #tpu.memory_space<vmem>>, %arg5: memref<1x16xf32, #tpu.memory_space<vmem>>, %arg6: memref<512x16xbf16, #tpu.memory_space<vmem>>, %arg7: memref<1x512x16xbf16, #tpu.memory_space<vmem>>, %arg8: memref<1x16xf32, #tpu.memory_space<vmem>>, %arg9: memref<1x16xf32, #tpu.memory_space<vmem>>) attributes {dimension_semantics = [#tpu.dimension_semantics<arbitrary>, #tpu.dimension_semantics<arbitrary>], iteration_bounds = array<i64: 2, 1>, scalar_prefetch = 0 : i64, scratch_operands = 3 : i64, tpu.core_type = #tpu.core_type<tc>, window_params = [{transform_indices = @transform_0, window_bounds = array<i64: 512, 128>}, {pipeline_mode = #tpu.pipeline_mode<synchronous>, transform_indices = @transform_1, window_bounds = array<i64: 128, 16>}, {pipeline_mode = #tpu.pipeline_mode<synchronous>, transform_indices = @transform_2, window_bounds = array<i64: 1, 16>}, {pipeline_mode = #tpu.pipeline_mode<synchronous>, transform_indices = @transform_3, window_bounds = array<i64: 1, 16>}, {transform_indices = @transform_4, window_bounds = array<i64: 512, 16>}]} {
    %c0_i32 = arith.constant 0 : i32
    %0 = arith.cmpi eq, %arg0, %c0_i32 : i32
    %c0_i32_0 = arith.constant 0 : i32
    %1 = arith.cmpi eq, %arg1, %c0_i32_0 : i32
    %2 = arith.andi %0, %1 : i1
    %3 = arith.extui %2 : i1 to i32
    %c0_i32_1 = arith.constant 0 : i32
    %4 = arith.cmpi ne, %3, %c0_i32_1 : i32
    scf.if %4 {
      %cst = arith.constant 0.000000e+00 : f32
      %11 = vector.broadcast %cst : f32 to vector<1x16xf32>
      %c0 = arith.constant 0 : index
      %c0_5 = arith.constant 0 : index
      %12 = vector.load %arg8[%c0, %c0_5] : memref<1x16xf32, #tpu.memory_space<vmem>>, vector<1x16xf32>
      tpu.vector_store %arg8[%c0, %c0_5], %11 {strides = array<i32>} : memref<1x16xf32, #tpu.memory_space<vmem>>, vector<1x16xf32>,
      %cst_6 = arith.constant 0.000000e+00 : f32
      %13 = vector.broadcast %cst_6 : f32 to vector<1x16xf32>
      %c0_7 = arith.constant 0 : index
      %c0_8 = arith.constant 0 : index
      %14 = vector.load %arg9[%c0_7, %c0_8] : memref<1x16xf32, #tpu.memory_space<vmem>>, vector<1x16xf32>
      tpu.vector_store %arg9[%c0_7, %c0_8], %13 {strides = array<i32>} : memref<1x16xf32, #tpu.memory_space<vmem>>, vector<1x16xf32>,
    } else {
    }
    %c0_i32_2 = arith.constant 0 : i32
    %5 = arith.cmpi eq, %arg0, %c0_i32_2 : i32
    %6 = arith.extui %5 : i1 to i32
    %c0_i32_3 = arith.constant 0 : i32
    %7 = arith.cmpi ne, %6, %c0_i32_3 : i32
    scf.if %7 {
      %c0 = arith.constant 0 : index
      %c0_5 = arith.constant 0 : index
      %11 = vector.load %arg2[%c0, %c0_5] : memref<512x128xbf16, #tpu.memory_space<vmem>>, vector<512x128xbf16>
      %c0_6 = arith.constant 0 : index
      %c0_7 = arith.constant 0 : index
      %12 = vector.load %arg3[%c0_6, %c0_7] : memref<128x16xbf16, #tpu.memory_space<vmem>>, vector<128x16xbf16>
      %cst = arith.constant dense<0.000000e+00> : vector<512x16xf32>
      %13 = tpu.matmul %11, %12, %cst {dimension_numbers = #tpu.dot_dimension_numbers<[1], [0], [0], [1], [0, 0, 1, 1], [], []>} : vector<512x128xbf16>, vector<128x16xbf16>, vector<512x16xf32> -> vector<512x16xf32>
      %14 = arith.truncf %13 : vector<512x16xf32> to vector<512x16xbf16>
      %15 = arith.index_cast %arg1 : i32 to index
      %c0_8 = arith.constant 0 : index
      %c0_9 = arith.constant 0 : index
      %16 = vector.load %arg7[%15, %c0_8, %c0_9] : memref<1x512x16xbf16, #tpu.memory_space<vmem>>, vector<1x512x16xbf16>
      %17 = vector.shape_cast %16 : vector<1x512x16xbf16> to vector<512x16xbf16>
      %18 = vector.shape_cast %14 : vector<512x16xbf16> to vector<1x512x16xbf16>
      tpu.vector_store %arg7[%15, %c0_8, %c0_9], %18 {strides = array<i32>} : memref<1x512x16xbf16, #tpu.memory_space<vmem>>, vector<1x512x16xbf16>,
      %c0_10 = arith.constant 0 : index
      %c0_11 = arith.constant 0 : index
      %19 = vector.load %arg8[%c0_10, %c0_11] : memref<1x16xf32, #tpu.memory_space<vmem>>, vector<1x16xf32>
      %cst_12 = arith.constant dense<0.000000e+00> : vector<16xf32>
      %20 = vector.multi_reduction <add>, %13, %cst_12 [0] : vector<512x16xf32> to vector<16xf32>
      %21 = vector.shape_cast %20 : vector<16xf32> to vector<1x16xf32>
      %22 = arith.addf %19, %21 : vector<1x16xf32>
      %c0_13 = arith.constant 0 : index
      %c0_14 = arith.constant 0 : index
      %23 = vector.load %arg8[%c0_13, %c0_14] : memref<1x16xf32, #tpu.memory_space<vmem>>, vector<1x16xf32>
      tpu.vector_store %arg8[%c0_13, %c0_14], %22 {strides = array<i32>} : memref<1x16xf32, #tpu.memory_space<vmem>>, vector<1x16xf32>,
      %c0_15 = arith.constant 0 : index
      %c0_16 = arith.constant 0 : index
      %24 = vector.load %arg9[%c0_15, %c0_16] : memref<1x16xf32, #tpu.memory_space<vmem>>, vector<1x16xf32>
      %25 = arith.mulf %13, %13 : vector<512x16xf32>
      %cst_17 = arith.constant dense<0.000000e+00> : vector<16xf32>
      %26 = vector.multi_reduction <add>, %25, %cst_17 [0] : vector<512x16xf32> to vector<16xf32>
      %27 = vector.shape_cast %26 : vector<16xf32> to vector<1x16xf32>
      %28 = arith.addf %24, %27 : vector<1x16xf32>
      %c0_18 = arith.constant 0 : index
      %c0_19 = arith.constant 0 : index
      %29 = vector.load %arg9[%c0_18, %c0_19] : memref<1x16xf32, #tpu.memory_space<vmem>>, vector<1x16xf32>
      tpu.vector_store %arg9[%c0_18, %c0_19], %28 {strides = array<i32>} : memref<1x16xf32, #tpu.memory_space<vmem>>, vector<1x16xf32>,
    } else {
    }
    %c1_i32 = arith.constant 1 : i32
    %8 = arith.cmpi eq, %arg0, %c1_i32 : i32
    %9 = arith.extui %8 : i1 to i32
    %c0_i32_4 = arith.constant 0 : i32
    %10 = arith.cmpi ne, %9, %c0_i32_4 : i32
    scf.if %10 {
      %c0 = arith.constant 0 : index
      %c0_5 = arith.constant 0 : index
      %11 = vector.load %arg8[%c0, %c0_5] : memref<1x16xf32, #tpu.memory_space<vmem>>, vector<1x16xf32>
      %cst = arith.constant 0.001953125 : f32
      %12 = vector.broadcast %cst : f32 to vector<1x16xf32>
      %13 = arith.mulf %11, %12 : vector<1x16xf32>
      %c0_6 = arith.constant 0 : index
      %c0_7 = arith.constant 0 : index
      %14 = vector.load %arg9[%c0_6, %c0_7] : memref<1x16xf32, #tpu.memory_space<vmem>>, vector<1x16xf32>
      %cst_8 = arith.constant 0.001953125 : f32
      %15 = vector.broadcast %cst_8 : f32 to vector<1x16xf32>
      %16 = arith.mulf %14, %15 : vector<1x16xf32>
      %17 = arith.mulf %13, %13 : vector<1x16xf32>
      %18 = arith.subf %16, %17 : vector<1x16xf32>
      %cst_9 = arith.constant 0.000000e+00 : f32
      %19 = vector.broadcast %cst_9 : f32 to vector<1x16xf32>
      %20 = arith.maximumf %18, %19 : vector<1x16xf32>
      %c0_10 = arith.constant 0 : index
      %c0_11 = arith.constant 0 : index
      %21 = vector.load %arg4[%c0_10, %c0_11] : memref<1x16xf32, #tpu.memory_space<vmem>>, vector<1x16xf32>
      %cst_12 = arith.constant 9.99999974E-6 : f32
      %22 = vector.broadcast %cst_12 : f32 to vector<1x16xf32>
      %23 = arith.addf %20, %22 : vector<1x16xf32>
      %24 = math.rsqrt %23 : vector<1x16xf32>
      %25 = arith.mulf %21, %24 : vector<1x16xf32>
      %c0_13 = arith.constant 0 : index
      %c0_14 = arith.constant 0 : index
      %26 = vector.load %arg5[%c0_13, %c0_14] : memref<1x16xf32, #tpu.memory_space<vmem>>, vector<1x16xf32>
      %27 = arith.mulf %13, %25 : vector<1x16xf32>
      %28 = arith.subf %26, %27 : vector<1x16xf32>
      %29 = arith.index_cast %arg1 : i32 to index
      %c0_15 = arith.constant 0 : index
      %c0_16 = arith.constant 0 : index
      %30 = vector.load %arg7[%29, %c0_15, %c0_16] : memref<1x512x16xbf16, #tpu.memory_space<vmem>>, vector<1x512x16xbf16>
      %31 = vector.shape_cast %30 : vector<1x512x16xbf16> to vector<512x16xbf16>
      %32 = arith.extf %31 : vector<512x16xbf16> to vector<512x16xf32>
      %33 = vector.broadcast %25 : vector<1x16xf32> to vector<512x16xf32>
      %34 = arith.mulf %32, %33 : vector<512x16xf32>
      %35 = vector.broadcast %28 : vector<1x16xf32> to vector<512x16xf32>
      %36 = arith.addf %34, %35 : vector<512x16xf32>
      %cst_17 = arith.constant 2.000000e-01 : f32
      %37 = vector.broadcast %cst_17 : f32 to vector<512x16xf32>
      %38 = arith.mulf %37, %36 : vector<512x16xf32>
      %39 = arith.maximumf %36, %38 : vector<512x16xf32>
      %40 = arith.truncf %39 : vector<512x16xf32> to vector<512x16xbf16>
      %c0_18 = arith.constant 0 : index
      %c0_19 = arith.constant 0 : index
      %41 = vector.load %arg6[%c0_18, %c0_19] : memref<512x16xbf16, #tpu.memory_space<vmem>>, vector<512x16xbf16>
      tpu.vector_store %arg6[%c0_18, %c0_19], %40 {strides = array<i32>} : memref<512x16xbf16, #tpu.memory_space<vmem>>, vector<512x16xbf16>,
    } else {
    }
    return
  }
  func.func @transform_0(%arg0: i32, %arg1: i32) -> (i32, i32) {
    %c1_i32 = arith.constant 1 : i32
    %0 = arith.subi %c1_i32, %arg0 : i32
    %1 = arith.muli %arg1, %0 : i32
    %c0_i32 = arith.constant 0 : i32
    %c0_i32_0 = arith.constant 0 : i32
    return %1, %c0_i32 : i32, i32
  }
  func.func @transform_1(%arg0: i32, %arg1: i32) -> (i32, i32) {
    %c0_i32 = arith.constant 0 : i32
    %c0_i32_0 = arith.constant 0 : i32
    %c0_i32_1 = arith.constant 0 : i32
    return %c0_i32, %c0_i32_0 : i32, i32
  }
  func.func @transform_2(%arg0: i32, %arg1: i32) -> (i32, i32) {
    %c0_i32 = arith.constant 0 : i32
    %c0_i32_0 = arith.constant 0 : i32
    %c0_i32_1 = arith.constant 0 : i32
    return %c0_i32, %c0_i32_0 : i32, i32
  }
  func.func @transform_3(%arg0: i32, %arg1: i32) -> (i32, i32) {
    %c0_i32 = arith.constant 0 : i32
    %c0_i32_0 = arith.constant 0 : i32
    %c0_i32_1 = arith.constant 0 : i32
    return %c0_i32, %c0_i32_0 : i32, i32
  }
  func.func @transform_4(%arg0: i32, %arg1: i32) -> (i32, i32) {
    %0 = arith.muli %arg1, %arg0 : i32
    %c0_i32 = arith.constant 0 : i32
    %c0_i32_0 = arith.constant 0 : i32
    return %0, %c0_i32 : i32, i32
  }
}

module attributes {stable_mosaic.version = 11 : i64} {
  func.func @_conv_bn_lrelu_fused_kernel(%arg0: i32, %arg1: i32, %arg2: memref<128x256xbf16, #tpu.memory_space<vmem>>, %arg3: memref<256x32xbf16, #tpu.memory_space<vmem>>, %arg4: memref<1x32xf32, #tpu.memory_space<vmem>>, %arg5: memref<1x32xf32, #tpu.memory_space<vmem>>, %arg6: memref<128x32xbf16, #tpu.memory_space<vmem>>, %arg7: memref<1x128x32xbf16, #tpu.memory_space<vmem>>, %arg8: memref<1x32xf32, #tpu.memory_space<vmem>>, %arg9: memref<1x32xf32, #tpu.memory_space<vmem>>) attributes {dimension_semantics = [#tpu.dimension_semantics<arbitrary>, #tpu.dimension_semantics<arbitrary>], iteration_bounds = array<i64: 2, 1>, scalar_prefetch = 0 : i64, scratch_operands = 3 : i64, tpu.core_type = #tpu.core_type<tc>, window_params = [{transform_indices = @transform_0, window_bounds = array<i64: 128, 256>}, {pipeline_mode = #tpu.pipeline_mode<synchronous>, transform_indices = @transform_1, window_bounds = array<i64: 256, 32>}, {pipeline_mode = #tpu.pipeline_mode<synchronous>, transform_indices = @transform_2, window_bounds = array<i64: 1, 32>}, {pipeline_mode = #tpu.pipeline_mode<synchronous>, transform_indices = @transform_3, window_bounds = array<i64: 1, 32>}, {transform_indices = @transform_4, window_bounds = array<i64: 128, 32>}]} {
    %c0_i32 = arith.constant 0 : i32
    %0 = arith.cmpi eq, %arg0, %c0_i32 : i32
    %c0_i32_0 = arith.constant 0 : i32
    %1 = arith.cmpi eq, %arg1, %c0_i32_0 : i32
    %2 = arith.andi %0, %1 : i1
    %3 = arith.extui %2 : i1 to i32
    %c0_i32_1 = arith.constant 0 : i32
    %4 = arith.cmpi ne, %3, %c0_i32_1 : i32
    scf.if %4 {
      %cst = arith.constant 0.000000e+00 : f32
      %11 = vector.broadcast %cst : f32 to vector<1x32xf32>
      %c0 = arith.constant 0 : index
      %c0_5 = arith.constant 0 : index
      %12 = vector.load %arg8[%c0, %c0_5] : memref<1x32xf32, #tpu.memory_space<vmem>>, vector<1x32xf32>
      tpu.vector_store %arg8[%c0, %c0_5], %11 {strides = array<i32>} : memref<1x32xf32, #tpu.memory_space<vmem>>, vector<1x32xf32>,
      %cst_6 = arith.constant 0.000000e+00 : f32
      %13 = vector.broadcast %cst_6 : f32 to vector<1x32xf32>
      %c0_7 = arith.constant 0 : index
      %c0_8 = arith.constant 0 : index
      %14 = vector.load %arg9[%c0_7, %c0_8] : memref<1x32xf32, #tpu.memory_space<vmem>>, vector<1x32xf32>
      tpu.vector_store %arg9[%c0_7, %c0_8], %13 {strides = array<i32>} : memref<1x32xf32, #tpu.memory_space<vmem>>, vector<1x32xf32>,
    } else {
    }
    %c0_i32_2 = arith.constant 0 : i32
    %5 = arith.cmpi eq, %arg0, %c0_i32_2 : i32
    %6 = arith.extui %5 : i1 to i32
    %c0_i32_3 = arith.constant 0 : i32
    %7 = arith.cmpi ne, %6, %c0_i32_3 : i32
    scf.if %7 {
      %c0 = arith.constant 0 : index
      %c0_5 = arith.constant 0 : index
      %11 = vector.load %arg2[%c0, %c0_5] : memref<128x256xbf16, #tpu.memory_space<vmem>>, vector<128x256xbf16>
      %c0_6 = arith.constant 0 : index
      %c0_7 = arith.constant 0 : index
      %12 = vector.load %arg3[%c0_6, %c0_7] : memref<256x32xbf16, #tpu.memory_space<vmem>>, vector<256x32xbf16>
      %cst = arith.constant dense<0.000000e+00> : vector<128x32xf32>
      %13 = tpu.matmul %11, %12, %cst {dimension_numbers = #tpu.dot_dimension_numbers<[1], [0], [0], [1], [0, 0, 1, 1], [], []>} : vector<128x256xbf16>, vector<256x32xbf16>, vector<128x32xf32> -> vector<128x32xf32>
      %14 = arith.truncf %13 : vector<128x32xf32> to vector<128x32xbf16>
      %15 = arith.index_cast %arg1 : i32 to index
      %c0_8 = arith.constant 0 : index
      %c0_9 = arith.constant 0 : index
      %16 = vector.load %arg7[%15, %c0_8, %c0_9] : memref<1x128x32xbf16, #tpu.memory_space<vmem>>, vector<1x128x32xbf16>
      %17 = vector.shape_cast %16 : vector<1x128x32xbf16> to vector<128x32xbf16>
      %18 = vector.shape_cast %14 : vector<128x32xbf16> to vector<1x128x32xbf16>
      tpu.vector_store %arg7[%15, %c0_8, %c0_9], %18 {strides = array<i32>} : memref<1x128x32xbf16, #tpu.memory_space<vmem>>, vector<1x128x32xbf16>,
      %c0_10 = arith.constant 0 : index
      %c0_11 = arith.constant 0 : index
      %19 = vector.load %arg8[%c0_10, %c0_11] : memref<1x32xf32, #tpu.memory_space<vmem>>, vector<1x32xf32>
      %cst_12 = arith.constant dense<0.000000e+00> : vector<32xf32>
      %20 = vector.multi_reduction <add>, %13, %cst_12 [0] : vector<128x32xf32> to vector<32xf32>
      %21 = vector.shape_cast %20 : vector<32xf32> to vector<1x32xf32>
      %22 = arith.addf %19, %21 : vector<1x32xf32>
      %c0_13 = arith.constant 0 : index
      %c0_14 = arith.constant 0 : index
      %23 = vector.load %arg8[%c0_13, %c0_14] : memref<1x32xf32, #tpu.memory_space<vmem>>, vector<1x32xf32>
      tpu.vector_store %arg8[%c0_13, %c0_14], %22 {strides = array<i32>} : memref<1x32xf32, #tpu.memory_space<vmem>>, vector<1x32xf32>,
      %c0_15 = arith.constant 0 : index
      %c0_16 = arith.constant 0 : index
      %24 = vector.load %arg9[%c0_15, %c0_16] : memref<1x32xf32, #tpu.memory_space<vmem>>, vector<1x32xf32>
      %25 = arith.mulf %13, %13 : vector<128x32xf32>
      %cst_17 = arith.constant dense<0.000000e+00> : vector<32xf32>
      %26 = vector.multi_reduction <add>, %25, %cst_17 [0] : vector<128x32xf32> to vector<32xf32>
      %27 = vector.shape_cast %26 : vector<32xf32> to vector<1x32xf32>
      %28 = arith.addf %24, %27 : vector<1x32xf32>
      %c0_18 = arith.constant 0 : index
      %c0_19 = arith.constant 0 : index
      %29 = vector.load %arg9[%c0_18, %c0_19] : memref<1x32xf32, #tpu.memory_space<vmem>>, vector<1x32xf32>
      tpu.vector_store %arg9[%c0_18, %c0_19], %28 {strides = array<i32>} : memref<1x32xf32, #tpu.memory_space<vmem>>, vector<1x32xf32>,
    } else {
    }
    %c1_i32 = arith.constant 1 : i32
    %8 = arith.cmpi eq, %arg0, %c1_i32 : i32
    %9 = arith.extui %8 : i1 to i32
    %c0_i32_4 = arith.constant 0 : i32
    %10 = arith.cmpi ne, %9, %c0_i32_4 : i32
    scf.if %10 {
      %c0 = arith.constant 0 : index
      %c0_5 = arith.constant 0 : index
      %11 = vector.load %arg8[%c0, %c0_5] : memref<1x32xf32, #tpu.memory_space<vmem>>, vector<1x32xf32>
      %cst = arith.constant 7.812500e-03 : f32
      %12 = vector.broadcast %cst : f32 to vector<1x32xf32>
      %13 = arith.mulf %11, %12 : vector<1x32xf32>
      %c0_6 = arith.constant 0 : index
      %c0_7 = arith.constant 0 : index
      %14 = vector.load %arg9[%c0_6, %c0_7] : memref<1x32xf32, #tpu.memory_space<vmem>>, vector<1x32xf32>
      %cst_8 = arith.constant 7.812500e-03 : f32
      %15 = vector.broadcast %cst_8 : f32 to vector<1x32xf32>
      %16 = arith.mulf %14, %15 : vector<1x32xf32>
      %17 = arith.mulf %13, %13 : vector<1x32xf32>
      %18 = arith.subf %16, %17 : vector<1x32xf32>
      %cst_9 = arith.constant 0.000000e+00 : f32
      %19 = vector.broadcast %cst_9 : f32 to vector<1x32xf32>
      %20 = arith.maximumf %18, %19 : vector<1x32xf32>
      %c0_10 = arith.constant 0 : index
      %c0_11 = arith.constant 0 : index
      %21 = vector.load %arg4[%c0_10, %c0_11] : memref<1x32xf32, #tpu.memory_space<vmem>>, vector<1x32xf32>
      %cst_12 = arith.constant 9.99999974E-6 : f32
      %22 = vector.broadcast %cst_12 : f32 to vector<1x32xf32>
      %23 = arith.addf %20, %22 : vector<1x32xf32>
      %24 = math.rsqrt %23 : vector<1x32xf32>
      %25 = arith.mulf %21, %24 : vector<1x32xf32>
      %c0_13 = arith.constant 0 : index
      %c0_14 = arith.constant 0 : index
      %26 = vector.load %arg5[%c0_13, %c0_14] : memref<1x32xf32, #tpu.memory_space<vmem>>, vector<1x32xf32>
      %27 = arith.mulf %13, %25 : vector<1x32xf32>
      %28 = arith.subf %26, %27 : vector<1x32xf32>
      %29 = arith.index_cast %arg1 : i32 to index
      %c0_15 = arith.constant 0 : index
      %c0_16 = arith.constant 0 : index
      %30 = vector.load %arg7[%29, %c0_15, %c0_16] : memref<1x128x32xbf16, #tpu.memory_space<vmem>>, vector<1x128x32xbf16>
      %31 = vector.shape_cast %30 : vector<1x128x32xbf16> to vector<128x32xbf16>
      %32 = arith.extf %31 : vector<128x32xbf16> to vector<128x32xf32>
      %33 = vector.broadcast %25 : vector<1x32xf32> to vector<128x32xf32>
      %34 = arith.mulf %32, %33 : vector<128x32xf32>
      %35 = vector.broadcast %28 : vector<1x32xf32> to vector<128x32xf32>
      %36 = arith.addf %34, %35 : vector<128x32xf32>
      %cst_17 = arith.constant 2.000000e-01 : f32
      %37 = vector.broadcast %cst_17 : f32 to vector<128x32xf32>
      %38 = arith.mulf %37, %36 : vector<128x32xf32>
      %39 = arith.maximumf %36, %38 : vector<128x32xf32>
      %40 = arith.truncf %39 : vector<128x32xf32> to vector<128x32xbf16>
      %c0_18 = arith.constant 0 : index
      %c0_19 = arith.constant 0 : index
      %41 = vector.load %arg6[%c0_18, %c0_19] : memref<128x32xbf16, #tpu.memory_space<vmem>>, vector<128x32xbf16>
      tpu.vector_store %arg6[%c0_18, %c0_19], %40 {strides = array<i32>} : memref<128x32xbf16, #tpu.memory_space<vmem>>, vector<128x32xbf16>,
    } else {
    }
    return
  }
  func.func @transform_0(%arg0: i32, %arg1: i32) -> (i32, i32) {
    %c1_i32 = arith.constant 1 : i32
    %0 = arith.subi %c1_i32, %arg0 : i32
    %1 = arith.muli %arg1, %0 : i32
    %c0_i32 = arith.constant 0 : i32
    %c0_i32_0 = arith.constant 0 : i32
    return %1, %c0_i32 : i32, i32
  }
  func.func @transform_1(%arg0: i32, %arg1: i32) -> (i32, i32) {
    %c0_i32 = arith.constant 0 : i32
    %c0_i32_0 = arith.constant 0 : i32
    %c0_i32_1 = arith.constant 0 : i32
    return %c0_i32, %c0_i32_0 : i32, i32
  }
  func.func @transform_2(%arg0: i32, %arg1: i32) -> (i32, i32) {
    %c0_i32 = arith.constant 0 : i32
    %c0_i32_0 = arith.constant 0 : i32
    %c0_i32_1 = arith.constant 0 : i32
    return %c0_i32, %c0_i32_0 : i32, i32
  }
  func.func @transform_3(%arg0: i32, %arg1: i32) -> (i32, i32) {
    %c0_i32 = arith.constant 0 : i32
    %c0_i32_0 = arith.constant 0 : i32
    %c0_i32_1 = arith.constant 0 : i32
    return %c0_i32, %c0_i32_0 : i32, i32
  }
  func.func @transform_4(%arg0: i32, %arg1: i32) -> (i32, i32) {
    %0 = arith.muli %arg1, %arg0 : i32
    %c0_i32 = arith.constant 0 : i32
    %c0_i32_0 = arith.constant 0 : i32
    return %0, %c0_i32 : i32, i32
  }
}

module attributes {stable_mosaic.version = 11 : i64} {
  func.func @_conv_bn_lrelu_fused_kernel(%arg0: i32, %arg1: i32, %arg2: memref<32x512xbf16, #tpu.memory_space<vmem>>, %arg3: memref<512x64xbf16, #tpu.memory_space<vmem>>, %arg4: memref<1x64xf32, #tpu.memory_space<vmem>>, %arg5: memref<1x64xf32, #tpu.memory_space<vmem>>, %arg6: memref<32x64xbf16, #tpu.memory_space<vmem>>, %arg7: memref<1x32x64xbf16, #tpu.memory_space<vmem>>, %arg8: memref<1x64xf32, #tpu.memory_space<vmem>>, %arg9: memref<1x64xf32, #tpu.memory_space<vmem>>) attributes {dimension_semantics = [#tpu.dimension_semantics<arbitrary>, #tpu.dimension_semantics<arbitrary>], iteration_bounds = array<i64: 2, 1>, scalar_prefetch = 0 : i64, scratch_operands = 3 : i64, tpu.core_type = #tpu.core_type<tc>, window_params = [{transform_indices = @transform_0, window_bounds = array<i64: 32, 512>}, {pipeline_mode = #tpu.pipeline_mode<synchronous>, transform_indices = @transform_1, window_bounds = array<i64: 512, 64>}, {pipeline_mode = #tpu.pipeline_mode<synchronous>, transform_indices = @transform_2, window_bounds = array<i64: 1, 64>}, {pipeline_mode = #tpu.pipeline_mode<synchronous>, transform_indices = @transform_3, window_bounds = array<i64: 1, 64>}, {transform_indices = @transform_4, window_bounds = array<i64: 32, 64>}]} {
    %c0_i32 = arith.constant 0 : i32
    %0 = arith.cmpi eq, %arg0, %c0_i32 : i32
    %c0_i32_0 = arith.constant 0 : i32
    %1 = arith.cmpi eq, %arg1, %c0_i32_0 : i32
    %2 = arith.andi %0, %1 : i1
    %3 = arith.extui %2 : i1 to i32
    %c0_i32_1 = arith.constant 0 : i32
    %4 = arith.cmpi ne, %3, %c0_i32_1 : i32
    scf.if %4 {
      %cst = arith.constant 0.000000e+00 : f32
      %11 = vector.broadcast %cst : f32 to vector<1x64xf32>
      %c0 = arith.constant 0 : index
      %c0_5 = arith.constant 0 : index
      %12 = vector.load %arg8[%c0, %c0_5] : memref<1x64xf32, #tpu.memory_space<vmem>>, vector<1x64xf32>
      tpu.vector_store %arg8[%c0, %c0_5], %11 {strides = array<i32>} : memref<1x64xf32, #tpu.memory_space<vmem>>, vector<1x64xf32>,
      %cst_6 = arith.constant 0.000000e+00 : f32
      %13 = vector.broadcast %cst_6 : f32 to vector<1x64xf32>
      %c0_7 = arith.constant 0 : index
      %c0_8 = arith.constant 0 : index
      %14 = vector.load %arg9[%c0_7, %c0_8] : memref<1x64xf32, #tpu.memory_space<vmem>>, vector<1x64xf32>
      tpu.vector_store %arg9[%c0_7, %c0_8], %13 {strides = array<i32>} : memref<1x64xf32, #tpu.memory_space<vmem>>, vector<1x64xf32>,
    } else {
    }
    %c0_i32_2 = arith.constant 0 : i32
    %5 = arith.cmpi eq, %arg0, %c0_i32_2 : i32
    %6 = arith.extui %5 : i1 to i32
    %c0_i32_3 = arith.constant 0 : i32
    %7 = arith.cmpi ne, %6, %c0_i32_3 : i32
    scf.if %7 {
      %c0 = arith.constant 0 : index
      %c0_5 = arith.constant 0 : index
      %11 = vector.load %arg2[%c0, %c0_5] : memref<32x512xbf16, #tpu.memory_space<vmem>>, vector<32x512xbf16>
      %c0_6 = arith.constant 0 : index
      %c0_7 = arith.constant 0 : index
      %12 = vector.load %arg3[%c0_6, %c0_7] : memref<512x64xbf16, #tpu.memory_space<vmem>>, vector<512x64xbf16>
      %cst = arith.constant dense<0.000000e+00> : vector<32x64xf32>
      %13 = tpu.matmul %11, %12, %cst {dimension_numbers = #tpu.dot_dimension_numbers<[1], [0], [0], [1], [0, 0, 1, 1], [], []>} : vector<32x512xbf16>, vector<512x64xbf16>, vector<32x64xf32> -> vector<32x64xf32>
      %14 = arith.truncf %13 : vector<32x64xf32> to vector<32x64xbf16>
      %15 = arith.index_cast %arg1 : i32 to index
      %c0_8 = arith.constant 0 : index
      %c0_9 = arith.constant 0 : index
      %16 = vector.load %arg7[%15, %c0_8, %c0_9] : memref<1x32x64xbf16, #tpu.memory_space<vmem>>, vector<1x32x64xbf16>
      %17 = vector.shape_cast %16 : vector<1x32x64xbf16> to vector<32x64xbf16>
      %18 = vector.shape_cast %14 : vector<32x64xbf16> to vector<1x32x64xbf16>
      tpu.vector_store %arg7[%15, %c0_8, %c0_9], %18 {strides = array<i32>} : memref<1x32x64xbf16, #tpu.memory_space<vmem>>, vector<1x32x64xbf16>,
      %c0_10 = arith.constant 0 : index
      %c0_11 = arith.constant 0 : index
      %19 = vector.load %arg8[%c0_10, %c0_11] : memref<1x64xf32, #tpu.memory_space<vmem>>, vector<1x64xf32>
      %cst_12 = arith.constant dense<0.000000e+00> : vector<64xf32>
      %20 = vector.multi_reduction <add>, %13, %cst_12 [0] : vector<32x64xf32> to vector<64xf32>
      %21 = vector.shape_cast %20 : vector<64xf32> to vector<1x64xf32>
      %22 = arith.addf %19, %21 : vector<1x64xf32>
      %c0_13 = arith.constant 0 : index
      %c0_14 = arith.constant 0 : index
      %23 = vector.load %arg8[%c0_13, %c0_14] : memref<1x64xf32, #tpu.memory_space<vmem>>, vector<1x64xf32>
      tpu.vector_store %arg8[%c0_13, %c0_14], %22 {strides = array<i32>} : memref<1x64xf32, #tpu.memory_space<vmem>>, vector<1x64xf32>,
      %c0_15 = arith.constant 0 : index
      %c0_16 = arith.constant 0 : index
      %24 = vector.load %arg9[%c0_15, %c0_16] : memref<1x64xf32, #tpu.memory_space<vmem>>, vector<1x64xf32>
      %25 = arith.mulf %13, %13 : vector<32x64xf32>
      %cst_17 = arith.constant dense<0.000000e+00> : vector<64xf32>
      %26 = vector.multi_reduction <add>, %25, %cst_17 [0] : vector<32x64xf32> to vector<64xf32>
      %27 = vector.shape_cast %26 : vector<64xf32> to vector<1x64xf32>
      %28 = arith.addf %24, %27 : vector<1x64xf32>
      %c0_18 = arith.constant 0 : index
      %c0_19 = arith.constant 0 : index
      %29 = vector.load %arg9[%c0_18, %c0_19] : memref<1x64xf32, #tpu.memory_space<vmem>>, vector<1x64xf32>
      tpu.vector_store %arg9[%c0_18, %c0_19], %28 {strides = array<i32>} : memref<1x64xf32, #tpu.memory_space<vmem>>, vector<1x64xf32>,
    } else {
    }
    %c1_i32 = arith.constant 1 : i32
    %8 = arith.cmpi eq, %arg0, %c1_i32 : i32
    %9 = arith.extui %8 : i1 to i32
    %c0_i32_4 = arith.constant 0 : i32
    %10 = arith.cmpi ne, %9, %c0_i32_4 : i32
    scf.if %10 {
      %c0 = arith.constant 0 : index
      %c0_5 = arith.constant 0 : index
      %11 = vector.load %arg8[%c0, %c0_5] : memref<1x64xf32, #tpu.memory_space<vmem>>, vector<1x64xf32>
      %cst = arith.constant 3.125000e-02 : f32
      %12 = vector.broadcast %cst : f32 to vector<1x64xf32>
      %13 = arith.mulf %11, %12 : vector<1x64xf32>
      %c0_6 = arith.constant 0 : index
      %c0_7 = arith.constant 0 : index
      %14 = vector.load %arg9[%c0_6, %c0_7] : memref<1x64xf32, #tpu.memory_space<vmem>>, vector<1x64xf32>
      %cst_8 = arith.constant 3.125000e-02 : f32
      %15 = vector.broadcast %cst_8 : f32 to vector<1x64xf32>
      %16 = arith.mulf %14, %15 : vector<1x64xf32>
      %17 = arith.mulf %13, %13 : vector<1x64xf32>
      %18 = arith.subf %16, %17 : vector<1x64xf32>
      %cst_9 = arith.constant 0.000000e+00 : f32
      %19 = vector.broadcast %cst_9 : f32 to vector<1x64xf32>
      %20 = arith.maximumf %18, %19 : vector<1x64xf32>
      %c0_10 = arith.constant 0 : index
      %c0_11 = arith.constant 0 : index
      %21 = vector.load %arg4[%c0_10, %c0_11] : memref<1x64xf32, #tpu.memory_space<vmem>>, vector<1x64xf32>
      %cst_12 = arith.constant 9.99999974E-6 : f32
      %22 = vector.broadcast %cst_12 : f32 to vector<1x64xf32>
      %23 = arith.addf %20, %22 : vector<1x64xf32>
      %24 = math.rsqrt %23 : vector<1x64xf32>
      %25 = arith.mulf %21, %24 : vector<1x64xf32>
      %c0_13 = arith.constant 0 : index
      %c0_14 = arith.constant 0 : index
      %26 = vector.load %arg5[%c0_13, %c0_14] : memref<1x64xf32, #tpu.memory_space<vmem>>, vector<1x64xf32>
      %27 = arith.mulf %13, %25 : vector<1x64xf32>
      %28 = arith.subf %26, %27 : vector<1x64xf32>
      %29 = arith.index_cast %arg1 : i32 to index
      %c0_15 = arith.constant 0 : index
      %c0_16 = arith.constant 0 : index
      %30 = vector.load %arg7[%29, %c0_15, %c0_16] : memref<1x32x64xbf16, #tpu.memory_space<vmem>>, vector<1x32x64xbf16>
      %31 = vector.shape_cast %30 : vector<1x32x64xbf16> to vector<32x64xbf16>
      %32 = arith.extf %31 : vector<32x64xbf16> to vector<32x64xf32>
      %33 = vector.broadcast %25 : vector<1x64xf32> to vector<32x64xf32>
      %34 = arith.mulf %32, %33 : vector<32x64xf32>
      %35 = vector.broadcast %28 : vector<1x64xf32> to vector<32x64xf32>
      %36 = arith.addf %34, %35 : vector<32x64xf32>
      %cst_17 = arith.constant 2.000000e-01 : f32
      %37 = vector.broadcast %cst_17 : f32 to vector<32x64xf32>
      %38 = arith.mulf %37, %36 : vector<32x64xf32>
      %39 = arith.maximumf %36, %38 : vector<32x64xf32>
      %40 = arith.truncf %39 : vector<32x64xf32> to vector<32x64xbf16>
      %c0_18 = arith.constant 0 : index
      %c0_19 = arith.constant 0 : index
      %41 = vector.load %arg6[%c0_18, %c0_19] : memref<32x64xbf16, #tpu.memory_space<vmem>>, vector<32x64xbf16>
      tpu.vector_store %arg6[%c0_18, %c0_19], %40 {strides = array<i32>} : memref<32x64xbf16, #tpu.memory_space<vmem>>, vector<32x64xbf16>,
    } else {
    }
    return
  }
  func.func @transform_0(%arg0: i32, %arg1: i32) -> (i32, i32) {
    %c1_i32 = arith.constant 1 : i32
    %0 = arith.subi %c1_i32, %arg0 : i32
    %1 = arith.muli %arg1, %0 : i32
    %c0_i32 = arith.constant 0 : i32
    %c0_i32_0 = arith.constant 0 : i32
    return %1, %c0_i32 : i32, i32
  }
  func.func @transform_1(%arg0: i32, %arg1: i32) -> (i32, i32) {
    %c0_i32 = arith.constant 0 : i32
    %c0_i32_0 = arith.constant 0 : i32
    %c0_i32_1 = arith.constant 0 : i32
    return %c0_i32, %c0_i32_0 : i32, i32
  }
  func.func @transform_2(%arg0: i32, %arg1: i32) -> (i32, i32) {
    %c0_i32 = arith.constant 0 : i32
    %c0_i32_0 = arith.constant 0 : i32
    %c0_i32_1 = arith.constant 0 : i32
    return %c0_i32, %c0_i32_0 : i32, i32
  }
  func.func @transform_3(%arg0: i32, %arg1: i32) -> (i32, i32) {
    %c0_i32 = arith.constant 0 : i32
    %c0_i32_0 = arith.constant 0 : i32
    %c0_i32_1 = arith.constant 0 : i32
    return %c0_i32, %c0_i32_0 : i32, i32
  }
  func.func @transform_4(%arg0: i32, %arg1: i32) -> (i32, i32) {
    %0 = arith.muli %arg1, %arg0 : i32
    %c0_i32 = arith.constant 0 : i32
    %c0_i32_0 = arith.constant 0 : i32
    return %0, %c0_i32 : i32, i32
  }
}

module attributes {stable_mosaic.version = 11 : i64} {
  func.func @_matmul_act_kernel(%arg0: i32, %arg1: memref<8x1024xbf16, #tpu.memory_space<vmem>>, %arg2: memref<1024x128xbf16, #tpu.memory_space<vmem>>, %arg3: memref<8x128xf32, #tpu.memory_space<vmem>>) attributes {dimension_semantics = [#tpu.dimension_semantics<parallel>], iteration_bounds = array<i64: 1>, scalar_prefetch = 0 : i64, scratch_operands = 0 : i64, tpu.core_type = #tpu.core_type<tc>, window_params = [{transform_indices = @transform_0, window_bounds = array<i64: 8, 1024>}, {pipeline_mode = #tpu.pipeline_mode<synchronous>, transform_indices = @transform_1, window_bounds = array<i64: 1024, 128>}, {transform_indices = @transform_2, window_bounds = array<i64: 8, 128>}]} {
    %c0 = arith.constant 0 : index
    %c0_0 = arith.constant 0 : index
    %0 = vector.load %arg1[%c0, %c0_0] : memref<8x1024xbf16, #tpu.memory_space<vmem>>, vector<8x1024xbf16>
    %c0_1 = arith.constant 0 : index
    %c0_2 = arith.constant 0 : index
    %1 = vector.load %arg2[%c0_1, %c0_2] : memref<1024x128xbf16, #tpu.memory_space<vmem>>, vector<1024x128xbf16>
    %cst = arith.constant dense<0.000000e+00> : vector<8x128xf32>
    %2 = tpu.matmul %0, %1, %cst {dimension_numbers = #tpu.dot_dimension_numbers<[1], [0], [0], [1], [0, 0, 1, 1], [], []>} : vector<8x1024xbf16>, vector<1024x128xbf16>, vector<8x128xf32> -> vector<8x128xf32>
    %cst_3 = arith.constant 0.000000e+00 : f32
    %3 = vector.broadcast %cst_3 : f32 to vector<8x128xf32>
    %4 = arith.subf %3, %2 : vector<8x128xf32>
    %5 = math.exp %4 : vector<8x128xf32>
    %cst_4 = arith.constant 1.000000e+00 : f32
    %6 = vector.broadcast %cst_4 : f32 to vector<8x128xf32>
    %7 = arith.addf %6, %5 : vector<8x128xf32>
    %cst_5 = arith.constant 1.000000e+00 : f32
    %8 = vector.broadcast %cst_5 : f32 to vector<8x128xf32>
    %9 = arith.divf %8, %7 : vector<8x128xf32>
    %c0_6 = arith.constant 0 : index
    %c0_7 = arith.constant 0 : index
    %10 = vector.load %arg3[%c0_6, %c0_7] : memref<8x128xf32, #tpu.memory_space<vmem>>, vector<8x128xf32>
    tpu.vector_store %arg3[%c0_6, %c0_7], %9 {strides = array<i32>} : memref<8x128xf32, #tpu.memory_space<vmem>>, vector<8x128xf32>,
    return
  }
  func.func @transform_0(%arg0: i32) -> (i32, i32) {
    %c0_i32 = arith.constant 0 : i32
    %c0_i32_0 = arith.constant 0 : i32
    return %arg0, %c0_i32 : i32, i32
  }
  func.func @transform_1(%arg0: i32) -> (i32, i32) {
    %c0_i32 = arith.constant 0 : i32
    %c0_i32_0 = arith.constant 0 : i32
    %c0_i32_1 = arith.constant 0 : i32
    return %c0_i32, %c0_i32_0 : i32, i32
  }
  func.func @transform_2(%arg0: i32) -> (i32, i32) {
    %c0_i32 = arith.constant 0 : i32
    %c0_i32_0 = arith.constant 0 : i32
    return %arg0, %c0_i32 : i32, i32
  }
}

</mosaic_0001>

<bundles_post_ra>
// kernel: _lambda_.5
= control target key start
LH: loop header
LB: loop body
LE: loop exit
PB: predicated region body
PF: predicated region fallthrough
CT: control target
= control target key end

     0   :  { %vm932_vm0 = vcmask 392192   ;;  %vm3910_vm1 = vcmask 60416   ;;  %s7032_s1 = inlined_call_operand.vmem [shape: bf16[48,8], index: 1, kind: input, shape index: {}]   ;;  %s7033_s0 = inlined_call_operand.vmem [shape: bf16[2048,48], index: 0, kind: input, shape index: {}]   ;;  %s7034_s2 = inlined_call_operand.vmem [shape: bf16[2048,8], index: 2, kind: output, shape index: {}]  }
   0x1   :  { %v5341_v0 = vld [vmem:[%s7032_s1] sm:$0xff]   ;;  %v5342_v1 = vld [vmem:[%s7032_s1 + $0x8] sm:$0xff]   ;;  %v5343_v2 = vld [vmem:[%s7032_s1 + $0x10] sm:$0xff]  }
   0x2   :  { %5073 = vmatprep.subr.bf16.mxu0 %v5341_v0  ;;  %5335 = vmatprep.subr.bf16.mxu1 %v5341_v0  ;;  %v5344_v3 = vld [vmem:[%s7033_s0] sm:$0xff]   ;;  %v5346_v5 = vld [vmem:[%s7033_s0 + $0x8] sm:$0xff]   ;;  %v5348_v7 = vld [vmem:[%s7033_s0 + $0x10] sm:$0xff]  }
   0x3   :  { %5074 = vmatpush3.bf16.msra.mxu0 %v5341_v0  ;;  %5338 = vmatpush3.bf16.msra.mxu1 %v5341_v0  ;;  %v5345_v4 = vld [vmem:[%s7033_s0 + $0x200] sm:$0xff]   ;;  %v5347_v6 = vld [vmem:[%s7033_s0 + $0x208] sm:$0xff]   ;;  %v5349_v8 = vld [vmem:[%s7033_s0 + $0x210] sm:$0xff]  }
   0x4   :  { %5075 = vmatprep.subr.bf16.mxu0 %v5342_v1  ;;  %5336 = vmatprep.subr.bf16.mxu1 %v5342_v1  ;;  %v5350_v9 = vld [vmem:[%s7033_s0 + $0x18] sm:$0xff]   ;;  %v5352_v11 = vld [vmem:[%s7033_s0 + $0x20] sm:$0xff]   ;;  %v5354_v13 = vld [vmem:[%s7033_s0 + $0x28] sm:$0xff]  }
   0x5   :  { %5079 = vmatprep.mubr.msk.bf16.mxu0 %vm932_vm0, %v5344_v3  ;;  %5207 = vmatprep.mubr.msk.bf16.mxu1 %vm932_vm0, %v5345_v4  ;;  %v5351_v10 = vld [vmem:[%s7033_s0 + $0x218] sm:$0xff]   ;;  %v5353_v12 = vld [vmem:[%s7033_s0 + $0x220] sm:$0xff]   ;;  %v5355_v14 = vld [vmem:[%s7033_s0 + $0x228] sm:$0xff]  }
   0x6   :  { %v5356_v15 = vld [vmem:[%s7033_s0 + $0x30] sm:$0xff]   ;;  %v5358_v17 = vld [vmem:[%s7033_s0 + $0x38] sm:$0xff]   ;;  %v5360_v19 = vld [vmem:[%s7033_s0 + $0x40] sm:$0xff]  }
   0x7   :  { %5076 = vmatpush3.bf16.msra.mxu0 %v5342_v1  ;;  %5339 = vmatpush3.bf16.msra.mxu1 %v5342_v1  ;;  %v5357_v16 = vld [vmem:[%s7033_s0 + $0x230] sm:$0xff]   ;;  %v5359_v18 = vld [vmem:[%s7033_s0 + $0x238] sm:$0xff]   ;;  %v5361_v20 = vld [vmem:[%s7033_s0 + $0x240] sm:$0xff]  }
   0x8   :  { %5077 = vmatprep.subr.bf16.mxu0 %v5343_v2  ;;  %5337 = vmatprep.subr.bf16.mxu1 %v5343_v2  ;;  %v5362_v21 = vld [vmem:[%s7033_s0 + $0x48] sm:$0xff]   ;;  %v5364_v23 = vld [vmem:[%s7033_s0 + $0x50] sm:$0xff]   ;;  %v5366_v25 = vld [vmem:[%s7033_s0 + $0x58] sm:$0xff]  }
   0x9   :  { %v5363_v22 = vld [vmem:[%s7033_s0 + $0x248] sm:$0xff]   ;;  %v5365_v24 = vld [vmem:[%s7033_s0 + $0x250] sm:$0xff]   ;;  %v5367_v26 = vld [vmem:[%s7033_s0 + $0x258] sm:$0xff]  }
   0xa   :  { %v5368_v27 = vld [vmem:[%s7033_s0 + $0x60] sm:$0xff]   ;;  %v5370_v29 = vld [vmem:[%s7033_s0 + $0x68] sm:$0xff]   ;;  %v5372_v31 = vld [vmem:[%s7033_s0 + $0x70] sm:$0xff]  }
   0xb   :  { %5078 = vmatpush3.bf16.msra.mxu0 %v5343_v2  ;;  %5340 = vmatpush3.bf16.msra.mxu1 %v5343_v2  ;;  %v5369_v28 = vld [vmem:[%s7033_s0 + $0x260] sm:$0xff]   ;;  %v5371_v30 = vld [vmem:[%s7033_s0 + $0x268] sm:$0xff]   ;;  %v5373_v32 = vld [vmem:[%s7033_s0 + $0x270] sm:$0xff]  }
   0xc   :  { %v5374_v33 = vld [vmem:[%s7033_s0 + $0x78] sm:$0xff]   ;;  %v5376_v35 = vld [vmem:[%s7033_s0 + $0x80] sm:$0xff]   ;;  %v5378_v37 = vld [vmem:[%s7033_s0 + $0x88] sm:$0xff]  }
   0xd   :  { %v5375_v34 = vld [vmem:[%s7033_s0 + $0x278] sm:$0xff]   ;;  %v5377_v36 = vld [vmem:[%s7033_s0 + $0x280] sm:$0xff]   ;;  %v5379_v38 = vld [vmem:[%s7033_s0 + $0x288] sm:$0xff]  }
   0xe   :  { %5080 = vmatmul.mubr.msk.bf16.vlgmr.msra.gmra.mrb[0].mxu0 %vm932_vm0, %v5346_v5  ;;  %5208 = vmatmul.mubr.msk.bf16.vlgmr.msra.gmra.mrb[0].mxu1 %vm932_vm0, %v5347_v6  ;;  %v5380_v39 = vld [vmem:[%s7033_s0 + $0x90] sm:$0xff]   ;;  %v5382_v41 = vld [vmem:[%s7033_s0 + $0x98] sm:$0xff]   ;;  %v5384_v43 = vld [vmem:[%s7033_s0 + $0xa0] sm:$0xff]  }
   0xf   :  { %5083 = vmatprep.mubr.msk.bf16.mxu0 %vm932_vm0, %v5348_v7  ;;  %5211 = vmatprep.mubr.msk.bf16.mxu1 %vm932_vm0, %v5349_v8  ;;  %v5381_v40 = vld [vmem:[%s7033_s0 + $0x290] sm:$0xff]   ;;  %v5383_v42 = vld [vmem:[%s7033_s0 + $0x298] sm:$0xff]   ;;  %v5385_v44 = vld [vmem:[%s7033_s0 + $0x2a0] sm:$0xff]  }
  0x10   :  { %v5386_v45 = vld [vmem:[%s7033_s0 + $0xa8] sm:$0xff]   ;;  %v5388_v47 = vld [vmem:[%s7033_s0 + $0xb0] sm:$0xff]   ;;  %v5390_v49 = vld [vmem:[%s7033_s0 + $0xb8] sm:$0xff]  }
  0x11   :  { %v5387_v46 = vld [vmem:[%s7033_s0 + $0x2a8] sm:$0xff]   ;;  %v5389_v48 = vld [vmem:[%s7033_s0 + $0x2b0] sm:$0xff]   ;;  %v5391_v50 = vld [vmem:[%s7033_s0 + $0x2b8] sm:$0xff]  }
  0x12   :  { %v5392_v51 = vld [vmem:[%s7033_s0 + $0xc0] sm:$0xff]   ;;  %v5394_v53 = vld [vmem:[%s7033_s0 + $0xc8] sm:$0xff]   ;;  %v5396_v55 = vld [vmem:[%s7033_s0 + $0xd0] sm:$0xff]  }
  0x13   :  { %v5393_v52 = vld [vmem:[%s7033_s0 + $0x2c0] sm:$0xff]   ;;  %v5395_v54 = vld [vmem:[%s7033_s0 + $0x2c8] sm:$0xff]   ;;  %v5397_v56 = vld [vmem:[%s7033_s0 + $0x2d0] sm:$0xff]  }
  0x14   :  { %v5398_v57 = vld [vmem:[%s7033_s0 + $0xd8] sm:$0xff]   ;;  %v5400_v59 = vld [vmem:[%s7033_s0 + $0xe0] sm:$0xff]   ;;  %v5402_v61 = vld [vmem:[%s7033_s0 + $0xe8] sm:$0xff]  }
  0x15   :  { %v5399_v58 = vld [vmem:[%s7033_s0 + $0x2d8] sm:$0xff]   ;;  %v5401_v60 = vld [vmem:[%s7033_s0 + $0x2e0] sm:$0xff]   ;;  %v5403_v62 = vld [vmem:[%s7033_s0 + $0x2e8] sm:$0xff]  }
  0x16   :  { %5084 = vmatmul.mubr.msk.bf16.gmra.mrb[4].mxu0 %vm932_vm0, %v5350_v9  ;;  %5212 = vmatmul.mubr.msk.bf16.gmra.mrb[4].mxu1 %vm932_vm0, %v5351_v10  ;;  %v5404_v63 = vld [vmem:[%s7033_s0 + $0xf0] sm:$0xff]   ;;  %v5406_v1 = vld [vmem:[%s7033_s0 + $0xf8] sm:$0xff]   ;;  %v5408_v3 = vld [vmem:[%s7033_s0 + $0x100] sm:$0xff]  }
  0x17   :  { %5087 = vmatprep.mubr.msk.bf16.mxu0 %vm932_vm0, %v5352_v11  ;;  %5215 = vmatprep.mubr.msk.bf16.mxu1 %vm932_vm0, %v5353_v12  ;;  %v5405_v0 = vld [vmem:[%s7033_s0 + $0x2f0] sm:$0xff]   ;;  %v5407_v2 = vld [vmem:[%s7033_s0 + $0x2f8] sm:$0xff]   ;;  %v5409_v4 = vld [vmem:[%s7033_s0 + $0x300] sm:$0xff]  }
  0x18   :  { %v5410_v5 = vld [vmem:[%s7033_s0 + $0x108] sm:$0xff]   ;;  %v5412_v7 = vld [vmem:[%s7033_s0 + $0x110] sm:$0xff]   ;;  %v5414_v9 = vld [vmem:[%s7033_s0 + $0x118] sm:$0xff]  }
  0x19   :  { %v5411_v6 = vld [vmem:[%s7033_s0 + $0x308] sm:$0xff]   ;;  %v5413_v8 = vld [vmem:[%s7033_s0 + $0x310] sm:$0xff]   ;;  %v5415_v10 = vld [vmem:[%s7033_s0 + $0x318] sm:$0xff]  }
  0x1a   :  { %v5416_v11 = vld [vmem:[%s7033_s0 + $0x120] sm:$0xff]  }
  0x1b   :  { %v5417_v12 = vld [vmem:[%s7033_s0 + $0x320] sm:$0xff]  }
  0x1e   :  { %5088 = vmatmul.mubr.msk.bf16.gmra.mrb[8].mxu0 %vm932_vm0, %v5354_v13  ;;  %5216 = vmatmul.mubr.msk.bf16.gmra.mrb[8].mxu1 %vm932_vm0, %v5355_v14  ;;  %v5418_v13 = vld [vmem:[%s7033_s0 + $0x128] sm:$0xff]  }
  0x1f   :  { %5091 = vmatprep.mubr.msk.bf16.mxu0 %vm932_vm0, %v5356_v15  ;;  %5219 = vmatprep.mubr.msk.bf16.mxu1 %vm932_vm0, %v5357_v16  ;;  %v5419_v14 = vld [vmem:[%s7033_s0 + $0x328] sm:$0xff]   ;;  %v5420_v15 = vld [vmem:[%s7033_s0 + $0x130] sm:$0xff]  }
  0x20   :  { %v5421_v16 = vld [vmem:[%s7033_s0 + $0x330] sm:$0xff]  }
  0x26   :  { %5092 = vmatmul.mubr.msk.bf16.gmra.mrb[12].mxu0 %vm932_vm0, %v5358_v17  ;;  %5220 = vmatmul.mubr.msk.bf16.gmra.mrb[12].mxu1 %vm932_vm0, %v5359_v18  ;;  %v5422_v17 = vld [vmem:[%s7033_s0 + $0x138] sm:$0xff]  }
  0x27   :  { %5095 = vmatprep.mubr.msk.bf16.mxu0 %vm932_vm0, %v5360_v19  ;;  %5223 = vmatprep.mubr.msk.bf16.mxu1 %vm932_vm0, %v5361_v20  ;;  %v5423_v18 = vld [vmem:[%s7033_s0 + $0x338] sm:$0xff]   ;;  %v5424_v19 = vld [vmem:[%s7033_s0 + $0x140] sm:$0xff]  }
  0x28   :  { %v5425_v20 = vld [vmem:[%s7033_s0 + $0x340] sm:$0xff]  }
  0x2e   :  { %5096 = vmatmul.mubr.msk.bf16.gmra.mrb[16].mxu0 %vm932_vm0, %v5362_v21  ;;  %5224 = vmatmul.mubr.msk.bf16.gmra.mrb[16].mxu1 %vm932_vm0, %v5363_v22  ;;  %v5426_v21 = vld [vmem:[%s7033_s0 + $0x148] sm:$0xff]  }
  0x2f   :  { %5099 = vmatprep.mubr.msk.bf16.mxu0 %vm932_vm0, %v5364_v23  ;;  %5227 = vmatprep.mubr.msk.bf16.mxu1 %vm932_vm0, %v5365_v24  ;;  %v5427_v22 = vld [vmem:[%s7033_s0 + $0x348] sm:$0xff]   ;;  %v5428_v23 = vld [vmem:[%s7033_s0 + $0x150] sm:$0xff]  }
  0x30   :  { %v5429_v24 = vld [vmem:[%s7033_s0 + $0x350] sm:$0xff]  }
  0x36   :  { %5100 = vmatmul.mubr.msk.bf16.gmra.mrb[20].mxu0 %vm932_vm0, %v5366_v25  ;;  %5228 = vmatmul.mubr.msk.bf16.gmra.mrb[20].mxu1 %vm932_vm0, %v5367_v26  ;;  %v5430_v25 = vld [vmem:[%s7033_s0 + $0x158] sm:$0xff]  }
  0x37   :  { %5103 = vmatprep.mubr.msk.bf16.mxu0 %vm932_vm0, %v5368_v27  ;;  %5231 = vmatprep.mubr.msk.bf16.mxu1 %vm932_vm0, %v5369_v28  ;;  %v5431_v26 = vld [vmem:[%s7033_s0 + $0x358] sm:$0xff]   ;;  %v5432_v27 = vld [vmem:[%s7033_s0 + $0x160] sm:$0xff]  }
  0x38   :  { %v5433_v28 = vld [vmem:[%s7033_s0 + $0x360] sm:$0xff]  }
  0x3e   :  { %5104 = vmatmul.mubr.msk.bf16.gmra.mrb[24].mxu0 %vm932_vm0, %v5370_v29  ;;  %5232 = vmatmul.mubr.msk.bf16.gmra.mrb[24].mxu1 %vm932_vm0, %v5371_v30  ;;  %v5434_v29 = vld [vmem:[%s7033_s0 + $0x168] sm:$0xff]  }
  0x3f   :  { %5107 = vmatprep.mubr.msk.bf16.mxu0 %vm932_vm0, %v5372_v31  ;;  %5235 = vmatprep.mubr.msk.bf16.mxu1 %vm932_vm0, %v5373_v32  ;;  %v5435_v30 = vld [vmem:[%s7033_s0 + $0x368] sm:$0xff]   ;;  %v5436_v31 = vld [vmem:[%s7033_s0 + $0x170] sm:$0xff]  }
  0x40   :  { %v5437_v32 = vld [vmem:[%s7033_s0 + $0x370] sm:$0xff]  }
  0x46   :  { %5108 = vmatmul.mubr.msk.bf16.gmra.mrb[28].mxu0 %vm932_vm0, %v5374_v33  ;;  %5236 = vmatmul.mubr.msk.bf16.gmra.mrb[28].mxu1 %vm932_vm0, %v5375_v34  ;;  %v5438_v33 = vld [vmem:[%s7033_s0 + $0x178] sm:$0xff]  }
  0x47   :  { %5111 = vmatprep.mubr.msk.bf16.mxu0 %vm932_vm0, %v5376_v35  ;;  %5239 = vmatprep.mubr.msk.bf16.mxu1 %vm932_vm0, %v5377_v36  ;;  %v5439_v34 = vld [vmem:[%s7033_s0 + $0x378] sm:$0xff]   ;;  %v5440_v35 = vld [vmem:[%s7033_s0 + $0x180] sm:$0xff]  }
  0x48   :  { %v5441_v36 = vld [vmem:[%s7033_s0 + $0x380] sm:$0xff]  }
  0x4e   :  { %5112 = vmatmul.mubr.msk.bf16.gmra.mrb[32].mxu0 %vm932_vm0, %v5378_v37  ;;  %5240 = vmatmul.mubr.msk.bf16.gmra.mrb[32].mxu1 %vm932_vm0, %v5379_v38  ;;  %v5442_v37 = vld [vmem:[%s7033_s0 + $0x188] sm:$0xff]  }
  0x4f   :  { %5115 = vmatprep.mubr.msk.bf16.mxu0 %vm932_vm0, %v5380_v39  ;;  %5243 = vmatprep.mubr.msk.bf16.mxu1 %vm932_vm0, %v5381_v40  ;;  %v5443_v38 = vld [vmem:[%s7033_s0 + $0x388] sm:$0xff]   ;;  %v5444_v39 = vld [vmem:[%s7033_s0 + $0x190] sm:$0xff]  }
  0x50   :  { %v5445_v40 = vld [vmem:[%s7033_s0 + $0x390] sm:$0xff]  }
  0x56   :  { %5116 = vmatmul.mubr.msk.bf16.gmra.mrb[36].mxu0 %vm932_vm0, %v5382_v41  ;;  %5244 = vmatmul.mubr.msk.bf16.gmra.mrb[36].mxu1 %vm932_vm0, %v5383_v42  ;;  %v5446_v41 = vld [vmem:[%s7033_s0 + $0x198] sm:$0xff]  }
  0x57   :  { %5119 = vmatprep.mubr.msk.bf16.mxu0 %vm932_vm0, %v5384_v43  ;;  %5247 = vmatprep.mubr.msk.bf16.mxu1 %vm932_vm0, %v5385_v44  ;;  %v5447_v42 = vld [vmem:[%s7033_s0 + $0x398] sm:$0xff]   ;;  %v5448_v43 = vld [vmem:[%s7033_s0 + $0x1a0] sm:$0xff]  }
  0x58   :  { %v5449_v44 = vld [vmem:[%s7033_s0 + $0x3a0] sm:$0xff]  }
  0x5e   :  { %5120 = vmatmul.mubr.msk.bf16.gmra.mrb[40].mxu0 %vm932_vm0, %v5386_v45  ;;  %5248 = vmatmul.mubr.msk.bf16.gmra.mrb[40].mxu1 %vm932_vm0, %v5387_v46  ;;  %v5450_v45 = vld [vmem:[%s7033_s0 + $0x1a8] sm:$0xff]  }
  0x5f   :  { %5123 = vmatprep.mubr.msk.bf16.mxu0 %vm932_vm0, %v5388_v47  ;;  %5251 = vmatprep.mubr.msk.bf16.mxu1 %vm932_vm0, %v5389_v48  ;;  %v5451_v46 = vld [vmem:[%s7033_s0 + $0x3a8] sm:$0xff]   ;;  %v5452_v47 = vld [vmem:[%s7033_s0 + $0x1b0] sm:$0xff]  }
  0x60   :  { %v5453_v48 = vld [vmem:[%s7033_s0 + $0x3b0] sm:$0xff]  }
  0x66   :  { %5124 = vmatmul.mubr.msk.bf16.gmra.mrb[44].mxu0 %vm932_vm0, %v5390_v49  ;;  %5252 = vmatmul.mubr.msk.bf16.gmra.mrb[44].mxu1 %vm932_vm0, %v5391_v50 }
  0x67   :  { %5127 = vmatprep.mubr.msk.bf16.mxu0 %vm932_vm0, %v5392_v51  ;;  %5255 = vmatprep.mubr.msk.bf16.mxu1 %vm932_vm0, %v5393_v52  ;;  %v5454_v51 = vld [vmem:[%s7033_s0 + $0x1b8] sm:$0xff]  }
  0x68   :  { %v5455_v52 = vld [vmem:[%s7033_s0 + $0x3b8] sm:$0xff]  }
  0x6e   :  { %5128 = vmatmul.mubr.msk.bf16.gmra.mrb[48].mxu0 %vm932_vm0, %v5394_v53  ;;  %5256 = vmatmul.mubr.msk.bf16.gmra.mrb[48].mxu1 %vm932_vm0, %v5395_v54 }
  0x6f   :  { %5131 = vmatprep.mubr.msk.bf16.mxu0 %vm932_vm0, %v5396_v55  ;;  %5259 = vmatprep.mubr.msk.bf16.mxu1 %vm932_vm0, %v5397_v56 }
  0x76   :  { %5132 = vmatmul.mubr.msk.bf16.gmra.mrb[52].mxu0 %vm932_vm0, %v5398_v57  ;;  %5260 = vmatmul.mubr.msk.bf16.gmra.mrb[52].mxu1 %vm932_vm0, %v5399_v58  ;;  %v5456_v57 = vld [vmem:[%s7033_s0 + $0x1c0] sm:$0xff]  }
  0x77   :  { %5135 = vmatprep.mubr.msk.bf16.mxu0 %vm932_vm0, %v5400_v59  ;;  %5263 = vmatprep.mubr.msk.bf16.mxu1 %vm932_vm0, %v5401_v60  ;;  %v5457_v58 = vld [vmem:[%s7033_s0 + $0x3c0] sm:$0xff]  }
  0x7e   :  { %5136 = vmatmul.mubr.msk.bf16.gmra.mrb[56].mxu0 %vm932_vm0, %v5402_v61  ;;  %5264 = vmatmul.mubr.msk.bf16.gmra.mrb[56].mxu1 %vm932_vm0, %v5403_v62 }
  0x7f   :  { %5139 = vmatprep.mubr.msk.bf16.mxu0 %vm932_vm0, %v5404_v63  ;;  %5267 = vmatprep.mubr.msk.bf16.mxu1 %vm932_vm0, %v5405_v0 }
  0x86   :  { %5140 = vmatmul.mubr.msk.bf16.gmra.mrb[60].mxu0 %vm932_vm0, %v5406_v1  ;;  %5268 = vmatmul.mubr.msk.bf16.gmra.mrb[60].mxu1 %vm932_vm0, %v5407_v2 }
  0x87   :  { %5143 = vmatprep.mubr.msk.bf16.mxu0 %vm932_vm0, %v5408_v3  ;;  %5271 = vmatprep.mubr.msk.bf16.mxu1 %vm932_vm0, %v5409_v4 }
  0x8e   :  { %5144 = vmatmul.mubr.msk.bf16.gmra.mrb[64].mxu0 %vm932_vm0, %v5410_v5  ;;  %5272 = vmatmul.mubr.msk.bf16.gmra.mrb[64].mxu1 %vm932_vm0, %v5411_v6 }
  0x8f   :  { %5147 = vmatprep.mubr.msk.bf16.mxu0 %vm932_vm0, %v5412_v7  ;;  %5275 = vmatprep.mubr.msk.bf16.mxu1 %vm932_vm0, %v5413_v8 }
  0x96   :  { %5148 = vmatmul.mubr.msk.bf16.gmra.mrb[68].mxu0 %vm932_vm0, %v5414_v9  ;;  %5276 = vmatmul.mubr.msk.bf16.gmra.mrb[68].mxu1 %vm932_vm0, %v5415_v10 }
  0x97   :  { %5151 = vmatprep.mubr.msk.bf16.mxu0 %vm932_vm0, %v5416_v11  ;;  %5279 = vmatprep.mubr.msk.bf16.mxu1 %vm932_vm0, %v5417_v12 }
  0x9e   :  { %5152 = vmatmul.mubr.msk.bf16.gmra.mrb[72].mxu0 %vm932_vm0, %v5418_v13  ;;  %5280 = vmatmul.mubr.msk.bf16.gmra.mrb[72].mxu1 %vm932_vm0, %v5419_v14 }
  0x9f   :  { %5155 = vmatprep.mubr.msk.bf16.mxu0 %vm932_vm0, %v5420_v15  ;;  %5283 = vmatprep.mubr.msk.bf16.mxu1 %vm932_vm0, %v5421_v16 }
  0xa6   :  { %5156 = vmatmul.mubr.msk.bf16.gmra.mrb[76].mxu0 %vm932_vm0, %v5422_v17  ;;  %5284 = vmatmul.mubr.msk.bf16.gmra.mrb[76].mxu1 %vm932_vm0, %v5423_v18 }
  0xa7   :  { %5159 = vmatprep.mubr.msk.bf16.mxu0 %vm932_vm0, %v5424_v19  ;;  %5287 = vmatprep.mubr.msk.bf16.mxu1 %vm932_vm0, %v5425_v20 }
  0xae   :  { %5160 = vmatmul.mubr.msk.bf16.gmra.mrb[80].mxu0 %vm932_vm0, %v5426_v21  ;;  %5288 = vmatmul.mubr.msk.bf16.gmra.mrb[80].mxu1 %vm932_vm0, %v5427_v22 }
  0xaf   :  { %5163 = vmatprep.mubr.msk.bf16.mxu0 %vm932_vm0, %v5428_v23  ;;  %5291 = vmatprep.mubr.msk.bf16.mxu1 %vm932_vm0, %v5429_v24  ;;  %v5458_v23 = vld [vmem:[%s7033_s0 + $0x1c8] sm:$0xff]  }
  0xb0   :  { %v5459_v24 = vld [vmem:[%s7033_s0 + $0x3c8] sm:$0xff]  }
  0xb6   :  { %5164 = vmatmul.mubr.msk.bf16.gmra.mrb[84].mxu0 %vm932_vm0, %v5430_v25  ;;  %5292 = vmatmul.mubr.msk.bf16.gmra.mrb[84].mxu1 %vm932_vm0, %v5431_v26 }
  0xb7   :  { %5167 = vmatprep.mubr.msk.bf16.mxu0 %vm932_vm0, %v5432_v27  ;;  %5295 = vmatprep.mubr.msk.bf16.mxu1 %vm932_vm0, %v5433_v28 }
  0xbe   :  { %5168 = vmatmul.mubr.msk.bf16.gmra.mrb[88].mxu0 %vm932_vm0, %v5434_v29  ;;  %5296 = vmatmul.mubr.msk.bf16.gmra.mrb[88].mxu1 %vm932_vm0, %v5435_v30  ;;  %v5460_v29 = vld [vmem:[%s7033_s0 + $0x1d0] sm:$0xff]  }
  0xbf   :  { %5171 = vmatprep.mubr.msk.bf16.mxu0 %vm932_vm0, %v5436_v31  ;;  %5299 = vmatprep.mubr.msk.bf16.mxu1 %vm932_vm0, %v5437_v32  ;;  %v5461_v30 = vld [vmem:[%s7033_s0 + $0x3d0] sm:$0xff]  }
  0xc6   :  { %5172 = vmatmul.mubr.msk.bf16.gmra.mrb[92].mxu0 %vm932_vm0, %v5438_v33  ;;  %5300 = vmatmul.mubr.msk.bf16.gmra.mrb[92].mxu1 %vm932_vm0, %v5439_v34 }
  0xc7   :  { %5175 = vmatprep.mubr.msk.bf16.mxu0 %vm932_vm0, %v5440_v35  ;;  %5303 = vmatprep.mubr.msk.bf16.mxu1 %vm932_vm0, %v5441_v36 }
  0xce   :  { %5176 = vmatmul.mubr.msk.bf16.gmra.mrb[96].mxu0 %vm932_vm0, %v5442_v37  ;;  %5304 = vmatmul.mubr.msk.bf16.gmra.mrb[96].mxu1 %vm932_vm0, %v5443_v38 }
  0xcf   :  { %5179 = vmatprep.mubr.msk.bf16.mxu0 %vm932_vm0, %v5444_v39  ;;  %5307 = vmatprep.mubr.msk.bf16.mxu1 %vm932_vm0, %v5445_v40 }
  0xd6   :  { %5180 = vmatmul.mubr.msk.bf16.gmra.mrb[100].mxu0 %vm932_vm0, %v5446_v41  ;;  %5308 = vmatmul.mubr.msk.bf16.gmra.mrb[100].mxu1 %vm932_vm0, %v5447_v42 }
  0xd7   :  { %5183 = vmatprep.mubr.msk.bf16.mxu0 %vm932_vm0, %v5448_v43  ;;  %5311 = vmatprep.mubr.msk.bf16.mxu1 %vm932_vm0, %v5449_v44 }
  0xde   :  { %5184 = vmatmul.mubr.msk.bf16.gmra.mrb[104].mxu0 %vm932_vm0, %v5450_v45  ;;  %5312 = vmatmul.mubr.msk.bf16.gmra.mrb[104].mxu1 %vm932_vm0, %v5451_v46 }
  0xdf   :  { %5187 = vmatprep.mubr.msk.bf16.mxu0 %vm932_vm0, %v5452_v47  ;;  %5315 = vmatprep.mubr.msk.bf16.mxu1 %vm932_vm0, %v5453_v48 }
  0xe1   :  { %v5081_v49 = vpop.f32.mrb[0].mxu0  ;;  %v5209_v50 = vpop.f32.mrb[0].mxu1 }
  0xe2   :  { %v2376_v53 = vmul.f32 0.2, %v5081_v49  ;;  %v2504_v54 = vmul.f32 0.2, %v5209_v50  ;;  %v1351_v55 = vpop.f32.mrb[1].mxu0  ;;  %v1863_v56 = vpop.f32.mrb[1].mxu1 }
  0xe3   :  { %v2374_v59 = vmul.f32 0.2, %v1351_v55  ;;  %v2502_v60 = vmul.f32 0.2, %v1863_v56  ;;  %v5082_v61 = vpop.f32.mrb[2].mxu0  ;;  %v5210_v62 = vpop.f32.mrb[2].mxu1 }
  0xe4   :  { %v2632_v63 = vmax.f32 %v5081_v49, %v2376_v53  ;;  %v2760_v0 = vmax.f32 %v5209_v50, %v2504_v54  ;;  %v2377_v1 = vmul.f32 0.2, %v5082_v61  ;;  %v2505_v2 = vmul.f32 0.2, %v5210_v62  ;;  %v1354_v3 = vpop.f32.mrb[3].mxu0  ;;  %v1866_v4 = vpop.f32.mrb[3].mxu1 }
  0xe5   :  { %v2630_v5 = vmax.f32 %v1351_v55, %v2374_v59  ;;  %v2758_v6 = vmax.f32 %v1863_v56, %v2502_v60  ;;  %v2375_v7 = vmul.f32 0.2, %v1354_v3  ;;  %v2503_v8 = vmul.f32 0.2, %v1866_v4  ;;  %v5462_v59 = vld [vmem:[%s7033_s0 + $0x1d8] sm:$0xff]  }
  0xe6   :  { %v4688_v9 = vpack.c.bf16 %v2632_v63, %v2632_v63  ;;  %v4816_v10 = vpack.c.bf16 %v2760_v0, %v2760_v0  ;;  %v2633_v11 = vmax.f32 %v5082_v61, %v2377_v1  ;;  %v2761_v12 = vmax.f32 %v5210_v62, %v2505_v2  ;;  %5188 = vmatmul.mubr.msk.bf16.gmra.mrb[108].mxu0 %vm932_vm0, %v5454_v51  ;;  %v5463_v60 = vld [vmem:[%s7033_s0 + $0x3d8] sm:$0xff]   ;;  %v5464_v1 = vld [vmem:[%s7033_s0 + $0x1e0] sm:$0xff]  }
  0xe7   :  { %v4686_v13 = vpack.c.bf16 %v2630_v5, %v2630_v5  ;;  %v4814_v14 = vpack.c.bf16 %v2758_v6, %v2758_v6  ;;  %v2631_v15 = vmax.f32 %v1354_v3, %v2375_v7  ;;  %v2759_v16 = vmax.f32 %v1866_v4, %v2503_v8  ;;  %5316 = vmatmul.mubr.msk.bf16.gmra.mrb[108].mxu1 %vm932_vm0, %v5455_v52  ;;  %v5465_v2 = vld [vmem:[%s7033_s0 + $0x3e0] sm:$0xff]  }
  0xe8   :  { %3913 = vst.msk [vmem:[%s7034_s2 + $0x8] sm:$0xf] %vm3910_vm1, %v4688_v9  ;;  %4041 = vst.msk [vmem:[%s7034_s2 + $0x208] sm:$0xf] %vm3910_vm1, %v4816_v10  ;;  %v4689_v17 = vpack.c.bf16 %v2633_v11, %v2633_v11  ;;  %v4817_v18 = vpack.c.bf16 %v2761_v12, %v2761_v12  ;;  %5191 = vmatprep.mubr.msk.bf16.mxu0 %vm932_vm0, %v5456_v57  ;;  %5319 = vmatprep.mubr.msk.bf16.mxu1 %vm932_vm0, %v5457_v58 }
  0xe9   :  { %3911 = vst.msk [vmem:[%s7034_s2] sm:$0xf] %vm3910_vm1, %v4686_v13  ;;  %4039 = vst.msk [vmem:[%s7034_s2 + $0x200] sm:$0xf] %vm3910_vm1, %v4814_v14  ;;  %v4687_v19 = vpack.c.bf16 %v2631_v15, %v2631_v15  ;;  %v4815_v20 = vpack.c.bf16 %v2759_v16, %v2759_v16  ;;  %v5085_v21 = vpop.f32.mrb[4].mxu0  ;;  %v5213_v22 = vpop.f32.mrb[4].mxu1 }
  0xea   :  { %3914 = vst.msk [vmem:[%s7034_s2 + $0xc] sm:$0xf] %vm3910_vm1, %v4689_v17  ;;  %4042 = vst.msk [vmem:[%s7034_s2 + $0x20c] sm:$0xf] %vm3910_vm1, %v4817_v18  ;;  %v2380_v25 = vmul.f32 0.2, %v5085_v21 }
  0xeb   :  { %v2508_v26 = vmul.f32 0.2, %v5213_v22  ;;  %v1367_v27 = vpop.f32.mrb[5].mxu0  ;;  %v1879_v28 = vpop.f32.mrb[5].mxu1  ;;  %3912 = vst.msk [vmem:[%s7034_s2 + $0x4] sm:$0xf] %vm3910_vm1, %v4687_v19 }
  0xec   :  { %4040 = vst.msk [vmem:[%s7034_s2 + $0x204] sm:$0xf] %vm3910_vm1, %v4815_v20  ;;  %v2378_v31 = vmul.f32 0.2, %v1367_v27  ;;  %v2506_v32 = vmul.f32 0.2, %v1879_v28  ;;  %v2636_v35 = vmax.f32 %v5085_v21, %v2380_v25 }
  0xed   :  { %v5086_v33 = vpop.f32.mrb[6].mxu0  ;;  %v5214_v34 = vpop.f32.mrb[6].mxu1  ;;  %v2764_v36 = vmax.f32 %v5213_v22, %v2508_v26 }
  0xee   :  { %v2381_v37 = vmul.f32 0.2, %v5086_v33  ;;  %v2509_v38 = vmul.f32 0.2, %v5214_v34  ;;  %v1370_v39 = vpop.f32.mrb[7].mxu0  ;;  %v1882_v40 = vpop.f32.mrb[7].mxu1  ;;  %v2634_v41 = vmax.f32 %v1367_v27, %v2378_v31  ;;  %v2762_v42 = vmax.f32 %v1879_v28, %v2506_v32  ;;  %5192 = vmatmul.mubr.msk.bf16.gmra.mrb[112].mxu0 %vm932_vm0, %v5458_v23 }
  0xef   :  { %v2379_v43 = vmul.f32 0.2, %v1370_v39  ;;  %v2507_v44 = vmul.f32 0.2, %v1882_v40  ;;  %v4692_v45 = vpack.c.bf16 %v2636_v35, %v2636_v35  ;;  %v4820_v46 = vpack.c.bf16 %v2764_v36, %v2764_v36  ;;  %5320 = vmatmul.mubr.msk.bf16.gmra.mrb[112].mxu1 %vm932_vm0, %v5459_v24  ;;  %5195 = vmatprep.mubr.msk.bf16.mxu0 %vm932_vm0, %v5460_v29  ;;  %v5466_v31 = vld [vmem:[%s7033_s0 + $0x1e8] sm:$0xff]  }
  0xf0   :  { %v2637_v47 = vmax.f32 %v5086_v33, %v2381_v37  ;;  %v2765_v48 = vmax.f32 %v5214_v34, %v2509_v38  ;;  %v4690_v49 = vpack.c.bf16 %v2634_v41, %v2634_v41  ;;  %v4818_v50 = vpack.c.bf16 %v2762_v42, %v2762_v42  ;;  %5323 = vmatprep.mubr.msk.bf16.mxu1 %vm932_vm0, %v5461_v30  ;;  %v5467_v32 = vld [vmem:[%s7033_s0 + $0x3e8] sm:$0xff]   ;;  %v5468_v37 = vld [vmem:[%s7033_s0 + $0x1f0] sm:$0xff]  }
  0xf1   :  { %v2635_v51 = vmax.f32 %v1370_v39, %v2379_v43  ;;  %v2763_v52 = vmax.f32 %v1882_v40, %v2507_v44  ;;  %3917 = vst.msk [vmem:[%s7034_s2 + $0x18] sm:$0xf] %vm3910_vm1, %v4692_v45  ;;  %4045 = vst.msk [vmem:[%s7034_s2 + $0x218] sm:$0xf] %vm3910_vm1, %v4820_v46  ;;  %v5089_v57 = vpop.f32.mrb[8].mxu0  ;;  %v5217_v58 = vpop.f32.mrb[8].mxu1 }
  0xf2   :  { %v4693_v53 = vpack.c.bf16 %v2637_v47, %v2637_v47  ;;  %v4821_v54 = vpack.c.bf16 %v2765_v48, %v2765_v48  ;;  %3915 = vst.msk [vmem:[%s7034_s2 + $0x10] sm:$0xf] %vm3910_vm1, %v4690_v49  ;;  %4043 = vst.msk [vmem:[%s7034_s2 + $0x210] sm:$0xf] %vm3910_vm1, %v4818_v50  ;;  %v2384_v61 = vmul.f32 0.2, %v5089_v57 }
  0xf3   :  { %v4691_v55 = vpack.c.bf16 %v2635_v51, %v2635_v51  ;;  %v4819_v56 = vpack.c.bf16 %v2763_v52, %v2763_v52  ;;  %v2512_v62 = vmul.f32 0.2, %v5217_v58  ;;  %v1383_v63 = vpop.f32.mrb[9].mxu0  ;;  %v1895_v0 = vpop.f32.mrb[9].mxu1  ;;  %v5469_v38 = vld [vmem:[%s7033_s0 + $0x3f0] sm:$0xff]  }
  0xf4   :  { %3918 = vst.msk [vmem:[%s7034_s2 + $0x1c] sm:$0xf] %vm3910_vm1, %v4693_v53  ;;  %4046 = vst.msk [vmem:[%s7034_s2 + $0x21c] sm:$0xf] %vm3910_vm1, %v4821_v54  ;;  %v2382_v3 = vmul.f32 0.2, %v1383_v63  ;;  %v2640_v7 = vmax.f32 %v5089_v57, %v2384_v61 }
  0xf5   :  { %3916 = vst.msk [vmem:[%s7034_s2 + $0x14] sm:$0xf] %vm3910_vm1, %v4691_v55  ;;  %4044 = vst.msk [vmem:[%s7034_s2 + $0x214] sm:$0xf] %vm3910_vm1, %v4819_v56  ;;  %v2510_v4 = vmul.f32 0.2, %v1895_v0  ;;  %v2768_v8 = vmax.f32 %v5217_v58, %v2512_v62 }
  0xf6   :  { %v5090_v5 = vpop.f32.mrb[10].mxu0  ;;  %v5218_v6 = vpop.f32.mrb[10].mxu1  ;;  %v2638_v13 = vmax.f32 %v1383_v63, %v2382_v3  ;;  %v4696_v17 = vpack.c.bf16 %v2640_v7, %v2640_v7  ;;  %5196 = vmatmul.mubr.msk.bf16.gmra.mrb[116].mxu0 %vm932_vm0, %v5462_v59  ;;  %v5470_v3 = vld [vmem:[%s7033_s0 + $0x1f8] sm:$0xff]  }
  0xf7   :  { %v2385_v9 = vmul.f32 0.2, %v5090_v5  ;;  %v2513_v10 = vmul.f32 0.2, %v5218_v6  ;;  %v1386_v11 = vpop.f32.mrb[11].mxu0  ;;  %v1898_v12 = vpop.f32.mrb[11].mxu1  ;;  %v2766_v14 = vmax.f32 %v1895_v0, %v2510_v4  ;;  %v4824_v18 = vpack.c.bf16 %v2768_v8, %v2768_v8  ;;  %5324 = vmatmul.mubr.msk.bf16.gmra.mrb[116].mxu1 %vm932_vm0, %v5463_v60  ;;  %5199 = vmatprep.mubr.msk.bf16.mxu0 %vm932_vm0, %v5464_v1 }
  0xf8   :  { %v2383_v15 = vmul.f32 0.2, %v1386_v11  ;;  %v2511_v16 = vmul.f32 0.2, %v1898_v12  ;;  %v4694_v21 = vpack.c.bf16 %v2638_v13, %v2638_v13  ;;  %3921 = vst.msk [vmem:[%s7034_s2 + $0x28] sm:$0xf] %vm3910_vm1, %v4696_v17  ;;  %5327 = vmatprep.mubr.msk.bf16.mxu1 %vm932_vm0, %v5465_v2 }
  0xf9   :  { %v2641_v19 = vmax.f32 %v5090_v5, %v2385_v9  ;;  %v2769_v20 = vmax.f32 %v5218_v6, %v2513_v10  ;;  %v4822_v22 = vpack.c.bf16 %v2766_v14, %v2766_v14  ;;  %4049 = vst.msk [vmem:[%s7034_s2 + $0x228] sm:$0xf] %vm3910_vm1, %v4824_v18  ;;  %v5093_v29 = vpop.f32.mrb[12].mxu0  ;;  %v5221_v30 = vpop.f32.mrb[12].mxu1  ;;  %v5471_v4 = vld [vmem:[%s7033_s0 + $0x3f8] sm:$0xff]  }
  0xfa   :  { %v2639_v23 = vmax.f32 %v1386_v11, %v2383_v15  ;;  %v2767_v24 = vmax.f32 %v1898_v12, %v2511_v16  ;;  %3919 = vst.msk [vmem:[%s7034_s2 + $0x20] sm:$0xf] %vm3910_vm1, %v4694_v21  ;;  %v2388_v33 = vmul.f32 0.2, %v5093_v29  ;;  %v2516_v34 = vmul.f32 0.2, %v5221_v30 }
  0xfb   :  { %v4697_v25 = vpack.c.bf16 %v2641_v19, %v2641_v19  ;;  %v4825_v26 = vpack.c.bf16 %v2769_v20, %v2769_v20  ;;  %4047 = vst.msk [vmem:[%s7034_s2 + $0x220] sm:$0xf] %vm3910_vm1, %v4822_v22  ;;  %v1399_v35 = vpop.f32.mrb[13].mxu0  ;;  %v1911_v36 = vpop.f32.mrb[13].mxu1 }
  0xfc   :  { %v4695_v27 = vpack.c.bf16 %v2639_v23, %v2639_v23  ;;  %v4823_v28 = vpack.c.bf16 %v2767_v24, %v2767_v24  ;;  %v2386_v39 = vmul.f32 0.2, %v1399_v35  ;;  %v2514_v40 = vmul.f32 0.2, %v1911_v36  ;;  %v5094_v41 = vpop.f32.mrb[14].mxu0  ;;  %v5222_v42 = vpop.f32.mrb[14].mxu1 }
  0xfd   :  { %3922 = vst.msk [vmem:[%s7034_s2 + $0x2c] sm:$0xf] %vm3910_vm1, %v4697_v25  ;;  %4050 = vst.msk [vmem:[%s7034_s2 + $0x22c] sm:$0xf] %vm3910_vm1, %v4825_v26  ;;  %v2644_v43 = vmax.f32 %v5093_v29, %v2388_v33  ;;  %v2772_v44 = vmax.f32 %v5221_v30, %v2516_v34  ;;  %v2389_v45 = vmul.f32 0.2, %v5094_v41 }
  0xfe   :  { %3920 = vst.msk [vmem:[%s7034_s2 + $0x24] sm:$0xf] %vm3910_vm1, %v4695_v27  ;;  %4048 = vst.msk [vmem:[%s7034_s2 + $0x224] sm:$0xf] %vm3910_vm1, %v4823_v28  ;;  %v2517_v46 = vmul.f32 0.2, %v5222_v42  ;;  %v2642_v49 = vmax.f32 %v1399_v35, %v2386_v39  ;;  %v2770_v50 = vmax.f32 %v1911_v36, %v2514_v40  ;;  %5200 = vmatmul.mubr.msk.bf16.gmra.mrb[120].mxu0 %vm932_vm0, %v5466_v31 }
  0xff   :  { %v1402_v47 = vpop.f32.mrb[15].mxu0  ;;  %v1914_v48 = vpop.f32.mrb[15].mxu1  ;;  %v4700_v53 = vpack.c.bf16 %v2644_v43, %v2644_v43  ;;  %v4828_v54 = vpack.c.bf16 %v2772_v44, %v2772_v44  ;;  %v2645_v55 = vmax.f32 %v5094_v41, %v2389_v45  ;;  %5328 = vmatmul.mubr.msk.bf16.gmra.mrb[120].mxu1 %vm932_vm0, %v5467_v32  ;;  %5203 = vmatprep.mubr.msk.bf16.mxu0 %vm932_vm0, %v5468_v37 }
 0x100   :  { %v2387_v51 = vmul.f32 0.2, %v1402_v47  ;;  %v2515_v52 = vmul.f32 0.2, %v1914_v48  ;;  %v2773_v56 = vmax.f32 %v5222_v42, %v2517_v46  ;;  %v4698_v57 = vpack.c.bf16 %v2642_v49, %v2642_v49  ;;  %5331 = vmatprep.mubr.msk.bf16.mxu1 %vm932_vm0, %v5469_v38 }
 0x101   :  { %v4826_v58 = vpack.c.bf16 %v2770_v50, %v2770_v50  ;;  %3925 = vst.msk [vmem:[%s7034_s2 + $0x38] sm:$0xf] %vm3910_vm1, %v4700_v53  ;;  %4053 = vst.msk [vmem:[%s7034_s2 + $0x238] sm:$0xf] %vm3910_vm1, %v4828_v54  ;;  %v4701_v61 = vpack.c.bf16 %v2645_v55, %v2645_v55  ;;  %v5097_v1 = vpop.f32.mrb[16].mxu0  ;;  %v5225_v2 = vpop.f32.mrb[16].mxu1 }
 0x102   :  { %v2643_v59 = vmax.f32 %v1402_v47, %v2387_v51  ;;  %v2771_v60 = vmax.f32 %v1914_v48, %v2515_v52  ;;  %v4829_v62 = vpack.c.bf16 %v2773_v56, %v2773_v56  ;;  %3923 = vst.msk [vmem:[%s7034_s2 + $0x30] sm:$0xf] %vm3910_vm1, %v4698_v57  ;;  %v2392_v5 = vmul.f32 0.2, %v5097_v1  ;;  %v1415_v7 = vpop.f32.mrb[17].mxu0  ;;  %v1927_v8 = vpop.f32.mrb[17].mxu1 }
 0x103   :  { %4051 = vst.msk [vmem:[%s7034_s2 + $0x230] sm:$0xf] %vm3910_vm1, %v4826_v58  ;;  %3926 = vst.msk [vmem:[%s7034_s2 + $0x3c] sm:$0xf] %vm3910_vm1, %v4701_v61  ;;  %v2520_v6 = vmul.f32 0.2, %v5225_v2 }
 0x104   :  { %v4699_v63 = vpack.c.bf16 %v2643_v59, %v2643_v59  ;;  %v4827_v0 = vpack.c.bf16 %v2771_v60, %v2771_v60  ;;  %4054 = vst.msk [vmem:[%s7034_s2 + $0x23c] sm:$0xf] %vm3910_vm1, %v4829_v62  ;;  %v2390_v9 = vmul.f32 0.2, %v1415_v7  ;;  %v2518_v10 = vmul.f32 0.2, %v1927_v8 }
 0x105   :  { %v5098_v11 = vpop.f32.mrb[18].mxu0  ;;  %v5226_v12 = vpop.f32.mrb[18].mxu1  ;;  %v2648_v13 = vmax.f32 %v5097_v1, %v2392_v5  ;;  %v2776_v14 = vmax.f32 %v5225_v2, %v2520_v6 }
 0x106   :  { %3924 = vst.msk [vmem:[%s7034_s2 + $0x34] sm:$0xf] %vm3910_vm1, %v4699_v63  ;;  %4052 = vst.msk [vmem:[%s7034_s2 + $0x234] sm:$0xf] %vm3910_vm1, %v4827_v0  ;;  %v2393_v15 = vmul.f32 0.2, %v5098_v11  ;;  %v2646_v19 = vmax.f32 %v1415_v7, %v2390_v9  ;;  %v2774_v20 = vmax.f32 %v1927_v8, %v2518_v10  ;;  %5204 = vmatmul.mubr.msk.bf16.gmra.mrb[124].mxu0 %vm932_vm0, %v5470_v3 }
 0x107   :  { %v2521_v16 = vmul.f32 0.2, %v5226_v12  ;;  %v1418_v17 = vpop.f32.mrb[19].mxu0  ;;  %v1930_v18 = vpop.f32.mrb[19].mxu1  ;;  %v4704_v23 = vpack.c.bf16 %v2648_v13, %v2648_v13  ;;  %v4832_v24 = vpack.c.bf16 %v2776_v14, %v2776_v14  ;;  %5332 = vmatmul.mubr.msk.bf16.gmra.mrb[124].mxu1 %vm932_vm0, %v5471_v4 }
 0x108   :  { %v2391_v21 = vmul.f32 0.2, %v1418_v17  ;;  %v2519_v22 = vmul.f32 0.2, %v1930_v18  ;;  %v2649_v25 = vmax.f32 %v5098_v11, %v2393_v15  ;;  %v4702_v27 = vpack.c.bf16 %v2646_v19, %v2646_v19 }
 0x109   :  { %v2777_v26 = vmax.f32 %v5226_v12, %v2521_v16  ;;  %v4830_v28 = vpack.c.bf16 %v2774_v20, %v2774_v20  ;;  %3929 = vst.msk [vmem:[%s7034_s2 + $0x48] sm:$0xf] %vm3910_vm1, %v4704_v23  ;;  %4057 = vst.msk [vmem:[%s7034_s2 + $0x248] sm:$0xf] %vm3910_vm1, %v4832_v24  ;;  %v5101_v35 = vpop.f32.mrb[20].mxu0  ;;  %v5229_v36 = vpop.f32.mrb[20].mxu1 }
 0x10a   :  { %v2647_v29 = vmax.f32 %v1418_v17, %v2391_v21  ;;  %v2775_v30 = vmax.f32 %v1930_v18, %v2519_v22  ;;  %v4705_v31 = vpack.c.bf16 %v2649_v25, %v2649_v25  ;;  %3927 = vst.msk [vmem:[%s7034_s2 + $0x40] sm:$0xf] %vm3910_vm1, %v4702_v27  ;;  %v2396_v37 = vmul.f32 0.2, %v5101_v35  ;;  %v1431_v39 = vpop.f32.mrb[21].mxu0  ;;  %v1943_v40 = vpop.f32.mrb[21].mxu1 }
 0x10b   :  { %v4833_v32 = vpack.c.bf16 %v2777_v26, %v2777_v26  ;;  %4055 = vst.msk [vmem:[%s7034_s2 + $0x240] sm:$0xf] %vm3910_vm1, %v4830_v28  ;;  %v2524_v38 = vmul.f32 0.2, %v5229_v36  ;;  %v2394_v41 = vmul.f32 0.2, %v1431_v39 }
 0x10c   :  { %v4703_v33 = vpack.c.bf16 %v2647_v29, %v2647_v29  ;;  %v4831_v34 = vpack.c.bf16 %v2775_v30, %v2775_v30  ;;  %3930 = vst.msk [vmem:[%s7034_s2 + $0x4c] sm:$0xf] %vm3910_vm1, %v4705_v31  ;;  %v2522_v42 = vmul.f32 0.2, %v1943_v40  ;;  %v5102_v43 = vpop.f32.mrb[22].mxu0  ;;  %v5230_v44 = vpop.f32.mrb[22].mxu1  ;;  %v2652_v45 = vmax.f32 %v5101_v35, %v2396_v37 }
 0x10d   :  { %4058 = vst.msk [vmem:[%s7034_s2 + $0x24c] sm:$0xf] %vm3910_vm1, %v4833_v32  ;;  %v2780_v46 = vmax.f32 %v5229_v36, %v2524_v38  ;;  %v2397_v47 = vmul.f32 0.2, %v5102_v43  ;;  %v2525_v48 = vmul.f32 0.2, %v5230_v44  ;;  %v2650_v51 = vmax.f32 %v1431_v39, %v2394_v41 }
 0x10e   :  { %3928 = vst.msk [vmem:[%s7034_s2 + $0x44] sm:$0xf] %vm3910_vm1, %v4703_v33  ;;  %4056 = vst.msk [vmem:[%s7034_s2 + $0x244] sm:$0xf] %vm3910_vm1, %v4831_v34  ;;  %v1434_v49 = vpop.f32.mrb[23].mxu0  ;;  %v1946_v50 = vpop.f32.mrb[23].mxu1  ;;  %v2778_v52 = vmax.f32 %v1943_v40, %v2522_v42  ;;  %v4708_v55 = vpack.c.bf16 %v2652_v45, %v2652_v45 }
 0x10f   :  { %v2395_v53 = vmul.f32 0.2, %v1434_v49  ;;  %v2523_v54 = vmul.f32 0.2, %v1946_v50  ;;  %v4836_v56 = vpack.c.bf16 %v2780_v46, %v2780_v46  ;;  %v2653_v57 = vmax.f32 %v5102_v43, %v2397_v47 }
 0x110   :  { %v2781_v58 = vmax.f32 %v5230_v44, %v2525_v48  ;;  %v4706_v59 = vpack.c.bf16 %v2650_v51, %v2650_v51  ;;  %v4834_v60 = vpack.c.bf16 %v2778_v52, %v2778_v52  ;;  %3933 = vst.msk [vmem:[%s7034_s2 + $0x58] sm:$0xf] %vm3910_vm1, %v4708_v55 }
 0x111   :  { %v2651_v61 = vmax.f32 %v1434_v49, %v2395_v53  ;;  %v2779_v62 = vmax.f32 %v1946_v50, %v2523_v54  ;;  %4061 = vst.msk [vmem:[%s7034_s2 + $0x258] sm:$0xf] %vm3910_vm1, %v4836_v56  ;;  %v4709_v63 = vpack.c.bf16 %v2653_v57, %v2653_v57  ;;  %v5105_v3 = vpop.f32.mrb[24].mxu0  ;;  %v5233_v4 = vpop.f32.mrb[24].mxu1 }
 0x112   :  { %v4837_v0 = vpack.c.bf16 %v2781_v58, %v2781_v58  ;;  %3931 = vst.msk [vmem:[%s7034_s2 + $0x50] sm:$0xf] %vm3910_vm1, %v4706_v59  ;;  %4059 = vst.msk [vmem:[%s7034_s2 + $0x250] sm:$0xf] %vm3910_vm1, %v4834_v60  ;;  %v2400_v5 = vmul.f32 0.2, %v5105_v3 }
 0x113   :  { %v4707_v1 = vpack.c.bf16 %v2651_v61, %v2651_v61  ;;  %v4835_v2 = vpack.c.bf16 %v2779_v62, %v2779_v62  ;;  %3934 = vst.msk [vmem:[%s7034_s2 + $0x5c] sm:$0xf] %vm3910_vm1, %v4709_v63  ;;  %v2528_v6 = vmul.f32 0.2, %v5233_v4  ;;  %v1447_v7 = vpop.f32.mrb[25].mxu0  ;;  %v1959_v8 = vpop.f32.mrb[25].mxu1 }
 0x114   :  { %4062 = vst.msk [vmem:[%s7034_s2 + $0x25c] sm:$0xf] %vm3910_vm1, %v4837_v0  ;;  %v2398_v9 = vmul.f32 0.2, %v1447_v7  ;;  %v2526_v10 = vmul.f32 0.2, %v1959_v8  ;;  %v2656_v13 = vmax.f32 %v5105_v3, %v2400_v5 }
 0x115   :  { %3932 = vst.msk [vmem:[%s7034_s2 + $0x54] sm:$0xf] %vm3910_vm1, %v4707_v1  ;;  %4060 = vst.msk [vmem:[%s7034_s2 + $0x254] sm:$0xf] %vm3910_vm1, %v4835_v2  ;;  %v5106_v11 = vpop.f32.mrb[26].mxu0  ;;  %v5234_v12 = vpop.f32.mrb[26].mxu1  ;;  %v2784_v14 = vmax.f32 %v5233_v4, %v2528_v6 }
 0x116   :  { %v2401_v15 = vmul.f32 0.2, %v5106_v11  ;;  %v2529_v16 = vmul.f32 0.2, %v5234_v12  ;;  %v1450_v17 = vpop.f32.mrb[27].mxu0  ;;  %v1962_v18 = vpop.f32.mrb[27].mxu1  ;;  %v2654_v19 = vmax.f32 %v1447_v7, %v2398_v9  ;;  %v2782_v20 = vmax.f32 %v1959_v8, %v2526_v10 }
 0x117   :  { %v2399_v21 = vmul.f32 0.2, %v1450_v17  ;;  %v2527_v22 = vmul.f32 0.2, %v1962_v18  ;;  %v4712_v23 = vpack.c.bf16 %v2656_v13, %v2656_v13  ;;  %v4840_v24 = vpack.c.bf16 %v2784_v14, %v2784_v14 }
 0x118   :  { %v2657_v25 = vmax.f32 %v5106_v11, %v2401_v15  ;;  %v2785_v26 = vmax.f32 %v5234_v12, %v2529_v16  ;;  %v4710_v27 = vpack.c.bf16 %v2654_v19, %v2654_v19  ;;  %v4838_v28 = vpack.c.bf16 %v2782_v20, %v2782_v20 }
 0x119   :  { %v2655_v29 = vmax.f32 %v1450_v17, %v2399_v21  ;;  %v2783_v30 = vmax.f32 %v1962_v18, %v2527_v22  ;;  %3937 = vst.msk [vmem:[%s7034_s2 + $0x68] sm:$0xf] %vm3910_vm1, %v4712_v23  ;;  %4065 = vst.msk [vmem:[%s7034_s2 + $0x268] sm:$0xf] %vm3910_vm1, %v4840_v24  ;;  %v5109_v35 = vpop.f32.mrb[28].mxu0  ;;  %v5237_v36 = vpop.f32.mrb[28].mxu1 }
 0x11a   :  { %v4713_v31 = vpack.c.bf16 %v2657_v25, %v2657_v25  ;;  %v4841_v32 = vpack.c.bf16 %v2785_v26, %v2785_v26  ;;  %3935 = vst.msk [vmem:[%s7034_s2 + $0x60] sm:$0xf] %vm3910_vm1, %v4710_v27  ;;  %4063 = vst.msk [vmem:[%s7034_s2 + $0x260] sm:$0xf] %vm3910_vm1, %v4838_v28  ;;  %v2404_v37 = vmul.f32 0.2, %v5109_v35 }
 0x11b   :  { %v4711_v33 = vpack.c.bf16 %v2655_v29, %v2655_v29  ;;  %v4839_v34 = vpack.c.bf16 %v2783_v30, %v2783_v30  ;;  %v2532_v38 = vmul.f32 0.2, %v5237_v36  ;;  %v1463_v39 = vpop.f32.mrb[29].mxu0  ;;  %v1975_v40 = vpop.f32.mrb[29].mxu1 }
 0x11c   :  { %3938 = vst.msk [vmem:[%s7034_s2 + $0x6c] sm:$0xf] %vm3910_vm1, %v4713_v31  ;;  %4066 = vst.msk [vmem:[%s7034_s2 + $0x26c] sm:$0xf] %vm3910_vm1, %v4841_v32  ;;  %v2402_v41 = vmul.f32 0.2, %v1463_v39  ;;  %v2660_v45 = vmax.f32 %v5109_v35, %v2404_v37 }
 0x11d   :  { %3936 = vst.msk [vmem:[%s7034_s2 + $0x64] sm:$0xf] %vm3910_vm1, %v4711_v33  ;;  %4064 = vst.msk [vmem:[%s7034_s2 + $0x264] sm:$0xf] %vm3910_vm1, %v4839_v34  ;;  %v2530_v42 = vmul.f32 0.2, %v1975_v40  ;;  %v2788_v46 = vmax.f32 %v5237_v36, %v2532_v38 }
 0x11e   :  { %v5110_v43 = vpop.f32.mrb[30].mxu0  ;;  %v5238_v44 = vpop.f32.mrb[30].mxu1  ;;  %v2658_v51 = vmax.f32 %v1463_v39, %v2402_v41  ;;  %v4716_v55 = vpack.c.bf16 %v2660_v45, %v2660_v45 }
 0x11f   :  { %v2405_v47 = vmul.f32 0.2, %v5110_v43  ;;  %v2533_v48 = vmul.f32 0.2, %v5238_v44  ;;  %v1466_v49 = vpop.f32.mrb[31].mxu0  ;;  %v1978_v50 = vpop.f32.mrb[31].mxu1  ;;  %v2786_v52 = vmax.f32 %v1975_v40, %v2530_v42  ;;  %v4844_v56 = vpack.c.bf16 %v2788_v46, %v2788_v46 }
 0x120   :  { %v2403_v53 = vmul.f32 0.2, %v1466_v49  ;;  %v2531_v54 = vmul.f32 0.2, %v1978_v50  ;;  %v4714_v59 = vpack.c.bf16 %v2658_v51, %v2658_v51  ;;  %3941 = vst.msk [vmem:[%s7034_s2 + $0x78] sm:$0xf] %vm3910_vm1, %v4716_v55 }
 0x121   :  { %v2661_v57 = vmax.f32 %v5110_v43, %v2405_v47  ;;  %v2789_v58 = vmax.f32 %v5238_v44, %v2533_v48  ;;  %v4842_v60 = vpack.c.bf16 %v2786_v52, %v2786_v52  ;;  %4069 = vst.msk [vmem:[%s7034_s2 + $0x278] sm:$0xf] %vm3910_vm1, %v4844_v56  ;;  %v5113_v3 = vpop.f32.mrb[32].mxu0  ;;  %v5241_v4 = vpop.f32.mrb[32].mxu1 }
 0x122   :  { %v2659_v61 = vmax.f32 %v1466_v49, %v2403_v53  ;;  %v2787_v62 = vmax.f32 %v1978_v50, %v2531_v54  ;;  %3939 = vst.msk [vmem:[%s7034_s2 + $0x70] sm:$0xf] %vm3910_vm1, %v4714_v59  ;;  %v2408_v5 = vmul.f32 0.2, %v5113_v3  ;;  %v2536_v6 = vmul.f32 0.2, %v5241_v4 }
 0x123   :  { %v4717_v63 = vpack.c.bf16 %v2661_v57, %v2661_v57  ;;  %v4845_v0 = vpack.c.bf16 %v2789_v58, %v2789_v58  ;;  %4067 = vst.msk [vmem:[%s7034_s2 + $0x270] sm:$0xf] %vm3910_vm1, %v4842_v60  ;;  %v1479_v7 = vpop.f32.mrb[33].mxu0  ;;  %v1991_v8 = vpop.f32.mrb[33].mxu1 }
 0x124   :  { %v4715_v1 = vpack.c.bf16 %v2659_v61, %v2659_v61  ;;  %v4843_v2 = vpack.c.bf16 %v2787_v62, %v2787_v62  ;;  %v2406_v9 = vmul.f32 0.2, %v1479_v7  ;;  %v2534_v10 = vmul.f32 0.2, %v1991_v8  ;;  %v5114_v11 = vpop.f32.mrb[34].mxu0  ;;  %v5242_v12 = vpop.f32.mrb[34].mxu1 }
 0x125   :  { %3942 = vst.msk [vmem:[%s7034_s2 + $0x7c] sm:$0xf] %vm3910_vm1, %v4717_v63  ;;  %4070 = vst.msk [vmem:[%s7034_s2 + $0x27c] sm:$0xf] %vm3910_vm1, %v4845_v0  ;;  %v2664_v13 = vmax.f32 %v5113_v3, %v2408_v5  ;;  %v2792_v14 = vmax.f32 %v5241_v4, %v2536_v6  ;;  %v2409_v15 = vmul.f32 0.2, %v5114_v11 }
 0x126   :  { %3940 = vst.msk [vmem:[%s7034_s2 + $0x74] sm:$0xf] %vm3910_vm1, %v4715_v1  ;;  %4068 = vst.msk [vmem:[%s7034_s2 + $0x274] sm:$0xf] %vm3910_vm1, %v4843_v2  ;;  %v2537_v16 = vmul.f32 0.2, %v5242_v12  ;;  %v2662_v19 = vmax.f32 %v1479_v7, %v2406_v9  ;;  %v2790_v20 = vmax.f32 %v1991_v8, %v2534_v10 }
 0x127   :  { %v1482_v17 = vpop.f32.mrb[35].mxu0  ;;  %v1994_v18 = vpop.f32.mrb[35].mxu1  ;;  %v4720_v23 = vpack.c.bf16 %v2664_v13, %v2664_v13  ;;  %v4848_v24 = vpack.c.bf16 %v2792_v14, %v2792_v14  ;;  %v2665_v25 = vmax.f32 %v5114_v11, %v2409_v15 }
 0x128   :  { %v2407_v21 = vmul.f32 0.2, %v1482_v17  ;;  %v2535_v22 = vmul.f32 0.2, %v1994_v18  ;;  %v2793_v26 = vmax.f32 %v5242_v12, %v2537_v16  ;;  %v4718_v27 = vpack.c.bf16 %v2662_v19, %v2662_v19 }
 0x129   :  { %v4846_v28 = vpack.c.bf16 %v2790_v20, %v2790_v20  ;;  %3945 = vst.msk [vmem:[%s7034_s2 + $0x88] sm:$0xf] %vm3910_vm1, %v4720_v23  ;;  %4073 = vst.msk [vmem:[%s7034_s2 + $0x288] sm:$0xf] %vm3910_vm1, %v4848_v24  ;;  %v4721_v31 = vpack.c.bf16 %v2665_v25, %v2665_v25  ;;  %v5117_v35 = vpop.f32.mrb[36].mxu0  ;;  %v5245_v36 = vpop.f32.mrb[36].mxu1 }
 0x12a   :  { %v2663_v29 = vmax.f32 %v1482_v17, %v2407_v21  ;;  %v2791_v30 = vmax.f32 %v1994_v18, %v2535_v22  ;;  %v4849_v32 = vpack.c.bf16 %v2793_v26, %v2793_v26  ;;  %3943 = vst.msk [vmem:[%s7034_s2 + $0x80] sm:$0xf] %vm3910_vm1, %v4718_v27  ;;  %v2412_v37 = vmul.f32 0.2, %v5117_v35  ;;  %v1495_v39 = vpop.f32.mrb[37].mxu0  ;;  %v2007_v40 = vpop.f32.mrb[37].mxu1 }
 0x12b   :  { %4071 = vst.msk [vmem:[%s7034_s2 + $0x280] sm:$0xf] %vm3910_vm1, %v4846_v28  ;;  %3946 = vst.msk [vmem:[%s7034_s2 + $0x8c] sm:$0xf] %vm3910_vm1, %v4721_v31  ;;  %v2540_v38 = vmul.f32 0.2, %v5245_v36 }
 0x12c   :  { %v4719_v33 = vpack.c.bf16 %v2663_v29, %v2663_v29  ;;  %v4847_v34 = vpack.c.bf16 %v2791_v30, %v2791_v30  ;;  %4074 = vst.msk [vmem:[%s7034_s2 + $0x28c] sm:$0xf] %vm3910_vm1, %v4849_v32  ;;  %v2410_v41 = vmul.f32 0.2, %v1495_v39  ;;  %v2538_v42 = vmul.f32 0.2, %v2007_v40 }
 0x12d   :  { %v5118_v43 = vpop.f32.mrb[38].mxu0  ;;  %v5246_v44 = vpop.f32.mrb[38].mxu1  ;;  %v2668_v45 = vmax.f32 %v5117_v35, %v2412_v37  ;;  %v2796_v46 = vmax.f32 %v5245_v36, %v2540_v38 }
 0x12e   :  { %3944 = vst.msk [vmem:[%s7034_s2 + $0x84] sm:$0xf] %vm3910_vm1, %v4719_v33  ;;  %4072 = vst.msk [vmem:[%s7034_s2 + $0x284] sm:$0xf] %vm3910_vm1, %v4847_v34  ;;  %v2413_v47 = vmul.f32 0.2, %v5118_v43  ;;  %v2666_v51 = vmax.f32 %v1495_v39, %v2410_v41  ;;  %v2794_v52 = vmax.f32 %v2007_v40, %v2538_v42 }
 0x12f   :  { %v2541_v48 = vmul.f32 0.2, %v5246_v44  ;;  %v1498_v49 = vpop.f32.mrb[39].mxu0  ;;  %v2010_v50 = vpop.f32.mrb[39].mxu1  ;;  %v4724_v55 = vpack.c.bf16 %v2668_v45, %v2668_v45  ;;  %v4852_v56 = vpack.c.bf16 %v2796_v46, %v2796_v46 }
 0x130   :  { %v2411_v53 = vmul.f32 0.2, %v1498_v49  ;;  %v2539_v54 = vmul.f32 0.2, %v2010_v50  ;;  %v2669_v57 = vmax.f32 %v5118_v43, %v2413_v47  ;;  %v4722_v59 = vpack.c.bf16 %v2666_v51, %v2666_v51 }
 0x131   :  { %v2797_v58 = vmax.f32 %v5246_v44, %v2541_v48  ;;  %v4850_v60 = vpack.c.bf16 %v2794_v52, %v2794_v52  ;;  %3949 = vst.msk [vmem:[%s7034_s2 + $0x98] sm:$0xf] %vm3910_vm1, %v4724_v55  ;;  %4077 = vst.msk [vmem:[%s7034_s2 + $0x298] sm:$0xf] %vm3910_vm1, %v4852_v56  ;;  %v5121_v3 = vpop.f32.mrb[40].mxu0  ;;  %v5249_v4 = vpop.f32.mrb[40].mxu1 }
 0x132   :  { %v2667_v61 = vmax.f32 %v1498_v49, %v2411_v53  ;;  %v2795_v62 = vmax.f32 %v2010_v50, %v2539_v54  ;;  %v4725_v63 = vpack.c.bf16 %v2669_v57, %v2669_v57  ;;  %3947 = vst.msk [vmem:[%s7034_s2 + $0x90] sm:$0xf] %vm3910_vm1, %v4722_v59  ;;  %v2416_v5 = vmul.f32 0.2, %v5121_v3  ;;  %v1511_v7 = vpop.f32.mrb[41].mxu0  ;;  %v2023_v8 = vpop.f32.mrb[41].mxu1 }
 0x133   :  { %v4853_v0 = vpack.c.bf16 %v2797_v58, %v2797_v58  ;;  %4075 = vst.msk [vmem:[%s7034_s2 + $0x290] sm:$0xf] %vm3910_vm1, %v4850_v60  ;;  %v2544_v6 = vmul.f32 0.2, %v5249_v4  ;;  %v2414_v9 = vmul.f32 0.2, %v1511_v7 }
 0x134   :  { %v4723_v1 = vpack.c.bf16 %v2667_v61, %v2667_v61  ;;  %v4851_v2 = vpack.c.bf16 %v2795_v62, %v2795_v62  ;;  %3950 = vst.msk [vmem:[%s7034_s2 + $0x9c] sm:$0xf] %vm3910_vm1, %v4725_v63  ;;  %v2542_v10 = vmul.f32 0.2, %v2023_v8  ;;  %v5122_v11 = vpop.f32.mrb[42].mxu0  ;;  %v5250_v12 = vpop.f32.mrb[42].mxu1  ;;  %v2672_v13 = vmax.f32 %v5121_v3, %v2416_v5 }
 0x135   :  { %4078 = vst.msk [vmem:[%s7034_s2 + $0x29c] sm:$0xf] %vm3910_vm1, %v4853_v0  ;;  %v2800_v14 = vmax.f32 %v5249_v4, %v2544_v6  ;;  %v2417_v15 = vmul.f32 0.2, %v5122_v11  ;;  %v2545_v16 = vmul.f32 0.2, %v5250_v12  ;;  %v2670_v19 = vmax.f32 %v1511_v7, %v2414_v9 }
 0x136   :  { %3948 = vst.msk [vmem:[%s7034_s2 + $0x94] sm:$0xf] %vm3910_vm1, %v4723_v1  ;;  %4076 = vst.msk [vmem:[%s7034_s2 + $0x294] sm:$0xf] %vm3910_vm1, %v4851_v2  ;;  %v1514_v17 = vpop.f32.mrb[43].mxu0  ;;  %v2026_v18 = vpop.f32.mrb[43].mxu1  ;;  %v2798_v20 = vmax.f32 %v2023_v8, %v2542_v10  ;;  %v4728_v23 = vpack.c.bf16 %v2672_v13, %v2672_v13 }
 0x137   :  { %v2415_v21 = vmul.f32 0.2, %v1514_v17  ;;  %v2543_v22 = vmul.f32 0.2, %v2026_v18  ;;  %v4856_v24 = vpack.c.bf16 %v2800_v14, %v2800_v14  ;;  %v2673_v25 = vmax.f32 %v5122_v11, %v2417_v15 }
 0x138   :  { %v2801_v26 = vmax.f32 %v5250_v12, %v2545_v16  ;;  %v4726_v27 = vpack.c.bf16 %v2670_v19, %v2670_v19  ;;  %v4854_v28 = vpack.c.bf16 %v2798_v20, %v2798_v20  ;;  %3953 = vst.msk [vmem:[%s7034_s2 + $0xa8] sm:$0xf] %vm3910_vm1, %v4728_v23 }
 0x139   :  { %v2671_v29 = vmax.f32 %v1514_v17, %v2415_v21  ;;  %v2799_v30 = vmax.f32 %v2026_v18, %v2543_v22  ;;  %4081 = vst.msk [vmem:[%s7034_s2 + $0x2a8] sm:$0xf] %vm3910_vm1, %v4856_v24  ;;  %v4729_v31 = vpack.c.bf16 %v2673_v25, %v2673_v25  ;;  %v5125_v35 = vpop.f32.mrb[44].mxu0  ;;  %v5253_v36 = vpop.f32.mrb[44].mxu1 }
 0x13a   :  { %v4857_v32 = vpack.c.bf16 %v2801_v26, %v2801_v26  ;;  %3951 = vst.msk [vmem:[%s7034_s2 + $0xa0] sm:$0xf] %vm3910_vm1, %v4726_v27  ;;  %4079 = vst.msk [vmem:[%s7034_s2 + $0x2a0] sm:$0xf] %vm3910_vm1, %v4854_v28  ;;  %v2420_v37 = vmul.f32 0.2, %v5125_v35 }
 0x13b   :  { %v4727_v33 = vpack.c.bf16 %v2671_v29, %v2671_v29  ;;  %v4855_v34 = vpack.c.bf16 %v2799_v30, %v2799_v30  ;;  %3954 = vst.msk [vmem:[%s7034_s2 + $0xac] sm:$0xf] %vm3910_vm1, %v4729_v31  ;;  %v2548_v38 = vmul.f32 0.2, %v5253_v36  ;;  %v1527_v39 = vpop.f32.mrb[45].mxu0  ;;  %v2039_v40 = vpop.f32.mrb[45].mxu1 }
 0x13c   :  { %4082 = vst.msk [vmem:[%s7034_s2 + $0x2ac] sm:$0xf] %vm3910_vm1, %v4857_v32  ;;  %v2418_v41 = vmul.f32 0.2, %v1527_v39  ;;  %v2546_v42 = vmul.f32 0.2, %v2039_v40  ;;  %v2676_v45 = vmax.f32 %v5125_v35, %v2420_v37 }
 0x13d   :  { %3952 = vst.msk [vmem:[%s7034_s2 + $0xa4] sm:$0xf] %vm3910_vm1, %v4727_v33  ;;  %4080 = vst.msk [vmem:[%s7034_s2 + $0x2a4] sm:$0xf] %vm3910_vm1, %v4855_v34  ;;  %v5126_v43 = vpop.f32.mrb[46].mxu0  ;;  %v5254_v44 = vpop.f32.mrb[46].mxu1  ;;  %v2804_v46 = vmax.f32 %v5253_v36, %v2548_v38 }
 0x13e   :  { %v2421_v47 = vmul.f32 0.2, %v5126_v43  ;;  %v2549_v48 = vmul.f32 0.2, %v5254_v44  ;;  %v1530_v49 = vpop.f32.mrb[47].mxu0  ;;  %v2042_v50 = vpop.f32.mrb[47].mxu1  ;;  %v2674_v51 = vmax.f32 %v1527_v39, %v2418_v41  ;;  %v2802_v52 = vmax.f32 %v2039_v40, %v2546_v42 }
 0x13f   :  { %v2419_v53 = vmul.f32 0.2, %v1530_v49  ;;  %v2547_v54 = vmul.f32 0.2, %v2042_v50  ;;  %v4732_v55 = vpack.c.bf16 %v2676_v45, %v2676_v45  ;;  %v4860_v56 = vpack.c.bf16 %v2804_v46, %v2804_v46 }
 0x140   :  { %v2677_v57 = vmax.f32 %v5126_v43, %v2421_v47  ;;  %v2805_v58 = vmax.f32 %v5254_v44, %v2549_v48  ;;  %v4730_v59 = vpack.c.bf16 %v2674_v51, %v2674_v51  ;;  %v4858_v60 = vpack.c.bf16 %v2802_v52, %v2802_v52 }
 0x141   :  { %v2675_v61 = vmax.f32 %v1530_v49, %v2419_v53  ;;  %v2803_v62 = vmax.f32 %v2042_v50, %v2547_v54  ;;  %3957 = vst.msk [vmem:[%s7034_s2 + $0xb8] sm:$0xf] %vm3910_vm1, %v4732_v55  ;;  %4085 = vst.msk [vmem:[%s7034_s2 + $0x2b8] sm:$0xf] %vm3910_vm1, %v4860_v56  ;;  %v5129_v3 = vpop.f32.mrb[48].mxu0  ;;  %v5257_v4 = vpop.f32.mrb[48].mxu1 }
 0x142   :  { %v4733_v63 = vpack.c.bf16 %v2677_v57, %v2677_v57  ;;  %v4861_v0 = vpack.c.bf16 %v2805_v58, %v2805_v58  ;;  %3955 = vst.msk [vmem:[%s7034_s2 + $0xb0] sm:$0xf] %vm3910_vm1, %v4730_v59  ;;  %4083 = vst.msk [vmem:[%s7034_s2 + $0x2b0] sm:$0xf] %vm3910_vm1, %v4858_v60  ;;  %v2424_v5 = vmul.f32 0.2, %v5129_v3 }
 0x143   :  { %v4731_v1 = vpack.c.bf16 %v2675_v61, %v2675_v61  ;;  %v4859_v2 = vpack.c.bf16 %v2803_v62, %v2803_v62  ;;  %v2552_v6 = vmul.f32 0.2, %v5257_v4  ;;  %v1543_v7 = vpop.f32.mrb[49].mxu0  ;;  %v2055_v8 = vpop.f32.mrb[49].mxu1 }
 0x144   :  { %3958 = vst.msk [vmem:[%s7034_s2 + $0xbc] sm:$0xf] %vm3910_vm1, %v4733_v63  ;;  %4086 = vst.msk [vmem:[%s7034_s2 + $0x2bc] sm:$0xf] %vm3910_vm1, %v4861_v0  ;;  %v2422_v9 = vmul.f32 0.2, %v1543_v7  ;;  %v2680_v13 = vmax.f32 %v5129_v3, %v2424_v5 }
 0x145   :  { %3956 = vst.msk [vmem:[%s7034_s2 + $0xb4] sm:$0xf] %vm3910_vm1, %v4731_v1  ;;  %4084 = vst.msk [vmem:[%s7034_s2 + $0x2b4] sm:$0xf] %vm3910_vm1, %v4859_v2  ;;  %v2550_v10 = vmul.f32 0.2, %v2055_v8  ;;  %v2808_v14 = vmax.f32 %v5257_v4, %v2552_v6 }
 0x146   :  { %v5130_v11 = vpop.f32.mrb[50].mxu0  ;;  %v5258_v12 = vpop.f32.mrb[50].mxu1  ;;  %v2678_v19 = vmax.f32 %v1543_v7, %v2422_v9  ;;  %v4736_v23 = vpack.c.bf16 %v2680_v13, %v2680_v13 }
 0x147   :  { %v2425_v15 = vmul.f32 0.2, %v5130_v11  ;;  %v2553_v16 = vmul.f32 0.2, %v5258_v12  ;;  %v1546_v17 = vpop.f32.mrb[51].mxu0  ;;  %v2058_v18 = vpop.f32.mrb[51].mxu1  ;;  %v2806_v20 = vmax.f32 %v2055_v8, %v2550_v10  ;;  %v4864_v24 = vpack.c.bf16 %v2808_v14, %v2808_v14 }
 0x148   :  { %v2423_v21 = vmul.f32 0.2, %v1546_v17  ;;  %v2551_v22 = vmul.f32 0.2, %v2058_v18  ;;  %v4734_v27 = vpack.c.bf16 %v2678_v19, %v2678_v19  ;;  %3961 = vst.msk [vmem:[%s7034_s2 + $0xc8] sm:$0xf] %vm3910_vm1, %v4736_v23 }
 0x149   :  { %v2681_v25 = vmax.f32 %v5130_v11, %v2425_v15  ;;  %v2809_v26 = vmax.f32 %v5258_v12, %v2553_v16  ;;  %v4862_v28 = vpack.c.bf16 %v2806_v20, %v2806_v20  ;;  %4089 = vst.msk [vmem:[%s7034_s2 + $0x2c8] sm:$0xf] %vm3910_vm1, %v4864_v24  ;;  %v5133_v35 = vpop.f32.mrb[52].mxu0  ;;  %v5261_v36 = vpop.f32.mrb[52].mxu1 }
 0x14a   :  { %v2679_v29 = vmax.f32 %v1546_v17, %v2423_v21  ;;  %v2807_v30 = vmax.f32 %v2058_v18, %v2551_v22  ;;  %3959 = vst.msk [vmem:[%s7034_s2 + $0xc0] sm:$0xf] %vm3910_vm1, %v4734_v27  ;;  %v2428_v37 = vmul.f32 0.2, %v5133_v35  ;;  %v2556_v38 = vmul.f32 0.2, %v5261_v36 }
 0x14b   :  { %v4737_v31 = vpack.c.bf16 %v2681_v25, %v2681_v25  ;;  %v4865_v32 = vpack.c.bf16 %v2809_v26, %v2809_v26  ;;  %4087 = vst.msk [vmem:[%s7034_s2 + $0x2c0] sm:$0xf] %vm3910_vm1, %v4862_v28  ;;  %v1559_v39 = vpop.f32.mrb[53].mxu0  ;;  %v2071_v40 = vpop.f32.mrb[53].mxu1 }
 0x14c   :  { %v4735_v33 = vpack.c.bf16 %v2679_v29, %v2679_v29  ;;  %v4863_v34 = vpack.c.bf16 %v2807_v30, %v2807_v30  ;;  %v2426_v41 = vmul.f32 0.2, %v1559_v39  ;;  %v2554_v42 = vmul.f32 0.2, %v2071_v40  ;;  %v5134_v43 = vpop.f32.mrb[54].mxu0  ;;  %v5262_v44 = vpop.f32.mrb[54].mxu1 }
 0x14d   :  { %3962 = vst.msk [vmem:[%s7034_s2 + $0xcc] sm:$0xf] %vm3910_vm1, %v4737_v31  ;;  %4090 = vst.msk [vmem:[%s7034_s2 + $0x2cc] sm:$0xf] %vm3910_vm1, %v4865_v32  ;;  %v2684_v45 = vmax.f32 %v5133_v35, %v2428_v37  ;;  %v2812_v46 = vmax.f32 %v5261_v36, %v2556_v38  ;;  %v2429_v47 = vmul.f32 0.2, %v5134_v43 }
 0x14e   :  { %3960 = vst.msk [vmem:[%s7034_s2 + $0xc4] sm:$0xf] %vm3910_vm1, %v4735_v33  ;;  %4088 = vst.msk [vmem:[%s7034_s2 + $0x2c4] sm:$0xf] %vm3910_vm1, %v4863_v34  ;;  %v2557_v48 = vmul.f32 0.2, %v5262_v44  ;;  %v2682_v51 = vmax.f32 %v1559_v39, %v2426_v41  ;;  %v2810_v52 = vmax.f32 %v2071_v40, %v2554_v42 }
 0x14f   :  { %v1562_v49 = vpop.f32.mrb[55].mxu0  ;;  %v2074_v50 = vpop.f32.mrb[55].mxu1  ;;  %v4740_v55 = vpack.c.bf16 %v2684_v45, %v2684_v45  ;;  %v4868_v56 = vpack.c.bf16 %v2812_v46, %v2812_v46  ;;  %v2685_v57 = vmax.f32 %v5134_v43, %v2429_v47 }
 0x150   :  { %v2427_v53 = vmul.f32 0.2, %v1562_v49  ;;  %v2555_v54 = vmul.f32 0.2, %v2074_v50  ;;  %v2813_v58 = vmax.f32 %v5262_v44, %v2557_v48  ;;  %v4738_v59 = vpack.c.bf16 %v2682_v51, %v2682_v51 }
 0x151   :  { %v4866_v60 = vpack.c.bf16 %v2810_v52, %v2810_v52  ;;  %3965 = vst.msk [vmem:[%s7034_s2 + $0xd8] sm:$0xf] %vm3910_vm1, %v4740_v55  ;;  %4093 = vst.msk [vmem:[%s7034_s2 + $0x2d8] sm:$0xf] %vm3910_vm1, %v4868_v56  ;;  %v4741_v63 = vpack.c.bf16 %v2685_v57, %v2685_v57  ;;  %v5137_v3 = vpop.f32.mrb[56].mxu0  ;;  %v5265_v4 = vpop.f32.mrb[56].mxu1 }
 0x152   :  { %v2683_v61 = vmax.f32 %v1562_v49, %v2427_v53  ;;  %v2811_v62 = vmax.f32 %v2074_v50, %v2555_v54  ;;  %v4869_v0 = vpack.c.bf16 %v2813_v58, %v2813_v58  ;;  %3963 = vst.msk [vmem:[%s7034_s2 + $0xd0] sm:$0xf] %vm3910_vm1, %v4738_v59  ;;  %v2432_v5 = vmul.f32 0.2, %v5137_v3  ;;  %v1575_v7 = vpop.f32.mrb[57].mxu0  ;;  %v2087_v8 = vpop.f32.mrb[57].mxu1 }
 0x153   :  { %4091 = vst.msk [vmem:[%s7034_s2 + $0x2d0] sm:$0xf] %vm3910_vm1, %v4866_v60  ;;  %3966 = vst.msk [vmem:[%s7034_s2 + $0xdc] sm:$0xf] %vm3910_vm1, %v4741_v63  ;;  %v2560_v6 = vmul.f32 0.2, %v5265_v4 }
 0x154   :  { %v4739_v1 = vpack.c.bf16 %v2683_v61, %v2683_v61  ;;  %v4867_v2 = vpack.c.bf16 %v2811_v62, %v2811_v62  ;;  %4094 = vst.msk [vmem:[%s7034_s2 + $0x2dc] sm:$0xf] %vm3910_vm1, %v4869_v0  ;;  %v2430_v9 = vmul.f32 0.2, %v1575_v7  ;;  %v2558_v10 = vmul.f32 0.2, %v2087_v8 }
 0x155   :  { %v5138_v11 = vpop.f32.mrb[58].mxu0  ;;  %v5266_v12 = vpop.f32.mrb[58].mxu1  ;;  %v2688_v13 = vmax.f32 %v5137_v3, %v2432_v5  ;;  %v2816_v14 = vmax.f32 %v5265_v4, %v2560_v6 }
 0x156   :  { %3964 = vst.msk [vmem:[%s7034_s2 + $0xd4] sm:$0xf] %vm3910_vm1, %v4739_v1  ;;  %4092 = vst.msk [vmem:[%s7034_s2 + $0x2d4] sm:$0xf] %vm3910_vm1, %v4867_v2  ;;  %v2433_v15 = vmul.f32 0.2, %v5138_v11  ;;  %v2686_v19 = vmax.f32 %v1575_v7, %v2430_v9  ;;  %v2814_v20 = vmax.f32 %v2087_v8, %v2558_v10 }
 0x157   :  { %v2561_v16 = vmul.f32 0.2, %v5266_v12  ;;  %v1578_v17 = vpop.f32.mrb[59].mxu0  ;;  %v2090_v18 = vpop.f32.mrb[59].mxu1  ;;  %v4744_v23 = vpack.c.bf16 %v2688_v13, %v2688_v13  ;;  %v4872_v24 = vpack.c.bf16 %v2816_v14, %v2816_v14 }
 0x158   :  { %v2431_v21 = vmul.f32 0.2, %v1578_v17  ;;  %v2559_v22 = vmul.f32 0.2, %v2090_v18  ;;  %v2689_v25 = vmax.f32 %v5138_v11, %v2433_v15  ;;  %v4742_v27 = vpack.c.bf16 %v2686_v19, %v2686_v19 }
 0x159   :  { %v2817_v26 = vmax.f32 %v5266_v12, %v2561_v16  ;;  %v4870_v28 = vpack.c.bf16 %v2814_v20, %v2814_v20  ;;  %3969 = vst.msk [vmem:[%s7034_s2 + $0xe8] sm:$0xf] %vm3910_vm1, %v4744_v23  ;;  %4097 = vst.msk [vmem:[%s7034_s2 + $0x2e8] sm:$0xf] %vm3910_vm1, %v4872_v24  ;;  %v5141_v35 = vpop.f32.mrb[60].mxu0  ;;  %v5269_v36 = vpop.f32.mrb[60].mxu1 }
 0x15a   :  { %v2687_v29 = vmax.f32 %v1578_v17, %v2431_v21  ;;  %v2815_v30 = vmax.f32 %v2090_v18, %v2559_v22  ;;  %v4745_v31 = vpack.c.bf16 %v2689_v25, %v2689_v25  ;;  %3967 = vst.msk [vmem:[%s7034_s2 + $0xe0] sm:$0xf] %vm3910_vm1, %v4742_v27  ;;  %v2436_v37 = vmul.f32 0.2, %v5141_v35  ;;  %v1591_v39 = vpop.f32.mrb[61].mxu0  ;;  %v2103_v40 = vpop.f32.mrb[61].mxu1 }
 0x15b   :  { %v4873_v32 = vpack.c.bf16 %v2817_v26, %v2817_v26  ;;  %4095 = vst.msk [vmem:[%s7034_s2 + $0x2e0] sm:$0xf] %vm3910_vm1, %v4870_v28  ;;  %v2564_v38 = vmul.f32 0.2, %v5269_v36  ;;  %v2434_v41 = vmul.f32 0.2, %v1591_v39 }
 0x15c   :  { %v4743_v33 = vpack.c.bf16 %v2687_v29, %v2687_v29  ;;  %v4871_v34 = vpack.c.bf16 %v2815_v30, %v2815_v30  ;;  %3970 = vst.msk [vmem:[%s7034_s2 + $0xec] sm:$0xf] %vm3910_vm1, %v4745_v31  ;;  %v2562_v42 = vmul.f32 0.2, %v2103_v40  ;;  %v5142_v43 = vpop.f32.mrb[62].mxu0  ;;  %v5270_v44 = vpop.f32.mrb[62].mxu1  ;;  %v2692_v45 = vmax.f32 %v5141_v35, %v2436_v37 }
 0x15d   :  { %4098 = vst.msk [vmem:[%s7034_s2 + $0x2ec] sm:$0xf] %vm3910_vm1, %v4873_v32  ;;  %v2820_v46 = vmax.f32 %v5269_v36, %v2564_v38  ;;  %v2437_v47 = vmul.f32 0.2, %v5142_v43  ;;  %v2565_v48 = vmul.f32 0.2, %v5270_v44  ;;  %v2690_v51 = vmax.f32 %v1591_v39, %v2434_v41 }
 0x15e   :  { %3968 = vst.msk [vmem:[%s7034_s2 + $0xe4] sm:$0xf] %vm3910_vm1, %v4743_v33  ;;  %4096 = vst.msk [vmem:[%s7034_s2 + $0x2e4] sm:$0xf] %vm3910_vm1, %v4871_v34  ;;  %v1594_v49 = vpop.f32.mrb[63].mxu0  ;;  %v2106_v50 = vpop.f32.mrb[63].mxu1  ;;  %v2818_v52 = vmax.f32 %v2103_v40, %v2562_v42  ;;  %v4748_v55 = vpack.c.bf16 %v2692_v45, %v2692_v45 }
 0x15f   :  { %v2435_v53 = vmul.f32 0.2, %v1594_v49  ;;  %v2563_v54 = vmul.f32 0.2, %v2106_v50  ;;  %v4876_v56 = vpack.c.bf16 %v2820_v46, %v2820_v46  ;;  %v2693_v57 = vmax.f32 %v5142_v43, %v2437_v47 }
 0x160   :  { %v2821_v58 = vmax.f32 %v5270_v44, %v2565_v48  ;;  %v4746_v59 = vpack.c.bf16 %v2690_v51, %v2690_v51  ;;  %v4874_v60 = vpack.c.bf16 %v2818_v52, %v2818_v52  ;;  %3973 = vst.msk [vmem:[%s7034_s2 + $0xf8] sm:$0xf] %vm3910_vm1, %v4748_v55 }
 0x161   :  { %v2691_v61 = vmax.f32 %v1594_v49, %v2435_v53  ;;  %v2819_v62 = vmax.f32 %v2106_v50, %v2563_v54  ;;  %4101 = vst.msk [vmem:[%s7034_s2 + $0x2f8] sm:$0xf] %vm3910_vm1, %v4876_v56  ;;  %v4749_v63 = vpack.c.bf16 %v2693_v57, %v2693_v57  ;;  %v5145_v3 = vpop.f32.mrb[64].mxu0  ;;  %v5273_v4 = vpop.f32.mrb[64].mxu1 }
 0x162   :  { %v4877_v0 = vpack.c.bf16 %v2821_v58, %v2821_v58  ;;  %3971 = vst.msk [vmem:[%s7034_s2 + $0xf0] sm:$0xf] %vm3910_vm1, %v4746_v59  ;;  %4099 = vst.msk [vmem:[%s7034_s2 + $0x2f0] sm:$0xf] %vm3910_vm1, %v4874_v60  ;;  %v2440_v5 = vmul.f32 0.2, %v5145_v3 }
 0x163   :  { %v4747_v1 = vpack.c.bf16 %v2691_v61, %v2691_v61  ;;  %v4875_v2 = vpack.c.bf16 %v2819_v62, %v2819_v62  ;;  %3974 = vst.msk [vmem:[%s7034_s2 + $0xfc] sm:$0xf] %vm3910_vm1, %v4749_v63  ;;  %v2568_v6 = vmul.f32 0.2, %v5273_v4  ;;  %v1607_v7 = vpop.f32.mrb[65].mxu0  ;;  %v2119_v8 = vpop.f32.mrb[65].mxu1 }
 0x164   :  { %4102 = vst.msk [vmem:[%s7034_s2 + $0x2fc] sm:$0xf] %vm3910_vm1, %v4877_v0  ;;  %v2438_v9 = vmul.f32 0.2, %v1607_v7  ;;  %v2566_v10 = vmul.f32 0.2, %v2119_v8  ;;  %v2696_v13 = vmax.f32 %v5145_v3, %v2440_v5 }
 0x165   :  { %3972 = vst.msk [vmem:[%s7034_s2 + $0xf4] sm:$0xf] %vm3910_vm1, %v4747_v1  ;;  %4100 = vst.msk [vmem:[%s7034_s2 + $0x2f4] sm:$0xf] %vm3910_vm1, %v4875_v2  ;;  %v5146_v11 = vpop.f32.mrb[66].mxu0  ;;  %v5274_v12 = vpop.f32.mrb[66].mxu1  ;;  %v2824_v14 = vmax.f32 %v5273_v4, %v2568_v6 }
 0x166   :  { %v2441_v15 = vmul.f32 0.2, %v5146_v11  ;;  %v2569_v16 = vmul.f32 0.2, %v5274_v12  ;;  %v1610_v17 = vpop.f32.mrb[67].mxu0  ;;  %v2122_v18 = vpop.f32.mrb[67].mxu1  ;;  %v2694_v19 = vmax.f32 %v1607_v7, %v2438_v9  ;;  %v2822_v20 = vmax.f32 %v2119_v8, %v2566_v10 }
 0x167   :  { %v2439_v21 = vmul.f32 0.2, %v1610_v17  ;;  %v2567_v22 = vmul.f32 0.2, %v2122_v18  ;;  %v4752_v23 = vpack.c.bf16 %v2696_v13, %v2696_v13  ;;  %v4880_v24 = vpack.c.bf16 %v2824_v14, %v2824_v14 }
 0x168   :  { %v2697_v25 = vmax.f32 %v5146_v11, %v2441_v15  ;;  %v2825_v26 = vmax.f32 %v5274_v12, %v2569_v16  ;;  %v4750_v27 = vpack.c.bf16 %v2694_v19, %v2694_v19  ;;  %v4878_v28 = vpack.c.bf16 %v2822_v20, %v2822_v20 }
 0x169   :  { %v2695_v29 = vmax.f32 %v1610_v17, %v2439_v21  ;;  %v2823_v30 = vmax.f32 %v2122_v18, %v2567_v22  ;;  %3977 = vst.msk [vmem:[%s7034_s2 + $0x108] sm:$0xf] %vm3910_vm1, %v4752_v23  ;;  %4105 = vst.msk [vmem:[%s7034_s2 + $0x308] sm:$0xf] %vm3910_vm1, %v4880_v24  ;;  %v5149_v35 = vpop.f32.mrb[68].mxu0  ;;  %v5277_v36 = vpop.f32.mrb[68].mxu1 }
 0x16a   :  { %v4753_v31 = vpack.c.bf16 %v2697_v25, %v2697_v25  ;;  %v4881_v32 = vpack.c.bf16 %v2825_v26, %v2825_v26  ;;  %3975 = vst.msk [vmem:[%s7034_s2 + $0x100] sm:$0xf] %vm3910_vm1, %v4750_v27  ;;  %4103 = vst.msk [vmem:[%s7034_s2 + $0x300] sm:$0xf] %vm3910_vm1, %v4878_v28  ;;  %v2444_v37 = vmul.f32 0.2, %v5149_v35 }
 0x16b   :  { %v4751_v33 = vpack.c.bf16 %v2695_v29, %v2695_v29  ;;  %v4879_v34 = vpack.c.bf16 %v2823_v30, %v2823_v30  ;;  %v2572_v38 = vmul.f32 0.2, %v5277_v36  ;;  %v1623_v39 = vpop.f32.mrb[69].mxu0  ;;  %v2135_v40 = vpop.f32.mrb[69].mxu1 }
 0x16c   :  { %3978 = vst.msk [vmem:[%s7034_s2 + $0x10c] sm:$0xf] %vm3910_vm1, %v4753_v31  ;;  %4106 = vst.msk [vmem:[%s7034_s2 + $0x30c] sm:$0xf] %vm3910_vm1, %v4881_v32  ;;  %v2442_v41 = vmul.f32 0.2, %v1623_v39  ;;  %v2700_v45 = vmax.f32 %v5149_v35, %v2444_v37 }
 0x16d   :  { %3976 = vst.msk [vmem:[%s7034_s2 + $0x104] sm:$0xf] %vm3910_vm1, %v4751_v33  ;;  %4104 = vst.msk [vmem:[%s7034_s2 + $0x304] sm:$0xf] %vm3910_vm1, %v4879_v34  ;;  %v2570_v42 = vmul.f32 0.2, %v2135_v40  ;;  %v2828_v46 = vmax.f32 %v5277_v36, %v2572_v38 }
 0x16e   :  { %v5150_v43 = vpop.f32.mrb[70].mxu0  ;;  %v5278_v44 = vpop.f32.mrb[70].mxu1  ;;  %v2698_v51 = vmax.f32 %v1623_v39, %v2442_v41  ;;  %v4756_v55 = vpack.c.bf16 %v2700_v45, %v2700_v45 }
 0x16f   :  { %v2445_v47 = vmul.f32 0.2, %v5150_v43  ;;  %v2573_v48 = vmul.f32 0.2, %v5278_v44  ;;  %v1626_v49 = vpop.f32.mrb[71].mxu0  ;;  %v2138_v50 = vpop.f32.mrb[71].mxu1  ;;  %v2826_v52 = vmax.f32 %v2135_v40, %v2570_v42  ;;  %v4884_v56 = vpack.c.bf16 %v2828_v46, %v2828_v46 }
 0x170   :  { %v2443_v53 = vmul.f32 0.2, %v1626_v49  ;;  %v2571_v54 = vmul.f32 0.2, %v2138_v50  ;;  %v4754_v59 = vpack.c.bf16 %v2698_v51, %v2698_v51  ;;  %3981 = vst.msk [vmem:[%s7034_s2 + $0x118] sm:$0xf] %vm3910_vm1, %v4756_v55 }
 0x171   :  { %v2701_v57 = vmax.f32 %v5150_v43, %v2445_v47  ;;  %v2829_v58 = vmax.f32 %v5278_v44, %v2573_v48  ;;  %v4882_v60 = vpack.c.bf16 %v2826_v52, %v2826_v52  ;;  %4109 = vst.msk [vmem:[%s7034_s2 + $0x318] sm:$0xf] %vm3910_vm1, %v4884_v56  ;;  %v5153_v3 = vpop.f32.mrb[72].mxu0  ;;  %v5281_v4 = vpop.f32.mrb[72].mxu1 }
 0x172   :  { %v2699_v61 = vmax.f32 %v1626_v49, %v2443_v53  ;;  %v2827_v62 = vmax.f32 %v2138_v50, %v2571_v54  ;;  %3979 = vst.msk [vmem:[%s7034_s2 + $0x110] sm:$0xf] %vm3910_vm1, %v4754_v59  ;;  %v2448_v5 = vmul.f32 0.2, %v5153_v3  ;;  %v2576_v6 = vmul.f32 0.2, %v5281_v4 }
 0x173   :  { %v4757_v63 = vpack.c.bf16 %v2701_v57, %v2701_v57  ;;  %v4885_v0 = vpack.c.bf16 %v2829_v58, %v2829_v58  ;;  %4107 = vst.msk [vmem:[%s7034_s2 + $0x310] sm:$0xf] %vm3910_vm1, %v4882_v60  ;;  %v1639_v7 = vpop.f32.mrb[73].mxu0  ;;  %v2151_v8 = vpop.f32.mrb[73].mxu1 }
 0x174   :  { %v4755_v1 = vpack.c.bf16 %v2699_v61, %v2699_v61  ;;  %v4883_v2 = vpack.c.bf16 %v2827_v62, %v2827_v62  ;;  %v2446_v9 = vmul.f32 0.2, %v1639_v7  ;;  %v2574_v10 = vmul.f32 0.2, %v2151_v8  ;;  %v5154_v11 = vpop.f32.mrb[74].mxu0  ;;  %v5282_v12 = vpop.f32.mrb[74].mxu1 }
 0x175   :  { %3982 = vst.msk [vmem:[%s7034_s2 + $0x11c] sm:$0xf] %vm3910_vm1, %v4757_v63  ;;  %4110 = vst.msk [vmem:[%s7034_s2 + $0x31c] sm:$0xf] %vm3910_vm1, %v4885_v0  ;;  %v2704_v13 = vmax.f32 %v5153_v3, %v2448_v5  ;;  %v2832_v14 = vmax.f32 %v5281_v4, %v2576_v6  ;;  %v2449_v15 = vmul.f32 0.2, %v5154_v11 }
 0x176   :  { %3980 = vst.msk [vmem:[%s7034_s2 + $0x114] sm:$0xf] %vm3910_vm1, %v4755_v1  ;;  %4108 = vst.msk [vmem:[%s7034_s2 + $0x314] sm:$0xf] %vm3910_vm1, %v4883_v2  ;;  %v2577_v16 = vmul.f32 0.2, %v5282_v12  ;;  %v2702_v19 = vmax.f32 %v1639_v7, %v2446_v9  ;;  %v2830_v20 = vmax.f32 %v2151_v8, %v2574_v10 }
 0x177   :  { %v1642_v17 = vpop.f32.mrb[75].mxu0  ;;  %v2154_v18 = vpop.f32.mrb[75].mxu1  ;;  %v4760_v23 = vpack.c.bf16 %v2704_v13, %v2704_v13  ;;  %v4888_v24 = vpack.c.bf16 %v2832_v14, %v2832_v14  ;;  %v2705_v25 = vmax.f32 %v5154_v11, %v2449_v15 }
 0x178   :  { %v2447_v21 = vmul.f32 0.2, %v1642_v17  ;;  %v2575_v22 = vmul.f32 0.2, %v2154_v18  ;;  %v2833_v26 = vmax.f32 %v5282_v12, %v2577_v16  ;;  %v4758_v27 = vpack.c.bf16 %v2702_v19, %v2702_v19 }
 0x179   :  { %v4886_v28 = vpack.c.bf16 %v2830_v20, %v2830_v20  ;;  %3985 = vst.msk [vmem:[%s7034_s2 + $0x128] sm:$0xf] %vm3910_vm1, %v4760_v23  ;;  %4113 = vst.msk [vmem:[%s7034_s2 + $0x328] sm:$0xf] %vm3910_vm1, %v4888_v24  ;;  %v4761_v31 = vpack.c.bf16 %v2705_v25, %v2705_v25  ;;  %v5157_v35 = vpop.f32.mrb[76].mxu0  ;;  %v5285_v36 = vpop.f32.mrb[76].mxu1 }
 0x17a   :  { %v2703_v29 = vmax.f32 %v1642_v17, %v2447_v21  ;;  %v2831_v30 = vmax.f32 %v2154_v18, %v2575_v22  ;;  %v4889_v32 = vpack.c.bf16 %v2833_v26, %v2833_v26  ;;  %3983 = vst.msk [vmem:[%s7034_s2 + $0x120] sm:$0xf] %vm3910_vm1, %v4758_v27  ;;  %v2452_v37 = vmul.f32 0.2, %v5157_v35  ;;  %v1655_v39 = vpop.f32.mrb[77].mxu0  ;;  %v2167_v40 = vpop.f32.mrb[77].mxu1 }
 0x17b   :  { %4111 = vst.msk [vmem:[%s7034_s2 + $0x320] sm:$0xf] %vm3910_vm1, %v4886_v28  ;;  %3986 = vst.msk [vmem:[%s7034_s2 + $0x12c] sm:$0xf] %vm3910_vm1, %v4761_v31  ;;  %v2580_v38 = vmul.f32 0.2, %v5285_v36 }
 0x17c   :  { %v4759_v33 = vpack.c.bf16 %v2703_v29, %v2703_v29  ;;  %v4887_v34 = vpack.c.bf16 %v2831_v30, %v2831_v30  ;;  %4114 = vst.msk [vmem:[%s7034_s2 + $0x32c] sm:$0xf] %vm3910_vm1, %v4889_v32  ;;  %v2450_v41 = vmul.f32 0.2, %v1655_v39  ;;  %v2578_v42 = vmul.f32 0.2, %v2167_v40 }
 0x17d   :  { %v5158_v43 = vpop.f32.mrb[78].mxu0  ;;  %v5286_v44 = vpop.f32.mrb[78].mxu1  ;;  %v2708_v45 = vmax.f32 %v5157_v35, %v2452_v37  ;;  %v2836_v46 = vmax.f32 %v5285_v36, %v2580_v38 }
 0x17e   :  { %3984 = vst.msk [vmem:[%s7034_s2 + $0x124] sm:$0xf] %vm3910_vm1, %v4759_v33  ;;  %4112 = vst.msk [vmem:[%s7034_s2 + $0x324] sm:$0xf] %vm3910_vm1, %v4887_v34  ;;  %v2453_v47 = vmul.f32 0.2, %v5158_v43  ;;  %v2706_v51 = vmax.f32 %v1655_v39, %v2450_v41  ;;  %v2834_v52 = vmax.f32 %v2167_v40, %v2578_v42 }
 0x17f   :  { %v2581_v48 = vmul.f32 0.2, %v5286_v44  ;;  %v1658_v49 = vpop.f32.mrb[79].mxu0  ;;  %v2170_v50 = vpop.f32.mrb[79].mxu1  ;;  %v4764_v55 = vpack.c.bf16 %v2708_v45, %v2708_v45  ;;  %v4892_v56 = vpack.c.bf16 %v2836_v46, %v2836_v46 }
 0x180   :  { %v2451_v53 = vmul.f32 0.2, %v1658_v49  ;;  %v2579_v54 = vmul.f32 0.2, %v2170_v50  ;;  %v2709_v57 = vmax.f32 %v5158_v43, %v2453_v47  ;;  %v4762_v59 = vpack.c.bf16 %v2706_v51, %v2706_v51 }
 0x181   :  { %v2837_v58 = vmax.f32 %v5286_v44, %v2581_v48  ;;  %v4890_v60 = vpack.c.bf16 %v2834_v52, %v2834_v52  ;;  %3989 = vst.msk [vmem:[%s7034_s2 + $0x138] sm:$0xf] %vm3910_vm1, %v4764_v55  ;;  %4117 = vst.msk [vmem:[%s7034_s2 + $0x338] sm:$0xf] %vm3910_vm1, %v4892_v56  ;;  %v5161_v3 = vpop.f32.mrb[80].mxu0  ;;  %v5289_v4 = vpop.f32.mrb[80].mxu1 }
 0x182   :  { %v2707_v61 = vmax.f32 %v1658_v49, %v2451_v53  ;;  %v2835_v62 = vmax.f32 %v2170_v50, %v2579_v54  ;;  %v4765_v63 = vpack.c.bf16 %v2709_v57, %v2709_v57  ;;  %3987 = vst.msk [vmem:[%s7034_s2 + $0x130] sm:$0xf] %vm3910_vm1, %v4762_v59  ;;  %v2456_v5 = vmul.f32 0.2, %v5161_v3  ;;  %v1671_v7 = vpop.f32.mrb[81].mxu0  ;;  %v2183_v8 = vpop.f32.mrb[81].mxu1 }
 0x183   :  { %v4893_v0 = vpack.c.bf16 %v2837_v58, %v2837_v58  ;;  %4115 = vst.msk [vmem:[%s7034_s2 + $0x330] sm:$0xf] %vm3910_vm1, %v4890_v60  ;;  %v2584_v6 = vmul.f32 0.2, %v5289_v4  ;;  %v2454_v9 = vmul.f32 0.2, %v1671_v7 }
 0x184   :  { %v4763_v1 = vpack.c.bf16 %v2707_v61, %v2707_v61  ;;  %v4891_v2 = vpack.c.bf16 %v2835_v62, %v2835_v62  ;;  %3990 = vst.msk [vmem:[%s7034_s2 + $0x13c] sm:$0xf] %vm3910_vm1, %v4765_v63  ;;  %v2582_v10 = vmul.f32 0.2, %v2183_v8  ;;  %v5162_v11 = vpop.f32.mrb[82].mxu0  ;;  %v5290_v12 = vpop.f32.mrb[82].mxu1  ;;  %v2712_v13 = vmax.f32 %v5161_v3, %v2456_v5 }
 0x185   :  { %4118 = vst.msk [vmem:[%s7034_s2 + $0x33c] sm:$0xf] %vm3910_vm1, %v4893_v0  ;;  %v2840_v14 = vmax.f32 %v5289_v4, %v2584_v6  ;;  %v2457_v15 = vmul.f32 0.2, %v5162_v11  ;;  %v2585_v16 = vmul.f32 0.2, %v5290_v12  ;;  %v2710_v19 = vmax.f32 %v1671_v7, %v2454_v9 }
 0x186   :  { %3988 = vst.msk [vmem:[%s7034_s2 + $0x134] sm:$0xf] %vm3910_vm1, %v4763_v1  ;;  %4116 = vst.msk [vmem:[%s7034_s2 + $0x334] sm:$0xf] %vm3910_vm1, %v4891_v2  ;;  %v1674_v17 = vpop.f32.mrb[83].mxu0  ;;  %v2186_v18 = vpop.f32.mrb[83].mxu1  ;;  %v2838_v20 = vmax.f32 %v2183_v8, %v2582_v10  ;;  %v4768_v23 = vpack.c.bf16 %v2712_v13, %v2712_v13 }
 0x187   :  { %v2455_v21 = vmul.f32 0.2, %v1674_v17  ;;  %v2583_v22 = vmul.f32 0.2, %v2186_v18  ;;  %v4896_v24 = vpack.c.bf16 %v2840_v14, %v2840_v14  ;;  %v2713_v25 = vmax.f32 %v5162_v11, %v2457_v15 }
 0x188   :  { %v2841_v26 = vmax.f32 %v5290_v12, %v2585_v16  ;;  %v4766_v27 = vpack.c.bf16 %v2710_v19, %v2710_v19  ;;  %v4894_v28 = vpack.c.bf16 %v2838_v20, %v2838_v20  ;;  %3993 = vst.msk [vmem:[%s7034_s2 + $0x148] sm:$0xf] %vm3910_vm1, %v4768_v23 }
 0x189   :  { %v2711_v29 = vmax.f32 %v1674_v17, %v2455_v21  ;;  %v2839_v30 = vmax.f32 %v2186_v18, %v2583_v22  ;;  %4121 = vst.msk [vmem:[%s7034_s2 + $0x348] sm:$0xf] %vm3910_vm1, %v4896_v24  ;;  %v4769_v31 = vpack.c.bf16 %v2713_v25, %v2713_v25  ;;  %v5165_v35 = vpop.f32.mrb[84].mxu0  ;;  %v5293_v36 = vpop.f32.mrb[84].mxu1 }
 0x18a   :  { %v4897_v32 = vpack.c.bf16 %v2841_v26, %v2841_v26  ;;  %3991 = vst.msk [vmem:[%s7034_s2 + $0x140] sm:$0xf] %vm3910_vm1, %v4766_v27  ;;  %4119 = vst.msk [vmem:[%s7034_s2 + $0x340] sm:$0xf] %vm3910_vm1, %v4894_v28  ;;  %v2460_v37 = vmul.f32 0.2, %v5165_v35 }
 0x18b   :  { %v4767_v33 = vpack.c.bf16 %v2711_v29, %v2711_v29  ;;  %v4895_v34 = vpack.c.bf16 %v2839_v30, %v2839_v30  ;;  %3994 = vst.msk [vmem:[%s7034_s2 + $0x14c] sm:$0xf] %vm3910_vm1, %v4769_v31  ;;  %v2588_v38 = vmul.f32 0.2, %v5293_v36  ;;  %v1687_v39 = vpop.f32.mrb[85].mxu0  ;;  %v2199_v40 = vpop.f32.mrb[85].mxu1 }
 0x18c   :  { %4122 = vst.msk [vmem:[%s7034_s2 + $0x34c] sm:$0xf] %vm3910_vm1, %v4897_v32  ;;  %v2458_v41 = vmul.f32 0.2, %v1687_v39  ;;  %v2586_v42 = vmul.f32 0.2, %v2199_v40  ;;  %v2716_v45 = vmax.f32 %v5165_v35, %v2460_v37 }
 0x18d   :  { %3992 = vst.msk [vmem:[%s7034_s2 + $0x144] sm:$0xf] %vm3910_vm1, %v4767_v33  ;;  %4120 = vst.msk [vmem:[%s7034_s2 + $0x344] sm:$0xf] %vm3910_vm1, %v4895_v34  ;;  %v5166_v43 = vpop.f32.mrb[86].mxu0  ;;  %v5294_v44 = vpop.f32.mrb[86].mxu1  ;;  %v2844_v46 = vmax.f32 %v5293_v36, %v2588_v38 }
 0x18e   :  { %v2461_v47 = vmul.f32 0.2, %v5166_v43  ;;  %v2589_v48 = vmul.f32 0.2, %v5294_v44  ;;  %v1690_v49 = vpop.f32.mrb[87].mxu0  ;;  %v2202_v50 = vpop.f32.mrb[87].mxu1  ;;  %v2714_v51 = vmax.f32 %v1687_v39, %v2458_v41  ;;  %v2842_v52 = vmax.f32 %v2199_v40, %v2586_v42 }
 0x18f   :  { %v2459_v53 = vmul.f32 0.2, %v1690_v49  ;;  %v2587_v54 = vmul.f32 0.2, %v2202_v50  ;;  %v4772_v55 = vpack.c.bf16 %v2716_v45, %v2716_v45  ;;  %v4900_v56 = vpack.c.bf16 %v2844_v46, %v2844_v46 }
 0x190   :  { %v2717_v57 = vmax.f32 %v5166_v43, %v2461_v47  ;;  %v2845_v58 = vmax.f32 %v5294_v44, %v2589_v48  ;;  %v4770_v59 = vpack.c.bf16 %v2714_v51, %v2714_v51  ;;  %v4898_v60 = vpack.c.bf16 %v2842_v52, %v2842_v52 }
 0x191   :  { %v2715_v61 = vmax.f32 %v1690_v49, %v2459_v53  ;;  %v2843_v62 = vmax.f32 %v2202_v50, %v2587_v54  ;;  %3997 = vst.msk [vmem:[%s7034_s2 + $0x158] sm:$0xf] %vm3910_vm1, %v4772_v55  ;;  %4125 = vst.msk [vmem:[%s7034_s2 + $0x358] sm:$0xf] %vm3910_vm1, %v4900_v56  ;;  %v5169_v3 = vpop.f32.mrb[88].mxu0  ;;  %v5297_v4 = vpop.f32.mrb[88].mxu1 }
 0x192   :  { %v4773_v63 = vpack.c.bf16 %v2717_v57, %v2717_v57  ;;  %v4901_v0 = vpack.c.bf16 %v2845_v58, %v2845_v58  ;;  %3995 = vst.msk [vmem:[%s7034_s2 + $0x150] sm:$0xf] %vm3910_vm1, %v4770_v59  ;;  %4123 = vst.msk [vmem:[%s7034_s2 + $0x350] sm:$0xf] %vm3910_vm1, %v4898_v60  ;;  %v2464_v5 = vmul.f32 0.2, %v5169_v3 }
 0x193   :  { %v4771_v1 = vpack.c.bf16 %v2715_v61, %v2715_v61  ;;  %v4899_v2 = vpack.c.bf16 %v2843_v62, %v2843_v62  ;;  %v2592_v6 = vmul.f32 0.2, %v5297_v4  ;;  %v1703_v7 = vpop.f32.mrb[89].mxu0  ;;  %v2215_v8 = vpop.f32.mrb[89].mxu1 }
 0x194   :  { %3998 = vst.msk [vmem:[%s7034_s2 + $0x15c] sm:$0xf] %vm3910_vm1, %v4773_v63  ;;  %4126 = vst.msk [vmem:[%s7034_s2 + $0x35c] sm:$0xf] %vm3910_vm1, %v4901_v0  ;;  %v2462_v9 = vmul.f32 0.2, %v1703_v7  ;;  %v2720_v13 = vmax.f32 %v5169_v3, %v2464_v5 }
 0x195   :  { %3996 = vst.msk [vmem:[%s7034_s2 + $0x154] sm:$0xf] %vm3910_vm1, %v4771_v1  ;;  %4124 = vst.msk [vmem:[%s7034_s2 + $0x354] sm:$0xf] %vm3910_vm1, %v4899_v2  ;;  %v2590_v10 = vmul.f32 0.2, %v2215_v8  ;;  %v2848_v14 = vmax.f32 %v5297_v4, %v2592_v6 }
 0x196   :  { %v5170_v11 = vpop.f32.mrb[90].mxu0  ;;  %v5298_v12 = vpop.f32.mrb[90].mxu1  ;;  %v2718_v19 = vmax.f32 %v1703_v7, %v2462_v9  ;;  %v4776_v23 = vpack.c.bf16 %v2720_v13, %v2720_v13 }
 0x197   :  { %v2465_v15 = vmul.f32 0.2, %v5170_v11  ;;  %v2593_v16 = vmul.f32 0.2, %v5298_v12  ;;  %v1706_v17 = vpop.f32.mrb[91].mxu0  ;;  %v2218_v18 = vpop.f32.mrb[91].mxu1  ;;  %v2846_v20 = vmax.f32 %v2215_v8, %v2590_v10  ;;  %v4904_v24 = vpack.c.bf16 %v2848_v14, %v2848_v14 }
 0x198   :  { %v2463_v21 = vmul.f32 0.2, %v1706_v17  ;;  %v2591_v22 = vmul.f32 0.2, %v2218_v18  ;;  %v4774_v27 = vpack.c.bf16 %v2718_v19, %v2718_v19  ;;  %4001 = vst.msk [vmem:[%s7034_s2 + $0x168] sm:$0xf] %vm3910_vm1, %v4776_v23 }
 0x199   :  { %v2721_v25 = vmax.f32 %v5170_v11, %v2465_v15  ;;  %v2849_v26 = vmax.f32 %v5298_v12, %v2593_v16  ;;  %v4902_v28 = vpack.c.bf16 %v2846_v20, %v2846_v20  ;;  %4129 = vst.msk [vmem:[%s7034_s2 + $0x368] sm:$0xf] %vm3910_vm1, %v4904_v24  ;;  %v5173_v35 = vpop.f32.mrb[92].mxu0  ;;  %v5301_v36 = vpop.f32.mrb[92].mxu1 }
 0x19a   :  { %v2719_v29 = vmax.f32 %v1706_v17, %v2463_v21  ;;  %v2847_v30 = vmax.f32 %v2218_v18, %v2591_v22  ;;  %3999 = vst.msk [vmem:[%s7034_s2 + $0x160] sm:$0xf] %vm3910_vm1, %v4774_v27  ;;  %v2468_v37 = vmul.f32 0.2, %v5173_v35  ;;  %v2596_v38 = vmul.f32 0.2, %v5301_v36 }
 0x19b   :  { %v4777_v31 = vpack.c.bf16 %v2721_v25, %v2721_v25  ;;  %v4905_v32 = vpack.c.bf16 %v2849_v26, %v2849_v26  ;;  %4127 = vst.msk [vmem:[%s7034_s2 + $0x360] sm:$0xf] %vm3910_vm1, %v4902_v28  ;;  %v1719_v39 = vpop.f32.mrb[93].mxu0  ;;  %v2231_v40 = vpop.f32.mrb[93].mxu1 }
 0x19c   :  { %v4775_v33 = vpack.c.bf16 %v2719_v29, %v2719_v29  ;;  %v4903_v34 = vpack.c.bf16 %v2847_v30, %v2847_v30  ;;  %v2466_v41 = vmul.f32 0.2, %v1719_v39  ;;  %v2594_v42 = vmul.f32 0.2, %v2231_v40  ;;  %v5174_v43 = vpop.f32.mrb[94].mxu0  ;;  %v5302_v44 = vpop.f32.mrb[94].mxu1 }
 0x19d   :  { %4002 = vst.msk [vmem:[%s7034_s2 + $0x16c] sm:$0xf] %vm3910_vm1, %v4777_v31  ;;  %4130 = vst.msk [vmem:[%s7034_s2 + $0x36c] sm:$0xf] %vm3910_vm1, %v4905_v32  ;;  %v2724_v45 = vmax.f32 %v5173_v35, %v2468_v37  ;;  %v2852_v46 = vmax.f32 %v5301_v36, %v2596_v38  ;;  %v2469_v47 = vmul.f32 0.2, %v5174_v43 }
 0x19e   :  { %4000 = vst.msk [vmem:[%s7034_s2 + $0x164] sm:$0xf] %vm3910_vm1, %v4775_v33  ;;  %4128 = vst.msk [vmem:[%s7034_s2 + $0x364] sm:$0xf] %vm3910_vm1, %v4903_v34  ;;  %v2597_v48 = vmul.f32 0.2, %v5302_v44  ;;  %v2722_v51 = vmax.f32 %v1719_v39, %v2466_v41  ;;  %v2850_v52 = vmax.f32 %v2231_v40, %v2594_v42 }
 0x19f   :  { %v1722_v49 = vpop.f32.mrb[95].mxu0  ;;  %v2234_v50 = vpop.f32.mrb[95].mxu1  ;;  %v4780_v55 = vpack.c.bf16 %v2724_v45, %v2724_v45  ;;  %v4908_v56 = vpack.c.bf16 %v2852_v46, %v2852_v46  ;;  %v2725_v57 = vmax.f32 %v5174_v43, %v2469_v47 }
 0x1a0   :  { %v2467_v53 = vmul.f32 0.2, %v1722_v49  ;;  %v2595_v54 = vmul.f32 0.2, %v2234_v50  ;;  %v2853_v58 = vmax.f32 %v5302_v44, %v2597_v48  ;;  %v4778_v59 = vpack.c.bf16 %v2722_v51, %v2722_v51 }
 0x1a1   :  { %v4906_v60 = vpack.c.bf16 %v2850_v52, %v2850_v52  ;;  %4005 = vst.msk [vmem:[%s7034_s2 + $0x178] sm:$0xf] %vm3910_vm1, %v4780_v55  ;;  %4133 = vst.msk [vmem:[%s7034_s2 + $0x378] sm:$0xf] %vm3910_vm1, %v4908_v56  ;;  %v4781_v63 = vpack.c.bf16 %v2725_v57, %v2725_v57  ;;  %v5177_v3 = vpop.f32.mrb[96].mxu0  ;;  %v5305_v4 = vpop.f32.mrb[96].mxu1 }
 0x1a2   :  { %v2723_v61 = vmax.f32 %v1722_v49, %v2467_v53  ;;  %v2851_v62 = vmax.f32 %v2234_v50, %v2595_v54  ;;  %v4909_v0 = vpack.c.bf16 %v2853_v58, %v2853_v58  ;;  %4003 = vst.msk [vmem:[%s7034_s2 + $0x170] sm:$0xf] %vm3910_vm1, %v4778_v59  ;;  %v2472_v5 = vmul.f32 0.2, %v5177_v3  ;;  %v1735_v7 = vpop.f32.mrb[97].mxu0  ;;  %v2247_v8 = vpop.f32.mrb[97].mxu1 }
 0x1a3   :  { %4131 = vst.msk [vmem:[%s7034_s2 + $0x370] sm:$0xf] %vm3910_vm1, %v4906_v60  ;;  %4006 = vst.msk [vmem:[%s7034_s2 + $0x17c] sm:$0xf] %vm3910_vm1, %v4781_v63  ;;  %v2600_v6 = vmul.f32 0.2, %v5305_v4 }
 0x1a4   :  { %v4779_v1 = vpack.c.bf16 %v2723_v61, %v2723_v61  ;;  %v4907_v2 = vpack.c.bf16 %v2851_v62, %v2851_v62  ;;  %4134 = vst.msk [vmem:[%s7034_s2 + $0x37c] sm:$0xf] %vm3910_vm1, %v4909_v0  ;;  %v2470_v9 = vmul.f32 0.2, %v1735_v7  ;;  %v2598_v10 = vmul.f32 0.2, %v2247_v8 }
 0x1a5   :  { %v5178_v11 = vpop.f32.mrb[98].mxu0  ;;  %v5306_v12 = vpop.f32.mrb[98].mxu1  ;;  %v2728_v13 = vmax.f32 %v5177_v3, %v2472_v5  ;;  %v2856_v14 = vmax.f32 %v5305_v4, %v2600_v6 }
 0x1a6   :  { %4004 = vst.msk [vmem:[%s7034_s2 + $0x174] sm:$0xf] %vm3910_vm1, %v4779_v1  ;;  %4132 = vst.msk [vmem:[%s7034_s2 + $0x374] sm:$0xf] %vm3910_vm1, %v4907_v2  ;;  %v2473_v15 = vmul.f32 0.2, %v5178_v11  ;;  %v2726_v19 = vmax.f32 %v1735_v7, %v2470_v9  ;;  %v2854_v20 = vmax.f32 %v2247_v8, %v2598_v10 }
 0x1a7   :  { %v2601_v16 = vmul.f32 0.2, %v5306_v12  ;;  %v1738_v17 = vpop.f32.mrb[99].mxu0  ;;  %v2250_v18 = vpop.f32.mrb[99].mxu1  ;;  %v4784_v23 = vpack.c.bf16 %v2728_v13, %v2728_v13  ;;  %v4912_v24 = vpack.c.bf16 %v2856_v14, %v2856_v14 }
 0x1a8   :  { %v2471_v21 = vmul.f32 0.2, %v1738_v17  ;;  %v2599_v22 = vmul.f32 0.2, %v2250_v18  ;;  %v2729_v25 = vmax.f32 %v5178_v11, %v2473_v15  ;;  %v4782_v27 = vpack.c.bf16 %v2726_v19, %v2726_v19 }
 0x1a9   :  { %v2857_v26 = vmax.f32 %v5306_v12, %v2601_v16  ;;  %v4910_v28 = vpack.c.bf16 %v2854_v20, %v2854_v20  ;;  %4009 = vst.msk [vmem:[%s7034_s2 + $0x188] sm:$0xf] %vm3910_vm1, %v4784_v23  ;;  %4137 = vst.msk [vmem:[%s7034_s2 + $0x388] sm:$0xf] %vm3910_vm1, %v4912_v24  ;;  %v5181_v35 = vpop.f32.mrb[100].mxu0  ;;  %v5309_v36 = vpop.f32.mrb[100].mxu1 }
 0x1aa   :  { %v2727_v29 = vmax.f32 %v1738_v17, %v2471_v21  ;;  %v2855_v30 = vmax.f32 %v2250_v18, %v2599_v22  ;;  %v4785_v31 = vpack.c.bf16 %v2729_v25, %v2729_v25  ;;  %4007 = vst.msk [vmem:[%s7034_s2 + $0x180] sm:$0xf] %vm3910_vm1, %v4782_v27  ;;  %v2476_v37 = vmul.f32 0.2, %v5181_v35  ;;  %v1751_v39 = vpop.f32.mrb[101].mxu0  ;;  %v2263_v40 = vpop.f32.mrb[101].mxu1 }
 0x1ab   :  { %v4913_v32 = vpack.c.bf16 %v2857_v26, %v2857_v26  ;;  %4135 = vst.msk [vmem:[%s7034_s2 + $0x380] sm:$0xf] %vm3910_vm1, %v4910_v28  ;;  %v2604_v38 = vmul.f32 0.2, %v5309_v36  ;;  %v2474_v41 = vmul.f32 0.2, %v1751_v39 }
 0x1ac   :  { %v4783_v33 = vpack.c.bf16 %v2727_v29, %v2727_v29  ;;  %v4911_v34 = vpack.c.bf16 %v2855_v30, %v2855_v30  ;;  %4010 = vst.msk [vmem:[%s7034_s2 + $0x18c] sm:$0xf] %vm3910_vm1, %v4785_v31  ;;  %v2602_v42 = vmul.f32 0.2, %v2263_v40  ;;  %v5182_v43 = vpop.f32.mrb[102].mxu0  ;;  %v5310_v44 = vpop.f32.mrb[102].mxu1  ;;  %v2732_v45 = vmax.f32 %v5181_v35, %v2476_v37 }
 0x1ad   :  { %4138 = vst.msk [vmem:[%s7034_s2 + $0x38c] sm:$0xf] %vm3910_vm1, %v4913_v32  ;;  %v2860_v46 = vmax.f32 %v5309_v36, %v2604_v38  ;;  %v2477_v47 = vmul.f32 0.2, %v5182_v43  ;;  %v2605_v48 = vmul.f32 0.2, %v5310_v44  ;;  %v2730_v51 = vmax.f32 %v1751_v39, %v2474_v41 }
 0x1ae   :  { %4008 = vst.msk [vmem:[%s7034_s2 + $0x184] sm:$0xf] %vm3910_vm1, %v4783_v33  ;;  %4136 = vst.msk [vmem:[%s7034_s2 + $0x384] sm:$0xf] %vm3910_vm1, %v4911_v34  ;;  %v1754_v49 = vpop.f32.mrb[103].mxu0  ;;  %v2266_v50 = vpop.f32.mrb[103].mxu1  ;;  %v2858_v52 = vmax.f32 %v2263_v40, %v2602_v42  ;;  %v4788_v55 = vpack.c.bf16 %v2732_v45, %v2732_v45 }
 0x1af   :  { %v2475_v53 = vmul.f32 0.2, %v1754_v49  ;;  %v2603_v54 = vmul.f32 0.2, %v2266_v50  ;;  %v4916_v56 = vpack.c.bf16 %v2860_v46, %v2860_v46  ;;  %v2733_v57 = vmax.f32 %v5182_v43, %v2477_v47 }
 0x1b0   :  { %v2861_v58 = vmax.f32 %v5310_v44, %v2605_v48  ;;  %v4786_v59 = vpack.c.bf16 %v2730_v51, %v2730_v51  ;;  %v4914_v60 = vpack.c.bf16 %v2858_v52, %v2858_v52  ;;  %4013 = vst.msk [vmem:[%s7034_s2 + $0x198] sm:$0xf] %vm3910_vm1, %v4788_v55 }
 0x1b1   :  { %v2731_v61 = vmax.f32 %v1754_v49, %v2475_v53  ;;  %v2859_v62 = vmax.f32 %v2266_v50, %v2603_v54  ;;  %4141 = vst.msk [vmem:[%s7034_s2 + $0x398] sm:$0xf] %vm3910_vm1, %v4916_v56  ;;  %v4789_v63 = vpack.c.bf16 %v2733_v57, %v2733_v57  ;;  %v5185_v3 = vpop.f32.mrb[104].mxu0  ;;  %v5313_v4 = vpop.f32.mrb[104].mxu1 }
 0x1b2   :  { %v4917_v0 = vpack.c.bf16 %v2861_v58, %v2861_v58  ;;  %4011 = vst.msk [vmem:[%s7034_s2 + $0x190] sm:$0xf] %vm3910_vm1, %v4786_v59  ;;  %4139 = vst.msk [vmem:[%s7034_s2 + $0x390] sm:$0xf] %vm3910_vm1, %v4914_v60  ;;  %v2480_v5 = vmul.f32 0.2, %v5185_v3 }
 0x1b3   :  { %v4787_v1 = vpack.c.bf16 %v2731_v61, %v2731_v61  ;;  %v4915_v2 = vpack.c.bf16 %v2859_v62, %v2859_v62  ;;  %4014 = vst.msk [vmem:[%s7034_s2 + $0x19c] sm:$0xf] %vm3910_vm1, %v4789_v63  ;;  %v2608_v6 = vmul.f32 0.2, %v5313_v4  ;;  %v1767_v7 = vpop.f32.mrb[105].mxu0  ;;  %v2279_v8 = vpop.f32.mrb[105].mxu1 }
 0x1b4   :  { %4142 = vst.msk [vmem:[%s7034_s2 + $0x39c] sm:$0xf] %vm3910_vm1, %v4917_v0  ;;  %v2478_v9 = vmul.f32 0.2, %v1767_v7  ;;  %v2606_v10 = vmul.f32 0.2, %v2279_v8  ;;  %v2736_v13 = vmax.f32 %v5185_v3, %v2480_v5 }
 0x1b5   :  { %4012 = vst.msk [vmem:[%s7034_s2 + $0x194] sm:$0xf] %vm3910_vm1, %v4787_v1  ;;  %4140 = vst.msk [vmem:[%s7034_s2 + $0x394] sm:$0xf] %vm3910_vm1, %v4915_v2  ;;  %v5186_v11 = vpop.f32.mrb[106].mxu0  ;;  %v5314_v12 = vpop.f32.mrb[106].mxu1  ;;  %v2864_v14 = vmax.f32 %v5313_v4, %v2608_v6 }
 0x1b6   :  { %v2481_v15 = vmul.f32 0.2, %v5186_v11  ;;  %v2609_v16 = vmul.f32 0.2, %v5314_v12  ;;  %v1770_v17 = vpop.f32.mrb[107].mxu0  ;;  %v2282_v18 = vpop.f32.mrb[107].mxu1  ;;  %v2734_v19 = vmax.f32 %v1767_v7, %v2478_v9  ;;  %v2862_v20 = vmax.f32 %v2279_v8, %v2606_v10 }
 0x1b7   :  { %v2479_v21 = vmul.f32 0.2, %v1770_v17  ;;  %v2607_v22 = vmul.f32 0.2, %v2282_v18  ;;  %v4792_v23 = vpack.c.bf16 %v2736_v13, %v2736_v13  ;;  %v4920_v24 = vpack.c.bf16 %v2864_v14, %v2864_v14 }
 0x1b8   :  { %v2737_v25 = vmax.f32 %v5186_v11, %v2481_v15  ;;  %v2865_v26 = vmax.f32 %v5314_v12, %v2609_v16  ;;  %v4790_v27 = vpack.c.bf16 %v2734_v19, %v2734_v19  ;;  %v4918_v28 = vpack.c.bf16 %v2862_v20, %v2862_v20 }
 0x1b9   :  { %v2735_v29 = vmax.f32 %v1770_v17, %v2479_v21  ;;  %v2863_v30 = vmax.f32 %v2282_v18, %v2607_v22  ;;  %4017 = vst.msk [vmem:[%s7034_s2 + $0x1a8] sm:$0xf] %vm3910_vm1, %v4792_v23  ;;  %4145 = vst.msk [vmem:[%s7034_s2 + $0x3a8] sm:$0xf] %vm3910_vm1, %v4920_v24  ;;  %v5189_v35 = vpop.f32.mrb[108].mxu0 }
 0x1ba   :  { %v4793_v31 = vpack.c.bf16 %v2737_v25, %v2737_v25  ;;  %v4921_v32 = vpack.c.bf16 %v2865_v26, %v2865_v26  ;;  %4015 = vst.msk [vmem:[%s7034_s2 + $0x1a0] sm:$0xf] %vm3910_vm1, %v4790_v27  ;;  %4143 = vst.msk [vmem:[%s7034_s2 + $0x3a0] sm:$0xf] %vm3910_vm1, %v4918_v28  ;;  %v2484_v36 = vmul.f32 0.2, %v5189_v35 }
 0x1bb   :  { %v4791_v33 = vpack.c.bf16 %v2735_v29, %v2735_v29  ;;  %v4919_v34 = vpack.c.bf16 %v2863_v30, %v2863_v30  ;;  %v5317_v37 = vpop.f32.mrb[108].mxu1  ;;  %v1783_v38 = vpop.f32.mrb[109].mxu0 }
 0x1bc   :  { %4018 = vst.msk [vmem:[%s7034_s2 + $0x1ac] sm:$0xf] %vm3910_vm1, %v4793_v31  ;;  %4146 = vst.msk [vmem:[%s7034_s2 + $0x3ac] sm:$0xf] %vm3910_vm1, %v4921_v32  ;;  %v2612_v39 = vmul.f32 0.2, %v5317_v37  ;;  %v2740_v43 = vmax.f32 %v5189_v35, %v2484_v36 }
 0x1bd   :  { %4016 = vst.msk [vmem:[%s7034_s2 + $0x1a4] sm:$0xf] %vm3910_vm1, %v4791_v33  ;;  %4144 = vst.msk [vmem:[%s7034_s2 + $0x3a4] sm:$0xf] %vm3910_vm1, %v4919_v34  ;;  %v2482_v40 = vmul.f32 0.2, %v1783_v38 }
 0x1be   :  { %v2295_v41 = vpop.f32.mrb[109].mxu1  ;;  %v5190_v42 = vpop.f32.mrb[110].mxu0  ;;  %v2868_v48 = vmax.f32 %v5317_v37, %v2612_v39  ;;  %v4796_v53 = vpack.c.bf16 %v2740_v43, %v2740_v43 }
 0x1bf   :  { %v2610_v44 = vmul.f32 0.2, %v2295_v41  ;;  %v2485_v45 = vmul.f32 0.2, %v5190_v42  ;;  %v5318_v46 = vpop.f32.mrb[110].mxu1  ;;  %v1786_v47 = vpop.f32.mrb[111].mxu0  ;;  %v2738_v49 = vmax.f32 %v1783_v38, %v2482_v40 }
 0x1c0   :  { %v2613_v50 = vmul.f32 0.2, %v5318_v46  ;;  %v2483_v51 = vmul.f32 0.2, %v1786_v47  ;;  %v2298_v52 = vpop.f32.mrb[111].mxu1  ;;  %v4924_v57 = vpack.c.bf16 %v2868_v48, %v2868_v48 }
 0x1c1   :  { %v2866_v54 = vmax.f32 %v2295_v41, %v2610_v44  ;;  %v2741_v55 = vmax.f32 %v5190_v42, %v2485_v45  ;;  %v2611_v56 = vmul.f32 0.2, %v2298_v52  ;;  %v4794_v58 = vpack.c.bf16 %v2738_v49, %v2738_v49  ;;  %4021 = vst.msk [vmem:[%s7034_s2 + $0x1b8] sm:$0xf] %vm3910_vm1, %v4796_v53  ;;  %v5193_v2 = vpop.f32.mrb[112].mxu0 }
 0x1c2   :  { %v2869_v59 = vmax.f32 %v5318_v46, %v2613_v50  ;;  %v2739_v60 = vmax.f32 %v1786_v47, %v2483_v51  ;;  %4149 = vst.msk [vmem:[%s7034_s2 + $0x3b8] sm:$0xf] %vm3910_vm1, %v4924_v57  ;;  %v2488_v4 = vmul.f32 0.2, %v5193_v2  ;;  %v5321_v5 = vpop.f32.mrb[112].mxu1  ;;  %v1799_v6 = vpop.f32.mrb[113].mxu0 }
 0x1c3   :  { %v4922_v61 = vpack.c.bf16 %v2866_v54, %v2866_v54  ;;  %v4797_v62 = vpack.c.bf16 %v2741_v55, %v2741_v55  ;;  %v2867_v63 = vmax.f32 %v2298_v52, %v2611_v56  ;;  %4019 = vst.msk [vmem:[%s7034_s2 + $0x1b0] sm:$0xf] %vm3910_vm1, %v4794_v58  ;;  %v2616_v7 = vmul.f32 0.2, %v5321_v5  ;;  %v2311_v9 = vpop.f32.mrb[113].mxu1  ;;  %v5194_v10 = vpop.f32.mrb[114].mxu0 }
 0x1c4   :  { %v4925_v0 = vpack.c.bf16 %v2869_v59, %v2869_v59  ;;  %v4795_v1 = vpack.c.bf16 %v2739_v60, %v2739_v60  ;;  %v2486_v8 = vmul.f32 0.2, %v1799_v6  ;;  %v2744_v11 = vmax.f32 %v5193_v2, %v2488_v4  ;;  %v5322_v14 = vpop.f32.mrb[114].mxu1  ;;  %v1802_v15 = vpop.f32.mrb[115].mxu0 }
 0x1c5   :  { %4147 = vst.msk [vmem:[%s7034_s2 + $0x3b0] sm:$0xf] %vm3910_vm1, %v4922_v61  ;;  %4022 = vst.msk [vmem:[%s7034_s2 + $0x1bc] sm:$0xf] %vm3910_vm1, %v4797_v62  ;;  %v4923_v3 = vpack.c.bf16 %v2867_v63, %v2867_v63  ;;  %v2614_v12 = vmul.f32 0.2, %v2311_v9  ;;  %v2872_v16 = vmax.f32 %v5321_v5, %v2616_v7 }
 0x1c6   :  { %4150 = vst.msk [vmem:[%s7034_s2 + $0x3bc] sm:$0xf] %vm3910_vm1, %v4925_v0  ;;  %4020 = vst.msk [vmem:[%s7034_s2 + $0x1b4] sm:$0xf] %vm3910_vm1, %v4795_v1  ;;  %v2489_v13 = vmul.f32 0.2, %v5194_v10  ;;  %v2742_v17 = vmax.f32 %v1799_v6, %v2486_v8  ;;  %v4800_v21 = vpack.c.bf16 %v2744_v11, %v2744_v11 }
 0x1c7   :  { %4148 = vst.msk [vmem:[%s7034_s2 + $0x3b4] sm:$0xf] %vm3910_vm1, %v4923_v3  ;;  %v2617_v18 = vmul.f32 0.2, %v5322_v14  ;;  %v2487_v19 = vmul.f32 0.2, %v1802_v15  ;;  %v2870_v22 = vmax.f32 %v2311_v9, %v2614_v12  ;;  %v4928_v25 = vpack.c.bf16 %v2872_v16, %v2872_v16 }
 0x1c8   :  { %v2314_v20 = vpop.f32.mrb[115].mxu1  ;;  %v2745_v23 = vmax.f32 %v5194_v10, %v2489_v13  ;;  %v4798_v26 = vpack.c.bf16 %v2742_v17, %v2742_v17  ;;  %4025 = vst.msk [vmem:[%s7034_s2 + $0x1c8] sm:$0xf] %vm3910_vm1, %v4800_v21 }
 0x1c9   :  { %v2615_v24 = vmul.f32 0.2, %v2314_v20  ;;  %v2873_v27 = vmax.f32 %v5322_v14, %v2617_v18  ;;  %v2743_v28 = vmax.f32 %v1802_v15, %v2487_v19  ;;  %v4926_v29 = vpack.c.bf16 %v2870_v22, %v2870_v22  ;;  %4153 = vst.msk [vmem:[%s7034_s2 + $0x3c8] sm:$0xf] %vm3910_vm1, %v4928_v25  ;;  %v5197_v34 = vpop.f32.mrb[116].mxu0 }
 0x1ca   :  { %v4801_v30 = vpack.c.bf16 %v2745_v23, %v2745_v23  ;;  %4023 = vst.msk [vmem:[%s7034_s2 + $0x1c0] sm:$0xf] %vm3910_vm1, %v4798_v26  ;;  %v2492_v36 = vmul.f32 0.2, %v5197_v34  ;;  %v5325_v37 = vpop.f32.mrb[116].mxu1  ;;  %v1815_v38 = vpop.f32.mrb[117].mxu0 }
 0x1cb   :  { %v2871_v31 = vmax.f32 %v2314_v20, %v2615_v24  ;;  %v4929_v32 = vpack.c.bf16 %v2873_v27, %v2873_v27  ;;  %v4799_v33 = vpack.c.bf16 %v2743_v28, %v2743_v28  ;;  %4151 = vst.msk [vmem:[%s7034_s2 + $0x3c0] sm:$0xf] %vm3910_vm1, %v4926_v29  ;;  %v2620_v39 = vmul.f32 0.2, %v5325_v37  ;;  %v2327_v41 = vpop.f32.mrb[117].mxu1  ;;  %v5198_v42 = vpop.f32.mrb[118].mxu0 }
 0x1cc   :  { %4026 = vst.msk [vmem:[%s7034_s2 + $0x1cc] sm:$0xf] %vm3910_vm1, %v4801_v30  ;;  %v2490_v40 = vmul.f32 0.2, %v1815_v38  ;;  %v2748_v43 = vmax.f32 %v5197_v34, %v2492_v36  ;;  %v2618_v44 = vmul.f32 0.2, %v2327_v41 }
 0x1cd   :  { %v4927_v35 = vpack.c.bf16 %v2871_v31, %v2871_v31  ;;  %4154 = vst.msk [vmem:[%s7034_s2 + $0x3cc] sm:$0xf] %vm3910_vm1, %v4929_v32  ;;  %4024 = vst.msk [vmem:[%s7034_s2 + $0x1c4] sm:$0xf] %vm3910_vm1, %v4799_v33  ;;  %v2493_v45 = vmul.f32 0.2, %v5198_v42  ;;  %v2876_v48 = vmax.f32 %v5325_v37, %v2620_v39 }
 0x1ce   :  { %v5326_v46 = vpop.f32.mrb[118].mxu1  ;;  %v1818_v47 = vpop.f32.mrb[119].mxu0  ;;  %v2746_v49 = vmax.f32 %v1815_v38, %v2490_v40  ;;  %v4804_v53 = vpack.c.bf16 %v2748_v43, %v2748_v43  ;;  %v2874_v54 = vmax.f32 %v2327_v41, %v2618_v44 }
 0x1cf   :  { %4152 = vst.msk [vmem:[%s7034_s2 + $0x3c4] sm:$0xf] %vm3910_vm1, %v4927_v35  ;;  %v2621_v50 = vmul.f32 0.2, %v5326_v46  ;;  %v2491_v51 = vmul.f32 0.2, %v1818_v47  ;;  %v2749_v55 = vmax.f32 %v5198_v42, %v2493_v45  ;;  %v4932_v57 = vpack.c.bf16 %v2876_v48, %v2876_v48 }
 0x1d0   :  { %v2330_v52 = vpop.f32.mrb[119].mxu1  ;;  %v4802_v58 = vpack.c.bf16 %v2746_v49, %v2746_v49  ;;  %4029 = vst.msk [vmem:[%s7034_s2 + $0x1d8] sm:$0xf] %vm3910_vm1, %v4804_v53  ;;  %v4930_v61 = vpack.c.bf16 %v2874_v54, %v2874_v54 }
 0x1d1   :  { %v2619_v56 = vmul.f32 0.2, %v2330_v52  ;;  %v2877_v59 = vmax.f32 %v5326_v46, %v2621_v50  ;;  %v2747_v60 = vmax.f32 %v1818_v47, %v2491_v51  ;;  %v4805_v62 = vpack.c.bf16 %v2749_v55, %v2749_v55  ;;  %4157 = vst.msk [vmem:[%s7034_s2 + $0x3d8] sm:$0xf] %vm3910_vm1, %v4932_v57  ;;  %v5201_v2 = vpop.f32.mrb[120].mxu0 }
 0x1d2   :  { %4027 = vst.msk [vmem:[%s7034_s2 + $0x1d0] sm:$0xf] %vm3910_vm1, %v4802_v58  ;;  %4155 = vst.msk [vmem:[%s7034_s2 + $0x3d0] sm:$0xf] %vm3910_vm1, %v4930_v61  ;;  %v2496_v4 = vmul.f32 0.2, %v5201_v2 }
 0x1d3   :  { %v2875_v63 = vmax.f32 %v2330_v52, %v2619_v56  ;;  %v4933_v0 = vpack.c.bf16 %v2877_v59, %v2877_v59  ;;  %v4803_v1 = vpack.c.bf16 %v2747_v60, %v2747_v60  ;;  %4030 = vst.msk [vmem:[%s7034_s2 + $0x1dc] sm:$0xf] %vm3910_vm1, %v4805_v62  ;;  %v5329_v5 = vpop.f32.mrb[120].mxu1  ;;  %v1831_v6 = vpop.f32.mrb[121].mxu0 }
 0x1d4   :  { %v2624_v7 = vmul.f32 0.2, %v5329_v5  ;;  %v2494_v8 = vmul.f32 0.2, %v1831_v6  ;;  %v2343_v9 = vpop.f32.mrb[121].mxu1  ;;  %v5202_v10 = vpop.f32.mrb[122].mxu0  ;;  %v2752_v11 = vmax.f32 %v5201_v2, %v2496_v4 }
 0x1d5   :  { %v4931_v3 = vpack.c.bf16 %v2875_v63, %v2875_v63  ;;  %4158 = vst.msk [vmem:[%s7034_s2 + $0x3dc] sm:$0xf] %vm3910_vm1, %v4933_v0  ;;  %4028 = vst.msk [vmem:[%s7034_s2 + $0x1d4] sm:$0xf] %vm3910_vm1, %v4803_v1  ;;  %v2622_v12 = vmul.f32 0.2, %v2343_v9 }
 0x1d6   :  { %v2497_v13 = vmul.f32 0.2, %v5202_v10  ;;  %v5330_v14 = vpop.f32.mrb[122].mxu1  ;;  %v1834_v15 = vpop.f32.mrb[123].mxu0  ;;  %v2880_v16 = vmax.f32 %v5329_v5, %v2624_v7  ;;  %v2750_v17 = vmax.f32 %v1831_v6, %v2494_v8  ;;  %v4808_v21 = vpack.c.bf16 %v2752_v11, %v2752_v11 }
 0x1d7   :  { %4156 = vst.msk [vmem:[%s7034_s2 + $0x3d4] sm:$0xf] %vm3910_vm1, %v4931_v3  ;;  %v2625_v18 = vmul.f32 0.2, %v5330_v14  ;;  %v2495_v19 = vmul.f32 0.2, %v1834_v15  ;;  %v2878_v22 = vmax.f32 %v2343_v9, %v2622_v12 }
 0x1d8   :  { %v2346_v20 = vpop.f32.mrb[123].mxu1  ;;  %v2753_v23 = vmax.f32 %v5202_v10, %v2497_v13  ;;  %v4936_v25 = vpack.c.bf16 %v2880_v16, %v2880_v16  ;;  %v4806_v26 = vpack.c.bf16 %v2750_v17, %v2750_v17  ;;  %4033 = vst.msk [vmem:[%s7034_s2 + $0x1e8] sm:$0xf] %vm3910_vm1, %v4808_v21 }
 0x1d9   :  { %v2623_v24 = vmul.f32 0.2, %v2346_v20  ;;  %v2881_v27 = vmax.f32 %v5330_v14, %v2625_v18  ;;  %v2751_v28 = vmax.f32 %v1834_v15, %v2495_v19  ;;  %v4934_v29 = vpack.c.bf16 %v2878_v22, %v2878_v22  ;;  %v5205_v34 = vpop.f32.mrb[124].mxu0 }
 0x1da   :  { %v4809_v30 = vpack.c.bf16 %v2753_v23, %v2753_v23  ;;  %4161 = vst.msk [vmem:[%s7034_s2 + $0x3e8] sm:$0xf] %vm3910_vm1, %v4936_v25  ;;  %4031 = vst.msk [vmem:[%s7034_s2 + $0x1e0] sm:$0xf] %vm3910_vm1, %v4806_v26  ;;  %v2500_v36 = vmul.f32 0.2, %v5205_v34 }
 0x1db   :  { %v2879_v31 = vmax.f32 %v2346_v20, %v2623_v24  ;;  %v4937_v32 = vpack.c.bf16 %v2881_v27, %v2881_v27  ;;  %v4807_v33 = vpack.c.bf16 %v2751_v28, %v2751_v28  ;;  %4159 = vst.msk [vmem:[%s7034_s2 + $0x3e0] sm:$0xf] %vm3910_vm1, %v4934_v29  ;;  %v5333_v37 = vpop.f32.mrb[124].mxu1  ;;  %v1847_v38 = vpop.f32.mrb[125].mxu0 }
 0x1dc   :  { %4034 = vst.msk [vmem:[%s7034_s2 + $0x1ec] sm:$0xf] %vm3910_vm1, %v4809_v30  ;;  %v2628_v39 = vmul.f32 0.2, %v5333_v37  ;;  %v2498_v40 = vmul.f32 0.2, %v1847_v38  ;;  %v2756_v43 = vmax.f32 %v5205_v34, %v2500_v36 }
 0x1dd   :  { %v4935_v35 = vpack.c.bf16 %v2879_v31, %v2879_v31  ;;  %4162 = vst.msk [vmem:[%s7034_s2 + $0x3ec] sm:$0xf] %vm3910_vm1, %v4937_v32  ;;  %4032 = vst.msk [vmem:[%s7034_s2 + $0x1e4] sm:$0xf] %vm3910_vm1, %v4807_v33  ;;  %v2359_v41 = vpop.f32.mrb[125].mxu1  ;;  %v5206_v42 = vpop.f32.mrb[126].mxu0 }
 0x1de   :  { %v2626_v44 = vmul.f32 0.2, %v2359_v41  ;;  %v2501_v45 = vmul.f32 0.2, %v5206_v42  ;;  %v5334_v46 = vpop.f32.mrb[126].mxu1  ;;  %v1850_v47 = vpop.f32.mrb[127].mxu0  ;;  %v2884_v48 = vmax.f32 %v5333_v37, %v2628_v39  ;;  %v2754_v49 = vmax.f32 %v1847_v38, %v2498_v40 }
 0x1df   :  { %4160 = vst.msk [vmem:[%s7034_s2 + $0x3e4] sm:$0xf] %vm3910_vm1, %v4935_v35  ;;  %v2629_v50 = vmul.f32 0.2, %v5334_v46  ;;  %v2499_v51 = vmul.f32 0.2, %v1850_v47  ;;  %v4812_v53 = vpack.c.bf16 %v2756_v43, %v2756_v43 }
 0x1e0   :  { %v2362_v52 = vpop.f32.mrb[127].mxu1  ;;  %v2882_v54 = vmax.f32 %v2359_v41, %v2626_v44  ;;  %v2757_v55 = vmax.f32 %v5206_v42, %v2501_v45  ;;  %v4940_v57 = vpack.c.bf16 %v2884_v48, %v2884_v48  ;;  %v4810_v58 = vpack.c.bf16 %v2754_v49, %v2754_v49 }
 0x1e1   :  { %v2627_v56 = vmul.f32 0.2, %v2362_v52  ;;  %v2885_v59 = vmax.f32 %v5334_v46, %v2629_v50  ;;  %v2755_v60 = vmax.f32 %v1850_v47, %v2499_v51  ;;  %4037 = vst.msk [vmem:[%s7034_s2 + $0x1f8] sm:$0xf] %vm3910_vm1, %v4812_v53 }
 0x1e2   :  { %v4938_v61 = vpack.c.bf16 %v2882_v54, %v2882_v54  ;;  %v4813_v62 = vpack.c.bf16 %v2757_v55, %v2757_v55  ;;  %4165 = vst.msk [vmem:[%s7034_s2 + $0x3f8] sm:$0xf] %vm3910_vm1, %v4940_v57  ;;  %4035 = vst.msk [vmem:[%s7034_s2 + $0x1f0] sm:$0xf] %vm3910_vm1, %v4810_v58 }
 0x1e3   :  { %v2883_v63 = vmax.f32 %v2362_v52, %v2627_v56  ;;  %v4941_v0 = vpack.c.bf16 %v2885_v59, %v2885_v59  ;;  %v4811_v1 = vpack.c.bf16 %v2755_v60, %v2755_v60 }
 0x1e4   :  { %4163 = vst.msk [vmem:[%s7034_s2 + $0x3f0] sm:$0xf] %vm3910_vm1, %v4938_v61  ;;  %4038 = vst.msk [vmem:[%s7034_s2 + $0x1fc] sm:$0xf] %vm3910_vm1, %v4813_v62 }
 0x1e5   :  { %v4939_v2 = vpack.c.bf16 %v2883_v63, %v2883_v63  ;;  %4166 = vst.msk [vmem:[%s7034_s2 + $0x3fc] sm:$0xf] %vm3910_vm1, %v4941_v0  ;;  %4036 = vst.msk [vmem:[%s7034_s2 + $0x1f4] sm:$0xf] %vm3910_vm1, %v4811_v1 }
 0x1e7   :  { %4164 = vst.msk [vmem:[%s7034_s2 + $0x3f4] sm:$0xf] %vm3910_vm1, %v4939_v2 }

// kernel: _lambda_.6
= control target key start
LH: loop header
LB: loop body
LE: loop exit
PB: predicated region body
PF: predicated region fallthrough
CT: control target
= control target key end

     0   :  { %s2472_s15 = smov 0   ;;  %s2474_s16 = smov 0   ;;  %s3638_s0 = inlined_call_operand.vmem [shape: bf16[512,128], index: 0, kind: input, shape index: {}]   ;;  %s3639_s1 = inlined_call_operand.vmem [shape: bf16[128,16], index: 1, kind: input, shape index: {}]   ;;  %s3640_s2 = inlined_call_operand.vmem [shape: f32[1,16], index: 2, kind: input, shape index: {}]   ;;  %s3641_s3 = inlined_call_operand.vmem [shape: f32[1,16], index: 3, kind: input, shape index: {}]   ;;  %s3642_s4 = inlined_call_operand.vmem [shape: bf16[512,16], index: 4, kind: output, shape index: {}]  }
   0x1   :  { %s2476_s17 = smov 0  }
   0x2 LB: > { %s26_s18 = sadd.s32 1, %s2440_s16  ;;  %p2042_p0 = scmp.ge.s32.totalorder %s2444_s17, 1  ;;  %s2444_s17 = sphi %s2476_s17, %s14_s17   ;;  %s2440_s16 = sphi %s2474_s16, %s3694_s16   ;;  %s2436_s15 = sphi %s2472_s15, %s3693_s15  }
   0x3   : > { %p28_p1 = scmp.ge.s32.totalorder %s26_s18, 2  ;;  %p185_p2 = scmp.lt.s32.totalorder %s2444_s17, 3 }
   0x5   : > { %s3696_s18 = smov (%p28_p1, %s26_s18), 0  ;;  %p186_p3 = pnand %p2042_p0, %p185_p2 }
   0x6   : > { %p233_p4 = scmp.eq.s32.totalorder (!%p186_p3), %s2436_s15, 0 }
   0x7   : > { %189 = sbr.rel (%p186_p3) target bundleno = 544 (0x220), region = 36 }
   0xe   : > { %238 = sbr.rel (!%p233_p4) target bundleno = 21 (0x15), region = 40  ;;  %vm239_vm0 = vcmask (%p233_p4), 122880   ;;  %v2446_v0 = vmov (%p233_p4), 0.0  }
   0xf   : > { %240 = vst.msk [vmem:[#allocation3] sm:$0x1] (%p233_p4), %vm239_vm0, %v2446_v0  ;;  %241 = vst.msk [vmem:[#allocation4] sm:$0x1] (%p233_p4), %vm239_vm0, %v2446_v0 }
  0x15 PF: > { %p2044_p5 = scmp.ne.s32.totalorder %s2436_s15, 0 }
  0x16   : > { %v2380_v1 = vld [vmem:[%s3639_s1] sm:$0xff] (!%p2044_p5)   ;;  %v2381_v2 = vld [vmem:[%s3639_s1 + $0x8] sm:$0xff] (!%p2044_p5)   ;;  %v2382_v3 = vld [vmem:[%s3639_s1 + $0x10] sm:$0xff] (!%p2044_p5)   ;;  %vm889_vm1 = vcmask (!%p2044_p5), 130048   ;;  %vm1057_vm2 = vcmask (!%p2044_p5), 122880  }
  0x17   : > { %244 = sbr.rel (%p2044_p5) target bundleno = 414 (0x19e), region = 44  ;;  %2259 = vmatprep.subr.bf16.mxu0 (!%p2044_p5), %v2380_v1  ;;  %2339 = vmatprep.subr.bf16.mxu1 (!%p2044_p5), %v2380_v1  ;;  %v2383_v4 = vld [vmem:[%s3639_s1 + $0x18] sm:$0xff] (!%p2044_p5)   ;;  %v2388_v5 = vld [vmem:[%s3638_s0] sm:$0xff] (!%p2044_p5)   ;;  %v2385_v7 = vld [vmem:[%s3639_s1 + $0x28] sm:$0xff] (!%p2044_p5)  }
  0x18   : > { %2260 = vmatpush3.bf16.msra.mxu0 (!%p2044_p5), %v2380_v1  ;;  %2347 = vmatpush3.bf16.msra.mxu1 (!%p2044_p5), %v2380_v1  ;;  %v2384_v6 = vld [vmem:[%s3639_s1 + $0x20] sm:$0xff] (!%p2044_p5)   ;;  %v2386_v8 = vld [vmem:[%s3639_s1 + $0x30] sm:$0xff] (!%p2044_p5)   ;;  %v2387_v9 = vld [vmem:[%s3639_s1 + $0x38] sm:$0xff] (!%p2044_p5)  }
  0x19   : > { %2261 = vmatprep.subr.bf16.mxu0 (!%p2044_p5), %v2381_v2  ;;  %2340 = vmatprep.subr.bf16.mxu1 (!%p2044_p5), %v2381_v2  ;;  %v2404_v10 = vld [vmem:[%s3638_s0 + $0x80] sm:$0xff] (!%p2044_p5)   ;;  %v2389_v11 = vld [vmem:[%s3638_s0 + $0x8] sm:$0xff] (!%p2044_p5)   ;;  %v2390_v12 = vld [vmem:[%s3638_s0 + $0x10] sm:$0xff] (!%p2044_p5)  }
  0x1a   : > { %2275 = vmatprep.mubr.bf16.mxu0 (!%p2044_p5), %v2388_v5  ;;  %2307 = vmatprep.mubr.bf16.mxu1 (!%p2044_p5), %v2404_v10  ;;  %v2405_v13 = vld [vmem:[%s3638_s0 + $0x88] sm:$0xff] (!%p2044_p5)   ;;  %v2406_v14 = vld [vmem:[%s3638_s0 + $0x90] sm:$0xff] (!%p2044_p5)   ;;  %v2391_v15 = vld [vmem:[%s3638_s0 + $0x18] sm:$0xff] (!%p2044_p5)  }
  0x1b   : > { %v2392_v16 = vld [vmem:[%s3638_s0 + $0x20] sm:$0xff] (!%p2044_p5)   ;;  %v2407_v17 = vld [vmem:[%s3638_s0 + $0x98] sm:$0xff] (!%p2044_p5)   ;;  %v2393_v19 = vld [vmem:[%s3638_s0 + $0x28] sm:$0xff] (!%p2044_p5)  }
  0x1c   : > { %2262 = vmatpush3.bf16.msra.mxu0 (!%p2044_p5), %v2381_v2  ;;  %2348 = vmatpush3.bf16.msra.mxu1 (!%p2044_p5), %v2381_v2  ;;  %v2408_v18 = vld [vmem:[%s3638_s0 + $0xa0] sm:$0xff] (!%p2044_p5)   ;;  %v2409_v20 = vld [vmem:[%s3638_s0 + $0xa8] sm:$0xff] (!%p2044_p5)   ;;  %v2394_v21 = vld [vmem:[%s3638_s0 + $0x30] sm:$0xff] (!%p2044_p5)  }
  0x1d   : > { %2263 = vmatprep.subr.bf16.mxu0 (!%p2044_p5), %v2382_v3  ;;  %2341 = vmatprep.subr.bf16.mxu1 (!%p2044_p5), %v2382_v3  ;;  %v2410_v22 = vld [vmem:[%s3638_s0 + $0xb0] sm:$0xff] (!%p2044_p5)   ;;  %v2395_v23 = vld [vmem:[%s3638_s0 + $0x38] sm:$0xff] (!%p2044_p5)   ;;  %v2396_v25 = vld [vmem:[%s3638_s0 + $0x40] sm:$0xff] (!%p2044_p5)  }
  0x1e   : > { %v2411_v24 = vld [vmem:[%s3638_s0 + $0xb8] sm:$0xff]   ;;  %v2412_v26 = vld [vmem:[%s3638_s0 + $0xc0] sm:$0xff]   ;;  %v2397_v27 = vld [vmem:[%s3638_s0 + $0x48] sm:$0xff]  }
  0x1f   : > { %v2413_v28 = vld [vmem:[%s3638_s0 + $0xc8] sm:$0xff]   ;;  %v2398_v29 = vld [vmem:[%s3638_s0 + $0x50] sm:$0xff]   ;;  %v2399_v31 = vld [vmem:[%s3638_s0 + $0x58] sm:$0xff]  }
  0x20   : > { %2264 = vmatpush3.bf16.msra.mxu0 %v2382_v3  ;;  %2349 = vmatpush3.bf16.msra.mxu1 %v2382_v3  ;;  %v2414_v30 = vld [vmem:[%s3638_s0 + $0xd0] sm:$0xff]   ;;  %v2415_v32 = vld [vmem:[%s3638_s0 + $0xd8] sm:$0xff]   ;;  %v2400_v33 = vld [vmem:[%s3638_s0 + $0x60] sm:$0xff]  }
  0x21   : > { %2265 = vmatprep.subr.bf16.mxu0 %v2383_v4  ;;  %2342 = vmatprep.subr.bf16.mxu1 %v2383_v4  ;;  %v2416_v34 = vld [vmem:[%s3638_s0 + $0xe0] sm:$0xff]   ;;  %v2401_v35 = vld [vmem:[%s3638_s0 + $0x68] sm:$0xff]   ;;  %v2402_v37 = vld [vmem:[%s3638_s0 + $0x70] sm:$0xff]  }
  0x22   : > { %v2417_v36 = vld [vmem:[%s3638_s0 + $0xe8] sm:$0xff]   ;;  %v2418_v38 = vld [vmem:[%s3638_s0 + $0xf0] sm:$0xff]   ;;  %v2403_v39 = vld [vmem:[%s3638_s0 + $0x78] sm:$0xff]  }
  0x23   : > { %v2419_v40 = vld [vmem:[%s3638_s0 + $0xf8] sm:$0xff]  }
  0x24   : > { %2266 = vmatpush3.bf16.msra.mxu0 %v2383_v4  ;;  %2350 = vmatpush3.bf16.msra.mxu1 %v2383_v4 }
  0x25   : > { %2267 = vmatprep.subr.bf16.mxu0 %v2384_v6  ;;  %2343 = vmatprep.subr.bf16.mxu1 %v2384_v6 }
  0x28   : > { %2268 = vmatpush3.bf16.msra.mxu0 %v2384_v6  ;;  %2351 = vmatpush3.bf16.msra.mxu1 %v2384_v6 }
  0x29   : > { %2269 = vmatprep.subr.bf16.mxu0 %v2385_v7  ;;  %2344 = vmatprep.subr.bf16.mxu1 %v2385_v7 }
  0x2c   : > { %2270 = vmatpush3.bf16.msra.mxu0 %v2385_v7  ;;  %2352 = vmatpush3.bf16.msra.mxu1 %v2385_v7 }
  0x2d   : > { %2271 = vmatprep.subr.bf16.mxu0 %v2386_v8  ;;  %2345 = vmatprep.subr.bf16.mxu1 %v2386_v8 }
  0x30   : > { %2272 = vmatpush3.bf16.msra.mxu0 %v2386_v8  ;;  %2353 = vmatpush3.bf16.msra.mxu1 %v2386_v8 }
  0x31   : > { %2273 = vmatprep.subr.bf16.mxu0 %v2387_v9  ;;  %2346 = vmatprep.subr.bf16.mxu1 %v2387_v9 }
  0x34   : > { %2274 = vmatpush3.bf16.msra.mxu0 %v2387_v9  ;;  %2354 = vmatpush3.bf16.msra.mxu1 %v2387_v9 }
  0x37   : > { %2276 = vmatmul.mubr.bf16.vlgmr.msra.gmra.mrb[0].mxu0 %v2389_v11  ;;  %2308 = vmatmul.mubr.bf16.vlgmr.msra.gmra.mrb[0].mxu1 %v2405_v13 }
  0x38   : > { %2279 = vmatprep.mubr.bf16.mxu0 %v2390_v12  ;;  %2311 = vmatprep.mubr.bf16.mxu1 %v2406_v14 }
  0x3f   : > { %2280 = vmatmul.mubr.bf16.gmra.mrb[4].mxu0 %v2391_v15  ;;  %2312 = vmatmul.mubr.bf16.gmra.mrb[4].mxu1 %v2407_v17 }
  0x40   : > { %2283 = vmatprep.mubr.bf16.mxu0 %v2392_v16  ;;  %2315 = vmatprep.mubr.bf16.mxu1 %v2408_v18 }
  0x47   : > { %2284 = vmatmul.mubr.bf16.gmra.mrb[8].mxu0 %v2393_v19  ;;  %2316 = vmatmul.mubr.bf16.gmra.mrb[8].mxu1 %v2409_v20 }
  0x48   : > { %2287 = vmatprep.mubr.bf16.mxu0 %v2394_v21  ;;  %2319 = vmatprep.mubr.bf16.mxu1 %v2410_v22 }
  0x4f   : > { %2288 = vmatmul.mubr.bf16.gmra.mrb[12].mxu0 %v2395_v23  ;;  %2320 = vmatmul.mubr.bf16.gmra.mrb[12].mxu1 %v2411_v24 }
  0x50   : > { %2291 = vmatprep.mubr.bf16.mxu0 %v2396_v25  ;;  %2323 = vmatprep.mubr.bf16.mxu1 %v2412_v26 }
  0x57   : > { %2292 = vmatmul.mubr.bf16.gmra.mrb[16].mxu0 %v2397_v27  ;;  %2324 = vmatmul.mubr.bf16.gmra.mrb[16].mxu1 %v2413_v28 }
  0x58   : > { %2295 = vmatprep.mubr.bf16.mxu0 %v2398_v29  ;;  %2327 = vmatprep.mubr.bf16.mxu1 %v2414_v30 }
  0x5f   : > { %2296 = vmatmul.mubr.bf16.gmra.mrb[20].mxu0 %v2399_v31  ;;  %2328 = vmatmul.mubr.bf16.gmra.mrb[20].mxu1 %v2415_v32 }
  0x60   : > { %2299 = vmatprep.mubr.bf16.mxu0 %v2400_v33  ;;  %2331 = vmatprep.mubr.bf16.mxu1 %v2416_v34 }
  0x67   : > { %2300 = vmatmul.mubr.bf16.gmra.mrb[24].mxu0 %v2401_v35  ;;  %2332 = vmatmul.mubr.bf16.gmra.mrb[24].mxu1 %v2417_v36 }
  0x68   : > { %2303 = vmatprep.mubr.bf16.mxu0 %v2402_v37  ;;  %2335 = vmatprep.mubr.bf16.mxu1 %v2418_v38 }
  0x6f   : > { %2304 = vmatmul.mubr.bf16.gmra.mrb[28].mxu0 %v2403_v39  ;;  %2336 = vmatmul.mubr.bf16.gmra.mrb[28].mxu1 %v2419_v40 }
 0x10a   : > { %v2277_v41 = vpop.f32.mrb[0].mxu0  ;;  %v2614_v42 = vpop.f32.mrb[0].mxu1 }
 0x10b   : > { %v599_v43 = vpop.f32.mrb[1].mxu0  ;;  %v2616_v44 = vpop.f32.mrb[1].mxu1  ;;  %v1062_v48 = vmul.f32 %v2277_v41, %v2277_v41  ;;  %v926_v56 = vsel %vm889_vm1, %v2277_v41, 0.0 }
 0x10c   : > { %v1060_v45 = vmul.f32 %v599_v43, %v599_v43  ;;  %v2278_v46 = vpop.f32.mrb[2].mxu0  ;;  %v2618_v47 = vpop.f32.mrb[2].mxu1  ;;  %v923_v52 = vsel %vm889_vm1, %v599_v43, 0.0 }
 0x10d   : > { %v855_v49 = vpack.c.bf16 %v2278_v46, %v2277_v41  ;;  %v602_v50 = vpop.f32.mrb[3].mxu0  ;;  %v2620_v51 = vpop.f32.mrb[3].mxu1  ;;  %v1063_v59 = vmul.f32 %v2278_v46, %v2278_v46  ;;  %v871_v61 = vpack.c.bf16 %v2618_v47, %v2614_v42  ;;  %v1127_v1 = vsel %vm889_vm1, %v1062_v48, 0.0 }
 0x10e   : > { %v854_v53 = vpack.c.bf16 %v602_v50, %v599_v43  ;;  %v924_v54 = vsel %vm889_vm1, %v602_v50, 0.0  ;;  %v1061_v55 = vmul.f32 %v602_v50, %v602_v50  ;;  %v1124_v58 = vsel %vm889_vm1, %v1060_v45, 0.0 }
 0x10f   : > { %891 = vst.msk [vmem:[#allocation2 + $0x8] sm:$0xff] %vm889_vm1, %v855_v49  ;;  %v925_v57 = vadd.f32 %v924_v54, %v923_v52  ;;  %v870_v0 = vpack.c.bf16 %v2620_v51, %v2616_v44  ;;  %v928_v2 = vsel %vm889_vm1, %v2278_v46, 0.0  ;;  %907 = vst.msk [vmem:[#allocation2 + $0x88] sm:$0xff] %vm889_vm1, %v871_v61  ;;  %v1129_v9 = vsel %vm889_vm1, %v1063_v59, 0.0 }
 0x110   : > { %890 = vst.msk [vmem:[#allocation2] sm:$0xff] %vm889_vm1, %v854_v53  ;;  %v1125_v60 = vsel %vm889_vm1, %v1061_v55, 0.0 }
 0x111   : > { %v927_v62 = vadd.f32 %v926_v56, %v925_v57  ;;  %v1126_v63 = vadd.f32 %v1125_v60, %v1124_v58  ;;  %906 = vst.msk [vmem:[#allocation2 + $0x80] sm:$0xff] %vm889_vm1, %v870_v0 }
 0x112   : > { %v2281_v3 = vpop.f32.mrb[4].mxu0  ;;  %v2636_v4 = vpop.f32.mrb[4].mxu1 }
 0x113   : > { %v1128_v5 = vadd.f32 %v1127_v1, %v1126_v63  ;;  %v615_v6 = vpop.f32.mrb[5].mxu0  ;;  %v929_v7 = vadd.f32 %v928_v2, %v927_v62  ;;  %v2639_v8 = vpop.f32.mrb[5].mxu1  ;;  %v1066_v21 = vmul.f32 %v2281_v3, %v2281_v3  ;;  %v934_v26 = vsel %vm889_vm1, %v2281_v3, 0.0 }
 0x114   : > { %v930_v10 = vsel %vm889_vm1, %v615_v6, 0.0  ;;  %v1064_v11 = vmul.f32 %v615_v6, %v615_v6  ;;  %v2282_v12 = vpop.f32.mrb[6].mxu0  ;;  %v2643_v13 = vpop.f32.mrb[6].mxu1 }
 0x115   : > { %v931_v14 = vadd.f32 %v930_v10, %v929_v7  ;;  %v1130_v15 = vadd.f32 %v1129_v9, %v1128_v5  ;;  %v857_v16 = vpack.c.bf16 %v2282_v12, %v2281_v3  ;;  %v618_v17 = vpop.f32.mrb[7].mxu0  ;;  %v2645_v18 = vpop.f32.mrb[7].mxu1  ;;  %v1067_v27 = vmul.f32 %v2282_v12, %v2282_v12 }
 0x116   : > { %v1131_v19 = vsel %vm889_vm1, %v1064_v11, 0.0  ;;  %v856_v20 = vpack.c.bf16 %v618_v17, %v615_v6  ;;  %v932_v23 = vsel %vm889_vm1, %v618_v17, 0.0  ;;  %v1065_v24 = vmul.f32 %v618_v17, %v618_v17 }
 0x117   : > { %v1132_v22 = vadd.f32 %v1131_v19, %v1130_v15  ;;  %893 = vst.msk [vmem:[#allocation2 + $0x18] sm:$0xff] %vm889_vm1, %v857_v16  ;;  %v933_v25 = vadd.f32 %v932_v23, %v931_v14  ;;  %v873_v29 = vpack.c.bf16 %v2643_v13, %v2636_v4  ;;  %v1135_v34 = vsel %vm889_vm1, %v1066_v21, 0.0 }
 0x118   : > { %892 = vst.msk [vmem:[#allocation2 + $0x10] sm:$0xff] %vm889_vm1, %v856_v20  ;;  %v1133_v28 = vsel %vm889_vm1, %v1065_v24, 0.0  ;;  %v936_v35 = vsel %vm889_vm1, %v2282_v12, 0.0  ;;  %v872_v37 = vpack.c.bf16 %v2645_v18, %v2639_v8  ;;  %v1137_v48 = vsel %vm889_vm1, %v1067_v27, 0.0 }
 0x119   : > { %v935_v30 = vadd.f32 %v934_v26, %v933_v25  ;;  %v1134_v31 = vadd.f32 %v1133_v28, %v1132_v22  ;;  %909 = vst.msk [vmem:[#allocation2 + $0x98] sm:$0xff] %vm889_vm1, %v873_v29 }
 0x11a   : > { %v2285_v32 = vpop.f32.mrb[8].mxu0  ;;  %v2655_v33 = vpop.f32.mrb[8].mxu1  ;;  %908 = vst.msk [vmem:[#allocation2 + $0x90] sm:$0xff] %vm889_vm1, %v872_v37 }
 0x11b   : > { %v631_v36 = vpop.f32.mrb[9].mxu0  ;;  %v2662_v38 = vpop.f32.mrb[9].mxu1  ;;  %v1136_v39 = vadd.f32 %v1135_v34, %v1134_v31  ;;  %v937_v40 = vadd.f32 %v936_v35, %v935_v30  ;;  %v1070_v57 = vmul.f32 %v2285_v32, %v2285_v32  ;;  %v942_v62 = vsel %vm889_vm1, %v2285_v32, 0.0 }
 0x11c   : > { %v938_v41 = vsel %vm889_vm1, %v631_v36, 0.0  ;;  %v1068_v43 = vmul.f32 %v631_v36, %v631_v36  ;;  %v2286_v45 = vpop.f32.mrb[10].mxu0  ;;  %v2665_v46 = vpop.f32.mrb[10].mxu1 }
 0x11d   : > { %v859_v49 = vpack.c.bf16 %v2286_v45, %v2285_v32  ;;  %v634_v50 = vpop.f32.mrb[11].mxu0  ;;  %v2669_v52 = vpop.f32.mrb[11].mxu1  ;;  %v939_v53 = vadd.f32 %v938_v41, %v937_v40  ;;  %v1138_v54 = vadd.f32 %v1137_v48, %v1136_v39  ;;  %v1071_v63 = vmul.f32 %v2286_v45, %v2286_v45 }
 0x11e   : > { %v1139_v55 = vsel %vm889_vm1, %v1068_v43, 0.0  ;;  %v858_v56 = vpack.c.bf16 %v634_v50, %v631_v36  ;;  %v940_v58 = vsel %vm889_vm1, %v634_v50, 0.0  ;;  %v1069_v59 = vmul.f32 %v634_v50, %v634_v50 }
 0x11f   : > { %895 = vst.msk [vmem:[#allocation2 + $0x28] sm:$0xff] %vm889_vm1, %v859_v49  ;;  %v1140_v60 = vadd.f32 %v1139_v55, %v1138_v54  ;;  %v941_v61 = vadd.f32 %v940_v58, %v939_v53  ;;  %v875_v5 = vpack.c.bf16 %v2665_v46, %v2655_v33  ;;  %v1143_v7 = vsel %vm889_vm1, %v1070_v57, 0.0 }
 0x120   : > { %894 = vst.msk [vmem:[#allocation2 + $0x20] sm:$0xff] %vm889_vm1, %v858_v56  ;;  %v1141_v0 = vsel %vm889_vm1, %v1069_v59, 0.0  ;;  %v944_v9 = vsel %vm889_vm1, %v2286_v45, 0.0  ;;  %v1145_v20 = vsel %vm889_vm1, %v1071_v63, 0.0  ;;  %v874_v34 = vpack.c.bf16 %v2669_v52, %v2662_v38 }
 0x121   : > { %v943_v1 = vadd.f32 %v942_v62, %v941_v61  ;;  %v1142_v2 = vadd.f32 %v1141_v0, %v1140_v60  ;;  %911 = vst.msk [vmem:[#allocation2 + $0xa8] sm:$0xff] %vm889_vm1, %v875_v5 }
 0x122   : > { %v2289_v3 = vpop.f32.mrb[12].mxu0  ;;  %v2679_v6 = vpop.f32.mrb[12].mxu1  ;;  %910 = vst.msk [vmem:[#allocation2 + $0xa0] sm:$0xff] %vm889_vm1, %v874_v34 }
 0x123   : > { %v647_v10 = vpop.f32.mrb[13].mxu0  ;;  %v2683_v11 = vpop.f32.mrb[13].mxu1  ;;  %v1144_v12 = vadd.f32 %v1143_v7, %v1142_v2  ;;  %v945_v14 = vadd.f32 %v944_v9, %v943_v1  ;;  %v1074_v28 = vmul.f32 %v2289_v3, %v2289_v3  ;;  %v950_v35 = vsel %vm889_vm1, %v2289_v3, 0.0 }
 0x124   : > { %v946_v15 = vsel %vm889_vm1, %v647_v10, 0.0  ;;  %v1072_v16 = vmul.f32 %v647_v10, %v647_v10  ;;  %v2290_v17 = vpop.f32.mrb[14].mxu0  ;;  %v2687_v19 = vpop.f32.mrb[14].mxu1 }
 0x125   : > { %v861_v21 = vpack.c.bf16 %v2290_v17, %v2289_v3  ;;  %v650_v22 = vpop.f32.mrb[15].mxu0  ;;  %v2690_v23 = vpop.f32.mrb[15].mxu1  ;;  %v947_v24 = vadd.f32 %v946_v15, %v945_v14  ;;  %v1146_v25 = vadd.f32 %v1145_v20, %v1144_v12  ;;  %v1075_v36 = vmul.f32 %v2290_v17, %v2290_v17 }
 0x126   : > { %v1147_v26 = vsel %vm889_vm1, %v1072_v16, 0.0  ;;  %v860_v27 = vpack.c.bf16 %v650_v22, %v647_v10  ;;  %v948_v29 = vsel %vm889_vm1, %v650_v22, 0.0  ;;  %v1073_v30 = vmul.f32 %v650_v22, %v650_v22 }
 0x127   : > { %897 = vst.msk [vmem:[#allocation2 + $0x38] sm:$0xff] %vm889_vm1, %v861_v21  ;;  %v1148_v31 = vadd.f32 %v1147_v26, %v1146_v25  ;;  %v949_v32 = vadd.f32 %v948_v29, %v947_v24  ;;  %v1151_v45 = vsel %vm889_vm1, %v1074_v28, 0.0  ;;  %v952_v48 = vsel %vm889_vm1, %v2290_v17, 0.0 }
 0x128   : > { %896 = vst.msk [vmem:[#allocation2 + $0x30] sm:$0xff] %vm889_vm1, %v860_v27  ;;  %v1149_v37 = vsel %vm889_vm1, %v1073_v30, 0.0  ;;  %v1153_v59 = vsel %vm889_vm1, %v1075_v36, 0.0  ;;  %v877_v12 = vpack.c.bf16 %v2687_v19, %v2679_v6  ;;  %v876_v17 = vpack.c.bf16 %v2690_v23, %v2683_v11 }
 0x129   : > { %v951_v39 = vadd.f32 %v950_v35, %v949_v32  ;;  %v1150_v40 = vadd.f32 %v1149_v37, %v1148_v31 }
 0x12a   : > { %v2293_v41 = vpop.f32.mrb[16].mxu0  ;;  %v2701_v43 = vpop.f32.mrb[16].mxu1  ;;  %913 = vst.msk [vmem:[#allocation2 + $0xb8] sm:$0xff] %vm889_vm1, %v877_v12  ;;  %912 = vst.msk [vmem:[#allocation2 + $0xb0] sm:$0xff] %vm889_vm1, %v876_v17 }
 0x12b   : > { %v663_v49 = vpop.f32.mrb[17].mxu0  ;;  %v2705_v50 = vpop.f32.mrb[17].mxu1  ;;  %v1152_v53 = vadd.f32 %v1151_v45, %v1150_v40  ;;  %v953_v54 = vadd.f32 %v952_v48, %v951_v39  ;;  %v1078_v3 = vmul.f32 %v2293_v41, %v2293_v41  ;;  %v958_v14 = vsel %vm889_vm1, %v2293_v41, 0.0 }
 0x12c   : > { %v954_v55 = vsel %vm889_vm1, %v663_v49, 0.0  ;;  %v1076_v56 = vmul.f32 %v663_v49, %v663_v49  ;;  %v2294_v57 = vpop.f32.mrb[18].mxu0  ;;  %v2708_v58 = vpop.f32.mrb[18].mxu1 }
 0x12d   : > { %v863_v60 = vpack.c.bf16 %v2294_v57, %v2293_v41  ;;  %v666_v61 = vpop.f32.mrb[19].mxu0  ;;  %v2711_v62 = vpop.f32.mrb[19].mxu1  ;;  %v955_v63 = vadd.f32 %v954_v55, %v953_v54  ;;  %v1154_v0 = vadd.f32 %v1153_v59, %v1152_v53  ;;  %v1079_v15 = vmul.f32 %v2294_v57, %v2294_v57 }
 0x12e   : > { %v1155_v1 = vsel %vm889_vm1, %v1076_v56, 0.0  ;;  %v862_v2 = vpack.c.bf16 %v666_v61, %v663_v49  ;;  %v956_v5 = vsel %vm889_vm1, %v666_v61, 0.0  ;;  %v1077_v7 = vmul.f32 %v666_v61, %v666_v61 }
 0x12f   : > { %899 = vst.msk [vmem:[#allocation2 + $0x48] sm:$0xff] %vm889_vm1, %v863_v60  ;;  %v1156_v9 = vadd.f32 %v1155_v1, %v1154_v0  ;;  %v957_v10 = vadd.f32 %v956_v5, %v955_v63  ;;  %v1159_v25 = vsel %vm889_vm1, %v1078_v3, 0.0  ;;  %v960_v26 = vsel %vm889_vm1, %v2294_v57, 0.0 }
 0x130   : > { %898 = vst.msk [vmem:[#allocation2 + $0x40] sm:$0xff] %vm889_vm1, %v862_v2  ;;  %v1157_v16 = vsel %vm889_vm1, %v1077_v7, 0.0  ;;  %v1161_v36 = vsel %vm889_vm1, %v1079_v15, 0.0  ;;  %v879_v63 = vpack.c.bf16 %v2708_v58, %v2701_v43 }
 0x131   : > { %v959_v20 = vadd.f32 %v958_v14, %v957_v10  ;;  %v1158_v21 = vadd.f32 %v1157_v16, %v1156_v9 }
 0x132   : > { %v2297_v22 = vpop.f32.mrb[20].mxu0  ;;  %v2724_v24 = vpop.f32.mrb[20].mxu1  ;;  %915 = vst.msk [vmem:[#allocation2 + $0xc8] sm:$0xff] %vm889_vm1, %v879_v63 }
 0x133   : > { %v679_v27 = vpop.f32.mrb[21].mxu0  ;;  %v2729_v28 = vpop.f32.mrb[21].mxu1  ;;  %v1160_v29 = vadd.f32 %v1159_v25, %v1158_v21  ;;  %v961_v30 = vadd.f32 %v960_v26, %v959_v20  ;;  %v1082_v53 = vmul.f32 %v2297_v22, %v2297_v22  ;;  %v966_v59 = vsel %vm889_vm1, %v2297_v22, 0.0 }
 0x134   : > { %v962_v31 = vsel %vm889_vm1, %v679_v27, 0.0  ;;  %v1080_v32 = vmul.f32 %v679_v27, %v679_v27  ;;  %v2298_v34 = vpop.f32.mrb[22].mxu0  ;;  %v2732_v35 = vpop.f32.mrb[22].mxu1 }
 0x135   : > { %v865_v37 = vpack.c.bf16 %v2298_v34, %v2297_v22  ;;  %v682_v39 = vpop.f32.mrb[23].mxu0  ;;  %v2735_v40 = vpop.f32.mrb[23].mxu1  ;;  %v963_v41 = vadd.f32 %v962_v31, %v961_v30  ;;  %v1162_v45 = vadd.f32 %v1161_v36, %v1160_v29  ;;  %v1083_v60 = vmul.f32 %v2298_v34, %v2298_v34 }
 0x136   : > { %v1163_v48 = vsel %vm889_vm1, %v1080_v32, 0.0  ;;  %v864_v49 = vpack.c.bf16 %v682_v39, %v679_v27  ;;  %v964_v54 = vsel %vm889_vm1, %v682_v39, 0.0  ;;  %v1081_v55 = vmul.f32 %v682_v39, %v682_v39 }
 0x137   : > { %901 = vst.msk [vmem:[#allocation2 + $0x58] sm:$0xff] %vm889_vm1, %v865_v37  ;;  %v1164_v56 = vadd.f32 %v1163_v48, %v1162_v45  ;;  %v965_v57 = vadd.f32 %v964_v54, %v963_v41  ;;  %v1167_v5 = vsel %vm889_vm1, %v1082_v53, 0.0  ;;  %v968_v7 = vsel %vm889_vm1, %v2298_v34, 0.0 }
 0x138   : > { %900 = vst.msk [vmem:[#allocation2 + $0x50] sm:$0xff] %vm889_vm1, %v864_v49  ;;  %v1165_v61 = vsel %vm889_vm1, %v1081_v55, 0.0  ;;  %v1169_v21 = vsel %vm889_vm1, %v1083_v60, 0.0  ;;  %v878_v41 = vpack.c.bf16 %v2711_v62, %v2705_v50 }
 0x139   : > { %v967_v0 = vadd.f32 %v966_v59, %v965_v57  ;;  %v1166_v1 = vadd.f32 %v1165_v61, %v1164_v56 }
 0x13a   : > { %v2301_v2 = vpop.f32.mrb[24].mxu0  ;;  %v2745_v3 = vpop.f32.mrb[24].mxu1  ;;  %914 = vst.msk [vmem:[#allocation2 + $0xc0] sm:$0xff] %vm889_vm1, %v878_v41  ;;  %v880_v41 = vpack.c.bf16 %v2735_v40, %v2729_v28 }
 0x13b   : > { %v695_v9 = vpop.f32.mrb[25].mxu0  ;;  %v2750_v10 = vpop.f32.mrb[25].mxu1  ;;  %v1168_v12 = vadd.f32 %v1167_v5, %v1166_v1  ;;  %v969_v14 = vadd.f32 %v968_v7, %v967_v0  ;;  %v1086_v32 = vmul.f32 %v2301_v2, %v2301_v2  ;;  %v974_v45 = vsel %vm889_vm1, %v2301_v2, 0.0 }
 0x13c   : > { %v970_v15 = vsel %vm889_vm1, %v695_v9, 0.0  ;;  %v1084_v16 = vmul.f32 %v695_v9, %v695_v9  ;;  %v2302_v17 = vpop.f32.mrb[26].mxu0  ;;  %v2753_v20 = vpop.f32.mrb[26].mxu1  ;;  %916 = vst.msk [vmem:[#allocation2 + $0xd0] sm:$0xff] %vm889_vm1, %v880_v41 }
 0x13d   : > { %v867_v22 = vpack.c.bf16 %v2302_v17, %v2301_v2  ;;  %v698_v25 = vpop.f32.mrb[27].mxu0  ;;  %v2756_v26 = vpop.f32.mrb[27].mxu1  ;;  %v971_v27 = vadd.f32 %v970_v15, %v969_v14  ;;  %v1170_v29 = vadd.f32 %v1169_v21, %v1168_v12  ;;  %v1087_v48 = vmul.f32 %v2302_v17, %v2302_v17 }
 0x13e   : > { %v1171_v30 = vsel %vm889_vm1, %v1084_v16, 0.0  ;;  %v866_v31 = vpack.c.bf16 %v698_v25, %v695_v9  ;;  %v972_v34 = vsel %vm889_vm1, %v698_v25, 0.0  ;;  %v1085_v36 = vmul.f32 %v698_v25, %v698_v25 }
 0x13f   : > { %903 = vst.msk [vmem:[#allocation2 + $0x68] sm:$0xff] %vm889_vm1, %v867_v22  ;;  %v1172_v37 = vadd.f32 %v1171_v30, %v1170_v29  ;;  %v973_v39 = vadd.f32 %v972_v34, %v971_v27  ;;  %v1175_v57 = vsel %vm889_vm1, %v1086_v32, 0.0  ;;  %v976_v59 = vsel %vm889_vm1, %v2302_v17, 0.0 }
 0x140   : > { %902 = vst.msk [vmem:[#allocation2 + $0x60] sm:$0xff] %vm889_vm1, %v866_v31  ;;  %v1173_v49 = vsel %vm889_vm1, %v1085_v36, 0.0  ;;  %v1177_v9 = vsel %vm889_vm1, %v1087_v48, 0.0  ;;  %v1092_v32 = vmul.f32 %v2616_v44, %v2616_v44  ;;  %v881_v34 = vpack.c.bf16 %v2732_v35, %v2724_v24 }
 0x141   : > { %v975_v53 = vadd.f32 %v974_v45, %v973_v39  ;;  %v1174_v54 = vadd.f32 %v1173_v49, %v1172_v37 }
 0x142   : > { %v2305_v55 = vpop.f32.mrb[28].mxu0  ;;  %v2767_v56 = vpop.f32.mrb[28].mxu1  ;;  %917 = vst.msk [vmem:[#allocation2 + $0xd8] sm:$0xff] %vm889_vm1, %v881_v34 }
 0x143   : > { %v711_v60 = vpop.f32.mrb[29].mxu0  ;;  %v2771_v61 = vpop.f32.mrb[29].mxu1  ;;  %v1176_v63 = vadd.f32 %v1175_v57, %v1174_v54  ;;  %v977_v0 = vadd.f32 %v976_v59, %v975_v53  ;;  %v1090_v25 = vmul.f32 %v2305_v55, %v2305_v55  ;;  %v982_v36 = vsel %vm889_vm1, %v2305_v55, 0.0 }
 0x144   : > { %v978_v1 = vsel %vm889_vm1, %v711_v60, 0.0  ;;  %v1088_v2 = vmul.f32 %v711_v60, %v711_v60  ;;  %v2306_v5 = vpop.f32.mrb[30].mxu0  ;;  %v2774_v7 = vpop.f32.mrb[30].mxu1  ;;  %v986_v54 = vsel %vm889_vm1, %v2616_v44, 0.0  ;;  %v883_v59 = vpack.c.bf16 %v2753_v20, %v2745_v3 }
 0x145   : > { %v869_v12 = vpack.c.bf16 %v2306_v5, %v2305_v55  ;;  %v714_v14 = vpop.f32.mrb[31].mxu0  ;;  %v2777_v15 = vpop.f32.mrb[31].mxu1  ;;  %v979_v16 = vadd.f32 %v978_v1, %v977_v0  ;;  %v1178_v21 = vadd.f32 %v1177_v9, %v1176_v63  ;;  %v1091_v37 = vmul.f32 %v2306_v5, %v2306_v5 }
 0x146   : > { %v1179_v17 = vsel %vm889_vm1, %v1088_v2, 0.0  ;;  %v868_v22 = vpack.c.bf16 %v714_v14, %v711_v60  ;;  %v980_v27 = vsel %vm889_vm1, %v714_v14, 0.0  ;;  %v1089_v29 = vmul.f32 %v714_v14, %v714_v14  ;;  %919 = vst.msk [vmem:[#allocation2 + $0xe8] sm:$0xff] %vm889_vm1, %v883_v59 }
 0x147   : > { %905 = vst.msk [vmem:[#allocation2 + $0x78] sm:$0xff] %vm889_vm1, %v869_v12  ;;  %v1180_v30 = vadd.f32 %v1179_v17, %v1178_v21  ;;  %v981_v31 = vadd.f32 %v980_v27, %v979_v16  ;;  %v1183_v49 = vsel %vm889_vm1, %v1090_v25, 0.0  ;;  %v984_v53 = vsel %vm889_vm1, %v2306_v5, 0.0 }
 0x148   : > { %904 = vst.msk [vmem:[#allocation2 + $0x70] sm:$0xff] %vm889_vm1, %v868_v22  ;;  %v1181_v39 = vsel %vm889_vm1, %v1089_v29, 0.0  ;;  %v1185_v60 = vsel %vm889_vm1, %v1091_v37, 0.0  ;;  %v1187_v63 = vsel %vm889_vm1, %v1092_v32, 0.0  ;;  %v1093_v0 = vmul.f32 %v2620_v51, %v2620_v51 }
 0x149   : > { %v983_v45 = vadd.f32 %v982_v36, %v981_v31  ;;  %v1182_v48 = vadd.f32 %v1181_v39, %v1180_v30  ;;  %v882_v44 = vpack.c.bf16 %v2756_v26, %v2750_v10  ;;  %v1094_v5 = vmul.f32 %v2614_v42, %v2614_v42 }
 0x14a   : > { %v988_v9 = vsel %vm889_vm1, %v2620_v51, 0.0  ;;  %v990_v12 = vsel %vm889_vm1, %v2614_v42, 0.0  ;;  %v1095_v21 = vmul.f32 %v2618_v47, %v2618_v47  ;;  %v1189_v17 = vsel %vm889_vm1, %v1093_v0, 0.0 }
 0x14b   : > { %v1184_v55 = vadd.f32 %v1183_v49, %v1182_v48  ;;  %v985_v57 = vadd.f32 %v984_v53, %v983_v45  ;;  %918 = vst.msk [vmem:[#allocation2 + $0xe0] sm:$0xff] %vm889_vm1, %v882_v44  ;;  %v1096_v22 = vmul.f32 %v2639_v8, %v2639_v8  ;;  %v885_v25 = vpack.c.bf16 %v2774_v7, %v2767_v56 }
 0x14c   : > { %v1191_v29 = vsel %vm889_vm1, %v1094_v5, 0.0  ;;  %v992_v42 = vsel %vm889_vm1, %v2618_v47, 0.0  ;;  %v994_v30 = vsel %vm889_vm1, %v2639_v8, 0.0  ;;  %v884_v31 = vpack.c.bf16 %v2777_v15, %v2771_v61 }
 0x14d   : > { %v987_v1 = vadd.f32 %v986_v54, %v985_v57  ;;  %v1186_v2 = vadd.f32 %v1185_v60, %v1184_v55  ;;  %921 = vst.msk [vmem:[#allocation2 + $0xf8] sm:$0xff] %vm889_vm1, %v885_v25  ;;  %v1193_v36 = vsel %vm889_vm1, %v1095_v21, 0.0  ;;  %v1195_v37 = vsel %vm889_vm1, %v1096_v22, 0.0 }
 0x14e   : > { %v1097_v39 = vmul.f32 %v2645_v18, %v2645_v18  ;;  %920 = vst.msk [vmem:[#allocation2 + $0xf0] sm:$0xff] %vm889_vm1, %v884_v31  ;;  %v1098_v8 = vmul.f32 %v2636_v4, %v2636_v4  ;;  %v996_v45 = vsel %vm889_vm1, %v2645_v18, 0.0  ;;  %v998_v53 = vsel %vm889_vm1, %v2636_v4, 0.0 }
 0x14f   : > { %v1188_v14 = vadd.f32 %v1187_v63, %v1186_v2  ;;  %v989_v16 = vadd.f32 %v988_v9, %v987_v1  ;;  %v1099_v54 = vmul.f32 %v2643_v13, %v2643_v13  ;;  %v1100_v57 = vmul.f32 %v2662_v38, %v2662_v38 }
 0x150   : > { %v1197_v55 = vsel %vm889_vm1, %v1097_v39, 0.0  ;;  %v1199_v63 = vsel %vm889_vm1, %v1098_v8, 0.0  ;;  %v1000_v18 = vsel %vm889_vm1, %v2643_v13, 0.0  ;;  %v1002_v0 = vsel %vm889_vm1, %v2662_v38, 0.0 }
 0x151   : > { %v991_v27 = vadd.f32 %v990_v12, %v989_v16  ;;  %v1190_v51 = vadd.f32 %v1189_v17, %v1188_v14  ;;  %v1201_v2 = vsel %vm889_vm1, %v1099_v54, 0.0  ;;  %v1203_v44 = vsel %vm889_vm1, %v1100_v57, 0.0 }
 0x152   : > { %v1101_v5 = vmul.f32 %v2669_v52, %v2669_v52  ;;  %v1102_v14 = vmul.f32 %v2655_v33, %v2655_v33  ;;  %v1004_v13 = vsel %vm889_vm1, %v2669_v52, 0.0  ;;  %v1006_v38 = vsel %vm889_vm1, %v2655_v33, 0.0 }
 0x153   : > { %v1192_v32 = vadd.f32 %v1191_v29, %v1190_v51  ;;  %v993_v34 = vadd.f32 %v992_v42, %v991_v27  ;;  %v1103_v17 = vmul.f32 %v2665_v46, %v2665_v46  ;;  %v1104_v25 = vmul.f32 %v2683_v11, %v2683_v11 }
 0x154   : > { %v1205_v22 = vsel %vm889_vm1, %v1101_v5, 0.0  ;;  %v1207_v29 = vsel %vm889_vm1, %v1102_v14, 0.0  ;;  %v1008_v52 = vsel %vm889_vm1, %v2665_v46, 0.0  ;;  %v1010_v42 = vsel %vm889_vm1, %v2683_v11, 0.0 }
 0x155   : > { %v995_v47 = vadd.f32 %v994_v30, %v993_v34  ;;  %v1194_v41 = vadd.f32 %v1193_v36, %v1192_v32  ;;  %v1209_v31 = vsel %vm889_vm1, %v1103_v17, 0.0  ;;  %v1211_v32 = vsel %vm889_vm1, %v1104_v25, 0.0 }
 0x156   : > { %v1105_v34 = vmul.f32 %v2690_v23, %v2690_v23  ;;  %v1106_v39 = vmul.f32 %v2679_v6, %v2679_v6  ;;  %v1012_v46 = vsel %vm889_vm1, %v2690_v23, 0.0  ;;  %v1014_v11 = vsel %vm889_vm1, %v2679_v6, 0.0 }
 0x157   : > { %v1196_v48 = vadd.f32 %v1195_v37, %v1194_v41  ;;  %v997_v49 = vadd.f32 %v996_v45, %v995_v47  ;;  %v1107_v8 = vmul.f32 %v2687_v19, %v2687_v19  ;;  %v1016_v23 = vsel %vm889_vm1, %v2687_v19, 0.0 }
 0x158   : > { %v1213_v45 = vsel %vm889_vm1, %v1105_v34, 0.0  ;;  %v1215_v54 = vsel %vm889_vm1, %v1106_v39, 0.0  ;;  %v1020_v19 = vsel %vm889_vm1, %v2711_v62, 0.0 }
 0x159   : > { %v999_v59 = vadd.f32 %v998_v53, %v997_v49  ;;  %v1198_v60 = vadd.f32 %v1197_v55, %v1196_v48  ;;  %v1108_v48 = vmul.f32 %v2705_v50, %v2705_v50  ;;  %v1018_v55 = vsel %vm889_vm1, %v2705_v50, 0.0 }
 0x15a   : > { %v1022_v50 = vsel %vm889_vm1, %v2701_v43, 0.0 }
 0x15b   : > { %v1200_v1 = vadd.f32 %v1199_v63, %v1198_v60  ;;  %v1001_v4 = vadd.f32 %v1000_v18, %v999_v59  ;;  %v1217_v59 = vsel %vm889_vm1, %v1107_v8, 0.0  ;;  %v1219_v60 = vsel %vm889_vm1, %v1108_v48, 0.0 }
 0x15c   : > { %v1109_v63 = vmul.f32 %v2711_v62, %v2711_v62  ;;  %v1024_v62 = vsel %vm889_vm1, %v2708_v58, 0.0  ;;  %v1118_v8 = vmul.f32 %v2745_v3, %v2745_v3 }
 0x15d   : > { %v1003_v9 = vadd.f32 %v1002_v0, %v1001_v4  ;;  %v1202_v12 = vadd.f32 %v1201_v2, %v1200_v1  ;;  %v1110_v1 = vmul.f32 %v2701_v43, %v2701_v43 }
 0x15e   : > { %v1221_v5 = vsel %vm889_vm1, %v1109_v63, 0.0 }
 0x15f   : > { %v1204_v16 = vadd.f32 %v1203_v44, %v1202_v12  ;;  %v1005_v21 = vadd.f32 %v1004_v13, %v1003_v9  ;;  %v1111_v44 = vmul.f32 %v2708_v58, %v2708_v58  ;;  %v1112_v9 = vmul.f32 %v2729_v28, %v2729_v28 }
 0x160   : > { %v1223_v13 = vsel %vm889_vm1, %v1110_v1, 0.0  ;;  %v1028_v58 = vsel %vm889_vm1, %v2735_v40, 0.0 }
 0x161   : > { %v1007_v27 = vadd.f32 %v1006_v38, %v1005_v21  ;;  %v1206_v51 = vadd.f32 %v1205_v22, %v1204_v16  ;;  %v1026_v16 = vsel %vm889_vm1, %v2729_v28, 0.0  ;;  %v1225_v38 = vsel %vm889_vm1, %v1111_v44, 0.0 }
 0x162   : > { %v1227_v17 = vsel %vm889_vm1, %v1112_v9, 0.0  ;;  %v1113_v22 = vmul.f32 %v2735_v40, %v2735_v40  ;;  %v1030_v28 = vsel %vm889_vm1, %v2724_v24, 0.0  ;;  %v1032_v40 = vsel %vm889_vm1, %v2732_v35, 0.0 }
 0x163   : > { %v1208_v30 = vadd.f32 %v1207_v29, %v1206_v51  ;;  %v1009_v33 = vadd.f32 %v1008_v52, %v1007_v27  ;;  %v1114_v51 = vmul.f32 %v2724_v24, %v2724_v24 }
 0x165   : > { %v1011_v36 = vadd.f32 %v1010_v42, %v1009_v33  ;;  %v1210_v37 = vadd.f32 %v1209_v31, %v1208_v30  ;;  %v1115_v42 = vmul.f32 %v2732_v35, %v2732_v35  ;;  %v1229_v30 = vsel %vm889_vm1, %v1113_v22, 0.0 }
 0x166   : > { %v1116_v33 = vmul.f32 %v2750_v10, %v2750_v10  ;;  %v1231_v34 = vsel %vm889_vm1, %v1114_v51, 0.0  ;;  %v1036_v35 = vsel %vm889_vm1, %v2756_v26, 0.0 }
 0x167   : > { %v1212_v47 = vadd.f32 %v1211_v32, %v1210_v37  ;;  %v1013_v41 = vadd.f32 %v1012_v46, %v1011_v36  ;;  %v1034_v36 = vsel %vm889_vm1, %v2750_v10, 0.0  ;;  %v1233_v39 = vsel %vm889_vm1, %v1115_v42, 0.0 }
 0x168   : > { %v1235_v46 = vsel %vm889_vm1, %v1116_v33, 0.0  ;;  %v1038_v10 = vsel %vm889_vm1, %v2745_v3, 0.0 }
 0x169   : > { %v1015_v49 = vadd.f32 %v1014_v11, %v1013_v41  ;;  %v1214_v53 = vadd.f32 %v1213_v45, %v1212_v47  ;;  %v1117_v47 = vmul.f32 %v2756_v26, %v2756_v26  ;;  %v1040_v26 = vsel %vm889_vm1, %v2753_v20, 0.0 }
 0x16b   : > { %v1216_v57 = vadd.f32 %v1215_v54, %v1214_v53  ;;  %v1017_v6 = vadd.f32 %v1016_v23, %v1015_v49  ;;  %v1119_v49 = vmul.f32 %v2753_v20, %v2753_v20  ;;  %v1237_v53 = vsel %vm889_vm1, %v1117_v47, 0.0 }
 0x16c   : > { %v1120_v54 = vmul.f32 %v2771_v61, %v2771_v61  ;;  %v1044_v20 = vsel %vm889_vm1, %v2777_v15, 0.0 }
 0x16d   : > { %v1019_v18 = vadd.f32 %v1018_v55, %v1017_v6  ;;  %v1218_v0 = vadd.f32 %v1217_v59, %v1216_v57  ;;  %v1239_v57 = vsel %vm889_vm1, %v1118_v8, 0.0  ;;  %v1042_v6 = vsel %vm889_vm1, %v2771_v61, 0.0 }
 0x16e   : > { %v1243_v63 = vsel %vm889_vm1, %v1120_v54, 0.0  ;;  %v1046_v61 = vsel %vm889_vm1, %v2767_v56, 0.0 }
 0x16f   : > { %v1220_v4 = vadd.f32 %v1219_v60, %v1218_v0  ;;  %v1021_v2 = vadd.f32 %v1020_v19, %v1019_v18  ;;  %v1241_v60 = vsel %vm889_vm1, %v1119_v49, 0.0  ;;  %v1121_v18 = vmul.f32 %v2777_v15, %v2777_v15 }
 0x170   : > { %v1122_v19 = vmul.f32 %v2767_v56, %v2767_v56 }
 0x171   : > { %v1023_v12 = vadd.f32 %v1022_v50, %v1021_v2  ;;  %v1222_v14 = vadd.f32 %v1221_v5, %v1220_v4  ;;  %v1123_v50 = vmul.f32 %v2774_v7, %v2774_v7  ;;  %v1245_v44 = vsel %vm889_vm1, %v1121_v18, 0.0 }
 0x173   : > { %v1224_v21 = vadd.f32 %v1223_v13, %v1222_v14  ;;  %v1025_v43 = vadd.f32 %v1024_v62, %v1023_v12  ;;  %v1247_v12 = vsel %vm889_vm1, %v1122_v19, 0.0  ;;  %v1048_v14 = vsel %vm889_vm1, %v2774_v7, 0.0 }
 0x174   : > { %v1249_v15 = vsel %vm889_vm1, %v1123_v50, 0.0 }
 0x175   : > { %v1027_v25 = vadd.f32 %v1026_v16, %v1025_v43  ;;  %v1226_v27 = vadd.f32 %v1225_v38, %v1224_v21 }
 0x177   : > { %v1228_v29 = vadd.f32 %v1227_v17, %v1226_v27  ;;  %v1029_v52 = vadd.f32 %v1028_v58, %v1027_v25  ;;  %v922_v58 = vld [vmem:[#allocation3] sm:$0x1] }
 0x179   : > { %v1031_v31 = vadd.f32 %v1030_v28, %v1029_v52  ;;  %v1230_v32 = vadd.f32 %v1229_v30, %v1228_v29  ;;  %v1059_v28 = vld [vmem:[#allocation4] sm:$0x1] }
 0x17b   : > { %v1232_v37 = vadd.f32 %v1231_v34, %v1230_v32  ;;  %v1033_v24 = vadd.f32 %v1032_v40, %v1031_v31 }
 0x17d   : > { %v1035_v41 = vadd.f32 %v1034_v36, %v1033_v24  ;;  %v1234_v11 = vadd.f32 %v1233_v39, %v1232_v37 }
 0x17f   : > { %v1236_v45 = vadd.f32 %v1235_v46, %v1234_v11  ;;  %v1037_v48 = vadd.f32 %v1036_v35, %v1035_v41 }
 0x181   : > { %v1039_v23 = vadd.f32 %v1038_v10, %v1037_v48  ;;  %v1238_v55 = vadd.f32 %v1237_v53, %v1236_v45 }
 0x183   : > { %v1240_v59 = vadd.f32 %v1239_v57, %v1238_v55  ;;  %v1041_v3 = vadd.f32 %v1040_v26, %v1039_v23 }
 0x185   : > { %v1043_v0 = vadd.f32 %v1042_v6, %v1041_v3  ;;  %v1242_v1 = vadd.f32 %v1241_v60, %v1240_v59 }
 0x187   : > { %v1244_v4 = vadd.f32 %v1243_v63, %v1242_v1  ;;  %v1045_v2 = vadd.f32 %v1044_v20, %v1043_v0 }
 0x189   : > { %v1047_v5 = vadd.f32 %v1046_v61, %v1045_v2  ;;  %v1246_v9 = vadd.f32 %v1245_v44, %v1244_v4 }
 0x18b   : > { %v1049_v13 = vadd.f32 %v1048_v14, %v1047_v5  ;;  %v1248_v62 = vadd.f32 %v1247_v12, %v1246_v9 }
 0x18d   : > { %v1050_v16 = vrot.slane %v1049_v13, 4  ;;  %v1250_v21 = vadd.f32 %v1249_v15, %v1248_v62 }
 0x18f   : > { %v1051_v43 = vadd.f32 %v1050_v16, %v1049_v13  ;;  %v1251_v56 = vrot.slane %v1250_v21, 4 }
 0x191   : > { %v1052_v38 = vrot.slane %v1051_v43, 2  ;;  %v1252_v17 = vadd.f32 %v1251_v56, %v1250_v21 }
 0x193   : > { %v1053_v22 = vadd.f32 %v1052_v38, %v1051_v43  ;;  %v1253_v25 = vrot.slane %v1252_v17, 2 }
 0x195   : > { %v1054_v27 = vrot.slane %v1053_v22, 1  ;;  %v1254_v51 = vadd.f32 %v1253_v25, %v1252_v17 }
 0x197   : > { %v1055_v29 = vadd.f32 %v1054_v27, %v1053_v22  ;;  %v1255_v52 = vrot.slane %v1254_v51, 1 }
 0x199   : > { %v1056_v7 = vadd.f32 %v1055_v29, %v922_v58  ;;  %v1256_v42 = vadd.f32 %v1255_v52, %v1254_v51 }
 0x19b   : > { %1058 = vst.msk [vmem:[#allocation3] sm:$0x1] %vm1057_vm2, %v1056_v7  ;;  %v1257_v30 = vadd.f32 %v1256_v42, %v1059_v28 }
 0x19d   : > { %1258 = vst.msk [vmem:[#allocation4] sm:$0x1] %vm1057_vm2, %v1257_v30 }
 0x19e PF: > { %p2085_p6 = scmp.ne.s32.totalorder %s2436_s15, 1 }
 0x19f   : > { %v1377_v40 = vlaneseq (!%p2085_p6)  ;;  %v2971_v24 = vld [vmem:[#allocation2] sm:$0xff] (!%p2085_p6)  ;;  %v2975_v46 = vld [vmem:[#allocation2 + $0x8] sm:$0xff] (!%p2085_p6)  ;;  %v2977_v47 = vld [vmem:[#allocation2 + $0x10] sm:$0xff] (!%p2085_p6)  ;;  %vm1900_vm3 = vcmask (!%p2085_p6), 125952  }
 0x1a0   : > { %1262 = sbr.rel (%p2085_p6) target bundleno = 544 (0x220), region = 48  ;;  %v2979_v11 = vld [vmem:[#allocation2 + $0x18] sm:$0xff] (!%p2085_p6)  ;;  %v1312_v8 = vunpack.c.l.bf16 (!%p2085_p6), %v2971_v24  ;;  %v1313_v35 = vunpack.c.h.bf16 (!%p2085_p6), %v2971_v24  ;;  %v2983_v45 = vld [vmem:[#allocation2 + $0x20] sm:$0xff] (!%p2085_p6)  ;;  %v2985_v48 = vld [vmem:[#allocation2 + $0x28] sm:$0xff] (!%p2085_p6)  ;;  %v1314_v49 = vunpack.c.l.bf16 (!%p2085_p6), %v2975_v46  ;;  %v1315_v53 = vunpack.c.h.bf16 (!%p2085_p6), %v2975_v46 }
 0x1a1   : > { %v2973_v39 = vshrl.u32 (!%p2085_p6), %v1377_v40, 7  ;;  %v1316_v54 = vunpack.c.l.bf16 (!%p2085_p6), %v2977_v47  ;;  %v2990_v23 = vld [vmem:[#allocation2 + $0x30] sm:$0xff] (!%p2085_p6)  ;;  %v2992_v55 = vld [vmem:[#allocation2 + $0x38] sm:$0xff] (!%p2085_p6)  ;;  %v1317_v26 = vunpack.c.h.bf16 (!%p2085_p6), %v2977_v47  ;;  %v1318_v6 = vunpack.c.l.bf16 (!%p2085_p6), %v2979_v11  ;;  %v2998_v3 = vld [vmem:[#allocation2 + $0x40] sm:$0xff] (!%p2085_p6) }
 0x1a2   : > { %v1263_v33 = vld [vmem:[#allocation3] sm:$0x1] (!%p2085_p6)  ;;  %v1319_v59 = vunpack.c.h.bf16 (!%p2085_p6), %v2979_v11  ;;  %v3000_v60 = vld [vmem:[#allocation2 + $0x48] sm:$0xff] (!%p2085_p6)  ;;  %v1320_v63 = vunpack.c.l.bf16 (!%p2085_p6), %v2983_v45  ;;  %v1321_v18 = vunpack.c.h.bf16 (!%p2085_p6), %v2983_v45  ;;  %v1322_v0 = vunpack.c.l.bf16 (!%p2085_p6), %v2985_v48  ;;  %v3005_v1 = vld [vmem:[#allocation2 + $0x50] sm:$0xff] (!%p2085_p6) }
 0x1a3   : > { %v2967_v32 = vmul.f32 (!%p2085_p6), 0.001953125, %v1263_v33  ;;  %v1379_v57 = vsub.s32 (!%p2085_p6), 0, %v2973_v39  ;;  %v3007_v19 = vld [vmem:[#allocation2 + $0x58] sm:$0xff] (!%p2085_p6)  ;;  %v1323_v20 = vunpack.c.h.bf16 (!%p2085_p6), %v2985_v48  ;;  %v1324_v4 = vunpack.c.l.bf16 (!%p2085_p6), %v2990_v23  ;;  %v3013_v50 = vld [vmem:[#allocation2 + $0x60] sm:$0xff] (!%p2085_p6)  ;;  %v3015_v44 = vld [vmem:[#allocation2 + $0x68] sm:$0xff] (!%p2085_p6) }
 0x1a4   : > { %v1265_v31 = vld [vmem:[#allocation4] sm:$0x1] (!%p2085_p6)  ;;  %v1325_v2 = vunpack.c.h.bf16 (!%p2085_p6), %v2990_v23  ;;  %v3021_v13 = vld [vmem:[#allocation2 + $0x70] sm:$0xff] (!%p2085_p6)  ;;  %v3023_v62 = vld [vmem:[#allocation2 + $0x78] sm:$0xff] (!%p2085_p6) }
 0x1a5   : > { %v1266_v34 = vmul.f32 (!%p2085_p6), 0.001953125, %v1265_v31  ;;  %v1267_v36 = vmul.f32 (!%p2085_p6), %v2967_v32, %v2967_v32  ;;  %v3029_v56 = vld [vmem:[#allocation2 + $0x80] sm:$0xff] (!%p2085_p6)  ;;  %v3031_v38 = vld [vmem:[#allocation2 + $0x88] sm:$0xff] (!%p2085_p6)  ;;  %v3037_v51 = vld [vmem:[#allocation2 + $0x90] sm:$0xff] (!%p2085_p6) }
 0x1a6   : > { %v3039_v58 = vld [vmem:[#allocation2 + $0x98] sm:$0xff] (!%p2085_p6)  ;;  %v3045_v42 = vld [vmem:[#allocation2 + $0xa0] sm:$0xff] (!%p2085_p6)  ;;  %v3047_v30 = vld [vmem:[#allocation2 + $0xa8] sm:$0xff] (!%p2085_p6) }
 0x1a7   : > { %v1268_v37 = vsub.f32 %v1266_v34, %v1267_v36  ;;  %v3053_v36 = vld [vmem:[#allocation2 + $0xb0] sm:$0xff]  ;;  %v3061_v52 = vld [vmem:[#allocation2 + $0xc0] sm:$0xff]  ;;  %v3063_v33 = vld [vmem:[#allocation2 + $0xc8] sm:$0xff] }
 0x1a8   : > { %v1270_v40 = vld [vmem:[%s3640_s2] sm:$0x1]  ;;  %v3072_v29 = vld [vmem:[#allocation2 + $0xd0] sm:$0xff]  ;;  %v3078_v22 = vld [vmem:[#allocation2 + $0xd8] sm:$0xff] }
 0x1a9   : > { %v1269_v41 = vmax.f32 %v1268_v37, 0.0  ;;  %v3055_v37 = vld [vmem:[#allocation2 + $0xb8] sm:$0xff]  ;;  %v3080_v17 = vld [vmem:[#allocation2 + $0xe0] sm:$0xff]  ;;  %v3086_v28 = vld [vmem:[#allocation2 + $0xe8] sm:$0xff] }
 0x1aa   : > { %v3091_v16 = vld [vmem:[#allocation2 + $0xf0] sm:$0xff]  ;;  %v3093_v15 = vld [vmem:[#allocation2 + $0xf8] sm:$0xff] }
 0x1ab   : > { %v1271_v10 = vadd.f32 1e-05, %v1269_v41  ;;  %v1274_v41 = vld [vmem:[%s3641_s3] sm:$0x1] }
 0x1ad   : > { %2420 = vrsqrt.f32 %v1271_v10 }
 0x1b7   : > { %v2421_v34 = vpop.eup %2420 }
 0x1b8   : > { %v1273_v7 = vmul.f32 %v2421_v34, %v1270_v40 }
 0x1ba   : > { %v1275_v25 = vmul.f32 %v1273_v7, %v2967_v32  ;;  %v3105_v21 = vrot.slane %v1273_v7, %v1379_v57 }
 0x1bc   : > { %v1276_v12 = vsub.f32 %v1274_v41, %v1275_v25  ;;  %v1382_v32 = vmul.f32 %v3105_v21, %v1312_v8  ;;  %v1383_v7 = vmul.f32 %v3105_v21, %v1313_v35  ;;  %v1384_v31 = vmul.f32 %v3105_v21, %v1314_v49 }
 0x1bd   : > { %v1385_v43 = vmul.f32 %v3105_v21, %v1315_v53  ;;  %v1386_v25 = vmul.f32 %v3105_v21, %v1316_v54  ;;  %v1387_v8 = vmul.f32 %v3105_v21, %v1317_v26  ;;  %v1388_v24 = vmul.f32 %v3105_v21, %v1318_v6 }
 0x1be   : > { %v3136_v35 = vrot.slane %v1276_v12, %v1379_v57  ;;  %v1389_v46 = vmul.f32 %v3105_v21, %v1319_v59  ;;  %v1390_v49 = vmul.f32 %v3105_v21, %v1320_v63  ;;  %v1391_v47 = vmul.f32 %v3105_v21, %v1321_v18 }
 0x1bf   : > { %v1392_v53 = vmul.f32 %v3105_v21, %v1322_v0  ;;  %v1393_v39 = vmul.f32 %v3105_v21, %v1323_v20  ;;  %v1394_v11 = vmul.f32 %v3105_v21, %v1324_v4  ;;  %v1395_v54 = vmul.f32 %v3105_v21, %v1325_v2 }
 0x1c0   : > { %v1452_v45 = vadd.f32 %v3136_v35, %v1382_v32  ;;  %v1453_v57 = vadd.f32 %v3136_v35, %v1383_v7  ;;  %v1454_v26 = vadd.f32 %v3136_v35, %v1384_v31  ;;  %v1455_v6 = vadd.f32 %v3136_v35, %v1385_v43 }
 0x1c1   : > { %v1456_v48 = vadd.f32 %v3136_v35, %v1386_v25  ;;  %v1457_v59 = vadd.f32 %v3136_v35, %v1387_v8  ;;  %v1458_v63 = vadd.f32 %v3136_v35, %v1388_v24  ;;  %v1459_v18 = vadd.f32 %v3136_v35, %v1389_v46 }
 0x1c2   : > { %v1516_v0 = vmul.f32 0.2, %v1452_v45  ;;  %v1517_v23 = vmul.f32 0.2, %v1453_v57  ;;  %v1518_v20 = vmul.f32 0.2, %v1454_v26  ;;  %v1460_v4 = vadd.f32 %v3136_v35, %v1390_v49 }
 0x1c3   : > { %v1519_v2 = vmul.f32 0.2, %v1455_v6  ;;  %v1520_v12 = vmul.f32 0.2, %v1456_v48  ;;  %v1521_v41 = vmul.f32 0.2, %v1457_v59  ;;  %v1461_v31 = vadd.f32 %v3136_v35, %v1391_v47 }
 0x1c4   : > { %v1580_v32 = vmax.f32 %v1452_v45, %v1516_v0  ;;  %v1581_v43 = vmax.f32 %v1453_v57, %v1517_v23  ;;  %v1582_v7 = vmax.f32 %v1454_v26, %v1518_v20  ;;  %v1522_v25 = vmul.f32 0.2, %v1458_v63 }
 0x1c5   : > { %v1583_v34 = vmax.f32 %v1455_v6, %v1519_v2  ;;  %v1584_v8 = vmax.f32 %v1456_v48, %v1520_v12  ;;  %v1585_v10 = vmax.f32 %v1457_v59, %v1521_v41  ;;  %v1523_v24 = vmul.f32 0.2, %v1459_v18 }
 0x1c6   : > { %v2155_v14 = vpack.c.bf16 %v1580_v32, %v1580_v32  ;;  %v2156_v46 = vpack.c.bf16 %v1581_v43, %v1581_v43  ;;  %v2157_v27 = vpack.c.bf16 %v1582_v7, %v1582_v7  ;;  %v1586_v40 = vmax.f32 %v1458_v63, %v1522_v25 }
 0x1c7   : > { %v2158_v9 = vpack.c.bf16 %v1583_v34, %v1583_v34  ;;  %v2159_v5 = vpack.c.bf16 %v1584_v8, %v1584_v8  ;;  %v2160_v49 = vpack.c.bf16 %v1585_v10, %v1585_v10  ;;  %v1587_v61 = vmax.f32 %v1459_v18, %v1523_v24 }
 0x1c8   : > { %1901 = vst.msk [vmem:[%s3642_s4] sm:$0xf] %vm1900_vm3, %v2155_v14  ;;  %1902 = vst.msk [vmem:[%s3642_s4 + $0x4] sm:$0xf] %vm1900_vm3, %v2156_v46  ;;  %v2161_v47 = vpack.c.bf16 %v1586_v40, %v1586_v40  ;;  %v1524_v34 = vmul.f32 0.2, %v1460_v4  ;;  %v1462_v10 = vadd.f32 %v3136_v35, %v1392_v53  ;;  %v1464_v40 = vadd.f32 %v3136_v35, %v1394_v11 }
 0x1c9   : > { %1903 = vst.msk [vmem:[%s3642_s4 + $0x8] sm:$0xf] %vm1900_vm3, %v2157_v27  ;;  %v1525_v45 = vmul.f32 0.2, %v1461_v31  ;;  %1904 = vst.msk [vmem:[%s3642_s4 + $0xc] sm:$0xf] %vm1900_vm3, %v2158_v9  ;;  %v2162_v14 = vpack.c.bf16 %v1587_v61, %v1587_v61  ;;  %v1463_v27 = vadd.f32 %v3136_v35, %v1393_v39  ;;  %v1465_v53 = vadd.f32 %v3136_v35, %v1395_v54 }
 0x1ca   : > { %1905 = vst.msk [vmem:[%s3642_s4 + $0x10] sm:$0xf] %vm1900_vm3, %v2159_v5  ;;  %1906 = vst.msk [vmem:[%s3642_s4 + $0x14] sm:$0xf] %vm1900_vm3, %v2160_v49  ;;  %v1588_v9 = vmax.f32 %v1460_v4, %v1524_v34  ;;  %v1526_v5 = vmul.f32 0.2, %v1462_v10  ;;  %v3643_v26 = vunpack.c.l.bf16 %v2992_v55  ;;  %v3644_v54 = vunpack.c.h.bf16 %v2992_v55 }
 0x1cb   : > { %1907 = vst.msk [vmem:[%s3642_s4 + $0x18] sm:$0xf] %vm1900_vm3, %v2161_v47  ;;  %v1589_v57 = vmax.f32 %v1461_v31, %v1525_v45  ;;  %1908 = vst.msk [vmem:[%s3642_s4 + $0x1c] sm:$0xf] %vm1900_vm3, %v2162_v14  ;;  %v1527_v61 = vmul.f32 0.2, %v1463_v27  ;;  %v3645_v41 = vunpack.c.l.bf16 %v2998_v3  ;;  %v3646_v32 = vunpack.c.h.bf16 %v2998_v3 }
 0x1cc   : > { %v1396_v6 = vmul.f32 %v3105_v21, %v3643_v26  ;;  %v1528_v39 = vmul.f32 0.2, %v1464_v40  ;;  %v1529_v11 = vmul.f32 0.2, %v1465_v53  ;;  %v1397_v48 = vmul.f32 %v3105_v21, %v3644_v54 }
 0x1cd   : > { %v2163_v59 = vpack.c.bf16 %v1588_v9, %v1588_v9  ;;  %v2164_v63 = vpack.c.bf16 %v1589_v57, %v1589_v57  ;;  %v1590_v18 = vmax.f32 %v1462_v10, %v1526_v5  ;;  %v1591_v23 = vmax.f32 %v1463_v27, %v1527_v61 }
 0x1ce   : > { %v1466_v0 = vadd.f32 %v3136_v35, %v1396_v6  ;;  %v1592_v20 = vmax.f32 %v1464_v40, %v1528_v39  ;;  %v1593_v4 = vmax.f32 %v1465_v53, %v1529_v11  ;;  %v1467_v2 = vadd.f32 %v3136_v35, %v1397_v48 }
 0x1cf   : > { %1909 = vst.msk [vmem:[%s3642_s4 + $0x20] sm:$0xf] %vm1900_vm3, %v2163_v59  ;;  %1910 = vst.msk [vmem:[%s3642_s4 + $0x24] sm:$0xf] %vm1900_vm3, %v2164_v63  ;;  %v2165_v55 = vpack.c.bf16 %v1590_v18, %v1590_v18  ;;  %v1398_v31 = vmul.f32 %v3105_v21, %v3645_v41  ;;  %v1399_v43 = vmul.f32 %v3105_v21, %v3646_v32  ;;  %v3647_v34 = vunpack.c.l.bf16 %v3000_v60 }
 0x1d0   : > { %v1530_v12 = vmul.f32 0.2, %v1466_v0  ;;  %v2166_v7 = vpack.c.bf16 %v1591_v23, %v1591_v23  ;;  %v2167_v25 = vpack.c.bf16 %v1592_v20, %v1592_v20  ;;  %v2168_v8 = vpack.c.bf16 %v1593_v4, %v1593_v4 }
 0x1d1   : > { %v1531_v24 = vmul.f32 0.2, %v1467_v2  ;;  %1911 = vst.msk [vmem:[%s3642_s4 + $0x28] sm:$0xf] %vm1900_vm3, %v2165_v55  ;;  %v1468_v49 = vadd.f32 %v3136_v35, %v1398_v31  ;;  %v1469_v47 = vadd.f32 %v3136_v35, %v1399_v43  ;;  %v1400_v3 = vmul.f32 %v3105_v21, %v3647_v34 }
 0x1d2   : > { %v1594_v46 = vmax.f32 %v1466_v0, %v1530_v12  ;;  %1912 = vst.msk [vmem:[%s3642_s4 + $0x2c] sm:$0xf] %vm1900_vm3, %v2166_v7  ;;  %1913 = vst.msk [vmem:[%s3642_s4 + $0x30] sm:$0xf] %vm1900_vm3, %v2167_v25  ;;  %v3648_v10 = vunpack.c.h.bf16 %v3000_v60  ;;  %v3649_v27 = vunpack.c.l.bf16 %v3005_v1  ;;  %v3650_v53 = vunpack.c.h.bf16 %v3005_v1 }
 0x1d3   : > { %1914 = vst.msk [vmem:[%s3642_s4 + $0x34] sm:$0xf] %vm1900_vm3, %v2168_v8  ;;  %v1595_v45 = vmax.f32 %v1467_v2, %v1531_v24  ;;  %v1532_v5 = vmul.f32 0.2, %v1468_v49  ;;  %v1533_v26 = vmul.f32 0.2, %v1469_v47  ;;  %v1470_v6 = vadd.f32 %v3136_v35, %v1400_v3 }
 0x1d4   : > { %v1401_v14 = vmul.f32 %v3105_v21, %v3648_v10  ;;  %v1402_v40 = vmul.f32 %v3105_v21, %v3649_v27  ;;  %v1403_v9 = vmul.f32 %v3105_v21, %v3650_v53  ;;  %v2169_v57 = vpack.c.bf16 %v1594_v46, %v1594_v46 }
 0x1d5   : > { %v2170_v61 = vpack.c.bf16 %v1595_v45, %v1595_v45  ;;  %v1596_v1 = vmax.f32 %v1468_v49, %v1532_v5  ;;  %v1597_v54 = vmax.f32 %v1469_v47, %v1533_v26  ;;  %v1534_v48 = vmul.f32 0.2, %v1470_v6 }
 0x1d6   : > { %v1471_v39 = vadd.f32 %v3136_v35, %v1401_v14  ;;  %v1472_v60 = vadd.f32 %v3136_v35, %v1402_v40  ;;  %v1473_v11 = vadd.f32 %v3136_v35, %v1403_v9  ;;  %1915 = vst.msk [vmem:[%s3642_s4 + $0x38] sm:$0xf] %vm1900_vm3, %v2169_v57  ;;  %v3651_v59 = vunpack.c.l.bf16 %v3007_v19 }
 0x1d7   : > { %1916 = vst.msk [vmem:[%s3642_s4 + $0x3c] sm:$0xf] %vm1900_vm3, %v2170_v61  ;;  %v3652_v20 = vunpack.c.h.bf16 %v3007_v19  ;;  %v2171_v2 = vpack.c.bf16 %v1596_v1, %v1596_v1  ;;  %v2172_v55 = vpack.c.bf16 %v1597_v54, %v1597_v54  ;;  %v1598_v12 = vmax.f32 %v1470_v6, %v1534_v48 }
 0x1d8   : > { %v1404_v63 = vmul.f32 %v3105_v21, %v3651_v59  ;;  %v1535_v18 = vmul.f32 0.2, %v1471_v39  ;;  %v1536_v0 = vmul.f32 0.2, %v1472_v60  ;;  %v1537_v23 = vmul.f32 0.2, %v1473_v11 }
 0x1d9   : > { %v1405_v4 = vmul.f32 %v3105_v21, %v3652_v20  ;;  %1917 = vst.msk [vmem:[%s3642_s4 + $0x40] sm:$0xf] %vm1900_vm3, %v2171_v2  ;;  %1918 = vst.msk [vmem:[%s3642_s4 + $0x44] sm:$0xf] %vm1900_vm3, %v2172_v55  ;;  %v2173_v19 = vpack.c.bf16 %v1598_v12, %v1598_v12  ;;  %v3653_v8 = vunpack.c.l.bf16 %v3013_v50  ;;  %v3654_v46 = vunpack.c.h.bf16 %v3013_v50 }
 0x1da   : > { %v1474_v41 = vadd.f32 %v3136_v35, %v1404_v63  ;;  %v1599_v31 = vmax.f32 %v1471_v39, %v1535_v18  ;;  %v1600_v32 = vmax.f32 %v1472_v60, %v1536_v0  ;;  %v1601_v43 = vmax.f32 %v1473_v11, %v1537_v23 }
 0x1db   : > { %v1475_v7 = vadd.f32 %v3136_v35, %v1405_v4  ;;  %v1406_v24 = vmul.f32 %v3105_v21, %v3653_v8  ;;  %v1407_v49 = vmul.f32 %v3105_v21, %v3654_v46  ;;  %1919 = vst.msk [vmem:[%s3642_s4 + $0x48] sm:$0xf] %vm1900_vm3, %v2173_v19  ;;  %v3655_v40 = vunpack.c.l.bf16 %v3015_v44 }
 0x1dc   : > { %v1538_v25 = vmul.f32 0.2, %v1474_v41  ;;  %v2174_v47 = vpack.c.bf16 %v1599_v31, %v1599_v31  ;;  %v2175_v34 = vpack.c.bf16 %v1600_v32, %v1600_v32  ;;  %v2176_v3 = vpack.c.bf16 %v1601_v43, %v1601_v43 }
 0x1dd   : > { %v1539_v45 = vmul.f32 0.2, %v1475_v7  ;;  %v1476_v14 = vadd.f32 %v3136_v35, %v1406_v24  ;;  %v1477_v27 = vadd.f32 %v3136_v35, %v1407_v49  ;;  %v1408_v50 = vmul.f32 %v3105_v21, %v3655_v40 }
 0x1de   : > { %v1602_v10 = vmax.f32 %v1474_v41, %v1538_v25  ;;  %1920 = vst.msk [vmem:[%s3642_s4 + $0x4c] sm:$0xf] %vm1900_vm3, %v2174_v47  ;;  %1921 = vst.msk [vmem:[%s3642_s4 + $0x50] sm:$0xf] %vm1900_vm3, %v2175_v34  ;;  %v3656_v9 = vunpack.c.h.bf16 %v3015_v44  ;;  %v3657_v5 = vunpack.c.l.bf16 %v3021_v13  ;;  %v3658_v6 = vunpack.c.h.bf16 %v3021_v13 }
 0x1df   : > { %1922 = vst.msk [vmem:[%s3642_s4 + $0x54] sm:$0xf] %vm1900_vm3, %v2176_v3  ;;  %v1603_v53 = vmax.f32 %v1475_v7, %v1539_v45  ;;  %v1540_v60 = vmul.f32 0.2, %v1476_v14  ;;  %v1541_v11 = vmul.f32 0.2, %v1477_v27  ;;  %v1478_v1 = vadd.f32 %v3136_v35, %v1408_v50 }
 0x1e0   : > { %v1409_v57 = vmul.f32 %v3105_v21, %v3656_v9  ;;  %v1410_v26 = vmul.f32 %v3105_v21, %v3657_v5  ;;  %v1411_v61 = vmul.f32 %v3105_v21, %v3658_v6  ;;  %v2177_v39 = vpack.c.bf16 %v1602_v10, %v1602_v10 }
 0x1e1   : > { %v2178_v54 = vpack.c.bf16 %v1603_v53, %v1603_v53  ;;  %v1604_v13 = vmax.f32 %v1476_v14, %v1540_v60  ;;  %v1605_v63 = vmax.f32 %v1477_v27, %v1541_v11  ;;  %v1542_v18 = vmul.f32 0.2, %v1478_v1 }
 0x1e2   : > { %v1479_v48 = vadd.f32 %v3136_v35, %v1409_v57  ;;  %v1480_v44 = vadd.f32 %v3136_v35, %v1410_v26  ;;  %v1481_v59 = vadd.f32 %v3136_v35, %v1411_v61  ;;  %1923 = vst.msk [vmem:[%s3642_s4 + $0x58] sm:$0xf] %vm1900_vm3, %v2177_v39  ;;  %v3659_v0 = vunpack.c.l.bf16 %v3023_v62 }
 0x1e3   : > { %1924 = vst.msk [vmem:[%s3642_s4 + $0x5c] sm:$0xf] %vm1900_vm3, %v2178_v54  ;;  %v3660_v55 = vunpack.c.h.bf16 %v3023_v62  ;;  %v2179_v41 = vpack.c.bf16 %v1604_v13, %v1604_v13  ;;  %v2180_v31 = vpack.c.bf16 %v1605_v63, %v1605_v63  ;;  %v1606_v32 = vmax.f32 %v1478_v1, %v1542_v18 }
 0x1e4   : > { %v1412_v23 = vmul.f32 %v3105_v21, %v3659_v0  ;;  %v1543_v20 = vmul.f32 0.2, %v1479_v48  ;;  %v1544_v4 = vmul.f32 0.2, %v1480_v44  ;;  %v1545_v2 = vmul.f32 0.2, %v1481_v59 }
 0x1e5   : > { %v1413_v12 = vmul.f32 %v3105_v21, %v3660_v55  ;;  %1925 = vst.msk [vmem:[%s3642_s4 + $0x60] sm:$0xf] %vm1900_vm3, %v2179_v41  ;;  %1926 = vst.msk [vmem:[%s3642_s4 + $0x64] sm:$0xf] %vm1900_vm3, %v2180_v31  ;;  %v2181_v62 = vpack.c.bf16 %v1606_v32, %v1606_v32  ;;  %v3661_v46 = vunpack.c.l.bf16 %v3029_v56  ;;  %v3662_v47 = vunpack.c.h.bf16 %v3029_v56 }
 0x1e6   : > { %v1482_v43 = vadd.f32 %v3136_v35, %v1412_v23  ;;  %v1607_v7 = vmax.f32 %v1479_v48, %v1543_v20  ;;  %v1608_v19 = vmax.f32 %v1480_v44, %v1544_v4  ;;  %v1609_v25 = vmax.f32 %v1481_v59, %v1545_v2 }
 0x1e7   : > { %v1483_v8 = vadd.f32 %v3136_v35, %v1413_v12  ;;  %v1414_v49 = vmul.f32 %v3105_v21, %v3661_v46  ;;  %v1415_v34 = vmul.f32 %v3105_v21, %v3662_v47  ;;  %1927 = vst.msk [vmem:[%s3642_s4 + $0x68] sm:$0xf] %vm1900_vm3, %v2181_v62  ;;  %v3663_v53 = vunpack.c.l.bf16 %v3031_v38 }
 0x1e8   : > { %v1546_v24 = vmul.f32 0.2, %v1482_v43  ;;  %v2182_v3 = vpack.c.bf16 %v1607_v7, %v1607_v7  ;;  %v2183_v45 = vpack.c.bf16 %v1608_v19, %v1608_v19  ;;  %v2184_v10 = vpack.c.bf16 %v1609_v25, %v1609_v25 }
 0x1e9   : > { %v1547_v14 = vmul.f32 0.2, %v1483_v8  ;;  %v1484_v40 = vadd.f32 %v3136_v35, %v1414_v49  ;;  %v1485_v50 = vadd.f32 %v3136_v35, %v1415_v34  ;;  %v1416_v56 = vmul.f32 %v3105_v21, %v3663_v53 }
 0x1ea   : > { %v1610_v27 = vmax.f32 %v1482_v43, %v1546_v24  ;;  %1928 = vst.msk [vmem:[%s3642_s4 + $0x6c] sm:$0xf] %vm1900_vm3, %v2182_v3  ;;  %1929 = vst.msk [vmem:[%s3642_s4 + $0x70] sm:$0xf] %vm1900_vm3, %v2183_v45  ;;  %v3664_v57 = vunpack.c.h.bf16 %v3031_v38  ;;  %v3665_v26 = vunpack.c.l.bf16 %v3037_v51  ;;  %v3666_v61 = vunpack.c.h.bf16 %v3037_v51 }
 0x1eb   : > { %1930 = vst.msk [vmem:[%s3642_s4 + $0x74] sm:$0xf] %vm1900_vm3, %v2184_v10  ;;  %v1611_v9 = vmax.f32 %v1483_v8, %v1547_v14  ;;  %v1548_v11 = vmul.f32 0.2, %v1484_v40  ;;  %v1549_v1 = vmul.f32 0.2, %v1485_v50  ;;  %v1486_v54 = vadd.f32 %v3136_v35, %v1416_v56 }
 0x1ec   : > { %v1417_v5 = vmul.f32 %v3105_v21, %v3664_v57  ;;  %v1418_v6 = vmul.f32 %v3105_v21, %v3665_v26  ;;  %v1419_v39 = vmul.f32 %v3105_v21, %v3666_v61  ;;  %v2185_v60 = vpack.c.bf16 %v1610_v27, %v1610_v27 }
 0x1ed   : > { %v2186_v48 = vpack.c.bf16 %v1611_v9, %v1611_v9  ;;  %v1612_v51 = vmax.f32 %v1484_v40, %v1548_v11  ;;  %v1613_v13 = vmax.f32 %v1485_v50, %v1549_v1  ;;  %v1550_v63 = vmul.f32 0.2, %v1486_v54 }
 0x1ee   : > { %v1487_v44 = vadd.f32 %v3136_v35, %v1417_v5  ;;  %v1488_v38 = vadd.f32 %v3136_v35, %v1418_v6  ;;  %v1489_v59 = vadd.f32 %v3136_v35, %v1419_v39  ;;  %1931 = vst.msk [vmem:[%s3642_s4 + $0x78] sm:$0xf] %vm1900_vm3, %v2185_v60  ;;  %v3667_v18 = vunpack.c.l.bf16 %v3039_v58 }
 0x1ef   : > { %1932 = vst.msk [vmem:[%s3642_s4 + $0x7c] sm:$0xf] %vm1900_vm3, %v2186_v48  ;;  %v3668_v2 = vunpack.c.h.bf16 %v3039_v58  ;;  %v2187_v12 = vpack.c.bf16 %v1612_v51, %v1612_v51  ;;  %v2188_v41 = vpack.c.bf16 %v1613_v13, %v1613_v13  ;;  %v1614_v31 = vmax.f32 %v1486_v54, %v1550_v63 }
 0x1f0   : > { %v1420_v0 = vmul.f32 %v3105_v21, %v3667_v18  ;;  %v1551_v23 = vmul.f32 0.2, %v1487_v44  ;;  %v1552_v20 = vmul.f32 0.2, %v1488_v38  ;;  %v1553_v4 = vmul.f32 0.2, %v1489_v59 }
 0x1f1   : > { %v1421_v55 = vmul.f32 %v3105_v21, %v3668_v2  ;;  %1933 = vst.msk [vmem:[%s3642_s4 + $0x80] sm:$0xf] %vm1900_vm3, %v2187_v12  ;;  %1934 = vst.msk [vmem:[%s3642_s4 + $0x84] sm:$0xf] %vm1900_vm3, %v2188_v41  ;;  %v2189_v58 = vpack.c.bf16 %v1614_v31, %v1614_v31  ;;  %v3669_v62 = vunpack.c.l.bf16 %v3045_v42  ;;  %v3670_v46 = vunpack.c.h.bf16 %v3045_v42 }
 0x1f2   : > { %v1490_v32 = vadd.f32 %v3136_v35, %v1420_v0  ;;  %v1615_v43 = vmax.f32 %v1487_v44, %v1551_v23  ;;  %v1616_v7 = vmax.f32 %v1488_v38, %v1552_v20  ;;  %v1617_v19 = vmax.f32 %v1489_v59, %v1553_v4 }
 0x1f3   : > { %v1491_v25 = vadd.f32 %v3136_v35, %v1421_v55  ;;  %v1422_v24 = vmul.f32 %v3105_v21, %v3669_v62  ;;  %v1423_v49 = vmul.f32 %v3105_v21, %v3670_v46  ;;  %1935 = vst.msk [vmem:[%s3642_s4 + $0x88] sm:$0xf] %vm1900_vm3, %v2189_v58  ;;  %v3671_v40 = vunpack.c.l.bf16 %v3047_v30 }
 0x1f4   : > { %v1554_v8 = vmul.f32 0.2, %v1490_v32  ;;  %v2190_v47 = vpack.c.bf16 %v1615_v43, %v1615_v43  ;;  %v2191_v34 = vpack.c.bf16 %v1616_v7, %v1616_v7  ;;  %v2192_v3 = vpack.c.bf16 %v1617_v19, %v1617_v19 }
 0x1f5   : > { %v1555_v45 = vmul.f32 0.2, %v1491_v25  ;;  %v1492_v14 = vadd.f32 %v3136_v35, %v1422_v24  ;;  %v1493_v27 = vadd.f32 %v3136_v35, %v1423_v49  ;;  %v1424_v42 = vmul.f32 %v3105_v21, %v3671_v40 }
 0x1f6   : > { %v1618_v10 = vmax.f32 %v1490_v32, %v1554_v8  ;;  %1936 = vst.msk [vmem:[%s3642_s4 + $0x8c] sm:$0xf] %vm1900_vm3, %v2190_v47  ;;  %1937 = vst.msk [vmem:[%s3642_s4 + $0x90] sm:$0xf] %vm1900_vm3, %v2191_v34  ;;  %v3672_v53 = vunpack.c.h.bf16 %v3047_v30  ;;  %v3673_v9 = vunpack.c.l.bf16 %v3053_v36  ;;  %v3674_v5 = vunpack.c.h.bf16 %v3053_v36 }
 0x1f7   : > { %1938 = vst.msk [vmem:[%s3642_s4 + $0x94] sm:$0xf] %vm1900_vm3, %v2192_v3  ;;  %v1619_v50 = vmax.f32 %v1491_v25, %v1555_v45  ;;  %v1556_v61 = vmul.f32 0.2, %v1492_v14  ;;  %v1557_v39 = vmul.f32 0.2, %v1493_v27  ;;  %v1494_v60 = vadd.f32 %v3136_v35, %v1424_v42 }
 0x1f8   : > { %v1425_v56 = vmul.f32 %v3105_v21, %v3672_v53  ;;  %v1426_v57 = vmul.f32 %v3105_v21, %v3673_v9  ;;  %v1427_v26 = vmul.f32 %v3105_v21, %v3674_v5  ;;  %v2193_v6 = vpack.c.bf16 %v1618_v10, %v1618_v10 }
 0x1f9   : > { %v2194_v11 = vpack.c.bf16 %v1619_v50, %v1619_v50  ;;  %v1620_v36 = vmax.f32 %v1492_v14, %v1556_v61  ;;  %v1621_v48 = vmax.f32 %v1493_v27, %v1557_v39  ;;  %v1558_v44 = vmul.f32 0.2, %v1494_v60 }
 0x1fa   : > { %v1495_v1 = vadd.f32 %v3136_v35, %v1425_v56  ;;  %v1496_v30 = vadd.f32 %v3136_v35, %v1426_v57  ;;  %v1497_v54 = vadd.f32 %v3136_v35, %v1427_v26  ;;  %1939 = vst.msk [vmem:[%s3642_s4 + $0x98] sm:$0xf] %vm1900_vm3, %v2193_v6  ;;  %v3675_v38 = vunpack.c.l.bf16 %v3055_v37 }
 0x1fb   : > { %1940 = vst.msk [vmem:[%s3642_s4 + $0x9c] sm:$0xf] %vm1900_vm3, %v2194_v11  ;;  %v3676_v18 = vunpack.c.h.bf16 %v3055_v37  ;;  %v2195_v23 = vpack.c.bf16 %v1620_v36, %v1620_v36  ;;  %v2196_v20 = vpack.c.bf16 %v1621_v48, %v1621_v48  ;;  %v1622_v4 = vmax.f32 %v1494_v60, %v1558_v44 }
 0x1fc   : > { %v1428_v59 = vmul.f32 %v3105_v21, %v3675_v38  ;;  %v1559_v51 = vmul.f32 0.2, %v1495_v1  ;;  %v1560_v13 = vmul.f32 0.2, %v1496_v30  ;;  %v1561_v63 = vmul.f32 0.2, %v1497_v54 }
 0x1fd   : > { %v1429_v0 = vmul.f32 %v3105_v21, %v3676_v18  ;;  %1941 = vst.msk [vmem:[%s3642_s4 + $0xa0] sm:$0xf] %vm1900_vm3, %v2195_v23  ;;  %1942 = vst.msk [vmem:[%s3642_s4 + $0xa4] sm:$0xf] %vm1900_vm3, %v2196_v20  ;;  %v2197_v37 = vpack.c.bf16 %v1622_v4, %v1622_v4  ;;  %v3677_v43 = vunpack.c.l.bf16 %v3061_v52  ;;  %v3678_v19 = vunpack.c.h.bf16 %v3061_v52 }
 0x1fe   : > { %v1498_v2 = vadd.f32 %v3136_v35, %v1428_v59  ;;  %v1623_v55 = vmax.f32 %v1495_v1, %v1559_v51  ;;  %v1624_v12 = vmax.f32 %v1496_v30, %v1560_v13  ;;  %v1625_v41 = vmax.f32 %v1497_v54, %v1561_v63 }
 0x1ff   : > { %v1499_v31 = vadd.f32 %v3136_v35, %v1429_v0  ;;  %v1430_v7 = vmul.f32 %v3105_v21, %v3677_v43  ;;  %v1431_v25 = vmul.f32 %v3105_v21, %v3678_v19  ;;  %1943 = vst.msk [vmem:[%s3642_s4 + $0xa8] sm:$0xf] %vm1900_vm3, %v2197_v37  ;;  %v3679_v34 = vunpack.c.l.bf16 %v3063_v33 }
 0x200   : > { %v1562_v32 = vmul.f32 0.2, %v1498_v2  ;;  %v2198_v58 = vpack.c.bf16 %v1623_v55, %v1623_v55  ;;  %v2199_v8 = vpack.c.bf16 %v1624_v12, %v1624_v12  ;;  %v2200_v62 = vpack.c.bf16 %v1625_v41, %v1625_v41 }
 0x201   : > { %v1563_v24 = vmul.f32 0.2, %v1499_v31  ;;  %v1500_v49 = vadd.f32 %v3136_v35, %v1430_v7  ;;  %v1501_v47 = vadd.f32 %v3136_v35, %v1431_v25  ;;  %v1432_v52 = vmul.f32 %v3105_v21, %v3679_v34 }
 0x202   : > { %v1626_v46 = vmax.f32 %v1498_v2, %v1562_v32  ;;  %1944 = vst.msk [vmem:[%s3642_s4 + $0xac] sm:$0xf] %vm1900_vm3, %v2198_v58  ;;  %1945 = vst.msk [vmem:[%s3642_s4 + $0xb0] sm:$0xf] %vm1900_vm3, %v2199_v8  ;;  %v3680_v45 = vunpack.c.h.bf16 %v3063_v33  ;;  %v3681_v14 = vunpack.c.l.bf16 %v3072_v29  ;;  %v3682_v40 = vunpack.c.h.bf16 %v3072_v29 }
 0x203   : > { %1946 = vst.msk [vmem:[%s3642_s4 + $0xb4] sm:$0xf] %vm1900_vm3, %v2200_v62  ;;  %v1627_v3 = vmax.f32 %v1499_v31, %v1563_v24  ;;  %v1564_v53 = vmul.f32 0.2, %v1500_v49  ;;  %v1565_v56 = vmul.f32 0.2, %v1501_v47  ;;  %v1502_v9 = vadd.f32 %v3136_v35, %v1432_v52 }
 0x204   : > { %v1433_v10 = vmul.f32 %v3105_v21, %v3680_v45  ;;  %v1434_v27 = vmul.f32 %v3105_v21, %v3681_v14  ;;  %v1435_v42 = vmul.f32 %v3105_v21, %v3682_v40  ;;  %v2201_v50 = vpack.c.bf16 %v1626_v46, %v1626_v46 }
 0x205   : > { %v2202_v57 = vpack.c.bf16 %v1627_v3, %v1627_v3  ;;  %v1628_v29 = vmax.f32 %v1500_v49, %v1564_v53  ;;  %v1629_v6 = vmax.f32 %v1501_v47, %v1565_v56  ;;  %v1566_v61 = vmul.f32 0.2, %v1502_v9 }
 0x206   : > { %v1503_v5 = vadd.f32 %v3136_v35, %v1433_v10  ;;  %v1504_v33 = vadd.f32 %v3136_v35, %v1434_v27  ;;  %v1505_v26 = vadd.f32 %v3136_v35, %v1435_v42  ;;  %1947 = vst.msk [vmem:[%s3642_s4 + $0xb8] sm:$0xf] %vm1900_vm3, %v2201_v50  ;;  %v3683_v39 = vunpack.c.l.bf16 %v3078_v22 }
 0x207   : > { %1948 = vst.msk [vmem:[%s3642_s4 + $0xbc] sm:$0xf] %vm1900_vm3, %v2202_v57  ;;  %v3684_v54 = vunpack.c.h.bf16 %v3078_v22  ;;  %v2203_v48 = vpack.c.bf16 %v1628_v29, %v1628_v29  ;;  %v2204_v44 = vpack.c.bf16 %v1629_v6, %v1629_v6  ;;  %v1630_v38 = vmax.f32 %v1502_v9, %v1566_v61 }
 0x208   : > { %v1436_v60 = vmul.f32 %v3105_v21, %v3683_v39  ;;  %v1567_v11 = vmul.f32 0.2, %v1503_v5  ;;  %v1568_v1 = vmul.f32 0.2, %v1504_v33  ;;  %v1569_v30 = vmul.f32 0.2, %v1505_v26 }
 0x209   : > { %v1437_v36 = vmul.f32 %v3105_v21, %v3684_v54  ;;  %1949 = vst.msk [vmem:[%s3642_s4 + $0xc0] sm:$0xf] %vm1900_vm3, %v2203_v48  ;;  %1950 = vst.msk [vmem:[%s3642_s4 + $0xc4] sm:$0xf] %vm1900_vm3, %v2204_v44  ;;  %v2205_v22 = vpack.c.bf16 %v1630_v38, %v1630_v38  ;;  %v3685_v23 = vunpack.c.l.bf16 %v3080_v17  ;;  %v3686_v4 = vunpack.c.h.bf16 %v3080_v17 }
 0x20a   : > { %v1506_v59 = vadd.f32 %v3136_v35, %v1436_v60  ;;  %v1631_v51 = vmax.f32 %v1503_v5, %v1567_v11  ;;  %v1632_v13 = vmax.f32 %v1504_v33, %v1568_v1  ;;  %v1633_v63 = vmax.f32 %v1505_v26, %v1569_v30 }
 0x20b   : > { %v1507_v18 = vadd.f32 %v3136_v35, %v1437_v36  ;;  %v1438_v20 = vmul.f32 %v3105_v21, %v3685_v23  ;;  %v1439_v2 = vmul.f32 %v3105_v21, %v3686_v4  ;;  %1951 = vst.msk [vmem:[%s3642_s4 + $0xc8] sm:$0xf] %vm1900_vm3, %v2205_v22  ;;  %v3687_v7 = vunpack.c.l.bf16 %v3086_v28 }
 0x20c   : > { %v1570_v0 = vmul.f32 0.2, %v1506_v59  ;;  %v2206_v55 = vpack.c.bf16 %v1631_v51, %v1631_v51  ;;  %v2207_v12 = vpack.c.bf16 %v1632_v13, %v1632_v13  ;;  %v2208_v41 = vpack.c.bf16 %v1633_v63, %v1633_v63 }
 0x20d   : > { %v1571_v31 = vmul.f32 0.2, %v1507_v18  ;;  %v1508_v32 = vadd.f32 %v3136_v35, %v1438_v20  ;;  %v1509_v43 = vadd.f32 %v3136_v35, %v1439_v2  ;;  %v1440_v17 = vmul.f32 %v3105_v21, %v3687_v7 }
 0x20e   : > { %v1634_v37 = vmax.f32 %v1506_v59, %v1570_v0  ;;  %1952 = vst.msk [vmem:[%s3642_s4 + $0xcc] sm:$0xf] %vm1900_vm3, %v2206_v55  ;;  %1953 = vst.msk [vmem:[%s3642_s4 + $0xd0] sm:$0xf] %vm1900_vm3, %v2207_v12  ;;  %v3688_v25 = vunpack.c.h.bf16 %v3086_v28  ;;  %v3689_v8 = vunpack.c.l.bf16 %v3091_v16  ;;  %v3690_v24 = vunpack.c.h.bf16 %v3091_v16 }
 0x20f   : > { %1954 = vst.msk [vmem:[%s3642_s4 + $0xd4] sm:$0xf] %vm1900_vm3, %v2208_v41  ;;  %v1635_v19 = vmax.f32 %v1507_v18, %v1571_v31  ;;  %v1572_v47 = vmul.f32 0.2, %v1508_v32  ;;  %v1573_v34 = vmul.f32 0.2, %v1509_v43  ;;  %v1510_v52 = vadd.f32 %v3136_v35, %v1440_v17 }
 0x210   : > { %v1441_v58 = vmul.f32 %v3105_v21, %v3688_v25  ;;  %v1442_v62 = vmul.f32 %v3105_v21, %v3689_v8  ;;  %v1443_v46 = vmul.f32 %v3105_v21, %v3690_v24  ;;  %v2209_v49 = vpack.c.bf16 %v1634_v37, %v1634_v37 }
 0x211   : > { %v2210_v3 = vpack.c.bf16 %v1635_v19, %v1635_v19  ;;  %v1636_v16 = vmax.f32 %v1508_v32, %v1572_v47  ;;  %v1637_v14 = vmax.f32 %v1509_v43, %v1573_v34  ;;  %v1574_v27 = vmul.f32 0.2, %v1510_v52 }
 0x212   : > { %v1511_v45 = vadd.f32 %v3136_v35, %v1441_v58  ;;  %v1512_v28 = vadd.f32 %v3136_v35, %v1442_v62  ;;  %v1513_v10 = vadd.f32 %v3136_v35, %v1443_v46  ;;  %1955 = vst.msk [vmem:[%s3642_s4 + $0xd8] sm:$0xf] %vm1900_vm3, %v2209_v49  ;;  %v3691_v40 = vunpack.c.l.bf16 %v3093_v15 }
 0x213   : > { %1956 = vst.msk [vmem:[%s3642_s4 + $0xdc] sm:$0xf] %vm1900_vm3, %v2210_v3  ;;  %v3692_v9 = vunpack.c.h.bf16 %v3093_v15  ;;  %v2211_v5 = vpack.c.bf16 %v1636_v16, %v1636_v16  ;;  %v2212_v33 = vpack.c.bf16 %v1637_v14, %v1637_v14  ;;  %v1638_v26 = vmax.f32 %v1510_v52, %v1574_v27 }
 0x214   : > { %v1444_v42 = vmul.f32 %v3105_v21, %v3691_v40  ;;  %v1575_v50 = vmul.f32 0.2, %v1511_v45  ;;  %v1576_v53 = vmul.f32 0.2, %v1512_v28  ;;  %v1577_v56 = vmul.f32 0.2, %v1513_v10 }
 0x215   : > { %v1445_v57 = vmul.f32 %v3105_v21, %v3692_v9  ;;  %1957 = vst.msk [vmem:[%s3642_s4 + $0xe0] sm:$0xf] %vm1900_vm3, %v2211_v5  ;;  %1958 = vst.msk [vmem:[%s3642_s4 + $0xe4] sm:$0xf] %vm1900_vm3, %v2212_v33  ;;  %v2213_v15 = vpack.c.bf16 %v1638_v26, %v1638_v26 }
 0x216   : > { %v1514_v29 = vadd.f32 %v3136_v35, %v1444_v42  ;;  %v1639_v6 = vmax.f32 %v1511_v45, %v1575_v50  ;;  %v1640_v61 = vmax.f32 %v1512_v28, %v1576_v53  ;;  %v1641_v39 = vmax.f32 %v1513_v10, %v1577_v56 }
 0x217   : > { %v1515_v60 = vadd.f32 %v3136_v35, %v1445_v57  ;;  %1959 = vst.msk [vmem:[%s3642_s4 + $0xe8] sm:$0xf] %vm1900_vm3, %v2213_v15 }
 0x218   : > { %v1578_v21 = vmul.f32 0.2, %v1514_v29  ;;  %v2214_v11 = vpack.c.bf16 %v1639_v6, %v1639_v6  ;;  %v2215_v1 = vpack.c.bf16 %v1640_v61, %v1640_v61  ;;  %v2216_v30 = vpack.c.bf16 %v1641_v39, %v1641_v39 }
 0x219   : > { %v1579_v54 = vmul.f32 0.2, %v1515_v60 }
 0x21a   : > { %v1642_v35 = vmax.f32 %v1514_v29, %v1578_v21  ;;  %1960 = vst.msk [vmem:[%s3642_s4 + $0xec] sm:$0xf] %vm1900_vm3, %v2214_v11  ;;  %1961 = vst.msk [vmem:[%s3642_s4 + $0xf0] sm:$0xf] %vm1900_vm3, %v2215_v1 }
 0x21b   : > { %1962 = vst.msk [vmem:[%s3642_s4 + $0xf4] sm:$0xf] %vm1900_vm3, %v2216_v30  ;;  %v1643_v36 = vmax.f32 %v1515_v60, %v1579_v54 }
 0x21c   : > { %v2217_v48 = vpack.c.bf16 %v1642_v35, %v1642_v35 }
 0x21d   : > { %v2218_v44 = vpack.c.bf16 %v1643_v36, %v1643_v36 }
 0x21e   : > { %1963 = vst.msk [vmem:[%s3642_s4 + $0xf8] sm:$0xf] %vm1900_vm3, %v2217_v48 }
 0x21f   : > { %1964 = vst.msk [vmem:[%s3642_s4 + $0xfc] sm:$0xf] %vm1900_vm3, %v2218_v44 }
 0x220 PF: > { %s14_s17 = sadd.s32 1, %s2444_s17   ;;  %s3693_s15 = smov %s2440_s16 }
 0x221   : > { %p11_p7 = scmp.ge.s32.totalorder %s14_s17, 4   ;;  %s3694_s16 = smov %s3696_s18 }
 0x223   :  { %13 = sbr.rel (!%p11_p7) target bundleno = 2 (0x2), region = 80 }

// kernel: _lambda_.7
= control target key start
LH: loop header
LB: loop body
LE: loop exit
PB: predicated region body
PF: predicated region fallthrough
CT: control target
= control target key end

     0   :  { %s1235_s15 = smov 0   ;;  %s1237_s16 = smov 0   ;;  %s1553_s0 = inlined_call_operand.vmem [shape: bf16[128,256], index: 0, kind: input, shape index: {}]   ;;  %s1554_s1 = inlined_call_operand.vmem [shape: bf16[256,32], index: 1, kind: input, shape index: {}]   ;;  %s1555_s2 = inlined_call_operand.vmem [shape: f32[1,32], index: 2, kind: input, shape index: {}]   ;;  %s1556_s3 = inlined_call_operand.vmem [shape: f32[1,32], index: 3, kind: input, shape index: {}]   ;;  %s1557_s4 = inlined_call_operand.vmem [shape: bf16[128,32], index: 4, kind: output, shape index: {}]  }
   0x1   :  { %s1239_s17 = smov 0  }
   0x2 LB: > { %s26_s18 = sadd.s32 1, %s1203_s16  ;;  %p965_p0 = scmp.ge.s32.totalorder %s1207_s17, 1  ;;  %s1207_s17 = sphi %s1239_s17, %s14_s17   ;;  %s1203_s16 = sphi %s1237_s16, %s1559_s16   ;;  %s1199_s15 = sphi %s1235_s15, %s1558_s15  }
   0x3   : > { %p28_p1 = scmp.ge.s32.totalorder %s26_s18, 2  ;;  %p186_p2 = scmp.lt.s32.totalorder %s1207_s17, 3 }
   0x5   : > { %s1561_s18 = smov (%p28_p1, %s26_s18), 0  ;;  %p187_p3 = pnand %p965_p0, %p186_p2 }
   0x6   : > { %p236_p4 = scmp.eq.s32.totalorder (!%p187_p3), %s1199_s15, 0 }
   0x7   : > { %190 = sbr.rel (%p187_p3) target bundleno = 388 (0x184), region = 36 }
   0xe   : > { %241 = sbr.rel (!%p236_p4) target bundleno = 21 (0x15), region = 40  ;;  %vm242_vm0 = vcmask (%p236_p4), 253952   ;;  %v1209_v0 = vmov (%p236_p4), 0.0  }
   0xf   : > { %243 = vst.msk [vmem:[#allocation3] sm:$0x1] (%p236_p4), %vm242_vm0, %v1209_v0  ;;  %244 = vst.msk [vmem:[#allocation4] sm:$0x1] (%p236_p4), %vm242_vm0, %v1209_v0 }
  0x15 PF: > { %p967_p5 = scmp.ne.s32.totalorder %s1199_s15, 0 }
  0x16   : > { %v1143_v1 = vld [vmem:[%s1554_s1 + $0x40] sm:$0xff] (!%p967_p5)   ;;  %v1145_v3 = vld [vmem:[%s1554_s1 + $0x48] sm:$0xff] (!%p967_p5)   ;;  %v1147_v5 = vld [vmem:[%s1554_s1 + $0x50] sm:$0xff] (!%p967_p5)   ;;  %vm580_vm1 = vcmask (!%p967_p5), 261120   ;;  %vm628_vm2 = vcmask (!%p967_p5), 253952  }
  0x17   : > { %247 = sbr.rel (%p967_p5) target bundleno = 332 (0x14c), region = 44  ;;  %v1144_v2 = vld [vmem:[%s1554_s1] sm:$0xff] (!%p967_p5)   ;;  %1038 = vmatprep.subr.bf16.mxu0 (!%p967_p5), %v1143_v1  ;;  %1102 = vmatprep.subr.bf16.mxu1 (!%p967_p5), %v1143_v1  ;;  %v1146_v4 = vld [vmem:[%s1554_s1 + $0x8] sm:$0xff] (!%p967_p5)   ;;  %v1148_v6 = vld [vmem:[%s1554_s1 + $0x10] sm:$0xff] (!%p967_p5)  }
  0x18   : > { %1039 = vmatpush3.bf16.msra.mxu0 (!%p967_p5), %v1144_v2  ;;  %1110 = vmatpush3.bf16.msra.mxu1 (!%p967_p5), %v1144_v2  ;;  %v1149_v7 = vld [vmem:[%s1554_s1 + $0x58] sm:$0xff] (!%p967_p5)   ;;  %v1151_v9 = vld [vmem:[%s1554_s1 + $0x60] sm:$0xff] (!%p967_p5)   ;;  %v1153_v11 = vld [vmem:[%s1554_s1 + $0x68] sm:$0xff] (!%p967_p5)  }
  0x19   : > { %1040 = vmatprep.subr.bf16.mxu0 (!%p967_p5), %v1145_v3  ;;  %1103 = vmatprep.subr.bf16.mxu1 (!%p967_p5), %v1145_v3  ;;  %v1150_v8 = vld [vmem:[%s1554_s1 + $0x18] sm:$0xff] (!%p967_p5)   ;;  %v1152_v10 = vld [vmem:[%s1554_s1 + $0x20] sm:$0xff] (!%p967_p5)   ;;  %v1154_v13 = vld [vmem:[%s1554_s1 + $0x28] sm:$0xff] (!%p967_p5)  }
  0x1a   : > { %v1161_v12 = vld [vmem:[%s1553_s0 + $0x4] ss:$8 sps:$4 sm:$0xff] (!%p967_p5)   ;;  %v1155_v15 = vld [vmem:[%s1554_s1 + $0x70] sm:$0xff] (!%p967_p5)   ;;  %v1157_v17 = vld [vmem:[%s1554_s1 + $0x78] sm:$0xff] (!%p967_p5)  }
  0x1b   : > { %v1167_v14 = vld [vmem:[%s1553_s0 + $0x44] ss:$8 sps:$4 sm:$0xff] (!%p967_p5)   ;;  %504 = vmatprep.mubr.bf16.mxu0 (!%p967_p5), %v1161_v12  ;;  %v1156_v16 = vld [vmem:[%s1554_s1 + $0x30] sm:$0xff] (!%p967_p5)   ;;  %v1158_v18 = vld [vmem:[%s1554_s1 + $0x38] sm:$0xff] (!%p967_p5)  }
  0x1c   : > { %1041 = vmatpush3.bf16.msra.mxu0 (!%p967_p5), %v1146_v4  ;;  %1111 = vmatpush3.bf16.msra.mxu1 (!%p967_p5), %v1146_v4  ;;  %v1159_v19 = vld [vmem:[%s1553_s0] ss:$8 sps:$4 sm:$0xff] (!%p967_p5)   ;;  %v1162_v21 = vld [vmem:[%s1553_s0 + $0x14] ss:$8 sps:$4 sm:$0xff] (!%p967_p5)   ;;  %v1164_v23 = vld [vmem:[%s1553_s0 + $0x10] ss:$8 sps:$4 sm:$0xff] (!%p967_p5)  }
  0x1d   : > { %1042 = vmatprep.subr.bf16.mxu0 (!%p967_p5), %v1147_v5  ;;  %1104 = vmatprep.subr.bf16.mxu1 (!%p967_p5), %v1147_v5  ;;  %v1165_v20 = vld [vmem:[%s1553_s0 + $0x40] ss:$8 sps:$4 sm:$0xff] (!%p967_p5)   ;;  %v1171_v22 = vld [vmem:[%s1553_s0 + $0x54] ss:$8 sps:$4 sm:$0xff] (!%p967_p5)   ;;  %v1173_v24 = vld [vmem:[%s1553_s0 + $0x50] ss:$8 sps:$4 sm:$0xff] (!%p967_p5)  }
  0x1e   : > { %536 = vmatprep.mubr.bf16.mxu1 %v1167_v14  ;;  %v1168_v25 = vld [vmem:[%s1553_s0 + $0x24] ss:$8 sps:$4 sm:$0xff]   ;;  %v1170_v27 = vld [vmem:[%s1553_s0 + $0x20] ss:$8 sps:$4 sm:$0xff]   ;;  %v1174_v29 = vld [vmem:[%s1553_s0 + $0x34] ss:$8 sps:$4 sm:$0xff]  }
  0x1f   : > { %v1177_v26 = vld [vmem:[%s1553_s0 + $0x64] ss:$8 sps:$4 sm:$0xff]   ;;  %v1179_v28 = vld [vmem:[%s1553_s0 + $0x60] ss:$8 sps:$4 sm:$0xff]   ;;  %v1180_v30 = vld [vmem:[%s1553_s0 + $0x74] ss:$8 sps:$4 sm:$0xff]  }
  0x20   : > { %1043 = vmatpush3.bf16.msra.mxu0 %v1148_v6  ;;  %1112 = vmatpush3.bf16.msra.mxu1 %v1148_v6  ;;  %v1176_v31 = vld [vmem:[%s1553_s0 + $0x30] ss:$8 sps:$4 sm:$0xff]  }
  0x21   : > { %1044 = vmatprep.subr.bf16.mxu0 %v1149_v7  ;;  %1105 = vmatprep.subr.bf16.mxu1 %v1149_v7  ;;  %v1182_v32 = vld [vmem:[%s1553_s0 + $0x70] ss:$8 sps:$4 sm:$0xff]  }
  0x24   : > { %1045 = vmatpush3.bf16.msra.mxu0 %v1150_v8  ;;  %1113 = vmatpush3.bf16.msra.mxu1 %v1150_v8 }
  0x25   : > { %1046 = vmatprep.subr.bf16.mxu0 %v1151_v9  ;;  %1106 = vmatprep.subr.bf16.mxu1 %v1151_v9 }
  0x28   : > { %1047 = vmatpush3.bf16.msra.mxu0 %v1152_v10  ;;  %1114 = vmatpush3.bf16.msra.mxu1 %v1152_v10 }
  0x29   : > { %1048 = vmatprep.subr.bf16.mxu0 %v1153_v11  ;;  %1107 = vmatprep.subr.bf16.mxu1 %v1153_v11 }
  0x2c   : > { %1049 = vmatpush3.bf16.msra.mxu0 %v1154_v13  ;;  %1115 = vmatpush3.bf16.msra.mxu1 %v1154_v13 }
  0x2d   : > { %1050 = vmatprep.subr.bf16.mxu0 %v1155_v15  ;;  %1108 = vmatprep.subr.bf16.mxu1 %v1155_v15 }
  0x30   : > { %1051 = vmatpush3.bf16.msra.mxu0 %v1156_v16  ;;  %1116 = vmatpush3.bf16.msra.mxu1 %v1156_v16 }
  0x31   : > { %1052 = vmatprep.subr.bf16.mxu0 %v1157_v17  ;;  %1109 = vmatprep.subr.bf16.mxu1 %v1157_v17 }
  0x34   : > { %1053 = vmatpush3.bf16.msra.mxu0 %v1158_v18  ;;  %1117 = vmatpush3.bf16.msra.mxu1 %v1158_v18 }
  0x37   : > { %505 = vmatmul.mubr.bf16.vlgmr.msra.gmra.mrb[0].mxu0 %v1159_v19  ;;  %537 = vmatmul.mubr.bf16.vlgmr.msra.gmra.mrb[0].mxu1 %v1165_v20 }
  0x38   : > { %512 = vmatprep.mubr.bf16.mxu0 %v1162_v21  ;;  %544 = vmatprep.mubr.bf16.mxu1 %v1171_v22 }
  0x3f   : > { %513 = vmatmul.mubr.bf16.gmra.mrb[4].mxu0 %v1164_v23  ;;  %545 = vmatmul.mubr.bf16.gmra.mrb[4].mxu1 %v1173_v24 }
  0x40   : > { %520 = vmatprep.mubr.bf16.mxu0 %v1168_v25  ;;  %552 = vmatprep.mubr.bf16.mxu1 %v1177_v26 }
  0x47   : > { %521 = vmatmul.mubr.bf16.gmra.mrb[8].mxu0 %v1170_v27  ;;  %553 = vmatmul.mubr.bf16.gmra.mrb[8].mxu1 %v1179_v28 }
  0x48   : > { %528 = vmatprep.mubr.bf16.mxu0 %v1174_v29  ;;  %560 = vmatprep.mubr.bf16.mxu1 %v1180_v30 }
  0x4f   : > { %529 = vmatmul.mubr.bf16.gmra.mrb[12].mxu0 %v1176_v31  ;;  %561 = vmatmul.mubr.bf16.gmra.mrb[12].mxu1 %v1182_v32 }
 0x10a   : > { %v1054_v33 = vpop.f32.mrb[0].mxu0  ;;  %v1078_v34 = vpop.f32.mrb[0].mxu1 }
 0x10b   : > { %v1055_v35 = vpop.f32.mrb[1].mxu0  ;;  %v1079_v36 = vpop.f32.mrb[1].mxu1 }
 0x10c   : > { %v1056_v37 = vadd.f32 %v1055_v35, %v1054_v33  ;;  %v1057_v38 = vpop.f32.mrb[2].mxu0  ;;  %v1353_v39 = vadd.f32 %v1079_v36, %v1078_v34  ;;  %v1081_v40 = vpop.f32.mrb[2].mxu1 }
 0x10d   : > { %v1058_v41 = vpop.f32.mrb[3].mxu0  ;;  %v1082_v42 = vpop.f32.mrb[3].mxu1 }
 0x10e   : > { %v631_v43 = vmul.f32 %v1056_v37, %v1056_v37  ;;  %v1059_v44 = vadd.f32 %v1058_v41, %v1057_v38  ;;  %v1355_v45 = vadd.f32 %v1082_v42, %v1081_v40  ;;  %v590_v46 = vsel %vm580_vm1, %v1056_v37, 0.0 }
 0x110   : > { %v569_v47 = vpack.c.bf16 %v1059_v44, %v1056_v37  ;;  %v591_v48 = vsel %vm580_vm1, %v1059_v44, 0.0  ;;  %v632_v49 = vmul.f32 %v1059_v44, %v1059_v44  ;;  %v573_v51 = vpack.c.bf16 %v1355_v45, %v1353_v39 }
 0x111   : > { %v592_v50 = vadd.f32 %v591_v48, %v590_v46  ;;  %v647_v52 = vsel %vm580_vm1, %v631_v43, 0.0 }
 0x112   : > { %581 = vst.msk [vmem:[#allocation2] sm:$0xff] %vm580_vm1, %v569_v47  ;;  %v648_v53 = vsel %vm580_vm1, %v632_v49, 0.0  ;;  %v1060_v54 = vpop.f32.mrb[4].mxu0  ;;  %v1084_v55 = vpop.f32.mrb[4].mxu1  ;;  %585 = vst.msk [vmem:[#allocation2 + $0x20] sm:$0xff] %vm580_vm1, %v573_v51 }
 0x113   : > { %v649_v56 = vadd.f32 %v648_v53, %v647_v52  ;;  %v1061_v57 = vpop.f32.mrb[5].mxu0  ;;  %v1085_v58 = vpop.f32.mrb[5].mxu1 }
 0x114   : > { %v1062_v59 = vadd.f32 %v1061_v57, %v1060_v54  ;;  %v1063_v60 = vpop.f32.mrb[6].mxu0  ;;  %v1365_v61 = vadd.f32 %v1085_v58, %v1084_v55  ;;  %v1087_v62 = vpop.f32.mrb[6].mxu1  ;;  %v639_v54 = vmul.f32 %v1353_v39, %v1353_v39 }
 0x115   : > { %v1064_v63 = vpop.f32.mrb[7].mxu0  ;;  %v1088_v0 = vpop.f32.mrb[7].mxu1 }
 0x116   : > { %v593_v1 = vsel %vm580_vm1, %v1062_v59, 0.0  ;;  %v633_v2 = vmul.f32 %v1062_v59, %v1062_v59  ;;  %v1065_v3 = vadd.f32 %v1064_v63, %v1063_v60  ;;  %v1368_v5 = vadd.f32 %v1088_v0, %v1087_v62 }
 0x117   : > { %v594_v4 = vadd.f32 %v593_v1, %v592_v50  ;;  %v605_v1 = vsel %vm580_vm1, %v1353_v39, 0.0 }
 0x118   : > { %v650_v6 = vsel %vm580_vm1, %v633_v2, 0.0  ;;  %v570_v7 = vpack.c.bf16 %v1065_v3, %v1062_v59  ;;  %v595_v8 = vsel %vm580_vm1, %v1065_v3, 0.0  ;;  %v634_v9 = vmul.f32 %v1065_v3, %v1065_v3 }
 0x119   : > { %v651_v10 = vadd.f32 %v650_v6, %v649_v56  ;;  %v596_v11 = vadd.f32 %v595_v8, %v594_v4  ;;  %v574_v12 = vpack.c.bf16 %v1368_v5, %v1365_v61  ;;  %v640_v2 = vmul.f32 %v1355_v45, %v1355_v45 }
 0x11a   : > { %582 = vst.msk [vmem:[#allocation2 + $0x8] sm:$0xff] %vm580_vm1, %v570_v7  ;;  %v652_v13 = vsel %vm580_vm1, %v634_v9, 0.0  ;;  %v1066_v14 = vpop.f32.mrb[8].mxu0  ;;  %v1090_v15 = vpop.f32.mrb[8].mxu1  ;;  %v662_v7 = vsel %vm580_vm1, %v639_v54, 0.0  ;;  %v607_v8 = vsel %vm580_vm1, %v1355_v45, 0.0  ;;  %v641_v9 = vmul.f32 %v1365_v61, %v1365_v61 }
 0x11b   : > { %v653_v16 = vadd.f32 %v652_v13, %v651_v10  ;;  %v1067_v17 = vpop.f32.mrb[9].mxu0  ;;  %586 = vst.msk [vmem:[#allocation2 + $0x28] sm:$0xff] %vm580_vm1, %v574_v12  ;;  %v1091_v18 = vpop.f32.mrb[9].mxu1  ;;  %v609_v12 = vsel %vm580_vm1, %v1365_v61, 0.0  ;;  %v642_v13 = vmul.f32 %v1368_v5, %v1368_v5  ;;  %v611_v45 = vsel %vm580_vm1, %v1368_v5, 0.0 }
 0x11c   : > { %v1068_v19 = vadd.f32 %v1067_v17, %v1066_v14  ;;  %v1069_v20 = vpop.f32.mrb[10].mxu0  ;;  %v1377_v21 = vadd.f32 %v1091_v18, %v1090_v15  ;;  %v1093_v22 = vpop.f32.mrb[10].mxu1 }
 0x11d   : > { %v1070_v23 = vpop.f32.mrb[11].mxu0  ;;  %v1094_v24 = vpop.f32.mrb[11].mxu1 }
 0x11e   : > { %v597_v25 = vsel %vm580_vm1, %v1068_v19, 0.0  ;;  %v635_v26 = vmul.f32 %v1068_v19, %v1068_v19  ;;  %v1071_v27 = vadd.f32 %v1070_v23, %v1069_v20  ;;  %v1380_v29 = vadd.f32 %v1094_v24, %v1093_v22 }
 0x11f   : > { %v598_v28 = vadd.f32 %v597_v25, %v596_v11  ;;  %v664_v11 = vsel %vm580_vm1, %v640_v2, 0.0  ;;  %v643_v17 = vmul.f32 %v1377_v21, %v1377_v21  ;;  %v668_v20 = vsel %vm580_vm1, %v642_v13, 0.0 }
 0x120   : > { %v654_v30 = vsel %vm580_vm1, %v635_v26, 0.0  ;;  %v571_v31 = vpack.c.bf16 %v1071_v27, %v1068_v19  ;;  %v599_v32 = vsel %vm580_vm1, %v1071_v27, 0.0  ;;  %v636_v33 = vmul.f32 %v1071_v27, %v1071_v27 }
 0x121   : > { %v655_v34 = vadd.f32 %v654_v30, %v653_v16  ;;  %v600_v35 = vadd.f32 %v599_v32, %v598_v28  ;;  %v575_v36 = vpack.c.bf16 %v1380_v29, %v1377_v21  ;;  %v666_v16 = vsel %vm580_vm1, %v641_v9, 0.0 }
 0x122   : > { %583 = vst.msk [vmem:[#allocation2 + $0x10] sm:$0xff] %vm580_vm1, %v571_v31  ;;  %v656_v37 = vsel %vm580_vm1, %v636_v33, 0.0  ;;  %v1072_v38 = vpop.f32.mrb[12].mxu0  ;;  %v1096_v40 = vpop.f32.mrb[12].mxu1  ;;  %v613_v61 = vsel %vm580_vm1, %v1377_v21, 0.0  ;;  %v644_v22 = vmul.f32 %v1380_v29, %v1380_v29  ;;  %v670_v26 = vsel %vm580_vm1, %v643_v17, 0.0 }
 0x123   : > { %v657_v41 = vadd.f32 %v656_v37, %v655_v34  ;;  %v1073_v42 = vpop.f32.mrb[13].mxu0  ;;  %587 = vst.msk [vmem:[#allocation2 + $0x30] sm:$0xff] %vm580_vm1, %v575_v36  ;;  %v1097_v43 = vpop.f32.mrb[13].mxu1  ;;  %v615_v5 = vsel %vm580_vm1, %v1380_v29, 0.0 }
 0x124   : > { %v1074_v44 = vadd.f32 %v1073_v42, %v1072_v38  ;;  %v1075_v46 = vpop.f32.mrb[14].mxu0  ;;  %v1098_v47 = vadd.f32 %v1097_v43, %v1096_v40  ;;  %v1099_v48 = vpop.f32.mrb[14].mxu1  ;;  %v672_v31 = vsel %vm580_vm1, %v644_v22, 0.0 }
 0x125   : > { %v1076_v49 = vpop.f32.mrb[15].mxu0  ;;  %v1100_v50 = vpop.f32.mrb[15].mxu1 }
 0x126   : > { %v601_v51 = vsel %vm580_vm1, %v1074_v44, 0.0  ;;  %v637_v52 = vmul.f32 %v1074_v44, %v1074_v44  ;;  %v1077_v53 = vadd.f32 %v1076_v49, %v1075_v46  ;;  %v1101_v56 = vadd.f32 %v1100_v50, %v1099_v48  ;;  %v589_v50 = vld [vmem:[#allocation3] sm:$0x1] }
 0x127   : > { %v602_v55 = vadd.f32 %v601_v51, %v600_v35  ;;  %v645_v23 = vmul.f32 %v1098_v47, %v1098_v47  ;;  %v617_v27 = vsel %vm580_vm1, %v1098_v47, 0.0 }
 0x128   : > { %v658_v57 = vsel %vm580_vm1, %v637_v52, 0.0  ;;  %v572_v58 = vpack.c.bf16 %v1077_v53, %v1074_v44  ;;  %v603_v59 = vsel %vm580_vm1, %v1077_v53, 0.0  ;;  %v638_v60 = vmul.f32 %v1077_v53, %v1077_v53  ;;  %v630_v53 = vld [vmem:[#allocation4] sm:$0x1] }
 0x129   : > { %v659_v62 = vadd.f32 %v658_v57, %v657_v41  ;;  %v604_v63 = vadd.f32 %v603_v59, %v602_v55  ;;  %v576_v0 = vpack.c.bf16 %v1101_v56, %v1098_v47  ;;  %v674_v32 = vsel %vm580_vm1, %v645_v23, 0.0 }
 0x12a   : > { %584 = vst.msk [vmem:[#allocation2 + $0x18] sm:$0xff] %vm580_vm1, %v572_v58  ;;  %v660_v3 = vsel %vm580_vm1, %v638_v60, 0.0  ;;  %v646_v21 = vmul.f32 %v1101_v56, %v1101_v56  ;;  %v619_v35 = vsel %vm580_vm1, %v1101_v56, 0.0 }
 0x12b   : > { %v606_v4 = vadd.f32 %v605_v1, %v604_v63  ;;  %v661_v6 = vadd.f32 %v660_v3, %v659_v62  ;;  %588 = vst.msk [vmem:[#allocation2 + $0x38] sm:$0xff] %vm580_vm1, %v576_v0 }
 0x12c   : > { %v676_v38 = vsel %vm580_vm1, %v646_v21, 0.0 }
 0x12d   : > { %v608_v39 = vadd.f32 %v607_v8, %v606_v4  ;;  %v663_v10 = vadd.f32 %v662_v7, %v661_v6 }
 0x12f   : > { %v665_v14 = vadd.f32 %v664_v11, %v663_v10  ;;  %v610_v15 = vadd.f32 %v609_v12, %v608_v39 }
 0x131   : > { %v612_v18 = vadd.f32 %v611_v45, %v610_v15  ;;  %v667_v19 = vadd.f32 %v666_v16, %v665_v14 }
 0x133   : > { %v614_v24 = vadd.f32 %v613_v61, %v612_v18  ;;  %v669_v25 = vadd.f32 %v668_v20, %v667_v19 }
 0x135   : > { %v671_v28 = vadd.f32 %v670_v26, %v669_v25  ;;  %v616_v30 = vadd.f32 %v615_v5, %v614_v24 }
 0x137   : > { %v673_v33 = vadd.f32 %v672_v31, %v671_v28  ;;  %v618_v34 = vadd.f32 %v617_v27, %v616_v30 }
 0x139   : > { %v675_v36 = vadd.f32 %v674_v32, %v673_v33  ;;  %v620_v37 = vadd.f32 %v619_v35, %v618_v34 }
 0x13b   : > { %v621_v40 = vrot.slane %v620_v37, 4  ;;  %v677_v41 = vadd.f32 %v676_v38, %v675_v36 }
 0x13d   : > { %v622_v29 = vadd.f32 %v621_v40, %v620_v37  ;;  %v678_v42 = vrot.slane %v677_v41, 4 }
 0x13f   : > { %v623_v43 = vrot.slane %v622_v29, 2  ;;  %v679_v44 = vadd.f32 %v678_v42, %v677_v41 }
 0x141   : > { %v624_v46 = vadd.f32 %v623_v43, %v622_v29  ;;  %v680_v47 = vrot.slane %v679_v44, 2 }
 0x143   : > { %v625_v48 = vrot.slane %v624_v46, 1  ;;  %v681_v49 = vadd.f32 %v680_v47, %v679_v44 }
 0x145   : > { %v626_v51 = vadd.f32 %v625_v48, %v624_v46  ;;  %v682_v52 = vrot.slane %v681_v49, 1 }
 0x147   : > { %v627_v54 = vadd.f32 %v626_v51, %v589_v50  ;;  %v683_v55 = vadd.f32 %v682_v52, %v681_v49 }
 0x149   : > { %629 = vst.msk [vmem:[#allocation3] sm:$0x1] %vm628_vm2, %v627_v54  ;;  %v684_v56 = vadd.f32 %v683_v55, %v630_v53 }
 0x14b   : > { %685 = vst.msk [vmem:[#allocation4] sm:$0x1] %vm628_vm2, %v684_v56 }
 0x14c PF: > { %p1000_p6 = scmp.ne.s32.totalorder %s1199_s15, 1 }
 0x14d   : > { %v732_v2 = vlaneseq (!%p1000_p6)  ;;  %v707_v4 = vld [vmem:[#allocation2] sm:$0xff] (!%p1000_p6)  ;;  %v708_v6 = vld [vmem:[#allocation2 + $0x8] sm:$0xff] (!%p1000_p6)  ;;  %v709_v8 = vld [vmem:[#allocation2 + $0x10] sm:$0xff] (!%p1000_p6)  ;;  %vm871_vm3 = vcmask (!%p1000_p6), 257024  }
 0x14e   : > { %689 = sbr.rel (%p1000_p6) target bundleno = 388 (0x184), region = 48  ;;  %v697_v7 = vld [vmem:[%s1555_s2] sm:$0x1] (!%p1000_p6)  ;;  %v710_v39 = vld [vmem:[#allocation2 + $0x18] sm:$0xff] (!%p1000_p6)  ;;  %v715_v12 = vunpack.c.l.bf16 (!%p1000_p6), %v707_v4  ;;  %v716_v13 = vunpack.c.h.bf16 (!%p1000_p6), %v707_v4  ;;  %v717_v14 = vunpack.c.l.bf16 (!%p1000_p6), %v708_v6  ;;  %v712_v15 = vld [vmem:[#allocation2 + $0x28] sm:$0xff] (!%p1000_p6)  ;;  %v718_v45 = vunpack.c.h.bf16 (!%p1000_p6), %v708_v6 }
 0x14f   : > { %v733_v3 = vshrl.u32 (!%p1000_p6), %v732_v2, 7  ;;  %v711_v10 = vld [vmem:[#allocation2 + $0x20] sm:$0xff] (!%p1000_p6)  ;;  %v719_v17 = vunpack.c.l.bf16 (!%p1000_p6), %v709_v8  ;;  %v720_v18 = vunpack.c.h.bf16 (!%p1000_p6), %v709_v8  ;;  %v713_v19 = vld [vmem:[#allocation2 + $0x30] sm:$0xff] (!%p1000_p6)  ;;  %v1433_v20 = vld [vmem:[#allocation2 + $0x38] sm:$0xff] (!%p1000_p6)  ;;  %v721_v22 = vunpack.c.l.bf16 (!%p1000_p6), %v710_v39 }
 0x150   : > { %v690_v57 = vld [vmem:[#allocation3] sm:$0x1] (!%p1000_p6)  ;;  %v722_v23 = vunpack.c.h.bf16 (!%p1000_p6), %v710_v39  ;;  %v723_v24 = vunpack.c.l.bf16 (!%p1000_p6), %v711_v10  ;;  %v724_v25 = vunpack.c.h.bf16 (!%p1000_p6), %v711_v10  ;;  %v725_v27 = vunpack.c.l.bf16 (!%p1000_p6), %v712_v15 }
 0x151   : > { %v691_v59 = vmul.f32 (!%p1000_p6), 0.0078125, %v690_v57  ;;  %v734_v9 = vsub.s32 (!%p1000_p6), 0, %v733_v3  ;;  %v701_v61 = vld [vmem:[%s1556_s3] sm:$0x1] (!%p1000_p6)  ;;  %v726_v28 = vunpack.c.h.bf16 (!%p1000_p6), %v712_v15  ;;  %v727_v30 = vunpack.c.l.bf16 (!%p1000_p6), %v713_v19 }
 0x152   : > { %v692_v58 = vld [vmem:[#allocation4] sm:$0x1] (!%p1000_p6)  ;;  %v728_v31 = vunpack.c.h.bf16 (!%p1000_p6), %v713_v19  ;;  %v729_v32 = vunpack.c.l.bf16 (!%p1000_p6), %v1433_v20  ;;  %v730_v21 = vunpack.c.h.bf16 (!%p1000_p6), %v1433_v20 }
 0x153   : > { %v693_v60 = vmul.f32 (!%p1000_p6), 0.0078125, %v692_v58  ;;  %v694_v62 = vmul.f32 (!%p1000_p6), %v691_v59, %v691_v59 }
 0x155   : > { %v695_v63 = vsub.f32 %v693_v60, %v694_v62 }
 0x157   : > { %v696_v0 = vmax.f32 %v695_v63, 0.0 }
 0x159   : > { %v698_v1 = vadd.f32 1e-05, %v696_v0 }
 0x15b   : > { %1183 = vrsqrt.f32 %v698_v1 }
 0x165   : > { %v1184_v11 = vpop.eup %1183 }
 0x166   : > { %v700_v16 = vmul.f32 %v1184_v11, %v697_v7 }
 0x168   : > { %v702_v26 = vmul.f32 %v700_v16, %v691_v59  ;;  %v1438_v5 = vrot.slane %v700_v16, %v734_v9 }
 0x16a   : > { %v703_v33 = vsub.f32 %v701_v61, %v702_v26  ;;  %v737_v34 = vmul.f32 %v1438_v5, %v715_v12  ;;  %v738_v35 = vmul.f32 %v1438_v5, %v716_v13  ;;  %v739_v36 = vmul.f32 %v1438_v5, %v717_v14 }
 0x16b   : > { %v740_v37 = vmul.f32 %v1438_v5, %v718_v45  ;;  %v741_v38 = vmul.f32 %v1438_v5, %v719_v17  ;;  %v742_v40 = vmul.f32 %v1438_v5, %v720_v18  ;;  %v743_v41 = vmul.f32 %v1438_v5, %v721_v22 }
 0x16c   : > { %v1449_v29 = vrot.slane %v703_v33, %v734_v9  ;;  %v744_v42 = vmul.f32 %v1438_v5, %v722_v23  ;;  %v745_v43 = vmul.f32 %v1438_v5, %v723_v24  ;;  %v746_v44 = vmul.f32 %v1438_v5, %v724_v25 }
 0x16d   : > { %v747_v46 = vmul.f32 %v1438_v5, %v725_v27  ;;  %v748_v47 = vmul.f32 %v1438_v5, %v726_v28  ;;  %v749_v48 = vmul.f32 %v1438_v5, %v727_v30  ;;  %v750_v49 = vmul.f32 %v1438_v5, %v728_v31 }
 0x16e   : > { %v759_v50 = vadd.f32 %v1449_v29, %v737_v34  ;;  %v760_v51 = vadd.f32 %v1449_v29, %v738_v35  ;;  %v761_v52 = vadd.f32 %v1449_v29, %v739_v36  ;;  %v762_v53 = vadd.f32 %v1449_v29, %v740_v37 }
 0x16f   : > { %v763_v54 = vadd.f32 %v1449_v29, %v741_v38  ;;  %v764_v55 = vadd.f32 %v1449_v29, %v742_v40  ;;  %v765_v56 = vadd.f32 %v1449_v29, %v743_v41  ;;  %v766_v57 = vadd.f32 %v1449_v29, %v744_v42 }
 0x170   : > { %v775_v58 = vmul.f32 0.2, %v759_v50  ;;  %v776_v59 = vmul.f32 0.2, %v760_v51  ;;  %v777_v60 = vmul.f32 0.2, %v761_v52  ;;  %v767_v62 = vadd.f32 %v1449_v29, %v745_v43 }
 0x171   : > { %v778_v63 = vmul.f32 0.2, %v762_v53  ;;  %v779_v0 = vmul.f32 0.2, %v763_v54  ;;  %v780_v1 = vmul.f32 0.2, %v764_v55  ;;  %v768_v2 = vadd.f32 %v1449_v29, %v746_v44 }
 0x172   : > { %v791_v3 = vmax.f32 %v759_v50, %v775_v58  ;;  %v792_v4 = vmax.f32 %v760_v51, %v776_v59  ;;  %v793_v6 = vmax.f32 %v761_v52, %v777_v60  ;;  %v781_v7 = vmul.f32 0.2, %v765_v56 }
 0x173   : > { %v794_v8 = vmax.f32 %v762_v53, %v778_v63  ;;  %v795_v9 = vmax.f32 %v763_v54, %v779_v0  ;;  %v796_v39 = vmax.f32 %v764_v55, %v780_v1  ;;  %v782_v10 = vmul.f32 0.2, %v766_v57 }
 0x174   : > { %v1022_v11 = vpack.c.bf16 %v791_v3, %v791_v3  ;;  %v1023_v12 = vpack.c.bf16 %v792_v4, %v792_v4  ;;  %v1024_v13 = vpack.c.bf16 %v793_v6, %v793_v6  ;;  %v797_v14 = vmax.f32 %v765_v56, %v781_v7 }
 0x175   : > { %v1025_v15 = vpack.c.bf16 %v794_v8, %v794_v8  ;;  %v1026_v16 = vpack.c.bf16 %v795_v9, %v795_v9  ;;  %v1027_v45 = vpack.c.bf16 %v796_v39, %v796_v39  ;;  %v798_v17 = vmax.f32 %v766_v57, %v782_v10 }
 0x176   : > { %872 = vst.msk [vmem:[%s1557_s4] sm:$0xf] %vm871_vm3, %v1022_v11  ;;  %873 = vst.msk [vmem:[%s1557_s4 + $0x4] sm:$0xf] %vm871_vm3, %v1023_v12  ;;  %v1028_v18 = vpack.c.bf16 %v797_v14, %v797_v14  ;;  %v783_v19 = vmul.f32 0.2, %v767_v62  ;;  %v769_v22 = vadd.f32 %v1449_v29, %v747_v46  ;;  %v770_v24 = vadd.f32 %v1449_v29, %v748_v47 }
 0x177   : > { %874 = vst.msk [vmem:[%s1557_s4 + $0x8] sm:$0xf] %vm871_vm3, %v1024_v13  ;;  %v784_v61 = vmul.f32 0.2, %v768_v2  ;;  %875 = vst.msk [vmem:[%s1557_s4 + $0xc] sm:$0xf] %vm871_vm3, %v1025_v15  ;;  %v1029_v23 = vpack.c.bf16 %v798_v17, %v798_v17  ;;  %v771_v25 = vadd.f32 %v1449_v29, %v749_v48  ;;  %v772_v26 = vadd.f32 %v1449_v29, %v750_v49 }
 0x178   : > { %876 = vst.msk [vmem:[%s1557_s4 + $0x10] sm:$0xf] %vm871_vm3, %v1026_v16  ;;  %877 = vst.msk [vmem:[%s1557_s4 + $0x14] sm:$0xf] %vm871_vm3, %v1027_v45  ;;  %v799_v27 = vmax.f32 %v767_v62, %v783_v19  ;;  %v785_v30 = vmul.f32 0.2, %v769_v22  ;;  %v751_v31 = vmul.f32 %v1438_v5, %v729_v32  ;;  %v752_v36 = vmul.f32 %v1438_v5, %v730_v21 }
 0x179   : > { %878 = vst.msk [vmem:[%s1557_s4 + $0x18] sm:$0xf] %vm871_vm3, %v1028_v18  ;;  %v800_v28 = vmax.f32 %v768_v2, %v784_v61  ;;  %879 = vst.msk [vmem:[%s1557_s4 + $0x1c] sm:$0xf] %vm871_vm3, %v1029_v23  ;;  %v786_v33 = vmul.f32 0.2, %v770_v24 }
 0x17a   : > { %v787_v34 = vmul.f32 0.2, %v771_v25  ;;  %v788_v35 = vmul.f32 0.2, %v772_v26  ;;  %v1030_v37 = vpack.c.bf16 %v799_v27, %v799_v27  ;;  %v801_v40 = vmax.f32 %v769_v22, %v785_v30 }
 0x17b   : > { %v1031_v38 = vpack.c.bf16 %v800_v28, %v800_v28  ;;  %v773_v41 = vadd.f32 %v1449_v29, %v751_v31  ;;  %v802_v42 = vmax.f32 %v770_v24, %v786_v33  ;;  %v774_v44 = vadd.f32 %v1449_v29, %v752_v36 }
 0x17c   : > { %v803_v43 = vmax.f32 %v771_v25, %v787_v34  ;;  %v804_v32 = vmax.f32 %v772_v26, %v788_v35  ;;  %880 = vst.msk [vmem:[%s1557_s4 + $0x20] sm:$0xf] %vm871_vm3, %v1030_v37  ;;  %v1032_v20 = vpack.c.bf16 %v801_v40, %v801_v40 }
 0x17d   : > { %881 = vst.msk [vmem:[%s1557_s4 + $0x24] sm:$0xf] %vm871_vm3, %v1031_v38  ;;  %v789_v5 = vmul.f32 0.2, %v773_v41  ;;  %v1033_v21 = vpack.c.bf16 %v802_v42, %v802_v42  ;;  %v790_v48 = vmul.f32 0.2, %v774_v44 }
 0x17e   : > { %v1034_v46 = vpack.c.bf16 %v803_v43, %v803_v43  ;;  %v1035_v47 = vpack.c.bf16 %v804_v32, %v804_v32  ;;  %882 = vst.msk [vmem:[%s1557_s4 + $0x28] sm:$0xf] %vm871_vm3, %v1032_v20 }
 0x17f   : > { %v805_v29 = vmax.f32 %v773_v41, %v789_v5  ;;  %883 = vst.msk [vmem:[%s1557_s4 + $0x2c] sm:$0xf] %vm871_vm3, %v1033_v21  ;;  %v806_v49 = vmax.f32 %v774_v44, %v790_v48 }
 0x180   : > { %884 = vst.msk [vmem:[%s1557_s4 + $0x30] sm:$0xf] %vm871_vm3, %v1034_v46  ;;  %885 = vst.msk [vmem:[%s1557_s4 + $0x34] sm:$0xf] %vm871_vm3, %v1035_v47 }
 0x181   : > { %v1036_v50 = vpack.c.bf16 %v805_v29, %v805_v29  ;;  %v1037_v51 = vpack.c.bf16 %v806_v49, %v806_v49 }
 0x183   : > { %886 = vst.msk [vmem:[%s1557_s4 + $0x38] sm:$0xf] %vm871_vm3, %v1036_v50  ;;  %887 = vst.msk [vmem:[%s1557_s4 + $0x3c] sm:$0xf] %vm871_vm3, %v1037_v51 }
 0x184 PF: > { %s14_s17 = sadd.s32 1, %s1207_s17   ;;  %s1558_s15 = smov %s1203_s16 }
 0x185   : > { %p11_p7 = scmp.ge.s32.totalorder %s14_s17, 4   ;;  %s1559_s16 = smov %s1561_s18 }
 0x187   :  { %13 = sbr.rel (!%p11_p7) target bundleno = 2 (0x2), region = 80 }

// kernel: _lambda_.8
= control target key start
LH: loop header
LB: loop body
LE: loop exit
PB: predicated region body
PF: predicated region fallthrough
CT: control target
= control target key end

     0   :  { %s1082_s15 = smov 0   ;;  %s1084_s16 = smov 0   ;;  %s1262_s0 = inlined_call_operand.vmem [shape: bf16[32,512], index: 0, kind: input, shape index: {}]   ;;  %s1263_s1 = inlined_call_operand.vmem [shape: bf16[512,64], index: 1, kind: input, shape index: {}]   ;;  %s1264_s2 = inlined_call_operand.vmem [shape: f32[1,64], index: 2, kind: input, shape index: {}]   ;;  %s1265_s3 = inlined_call_operand.vmem [shape: f32[1,64], index: 3, kind: input, shape index: {}]   ;;  %s1266_s4 = inlined_call_operand.vmem [shape: bf16[32,64], index: 4, kind: output, shape index: {}]  }
   0x1   :  { %s1086_s17 = smov 0  }
   0x2 LB: > { %s26_s18 = sadd.s32 1, %s1050_s16  ;;  %p848_p0 = scmp.ge.s32.totalorder %s1054_s17, 1  ;;  %s1054_s17 = sphi %s1086_s17, %s14_s17   ;;  %s1050_s16 = sphi %s1084_s16, %s1268_s16   ;;  %s1046_s15 = sphi %s1082_s15, %s1267_s15  }
   0x3   : > { %p28_p1 = scmp.ge.s32.totalorder %s26_s18, 2  ;;  %p186_p2 = scmp.lt.s32.totalorder %s1054_s17, 3 }
   0x5   : > { %s1270_s18 = smov (%p28_p1, %s26_s18), 0  ;;  %p187_p3 = pnand %p848_p0, %p186_p2 }
   0x6   : > { %p236_p4 = scmp.eq.s32.totalorder (!%p187_p3), %s1046_s15, 0 }
   0x7   : > { %190 = sbr.rel (%p187_p3) target bundleno = 348 (0x15c), region = 36 }
   0xe   : > { %241 = sbr.rel (!%p236_p4) target bundleno = 21 (0x15), region = 40  ;;  %vm242_vm0 = vcmask (%p236_p4), 516096   ;;  %v1056_v0 = vmov (%p236_p4), 0.0  }
   0xf   : > { %243 = vst.msk [vmem:[#allocation3] sm:$0x1] (%p236_p4), %vm242_vm0, %v1056_v0  ;;  %244 = vst.msk [vmem:[#allocation4] sm:$0x1] (%p236_p4), %vm242_vm0, %v1056_v0 }
  0x15 PF: > { %p850_p5 = scmp.ne.s32.totalorder %s1046_s15, 0 }
  0x16   : > { %v986_v1 = vld [vmem:[%s1263_s1 + $0x40] sm:$0xff] (!%p850_p5)   ;;  %v990_v5 = vld [vmem:[%s1263_s1 + $0x48] sm:$0xff] (!%p850_p5)   ;;  %v994_v9 = vld [vmem:[%s1263_s1 + $0x50] sm:$0xff] (!%p850_p5)   ;;  %vm655_vm1 = vcmask (!%p850_p5), 523264   ;;  %vm673_vm2 = vcmask (!%p850_p5), 516096  }
  0x17   : > { %247 = sbr.rel (%p850_p5) target bundleno = 304 (0x130), region = 44  ;;  %v987_v2 = vld [vmem:[%s1263_s1 + $0xc0] sm:$0xff] (!%p850_p5)   ;;  %905 = vmatprep.subr.bf16.mxu0 (!%p850_p5), %v986_v1  ;;  %v991_v6 = vld [vmem:[%s1263_s1 + $0xc8] sm:$0xff] (!%p850_p5)   ;;  %v995_v10 = vld [vmem:[%s1263_s1 + $0xd0] sm:$0xff] (!%p850_p5)  }
  0x18   : > { %v988_v3 = vld [vmem:[%s1263_s1] sm:$0xff] (!%p850_p5)   ;;  %933 = vmatprep.subr.bf16.mxu1 (!%p850_p5), %v987_v2  ;;  %v992_v7 = vld [vmem:[%s1263_s1 + $0x8] sm:$0xff] (!%p850_p5)   ;;  %v996_v11 = vld [vmem:[%s1263_s1 + $0x10] sm:$0xff] (!%p850_p5)  }
  0x19   : > { %v989_v4 = vld [vmem:[%s1263_s1 + $0x80] sm:$0xff] (!%p850_p5)   ;;  %906 = vmatpush3.bf16.msra.mxu0 (!%p850_p5), %v988_v3  ;;  %v993_v8 = vld [vmem:[%s1263_s1 + $0x88] sm:$0xff] (!%p850_p5)   ;;  %v997_v12 = vld [vmem:[%s1263_s1 + $0x90] sm:$0xff] (!%p850_p5)  }
  0x1a   : > { %934 = vmatpush3.bf16.msra.mxu1 (!%p850_p5), %v989_v4  ;;  %907 = vmatprep.subr.bf16.mxu0 (!%p850_p5), %v990_v5  ;;  %v998_v13 = vld [vmem:[%s1263_s1 + $0x58] sm:$0xff] (!%p850_p5)   ;;  %v1002_v17 = vld [vmem:[%s1263_s1 + $0x60] sm:$0xff] (!%p850_p5)   ;;  %v1006_v21 = vld [vmem:[%s1263_s1 + $0x68] sm:$0xff] (!%p850_p5)  }
  0x1b   : > { %935 = vmatprep.subr.bf16.mxu1 (!%p850_p5), %v991_v6  ;;  %v999_v14 = vld [vmem:[%s1263_s1 + $0xd8] sm:$0xff] (!%p850_p5)   ;;  %v1003_v18 = vld [vmem:[%s1263_s1 + $0xe0] sm:$0xff] (!%p850_p5)   ;;  %v1007_v22 = vld [vmem:[%s1263_s1 + $0xe8] sm:$0xff] (!%p850_p5)  }
  0x1c   : > { %v1000_v15 = vld [vmem:[%s1263_s1 + $0x18] sm:$0xff] (!%p850_p5)   ;;  %v1004_v19 = vld [vmem:[%s1263_s1 + $0x20] sm:$0xff] (!%p850_p5)   ;;  %v1008_v23 = vld [vmem:[%s1263_s1 + $0x28] sm:$0xff] (!%p850_p5)  }
  0x1d   : > { %908 = vmatpush3.bf16.msra.mxu0 (!%p850_p5), %v992_v7  ;;  %v1001_v16 = vld [vmem:[%s1263_s1 + $0x98] sm:$0xff] (!%p850_p5)   ;;  %v1005_v20 = vld [vmem:[%s1263_s1 + $0xa0] sm:$0xff] (!%p850_p5)   ;;  %v1009_v24 = vld [vmem:[%s1263_s1 + $0xa8] sm:$0xff] (!%p850_p5)  }
  0x1e   : > { %936 = vmatpush3.bf16.msra.mxu1 %v993_v8  ;;  %909 = vmatprep.subr.bf16.mxu0 %v994_v9  ;;  %v1010_v25 = vld [vmem:[%s1263_s1 + $0x70] sm:$0xff]   ;;  %v1014_v29 = vld [vmem:[%s1263_s1 + $0x78] sm:$0xff]  }
  0x1f   : > { %937 = vmatprep.subr.bf16.mxu1 %v995_v10  ;;  %v1011_v26 = vld [vmem:[%s1263_s1 + $0xf0] sm:$0xff]   ;;  %v1015_v30 = vld [vmem:[%s1263_s1 + $0xf8] sm:$0xff]  }
  0x20   : > { %v1012_v27 = vld [vmem:[%s1263_s1 + $0x30] sm:$0xff]   ;;  %v1016_v31 = vld [vmem:[%s1263_s1 + $0x38] sm:$0xff]  }
  0x21   : > { %910 = vmatpush3.bf16.msra.mxu0 %v996_v11  ;;  %v1013_v28 = vld [vmem:[%s1263_s1 + $0xb0] sm:$0xff]   ;;  %v1017_v32 = vld [vmem:[%s1263_s1 + $0xb8] sm:$0xff]  }
  0x22   : > { %938 = vmatpush3.bf16.msra.mxu1 %v997_v12  ;;  %911 = vmatprep.subr.bf16.mxu0 %v998_v13  ;;  %v1018_v33 = vld [vmem:[%s1262_s0] ss:$16 sps:$4 sm:$0xff]   ;;  %v1020_v34 = vld [vmem:[%s1262_s0 + $0x4] ss:$16 sps:$4 sm:$0xff]   ;;  %v1021_v35 = vld [vmem:[%s1262_s0 + $0x8] ss:$16 sps:$4 sm:$0xff]  }
  0x23   : > { %939 = vmatprep.subr.bf16.mxu1 %v999_v14  ;;  %v1023_v36 = vld [vmem:[%s1262_s0 + $0xc] ss:$16 sps:$4 sm:$0xff]   ;;  %584 = vmatprep.mubr.bf16.mxu0 %v1020_v34  ;;  %v1024_v37 = vld [vmem:[%s1262_s0 + $0x24] ss:$16 sps:$4 sm:$0xff]   ;;  %v1028_v39 = vld [vmem:[%s1262_s0 + $0x20] ss:$16 sps:$4 sm:$0xff]  }
  0x24   : > { %633 = vmatprep.mubr.bf16.mxu1 %v1023_v36  ;;  %v1026_v38 = vld [vmem:[%s1262_s0 + $0x2c] ss:$16 sps:$4 sm:$0xff]   ;;  %v1029_v40 = vld [vmem:[%s1262_s0 + $0x28] ss:$16 sps:$4 sm:$0xff]   ;;  %v658_v34 = vld [vmem:[#allocation3] sm:$0x1] }
  0x25   : > { %912 = vmatpush3.bf16.msra.mxu0 %v1000_v15 }
  0x26   : > { %940 = vmatpush3.bf16.msra.mxu1 %v1001_v16  ;;  %913 = vmatprep.subr.bf16.mxu0 %v1002_v17 }
  0x27   : > { %941 = vmatprep.subr.bf16.mxu1 %v1003_v18 }
  0x29   : > { %914 = vmatpush3.bf16.msra.mxu0 %v1004_v19 }
  0x2a   : > { %942 = vmatpush3.bf16.msra.mxu1 %v1005_v20  ;;  %915 = vmatprep.subr.bf16.mxu0 %v1006_v21 }
  0x2b   : > { %943 = vmatprep.subr.bf16.mxu1 %v1007_v22 }
  0x2d   : > { %916 = vmatpush3.bf16.msra.mxu0 %v1008_v23 }
  0x2e   : > { %944 = vmatpush3.bf16.msra.mxu1 %v1009_v24  ;;  %917 = vmatprep.subr.bf16.mxu0 %v1010_v25 }
  0x2f   : > { %945 = vmatprep.subr.bf16.mxu1 %v1011_v26 }
  0x31   : > { %918 = vmatpush3.bf16.msra.mxu0 %v1012_v27 }
  0x32   : > { %946 = vmatpush3.bf16.msra.mxu1 %v1013_v28  ;;  %919 = vmatprep.subr.bf16.mxu0 %v1014_v29 }
  0x33   : > { %947 = vmatprep.subr.bf16.mxu1 %v1015_v30 }
  0x35   : > { %920 = vmatpush3.bf16.msra.mxu0 %v1016_v31 }
  0x36   : > { %948 = vmatpush3.bf16.msra.mxu1 %v1017_v32 }
  0x38   : > { %585 = vmatmul.mubr.bf16.vlgmr.msra.gmra.mrb[0].mxu0 %v1018_v33 }
  0x39   : > { %634 = vmatmul.mubr.bf16.vlgmr.msra.gmra.mrb[0].mxu1 %v1021_v35  ;;  %592 = vmatprep.mubr.bf16.mxu0 %v1024_v37  ;;  %v675_v37 = vld [vmem:[#allocation4] sm:$0x1] }
  0x3a   : > { %641 = vmatprep.mubr.bf16.mxu1 %v1026_v38 }
  0x40   : > { %593 = vmatmul.mubr.bf16.gmra.mrb[4].mxu0 %v1028_v39 }
  0x41   : > { %642 = vmatmul.mubr.bf16.gmra.mrb[4].mxu1 %v1029_v40 }
 0x10b   : > { %v921_v41 = vpop.f32.mrb[0].mxu0 }
 0x10c   : > { %v949_v42 = vpop.f32.mrb[0].mxu1  ;;  %v922_v43 = vpop.f32.mrb[1].mxu0 }
 0x10d   : > { %v923_v44 = vadd.f32 %v922_v43, %v921_v41  ;;  %v950_v45 = vpop.f32.mrb[1].mxu1  ;;  %v924_v46 = vpop.f32.mrb[2].mxu0 }
 0x10e   : > { %v951_v47 = vadd.f32 %v950_v45, %v949_v42  ;;  %v952_v48 = vpop.f32.mrb[2].mxu1  ;;  %v925_v49 = vpop.f32.mrb[3].mxu0 }
 0x10f   : > { %v926_v50 = vadd.f32 %v925_v49, %v924_v46  ;;  %v953_v51 = vpop.f32.mrb[3].mxu1 }
 0x110   : > { %v636_v52 = vadd.f32 %v951_v47, %v923_v44  ;;  %v954_v53 = vadd.f32 %v953_v51, %v952_v48 }
 0x112   : > { %v676_v54 = vmul.f32 %v636_v52, %v636_v52  ;;  %v639_v55 = vadd.f32 %v954_v53, %v926_v50  ;;  %v659_v57 = vsel %vm655_vm1, %v636_v52, 0.0 }
 0x113   : > { %v927_v56 = vpop.f32.mrb[4].mxu0 }
 0x114   : > { %v650_v58 = vpack.c.bf16 %v639_v55, %v636_v52  ;;  %v660_v59 = vsel %vm655_vm1, %v639_v55, 0.0  ;;  %v677_v60 = vmul.f32 %v639_v55, %v639_v55  ;;  %v955_v61 = vpop.f32.mrb[4].mxu1  ;;  %v928_v62 = vpop.f32.mrb[5].mxu0  ;;  %v680_v3 = vsel %vm655_vm1, %v676_v54, 0.0 }
 0x115   : > { %v661_v63 = vadd.f32 %v660_v59, %v659_v57  ;;  %v929_v0 = vadd.f32 %v928_v62, %v927_v56  ;;  %v956_v1 = vpop.f32.mrb[5].mxu1  ;;  %v930_v2 = vpop.f32.mrb[6].mxu0 }
 0x116   : > { %656 = vst.msk [vmem:[#allocation2] sm:$0xff] %vm655_vm1, %v650_v58  ;;  %v681_v4 = vsel %vm655_vm1, %v677_v60, 0.0  ;;  %v957_v5 = vadd.f32 %v956_v1, %v955_v61  ;;  %v958_v6 = vpop.f32.mrb[6].mxu1  ;;  %v931_v7 = vpop.f32.mrb[7].mxu0 }
 0x117   : > { %v682_v8 = vadd.f32 %v681_v4, %v680_v3  ;;  %v932_v9 = vadd.f32 %v931_v7, %v930_v2  ;;  %v959_v10 = vpop.f32.mrb[7].mxu1 }
 0x118   : > { %v644_v11 = vadd.f32 %v957_v5, %v929_v0  ;;  %v960_v12 = vadd.f32 %v959_v10, %v958_v6 }
 0x11a   : > { %v662_v13 = vsel %vm655_vm1, %v644_v11, 0.0  ;;  %v678_v14 = vmul.f32 %v644_v11, %v644_v11  ;;  %v647_v15 = vadd.f32 %v960_v12, %v932_v9 }
 0x11b   : > { %v663_v16 = vadd.f32 %v662_v13, %v661_v63 }
 0x11c   : > { %v683_v17 = vsel %vm655_vm1, %v678_v14, 0.0  ;;  %v651_v18 = vpack.c.bf16 %v647_v15, %v644_v11  ;;  %v664_v19 = vsel %vm655_vm1, %v647_v15, 0.0  ;;  %v679_v20 = vmul.f32 %v647_v15, %v647_v15 }
 0x11d   : > { %v684_v21 = vadd.f32 %v683_v17, %v682_v8  ;;  %v665_v22 = vadd.f32 %v664_v19, %v663_v16 }
 0x11e   : > { %657 = vst.msk [vmem:[#allocation2 + $0x8] sm:$0xff] %vm655_vm1, %v651_v18  ;;  %v685_v23 = vsel %vm655_vm1, %v679_v20, 0.0 }
 0x11f   : > { %v666_v24 = vrot.slane %v665_v22, 4  ;;  %v686_v25 = vadd.f32 %v685_v23, %v684_v21 }
 0x121   : > { %v667_v26 = vadd.f32 %v666_v24, %v665_v22  ;;  %v687_v27 = vrot.slane %v686_v25, 4 }
 0x123   : > { %v668_v28 = vrot.slane %v667_v26, 2  ;;  %v688_v29 = vadd.f32 %v687_v27, %v686_v25 }
 0x125   : > { %v669_v30 = vadd.f32 %v668_v28, %v667_v26  ;;  %v689_v31 = vrot.slane %v688_v29, 2 }
 0x127   : > { %v670_v32 = vrot.slane %v669_v30, 1  ;;  %v690_v33 = vadd.f32 %v689_v31, %v688_v29 }
 0x129   : > { %v671_v35 = vadd.f32 %v670_v32, %v669_v30  ;;  %v691_v36 = vrot.slane %v690_v33, 1 }
 0x12b   : > { %v672_v38 = vadd.f32 %v671_v35, %v658_v34  ;;  %v692_v39 = vadd.f32 %v691_v36, %v690_v33 }
 0x12d   : > { %674 = vst.msk [vmem:[#allocation3] sm:$0x1] %vm673_vm2, %v672_v38  ;;  %v693_v40 = vadd.f32 %v692_v39, %v675_v37 }
 0x12f   : > { %694 = vst.msk [vmem:[#allocation4] sm:$0x1] %vm673_vm2, %v693_v40 }
 0x130 PF: > { %p891_p6 = scmp.ne.s32.totalorder %s1046_s15, 1 }
 0x131   : > { %v723_v49 = vlaneseq (!%p891_p6)  ;;  %v706_v51 = vld [vmem:[%s1264_s2] sm:$0x1] (!%p891_p6)  ;;  %v717_v53 = vld [vmem:[#allocation2 + $0x8] sm:$0xff] (!%p891_p6)  ;;  %vm766_vm3 = vcmask (!%p891_p6), 519168  }
 0x132   : > { %698 = sbr.rel (%p891_p6) target bundleno = 348 (0x15c), region = 48  ;;  %v716_v52 = vld [vmem:[#allocation2] sm:$0xff] (!%p891_p6)  ;;  %v720_v59 = vunpack.c.l.bf16 (!%p891_p6), %v717_v53  ;;  %v721_v61 = vunpack.c.h.bf16 (!%p891_p6), %v717_v53 }
 0x133   : > { %v724_v50 = vshrl.u32 (!%p891_p6), %v723_v49, 7  ;;  %v718_v57 = vunpack.c.l.bf16 (!%p891_p6), %v716_v52  ;;  %v719_v58 = vunpack.c.h.bf16 (!%p891_p6), %v716_v52  ;;  %v710_v60 = vld [vmem:[%s1265_s3] sm:$0x1] (!%p891_p6) }
 0x134   : > { %v699_v41 = vld [vmem:[#allocation3] sm:$0x1] (!%p891_p6) }
 0x135   : > { %v700_v43 = vmul.f32 (!%p891_p6), 0.03125, %v699_v41  ;;  %v725_v54 = vsub.s32 (!%p891_p6), 0, %v724_v50 }
 0x136   : > { %v701_v42 = vld [vmem:[#allocation4] sm:$0x1] (!%p891_p6) }
 0x137   : > { %v702_v44 = vmul.f32 (!%p891_p6), 0.03125, %v701_v42  ;;  %v703_v45 = vmul.f32 (!%p891_p6), %v700_v43, %v700_v43 }
 0x139   : > { %v704_v46 = vsub.f32 %v702_v44, %v703_v45 }
 0x13b   : > { %v705_v47 = vmax.f32 %v704_v46, 0.0 }
 0x13d   : > { %v707_v48 = vadd.f32 1e-05, %v705_v47 }
 0x13f   : > { %1030 = vrsqrt.f32 %v707_v48 }
 0x149   : > { %v1031_v55 = vpop.eup %1030 }
 0x14a   : > { %v709_v56 = vmul.f32 %v1031_v55, %v706_v51 }
 0x14c   : > { %v711_v62 = vmul.f32 %v709_v56, %v700_v43  ;;  %v726_v63 = vrot.slane %v709_v56, %v725_v54 }
 0x14e   : > { %v712_v0 = vsub.f32 %v710_v60, %v711_v62  ;;  %v728_v1 = vmul.f32 %v726_v63, %v718_v57  ;;  %v729_v2 = vmul.f32 %v726_v63, %v719_v58  ;;  %v730_v3 = vmul.f32 %v726_v63, %v720_v59 }
 0x14f   : > { %v731_v4 = vmul.f32 %v726_v63, %v721_v61 }
 0x150   : > { %v736_v5 = vrot.slane %v712_v0, %v725_v54 }
 0x152   : > { %v738_v6 = vadd.f32 %v736_v5, %v728_v1  ;;  %v739_v7 = vadd.f32 %v736_v5, %v729_v2  ;;  %v740_v8 = vadd.f32 %v736_v5, %v730_v3  ;;  %v741_v9 = vadd.f32 %v736_v5, %v731_v4 }
 0x154   : > { %v742_v10 = vmul.f32 0.2, %v738_v6  ;;  %v743_v11 = vmul.f32 0.2, %v739_v7  ;;  %v744_v12 = vmul.f32 0.2, %v740_v8 }
 0x155   : > { %v745_v13 = vmul.f32 0.2, %v741_v9 }
 0x156   : > { %v746_v14 = vmax.f32 %v738_v6, %v742_v10  ;;  %v747_v15 = vmax.f32 %v739_v7, %v743_v11  ;;  %v748_v16 = vmax.f32 %v740_v8, %v744_v12 }
 0x157   : > { %v749_v17 = vmax.f32 %v741_v9, %v745_v13 }
 0x158   : > { %v901_v18 = vpack.c.bf16 %v746_v14, %v746_v14  ;;  %v902_v19 = vpack.c.bf16 %v747_v15, %v747_v15  ;;  %v903_v20 = vpack.c.bf16 %v748_v16, %v748_v16 }
 0x159   : > { %v904_v21 = vpack.c.bf16 %v749_v17, %v749_v17 }
 0x15a   : > { %767 = vst.msk [vmem:[%s1266_s4] sm:$0xf] %vm766_vm3, %v901_v18  ;;  %768 = vst.msk [vmem:[%s1266_s4 + $0x4] sm:$0xf] %vm766_vm3, %v902_v19 }
 0x15b   : > { %769 = vst.msk [vmem:[%s1266_s4 + $0x8] sm:$0xf] %vm766_vm3, %v903_v20  ;;  %770 = vst.msk [vmem:[%s1266_s4 + $0xc] sm:$0xf] %vm766_vm3, %v904_v21 }
 0x15c PF: > { %s14_s17 = sadd.s32 1, %s1054_s17   ;;  %s1267_s15 = smov %s1050_s16 }
 0x15d   : > { %p11_p7 = scmp.ge.s32.totalorder %s14_s17, 4   ;;  %s1268_s16 = smov %s1270_s18 }
 0x15f   :  { %13 = sbr.rel (!%p11_p7) target bundleno = 2 (0x2), region = 80 }

// kernel: _lambda_.9
= control target key start
LH: loop header
LB: loop body
LE: loop exit
PB: predicated region body
PF: predicated region fallthrough
CT: control target
= control target key end

     0   :  { %s1185_s1 = inlined_call_operand.vmem [shape: bf16[1024,128], index: 1, kind: input, shape index: {}]   ;;  %s1186_s0 = inlined_call_operand.vmem [shape: bf16[8,1024], index: 0, kind: input, shape index: {}]   ;;  %s1187_s2 = inlined_call_operand.vmem [shape: f32[8,128], index: 2, kind: output, shape index: {}]  }
   0x1   :  { %v887_v0 = vld [vmem:[%s1185_s1 + $0x40] sm:$0xff]   ;;  %v891_v4 = vld [vmem:[%s1185_s1 + $0x48] sm:$0xff]   ;;  %v895_v8 = vld [vmem:[%s1185_s1 + $0x50] sm:$0xff]  }
   0x2   :  { %v888_v1 = vld [vmem:[%s1185_s1 + $0xc0] sm:$0xff]   ;;  %799 = vmatprep.subr.bf16.mxu0 %v887_v0  ;;  %v892_v5 = vld [vmem:[%s1185_s1 + $0xc8] sm:$0xff]   ;;  %v896_v9 = vld [vmem:[%s1185_s1 + $0xd0] sm:$0xff]  }
   0x3   :  { %v889_v2 = vld [vmem:[%s1185_s1] sm:$0xff]   ;;  %821 = vmatprep.subr.bf16.mxu1 %v888_v1  ;;  %v893_v6 = vld [vmem:[%s1185_s1 + $0x8] sm:$0xff]   ;;  %v897_v10 = vld [vmem:[%s1185_s1 + $0x10] sm:$0xff]  }
   0x4   :  { %v890_v3 = vld [vmem:[%s1185_s1 + $0x80] sm:$0xff]   ;;  %800 = vmatpush3.bf16.msra.mxu0 %v889_v2  ;;  %v894_v7 = vld [vmem:[%s1185_s1 + $0x88] sm:$0xff]   ;;  %v898_v11 = vld [vmem:[%s1185_s1 + $0x90] sm:$0xff]  }
   0x5   :  { %822 = vmatpush3.bf16.msra.mxu1 %v890_v3  ;;  %801 = vmatprep.subr.bf16.mxu0 %v891_v4  ;;  %v899_v12 = vld [vmem:[%s1185_s1 + $0x58] sm:$0xff]   ;;  %v903_v16 = vld [vmem:[%s1185_s1 + $0x60] sm:$0xff]   ;;  %v907_v20 = vld [vmem:[%s1185_s1 + $0x68] sm:$0xff]  }
   0x6   :  { %823 = vmatprep.subr.bf16.mxu1 %v892_v5  ;;  %v900_v13 = vld [vmem:[%s1185_s1 + $0xd8] sm:$0xff]   ;;  %v904_v17 = vld [vmem:[%s1185_s1 + $0xe0] sm:$0xff]   ;;  %v908_v21 = vld [vmem:[%s1185_s1 + $0xe8] sm:$0xff]  }
   0x7   :  { %v901_v14 = vld [vmem:[%s1185_s1 + $0x18] sm:$0xff]   ;;  %v905_v18 = vld [vmem:[%s1185_s1 + $0x20] sm:$0xff]   ;;  %v909_v22 = vld [vmem:[%s1185_s1 + $0x28] sm:$0xff]  }
   0x8   :  { %802 = vmatpush3.bf16.msra.mxu0 %v893_v6  ;;  %v902_v15 = vld [vmem:[%s1185_s1 + $0x98] sm:$0xff]   ;;  %v906_v19 = vld [vmem:[%s1185_s1 + $0xa0] sm:$0xff]   ;;  %v910_v23 = vld [vmem:[%s1185_s1 + $0xa8] sm:$0xff]  }
   0x9   :  { %824 = vmatpush3.bf16.msra.mxu1 %v894_v7  ;;  %803 = vmatprep.subr.bf16.mxu0 %v895_v8  ;;  %v911_v24 = vld [vmem:[%s1185_s1 + $0x70] sm:$0xff]   ;;  %v915_v28 = vld [vmem:[%s1185_s1 + $0x78] sm:$0xff]   ;;  %v12_v32 = vld [vmem:[%s1186_s0] sm:$0xff] }
   0xa   :  { %825 = vmatprep.subr.bf16.mxu1 %v896_v9  ;;  %v912_v25 = vld [vmem:[%s1185_s1 + $0xf0] sm:$0xff]   ;;  %v916_v29 = vld [vmem:[%s1185_s1 + $0xf8] sm:$0xff]   ;;  %v13_v33 = vld [vmem:[%s1186_s0 + $0x8] sm:$0xff]  ;;  %v727_v34 = vcombine.low %v12_v32, %v12_v32  ;;  %v728_v35 = vcombine.high %v12_v32, %v12_v32 }
   0xb   :  { %v913_v26 = vld [vmem:[%s1185_s1 + $0x30] sm:$0xff]   ;;  %v917_v30 = vld [vmem:[%s1185_s1 + $0x38] sm:$0xff]   ;;  %v729_v36 = vcombine.low %v13_v33, %v13_v33  ;;  %v730_v37 = vcombine.high %v13_v33, %v13_v33  ;;  %v923_v38 = vld [vmem:[%s1185_s1 + $0x140] sm:$0xff]  }
   0xc   :  { %804 = vmatpush3.bf16.msra.mxu0 %v897_v10  ;;  %v914_v27 = vld [vmem:[%s1185_s1 + $0xb0] sm:$0xff]   ;;  %v918_v31 = vld [vmem:[%s1185_s1 + $0xb8] sm:$0xff]   ;;  %v924_v39 = vld [vmem:[%s1185_s1 + $0x1c0] sm:$0xff]   ;;  %588 = vmatprep.mubr.bf16.mxu0 %v728_v35 }
   0xd   :  { %826 = vmatpush3.bf16.msra.mxu1 %v898_v11  ;;  %805 = vmatprep.subr.bf16.mxu0 %v899_v12  ;;  %v925_v40 = vld [vmem:[%s1185_s1 + $0x100] sm:$0xff]   ;;  %v927_v42 = vld [vmem:[%s1185_s1 + $0x148] sm:$0xff]   ;;  %v931_v46 = vld [vmem:[%s1185_s1 + $0x150] sm:$0xff]  }
   0xe   :  { %827 = vmatprep.subr.bf16.mxu1 %v900_v13  ;;  %628 = vmatprep.mubr.bf16.mxu1 %v730_v37  ;;  %v926_v41 = vld [vmem:[%s1185_s1 + $0x180] sm:$0xff]   ;;  %v928_v43 = vld [vmem:[%s1185_s1 + $0x1c8] sm:$0xff]   ;;  %v932_v47 = vld [vmem:[%s1185_s1 + $0x1d0] sm:$0xff]  }
   0xf   :  { %v929_v44 = vld [vmem:[%s1185_s1 + $0x108] sm:$0xff]   ;;  %v933_v48 = vld [vmem:[%s1185_s1 + $0x110] sm:$0xff]   ;;  %v935_v50 = vld [vmem:[%s1185_s1 + $0x158] sm:$0xff]  }
  0x10   :  { %806 = vmatpush3.bf16.msra.mxu0 %v901_v14  ;;  %v930_v45 = vld [vmem:[%s1185_s1 + $0x188] sm:$0xff]   ;;  %v934_v49 = vld [vmem:[%s1185_s1 + $0x190] sm:$0xff]   ;;  %v936_v51 = vld [vmem:[%s1185_s1 + $0x1d8] sm:$0xff]  }
  0x11   :  { %828 = vmatpush3.bf16.msra.mxu1 %v902_v15  ;;  %807 = vmatprep.subr.bf16.mxu0 %v903_v16  ;;  %v937_v52 = vld [vmem:[%s1185_s1 + $0x118] sm:$0xff]   ;;  %v939_v54 = vld [vmem:[%s1185_s1 + $0x160] sm:$0xff]   ;;  %v943_v58 = vld [vmem:[%s1185_s1 + $0x168] sm:$0xff]  }
  0x12   :  { %829 = vmatprep.subr.bf16.mxu1 %v904_v17  ;;  %v938_v53 = vld [vmem:[%s1185_s1 + $0x198] sm:$0xff]   ;;  %v940_v55 = vld [vmem:[%s1185_s1 + $0x1e0] sm:$0xff]   ;;  %v944_v59 = vld [vmem:[%s1185_s1 + $0x1e8] sm:$0xff]  }
  0x13   :  { %v941_v56 = vld [vmem:[%s1185_s1 + $0x120] sm:$0xff]   ;;  %v945_v60 = vld [vmem:[%s1185_s1 + $0x128] sm:$0xff]   ;;  %v947_v62 = vld [vmem:[%s1185_s1 + $0x170] sm:$0xff]  }
  0x14   :  { %808 = vmatpush3.bf16.msra.mxu0 %v905_v18  ;;  %v942_v57 = vld [vmem:[%s1185_s1 + $0x1a0] sm:$0xff]   ;;  %v946_v61 = vld [vmem:[%s1185_s1 + $0x1a8] sm:$0xff]   ;;  %v948_v63 = vld [vmem:[%s1185_s1 + $0x1f0] sm:$0xff]  }
  0x15   :  { %830 = vmatpush3.bf16.msra.mxu1 %v906_v19  ;;  %809 = vmatprep.subr.bf16.mxu0 %v907_v20  ;;  %v949_v0 = vld [vmem:[%s1185_s1 + $0x130] sm:$0xff]   ;;  %v951_v2 = vld [vmem:[%s1185_s1 + $0x178] sm:$0xff]  }
  0x16   :  { %831 = vmatprep.subr.bf16.mxu1 %v908_v21  ;;  %v950_v1 = vld [vmem:[%s1185_s1 + $0x1b0] sm:$0xff]   ;;  %v952_v3 = vld [vmem:[%s1185_s1 + $0x1f8] sm:$0xff]  }
  0x17   :  { %v953_v4 = vld [vmem:[%s1185_s1 + $0x138] sm:$0xff]   ;;  %v14_v6 = vld [vmem:[%s1186_s0 + $0x10] sm:$0xff] }
  0x18   :  { %810 = vmatpush3.bf16.msra.mxu0 %v909_v22  ;;  %v954_v5 = vld [vmem:[%s1185_s1 + $0x1b8] sm:$0xff]   ;;  %v731_v7 = vcombine.low %v14_v6, %v14_v6  ;;  %v732_v8 = vcombine.high %v14_v6, %v14_v6 }
  0x19   :  { %832 = vmatpush3.bf16.msra.mxu1 %v910_v23  ;;  %811 = vmatprep.subr.bf16.mxu0 %v911_v24  ;;  %v15_v9 = vld [vmem:[%s1186_s0 + $0x18] sm:$0xff] }
  0x1a   :  { %833 = vmatprep.subr.bf16.mxu1 %v912_v25  ;;  %v733_v10 = vcombine.low %v15_v9, %v15_v9  ;;  %v734_v11 = vcombine.high %v15_v9, %v15_v9 }
  0x1c   :  { %812 = vmatpush3.bf16.msra.mxu0 %v913_v26 }
  0x1d   :  { %834 = vmatpush3.bf16.msra.mxu1 %v914_v27  ;;  %813 = vmatprep.subr.bf16.mxu0 %v915_v28 }
  0x1e   :  { %835 = vmatprep.subr.bf16.mxu1 %v916_v29 }
  0x20   :  { %814 = vmatpush3.bf16.msra.mxu0 %v917_v30 }
  0x21   :  { %836 = vmatpush3.bf16.msra.mxu1 %v918_v31  ;;  %843 = vmatprep.subr.bf16.mxu0 %v923_v38 }
  0x22   :  { %865 = vmatprep.subr.bf16.mxu1 %v924_v39 }
  0x23   :  { %589 = vmatmul.mubr.bf16.vlgmr.msra.gmra.mrb[0].mxu0 %v727_v34 }
  0x24   :  { %629 = vmatmul.mubr.bf16.vlgmr.msra.gmra.mrb[0].mxu1 %v729_v36  ;;  %844 = vmatpush3.bf16.msra.mxu0 %v925_v40 }
  0x25   :  { %866 = vmatpush3.bf16.msra.mxu1 %v926_v41  ;;  %845 = vmatprep.subr.bf16.mxu0 %v927_v42 }
  0x26   :  { %867 = vmatprep.subr.bf16.mxu1 %v928_v43  ;;  %668 = vmatprep.mubr.bf16.mxu0 %v732_v8 }
  0x27   :  { %708 = vmatprep.mubr.bf16.mxu1 %v734_v11 }
  0x28   :  { %846 = vmatpush3.bf16.msra.mxu0 %v929_v44 }
  0x29   :  { %868 = vmatpush3.bf16.msra.mxu1 %v930_v45  ;;  %847 = vmatprep.subr.bf16.mxu0 %v931_v46 }
  0x2a   :  { %869 = vmatprep.subr.bf16.mxu1 %v932_v47 }
  0x2c   :  { %848 = vmatpush3.bf16.msra.mxu0 %v933_v48 }
  0x2d   :  { %870 = vmatpush3.bf16.msra.mxu1 %v934_v49  ;;  %849 = vmatprep.subr.bf16.mxu0 %v935_v50 }
  0x2e   :  { %871 = vmatprep.subr.bf16.mxu1 %v936_v51 }
  0x30   :  { %850 = vmatpush3.bf16.msra.mxu0 %v937_v52 }
  0x31   :  { %872 = vmatpush3.bf16.msra.mxu1 %v938_v53  ;;  %851 = vmatprep.subr.bf16.mxu0 %v939_v54 }
  0x32   :  { %873 = vmatprep.subr.bf16.mxu1 %v940_v55 }
  0x34   :  { %852 = vmatpush3.bf16.msra.mxu0 %v941_v56 }
  0x35   :  { %874 = vmatpush3.bf16.msra.mxu1 %v942_v57  ;;  %853 = vmatprep.subr.bf16.mxu0 %v943_v58 }
  0x36   :  { %875 = vmatprep.subr.bf16.mxu1 %v944_v59 }
  0x38   :  { %854 = vmatpush3.bf16.msra.mxu0 %v945_v60 }
  0x39   :  { %876 = vmatpush3.bf16.msra.mxu1 %v946_v61  ;;  %855 = vmatprep.subr.bf16.mxu0 %v947_v62 }
  0x3a   :  { %877 = vmatprep.subr.bf16.mxu1 %v948_v63 }
  0x3c   :  { %856 = vmatpush3.bf16.msra.mxu0 %v949_v0 }
  0x3d   :  { %878 = vmatpush3.bf16.msra.mxu1 %v950_v1  ;;  %857 = vmatprep.subr.bf16.mxu0 %v951_v2 }
  0x3e   :  { %879 = vmatprep.subr.bf16.mxu1 %v952_v3 }
  0x40   :  { %858 = vmatpush3.bf16.msra.mxu0 %v953_v4 }
  0x41   :  { %880 = vmatpush3.bf16.msra.mxu1 %v954_v5 }
  0x43   :  { %669 = vmatmul.mubr.bf16.vlgmr.msra.gmra.mrb[4].mxu0 %v731_v7 }
  0x44   :  { %709 = vmatmul.mubr.bf16.vlgmr.msra.gmra.mrb[4].mxu1 %v733_v10 }
  0xf6   :  { %v815_v12 = vpop.f32.mrb[0].mxu0 }
  0xf7   :  { %v837_v13 = vpop.f32.mrb[0].mxu1  ;;  %v816_v14 = vpop.f32.mrb[1].mxu0 }
  0xf8   :  { %v838_v15 = vpop.f32.mrb[1].mxu1  ;;  %v817_v16 = vadd.f32 %v816_v14, %v815_v12  ;;  %v818_v18 = vpop.f32.mrb[2].mxu0 }
  0xf9   :  { %v839_v17 = vadd.f32 %v838_v15, %v837_v13  ;;  %v840_v19 = vpop.f32.mrb[2].mxu1  ;;  %v819_v20 = vpop.f32.mrb[3].mxu0 }
  0xfa   :  { %v841_v21 = vpop.f32.mrb[3].mxu1 }
  0xfb   :  { %v631_v22 = vadd.f32 %v839_v17, %v817_v16 }
 0x116   :  { %v859_v23 = vpop.f32.mrb[4].mxu0 }
 0x117   :  { %v881_v24 = vpop.f32.mrb[4].mxu1  ;;  %v860_v25 = vpop.f32.mrb[5].mxu0 }
 0x118   :  { %v882_v26 = vpop.f32.mrb[5].mxu1  ;;  %v861_v27 = vadd.f32 %v860_v25, %v859_v23  ;;  %v862_v29 = vpop.f32.mrb[6].mxu0 }
 0x119   :  { %v883_v28 = vadd.f32 %v882_v26, %v881_v24  ;;  %v884_v30 = vpop.f32.mrb[6].mxu1  ;;  %v863_v31 = vpop.f32.mrb[7].mxu0 }
 0x11a   :  { %v885_v32 = vpop.f32.mrb[7].mxu1  ;;  %v671_v33 = vadd.f32 %v861_v27, %v631_v22 }
 0x11c   :  { %v711_v34 = vadd.f32 %v883_v28, %v671_v33 }
 0x11e   :  { %v716_v35 = vsub.f32 0.0, %v711_v34 }
 0x120   :  { %v717_v36 = vmul.f32 1.442695, %v716_v35 }
 0x122   :  { %959 = vpow2.f32 %v717_v36 }
 0x12c   :  { %v960_v37 = vpop.eup %959 }
 0x12d   :  { %v719_v38 = vadd.f32 1.0, %v960_v37 }
 0x12f   :  { %961 = vrcp.f32 %v719_v38 }
 0x139   :  { %v962_v39 = vpop.eup %961 }
 0x13a   :  { %722 = vst [vmem:[%s1187_s2] sm:$0xff] %v962_v39 }

</bundles_post_ra>
